<compile_context>
chip_gen: v7x
topology: tpu7x:2x2x1
jax: 0.10.0
libtpu: 0.0.40
codegen_flags: <defaults>
</compile_context>

<pallas_src>
import string

import jax
import jax.numpy as jnp
from jax.experimental import pallas as pl
from jax.experimental.pallas import tpu as pltpu

CHAR_VEC_DIM = 32                       # D
PACK = 128 // CHAR_VEC_DIM              # 4 chars per 128-lane output row
V_PAD = 64                              # vocab rows padded (vocab=41 <= 64)
K_DIM = PACK * V_PAD                    # 256 contraction depth
N_CHUNKS = 3                            # bf16 hi/mid/lo split == exact f32
MAX_TILE_N = 8192                       # chars per grid step (upper bound)
MIN_TILE_N = 2048                       # lower bound when shrinking for grid>=2
MIN_PALLAS_N = 1024                     # below this, plain XLA gather wins

VOCAB = list(string.ascii_lowercase + string.digits + " .,!?")  # deterministic char vocab
CHAR2ID = {c: i for i, c in enumerate(VOCAB)}


def char_ids(chars):
    """Map characters to vocab ids (unknown chars -> id 0)."""
    return jnp.array([CHAR2ID.get(c, 0) for c in chars], jnp.int32)


def build_block_table_bf16(embedding):
    """(V, D) f32 table -> (N_CHUNKS, K_DIM, PACK*D) bf16 block-diagonal chunks.

    Block j holds the padded vocab shifted into lanes [j*D, (j+1)*D).  The f32
    values are split into 3 bf16 chunks (hi/mid/lo, 8 mantissa bits each) so
    that hi+mid+lo reconstructs the f32 value exactly; DEFAULT-precision bf16
    dots then keep the gather exact at 3 MXU passes instead of HIGHEST's 6.
    """
    v, d = embedding.shape
    assert v <= V_PAD and d == CHAR_VEC_DIM
    e_pad = jnp.zeros((V_PAD, d), jnp.float32).at[:v].set(embedding.astype(jnp.float32))
    blk = jnp.zeros((K_DIM, PACK * d), jnp.float32)
    for j in range(PACK):
        blk = blk.at[j * V_PAD:(j + 1) * V_PAD, j * d:(j + 1) * d].set(e_pad)
    chunks = []
    resid = blk
    for _ in range(N_CHUNKS):
        c = resid.astype(jnp.bfloat16)
        chunks.append(c)
        resid = resid - c.astype(jnp.float32)
    return jnp.stack(chunks)                                     # (3, 256, 128) bf16


def chars2vec_kernel(idx_ref, emb_ref, out_ref):
    # idx_ref: (R_TILE, PACK) int32, slot-j ids pre-biased by j*V_PAD
    # emb_ref: (N_CHUNKS, K_DIM, PACK*D) bf16 block-diagonal table chunks
    #          (constant index_map -> fetched once, resident)
    # out_ref: (R_TILE, PACK*D) f32 — PACK char vectors per row (lane-dense store)
    r = out_ref.shape[0]
    k_total = emb_ref.shape[1]
    idx = idx_ref[...]                                           # (R, PACK)
    c = jax.lax.broadcasted_iota(jnp.int32, (r, k_total), 1)     # (R, 256)
    # Biased ids live in disjoint 64-wide ranges -> OR of PACK compares gives
    # the packed one-hot in a single pass; cast once, directly to bf16.
    hit = c == idx[:, 0:1]
    for j in range(1, idx.shape[1]):
        hit = hit | (c == idx[:, j:j + 1])
    onehot = hit.astype(jnp.bfloat16)                            # exact {0,1}
    # gather == one-hot matmul on the MXU; 3 native bf16 passes, f32 accum.
    acc = jnp.dot(onehot, emb_ref[0], preferred_element_type=jnp.float32)
    acc = acc + jnp.dot(onehot, emb_ref[1], preferred_element_type=jnp.float32)
    acc = acc + jnp.dot(onehot, emb_ref[2], preferred_element_type=jnp.float32)
    out_ref[...] = acc


def _pick_tile(n):
    """Biggest tile that amortizes per-step overhead while keeping >= 2 grid
    steps where possible (so v7x dual-TC sharding has work to split)."""
    t = MAX_TILE_N
    while t > MIN_TILE_N and n < 2 * t:
        t //= 2
    return t


def chars2vec(indices, embedding, *, min_pallas_n=MIN_PALLAS_N):
    """indices: (N,) int32 char ids; embedding: (V, D=32) f32. Returns (N, D) f32."""
    n = int(indices.shape[0])
    d = int(embedding.shape[1])
    if n < min_pallas_n:
        # Launch + per-step overhead dominates tiny gathers; plain XLA wins.
        return embedding[indices]

    tile = _pick_tile(n)
    r_tile = tile // PACK
    n_pad = pl.cdiv(n, tile) * tile
    idx = jnp.pad(indices.astype(jnp.int32), (0, n_pad - n))     # pad rows gather row 0
    # Pack 4 chars per output row; bias slot j into block j of the contraction dim.
    idx_packed = idx.reshape(n_pad // PACK, PACK) + \
        jnp.arange(PACK, dtype=jnp.int32)[None, :] * V_PAD
    emb_chunks = build_block_table_bf16(embedding)               # (3, 256, 128) bf16

    flops = 2 * (n_pad // PACK) * K_DIM * (PACK * d) * N_CHUNKS
    bytes_accessed = (idx_packed.size * 4 + emb_chunks.size * 2
                      + (n_pad // PACK) * (PACK * d) * 4)

    out = pl.pallas_call(
        chars2vec_kernel,
        out_shape=jax.ShapeDtypeStruct((n_pad // PACK, PACK * d), jnp.float32),
        grid_spec=pltpu.PrefetchScalarGridSpec(
            num_scalar_prefetch=0,
            grid=(n_pad // tile,),
            in_specs=[pl.BlockSpec((r_tile, PACK), lambda i: (i, 0)),
                      pl.BlockSpec((N_CHUNKS, K_DIM, PACK * d), lambda i: (0, 0, 0))],
            out_specs=pl.BlockSpec((r_tile, PACK * d), lambda i: (i, 0)),
        ),
        compiler_params=pltpu.CompilerParams(
            dimension_semantics=("parallel",)),                   # 2x on v7x dual-TC
        cost_estimate=pl.CostEstimate(flops=int(flops), transcendentals=0,
                                      bytes_accessed=int(bytes_accessed)),
    )(idx_packed, emb_chunks)

    return out.reshape(n_pad, d)[:n]


if __name__ == "__main__":
    key = jax.random.PRNGKey(0)
    # TODO(synk): gensim FastText training in __init__ has no forward-pass
    # equivalent; the trained char vectors are replaced by a deterministic
    # random table.
    embedding = jax.random.normal(key, (len(VOCAB), CHAR_VEC_DIM), jnp.float32)

    # Moderate batch -> exercises the tiled, pipelined Pallas path (2 grid steps
    # with the adaptive 4096-char tile).
    text = "hello world, pallas on tpu! 0123456789 "
    n_demo = 8192
    chars = list((text * (n_demo // len(text) + 1))[:n_demo])
    idx = char_ids(chars)                                        # (8192,)

    vecs = chars2vec(idx, embedding)
    jax.block_until_ready(vecs)
    ref = embedding[idx]                                         # plain-JAX gather reference
    assert vecs.shape == (n_demo, CHAR_VEC_DIM)
    assert vecs.dtype == jnp.float32
    assert jnp.allclose(vecs, ref, atol=1e-5)

    # Odd length, forced onto the kernel -> exercises row padding + a 3-step grid.
    idx_odd = idx[:4100]
    vecs_odd = chars2vec(idx_odd, embedding, min_pallas_n=0)
    jax.block_until_ready(vecs_odd)
    assert vecs_odd.shape == (4100, CHAR_VEC_DIM)
    assert jnp.allclose(vecs_odd, embedding[idx_odd], atol=1e-5)

    # Tiny batch (original demo size) takes the XLA fast path of the wrapper.
    small_idx = char_ids(list("hello wo"))                       # (8,)
    small = chars2vec(small_idx, embedding)
    jax.block_until_ready(small)
    assert small.shape == (8, CHAR_VEC_DIM)
    assert jnp.allclose(small, embedding[small_idx], atol=1e-5)

    print("KERNEL_OK")
</pallas_src>

<mosaic_0001>
module attributes {stable_mosaic.version = 11 : i64} {
  func.func @chars2vec_kernel(%arg0: i32, %arg1: memref<1024x4xi32, #tpu.memory_space<vmem>>, %arg2: memref<3x256x128xbf16, #tpu.memory_space<vmem>>, %arg3: memref<1024x128xf32, #tpu.memory_space<vmem>>) attributes {dimension_semantics = [#tpu.dimension_semantics<parallel>], iteration_bounds = array<i64: 2>, scalar_prefetch = 0 : i64, scratch_operands = 0 : i64, tpu.core_type = #tpu.core_type<tc>, window_params = [{transform_indices = @transform_0, window_bounds = array<i64: 1024, 4>}, {pipeline_mode = #tpu.pipeline_mode<synchronous>, transform_indices = @transform_1, window_bounds = array<i64: 3, 256, 128>}, {transform_indices = @transform_2, window_bounds = array<i64: 1024, 128>}]} {
    %c0 = arith.constant 0 : index
    %c0_0 = arith.constant 0 : index
    %0 = vector.load %arg1[%c0, %c0_0] : memref<1024x4xi32, #tpu.memory_space<vmem>>, vector<1024x4xi32>
    %1 = tpu.iota {dimensions = array<i32: 1>} : vector<1024x256xi32>
    %2 = vector.extract_strided_slice %0 {offsets = [0, 0], sizes = [1024, 1], strides = [1, 1]} : vector<1024x4xi32> to vector<1024x1xi32>
    %3 = vector.broadcast %2 : vector<1024x1xi32> to vector<1024x256xi32>
    %4 = arith.cmpi eq, %1, %3 : vector<1024x256xi32>
    %5 = vector.extract_strided_slice %0 {offsets = [0, 1], sizes = [1024, 1], strides = [1, 1]} : vector<1024x4xi32> to vector<1024x1xi32>
    %6 = vector.broadcast %5 : vector<1024x1xi32> to vector<1024x256xi32>
    %7 = arith.cmpi eq, %1, %6 : vector<1024x256xi32>
    %8 = arith.ori %4, %7 : vector<1024x256xi1>
    %9 = vector.extract_strided_slice %0 {offsets = [0, 2], sizes = [1024, 1], strides = [1, 1]} : vector<1024x4xi32> to vector<1024x1xi32>
    %10 = vector.broadcast %9 : vector<1024x1xi32> to vector<1024x256xi32>
    %11 = arith.cmpi eq, %1, %10 : vector<1024x256xi32>
    %12 = arith.ori %8, %11 : vector<1024x256xi1>
    %13 = vector.extract_strided_slice %0 {offsets = [0, 3], sizes = [1024, 1], strides = [1, 1]} : vector<1024x4xi32> to vector<1024x1xi32>
    %14 = vector.broadcast %13 : vector<1024x1xi32> to vector<1024x256xi32>
    %15 = arith.cmpi eq, %1, %14 : vector<1024x256xi32>
    %16 = arith.ori %12, %15 : vector<1024x256xi1>
    %17 = arith.extui %16 : vector<1024x256xi1> to vector<1024x256xi32>
    %18 = arith.sitofp %17 : vector<1024x256xi32> to vector<1024x256xf32>
    %19 = arith.truncf %18 : vector<1024x256xf32> to vector<1024x256xbf16>
    %c0_1 = arith.constant 0 : index
    %c0_2 = arith.constant 0 : index
    %c0_3 = arith.constant 0 : index
    %20 = vector.load %arg2[%c0_1, %c0_2, %c0_3] : memref<3x256x128xbf16, #tpu.memory_space<vmem>>, vector<1x256x128xbf16>
    %21 = vector.shape_cast %20 : vector<1x256x128xbf16> to vector<256x128xbf16>
    %cst = arith.constant dense<0.000000e+00> : vector<1024x128xf32>
    %22 = tpu.matmul %19, %21, %cst {dimension_numbers = #tpu.dot_dimension_numbers<[1], [0], [0], [1], [0, 0, 1, 1], [], []>} : vector<1024x256xbf16>, vector<256x128xbf16>, vector<1024x128xf32> -> vector<1024x128xf32>
    %c1 = arith.constant 1 : index
    %c0_4 = arith.constant 0 : index
    %c0_5 = arith.constant 0 : index
    %23 = vector.load %arg2[%c1, %c0_4, %c0_5] : memref<3x256x128xbf16, #tpu.memory_space<vmem>>, vector<1x256x128xbf16>
    %24 = vector.shape_cast %23 : vector<1x256x128xbf16> to vector<256x128xbf16>
    %cst_6 = arith.constant dense<0.000000e+00> : vector<1024x128xf32>
    %25 = tpu.matmul %19, %24, %cst_6 {dimension_numbers = #tpu.dot_dimension_numbers<[1], [0], [0], [1], [0, 0, 1, 1], [], []>} : vector<1024x256xbf16>, vector<256x128xbf16>, vector<1024x128xf32> -> vector<1024x128xf32>
    %26 = arith.addf %22, %25 : vector<1024x128xf32>
    %c2 = arith.constant 2 : index
    %c0_7 = arith.constant 0 : index
    %c0_8 = arith.constant 0 : index
    %27 = vector.load %arg2[%c2, %c0_7, %c0_8] : memref<3x256x128xbf16, #tpu.memory_space<vmem>>, vector<1x256x128xbf16>
    %28 = vector.shape_cast %27 : vector<1x256x128xbf16> to vector<256x128xbf16>
    %cst_9 = arith.constant dense<0.000000e+00> : vector<1024x128xf32>
    %29 = tpu.matmul %19, %28, %cst_9 {dimension_numbers = #tpu.dot_dimension_numbers<[1], [0], [0], [1], [0, 0, 1, 1], [], []>} : vector<1024x256xbf16>, vector<256x128xbf16>, vector<1024x128xf32> -> vector<1024x128xf32>
    %30 = arith.addf %26, %29 : vector<1024x128xf32>
    %c0_10 = arith.constant 0 : index
    %c0_11 = arith.constant 0 : index
    %31 = vector.load %arg3[%c0_10, %c0_11] : memref<1024x128xf32, #tpu.memory_space<vmem>>, vector<1024x128xf32>
    tpu.vector_store %arg3[%c0_10, %c0_11], %30 {strides = array<i32>} : memref<1024x128xf32, #tpu.memory_space<vmem>>, vector<1024x128xf32>,
    return
  }
  func.func @transform_0(%arg0: i32) -> (i32, i32) {
    %c0_i32 = arith.constant 0 : i32
    %c0_i32_0 = arith.constant 0 : i32
    return %arg0, %c0_i32 : i32, i32
  }
  func.func @transform_1(%arg0: i32) -> (i32, i32, i32) {
    %c0_i32 = arith.constant 0 : i32
    %c0_i32_0 = arith.constant 0 : i32
    %c0_i32_1 = arith.constant 0 : i32
    %c0_i32_2 = arith.constant 0 : i32
    return %c0_i32, %c0_i32_0, %c0_i32_1 : i32, i32, i32
  }
  func.func @transform_2(%arg0: i32) -> (i32, i32) {
    %c0_i32 = arith.constant 0 : i32
    %c0_i32_0 = arith.constant 0 : i32
    return %arg0, %c0_i32 : i32, i32
  }
}

</mosaic_0001>

<bundles_post_ra>
// kernel: tpu_custom_call.1
= control target key start
LH: loop header
LB: loop body
LE: loop exit
PB: predicated region body
PF: predicated region fallthrough
CT: control target
= control target key end

     0   :  { %7 = vsyncpa [#allocation3], 0  ;;  %s17958_s0 = inlined_call_operand.vmem [shape: s32[2048,4], index: 0, kind: input, shape index: {}]   ;;  %s17959_s1 = inlined_call_operand.vmem [shape: bf16[3,256,128], index: 1, kind: input, shape index: {}]   ;;  %s17960_s2 = inlined_call_operand.hbm [shape: f32[2048,128], index: 2, kind: output, shape index: {}]  }
   0x1   :  { %9 = vsyncpa [#allocation3 + $0x1], 0  ;;  %s8705_s9 = smov 0   ;;  %s8707_s10 = smov 0  }
   0x2   :  { %s8709_s11 = smov 0   ;;  %s8711_s12 = smov 0  }
   0x3 LB: > { %s8726_s13 = sadd.s32 4294967295, %s8680_s12   ;;  %s6598_s14 = sadd.s32 4294967294, %s8680_s12   ;;  %s8680_s12 = sphi %s8711_s12, %s20764_s12   ;;  %s8676_s11 = sphi %s8709_s11, %s20763_s11   ;;  %s8672_s10 = sphi %s8707_s10, %s20762_s10   ;;  %s8668_s9 = sphi %s8705_s9, %s20761_s9  }
   0x4   : > { %s8730_s15 = sadd.s32 1, %s8680_s12   ;;  %s69_s16 = sadd.s32 1, %s8676_s11 }
   0x5   : > { %s66_s17 = ssub.s32 %s8680_s12, %s8730_s15  ;;  %p79_p0 = scmp.ne.s32.totalorder %s8676_s11, %s8672_s10 }
   0x6   : > { %p67_p1 = scmp.eq.s32.totalorder %s66_s17, 0  ;;  %p80_p2 = scmp.eq.s32.totalorder %s8726_s13, 1 }
   0x7   : > { %p85_p3 = scmp.ne.s32.totalorder %s8672_s10, %s8668_s9  ;;  %p86_p4 = scmp.eq.s32.totalorder %s6598_s14, 1 }
   0x8   : > { %s8741_s18 = scalar_select %p67_p1, %s8676_s11, %s69_s16  }
   0x9   : > { %p8743_p5 = por %p80_p2, %p79_p0  ;;  %p8747_p6 = por %p86_p4, %p85_p3 }
   0xa   : > { %p6601_p7 = scmp.ge.s32.totalorder %s8680_s12, 1  ;;  %p116_p8 = scmp.lt.s32.totalorder %s8680_s12, 3 }
   0xc   : > { %p117_p9 = pnand %p6601_p7, %p116_p8 }
   0xe   : > { %120 = sbr.rel (%p117_p9) target bundleno = 2050 (0x802), region = 28 }
  0x15   : > { %s6603_s21 = sshll.u32 %s8726_s13, 7  ;;  %v17961_v0 = vmov 0   ;;  %s135_s4 = sand.u32 1, %s8672_s10  }
  0x16   : > { %8210 = vset.pattern.permute.xlu1 %v17961_v0  ;;  %8209 = vset.pattern.permute.xlu0 %v17961_v0  ;;  %p139_p10 = scmp.lt.s32.totalorder %s6603_s21, 255  ;;  %s6602_s5 = sshll.u32 %s135_s4, 10 }
  0x17   : > { %4406 = vmatprep.subr.bf16.mxu1 %v17961_v0  ;;  %5047 = vmatprep.subr.bf16.mxu0 %v17961_v0  ;;  %s15877_s6 = scalar_lea.vmem [#allocation2], %s6602_s5 }
  0x18   : > { %s20766_s21 = smov (!%p139_p10, %s6603_s21), 255  ;;  %s6536_s7 = sshll.u32 %s15877_s6, 4  ;;  %s17910_s7 = int_to_ptr.vmem [resolvable:$true] %s6536_s7 }
  0x19   : > { %s6604_s22 = sshll.u32 %s20766_s21, 3  ;;  %s8618_s17 = scalar_lea.vmem %s17910_s7, 16384 }
  0x1a   : > { %s8761_s25 = scalar_lea.vmem %s17958_s0, %s6604_s22  ;;  %p8619_p11 = scmp.ne.s32.totalorder %s17910_s7, %s8618_s17 }
  0x1b   : > { %v8764_v1 = vld [vmem:[%s8761_s25 + $0x10] sm:$0xff]  ;;  %v8767_v2 = vld [vmem:[%s8761_s25] sm:$0xff]  ;;  %v8772_v3 = vld [vmem:[%s8761_s25 + $0x18] sm:$0xff]  ;;  %s8687_s21 = smov [#allocation2]  }
  0x1c   : > { %284 = vperm.xlu1 %8210, %v8764_v1   ;;  %278 = vperm.xlu0 %8209, %v8767_v2   ;;  %v8775_v4 = vld [vmem:[%s8761_s25 + $0x8] sm:$0xff]  ;;  %v8783_v6 = vld [vmem:[%s8761_s25 + $0x20] sm:$0xff]  ;;  %v8788_v7 = vld [vmem:[%s8761_s25 + $0x38] sm:$0xff]  ;;  %p8620_p12 = pnand %p8619_p11, %p8743_p5  ;;  %s8622_s22 = sshll.u32 %s8687_s21, 4  ;;  %s8623_s22 = int_to_ptr.vmem [resolvable:$false] %s8622_s22 }
  0x1d   : > { %v8780_v5 = vld [vmem:[%s8761_s25 + $0x28] sm:$0xff]  ;;  %v8791_v8 = vld [vmem:[%s8761_s25 + $0x30] sm:$0xff]  ;;  %v8799_v10 = vld [vmem:[%s8761_s25 + $0x40] sm:$0xff]  ;;  %s8624_s23 = scalar_lea.vmem %s8623_s22, 32768  ;;  %p8625_p0 = scmp.lt.s32.totalorder %s17910_s7, %s8623_s22 }
  0x1e   : > { %v8796_v9 = vld [vmem:[%s8761_s25 + $0x48] sm:$0xff]  ;;  %v8804_v11 = vld [vmem:[%s8761_s25 + $0x58] sm:$0xff]  ;;  %v8807_v12 = vld [vmem:[%s8761_s25 + $0x50] sm:$0xff]  ;;  %p8621_p13 = pneg %p8620_p12  ;;  %p8626_p1 = scmp.lt.s32.totalorder %s8624_s23, %s8618_s17 }
  0x1f   : > { %v8812_v13 = vld [vmem:[%s8761_s25 + $0x68] sm:$0xff]  ;;  %v8815_v14 = vld [vmem:[%s8761_s25 + $0x60] sm:$0xff]  ;;  %v8820_v15 = vld [vmem:[%s8761_s25 + $0x78] sm:$0xff] }
  0x20   : > { %287 = vperm.xlu1 %8210, %v8772_v3   ;;  %281 = vperm.xlu0 %8209, %v8775_v4   ;;  %v8823_v16 = vld [vmem:[%s8761_s25 + $0x70] sm:$0xff]  ;;  %v8826_v17 = vld [vmem:[%s8761_s25 + $0x88] sm:$0xff]  ;;  %v8829_v18 = vld [vmem:[%s8761_s25 + $0x80] sm:$0xff]  ;;  %p8627_p2 = por %p8626_p1, %p8625_p0 }
  0x21   : > { %v8834_v19 = vld [vmem:[%s8761_s25 + $0x98] sm:$0xff]  ;;  %v8837_v20 = vld [vmem:[%s8761_s25 + $0x90] sm:$0xff]  ;;  %v8842_v21 = vld [vmem:[%s8761_s25 + $0xa8] sm:$0xff] }
  0x22   : > { %v8845_v22 = vld [vmem:[%s8761_s25 + $0xa0] sm:$0xff]  ;;  %v8850_v23 = vld [vmem:[%s8761_s25 + $0xb8] sm:$0xff]  ;;  %v8853_v24 = vld [vmem:[%s8761_s25 + $0xb0] sm:$0xff]  ;;  %p8628_p3 = pnand %p8627_p2, %p8621_p13 }
  0x23   : > { %v8858_v25 = vld [vmem:[%s8761_s25 + $0xc8] sm:$0xff]  ;;  %v8861_v26 = vld [vmem:[%s8761_s25 + $0xc0] sm:$0xff]  ;;  %v8866_v27 = vld [vmem:[%s8761_s25 + $0xd8] sm:$0xff] }
  0x24   : > { %293 = vperm.xlu1 %8210, %v8780_v5   ;;  %290 = vperm.xlu0 %8209, %v8783_v6   ;;  %v8869_v28 = vld [vmem:[%s8761_s25 + $0xd0] sm:$0xff]  ;;  %v8874_v29 = vld [vmem:[%s8761_s25 + $0xe8] sm:$0xff]  ;;  %v8877_v30 = vld [vmem:[%s8761_s25 + $0xe0] sm:$0xff] }
  0x25   : > { %v8884_v31 = vld [vmem:[%s8761_s25 + $0xf8] sm:$0xff]  ;;  %v8887_v32 = vld [vmem:[%s8761_s25 + $0xf0] sm:$0xff]  ;;  %v8892_v33 = vld [vmem:[%s8761_s25 + $0x108] sm:$0xff] }
  0x26   : > { %v8895_v34 = vld [vmem:[%s8761_s25 + $0x100] sm:$0xff]  ;;  %v8900_v35 = vld [vmem:[%s8761_s25 + $0x118] sm:$0xff]  ;;  %v8903_v36 = vld [vmem:[%s8761_s25 + $0x110] sm:$0xff] }
  0x27   : > { %v8908_v37 = vld [vmem:[%s8761_s25 + $0x128] sm:$0xff]  ;;  %v8911_v38 = vld [vmem:[%s8761_s25 + $0x120] sm:$0xff]  ;;  %v8916_v39 = vld [vmem:[%s8761_s25 + $0x138] sm:$0xff] }
  0x28   : > { %299 = vperm.xlu1 %8210, %v8788_v7   ;;  %296 = vperm.xlu0 %8209, %v8791_v8   ;;  %v8919_v40 = vld [vmem:[%s8761_s25 + $0x130] sm:$0xff]  ;;  %v8924_v41 = vld [vmem:[%s8761_s25 + $0x148] sm:$0xff]  ;;  %v8927_v42 = vld [vmem:[%s8761_s25 + $0x140] sm:$0xff] }
  0x29   : > { %v8932_v43 = vld [vmem:[%s8761_s25 + $0x158] sm:$0xff]  ;;  %v8935_v44 = vld [vmem:[%s8761_s25 + $0x150] sm:$0xff]  ;;  %v8940_v45 = vld [vmem:[%s8761_s25 + $0x168] sm:$0xff] }
  0x2a   : > { %v8943_v46 = vld [vmem:[%s8761_s25 + $0x160] sm:$0xff]  ;;  %v8948_v47 = vld [vmem:[%s8761_s25 + $0x178] sm:$0xff]  ;;  %v8951_v48 = vld [vmem:[%s8761_s25 + $0x170] sm:$0xff] }
  0x2b   : > { %v8956_v49 = vld [vmem:[%s8761_s25 + $0x188] sm:$0xff]  ;;  %v8959_v50 = vld [vmem:[%s8761_s25 + $0x180] sm:$0xff]  ;;  %v8964_v51 = vld [vmem:[%s8761_s25 + $0x198] sm:$0xff] }
  0x2c   : > { %305 = vperm.xlu1 %8210, %v8796_v9   ;;  %302 = vperm.xlu0 %8209, %v8799_v10   ;;  %v8967_v52 = vld [vmem:[%s8761_s25 + $0x190] sm:$0xff]  ;;  %v8972_v53 = vld [vmem:[%s8761_s25 + $0x1a8] sm:$0xff]  ;;  %v8975_v54 = vld [vmem:[%s8761_s25 + $0x1a0] sm:$0xff] }
  0x2d   : > { %18508 = vst [vmem:[#allocation5_spill] sm:$0xff] %v8972_v53  ;;  %18509 = vst [vmem:[#allocation6_spill] sm:$0xff] %v8975_v54  ;;  %v8980_v55 = vld [vmem:[%s8761_s25 + $0x1b8] sm:$0xff]  ;;  %v8983_v56 = vld [vmem:[%s8761_s25 + $0x1b0] sm:$0xff] }
  0x2e   : > { %18510 = vst [vmem:[#allocation7_spill] sm:$0xff] %v8980_v55  ;;  %18511 = vst [vmem:[#allocation8_spill] sm:$0xff] %v8983_v56  ;;  %v8988_v57 = vld [vmem:[%s8761_s25 + $0x1c8] sm:$0xff]  ;;  %v8991_v58 = vld [vmem:[%s8761_s25 + $0x1c0] sm:$0xff] }
  0x2f   : > { %18512 = vst [vmem:[#allocation9_spill] sm:$0xff] %v8988_v57  ;;  %18513 = vst [vmem:[#allocation10_spill] sm:$0xff] %v8991_v58  ;;  %v8996_v59 = vld [vmem:[%s8761_s25 + $0x1d8] sm:$0xff]  ;;  %v8999_v60 = vld [vmem:[%s8761_s25 + $0x1d0] sm:$0xff] }
  0x30   : > { %311 = vperm.xlu1 %8210, %v8804_v11   ;;  %308 = vperm.xlu0 %8209, %v8807_v12   ;;  %18514 = vst [vmem:[#allocation11_spill] sm:$0xff] %v8996_v59  ;;  %18515 = vst [vmem:[#allocation12_spill] sm:$0xff] %v8999_v60  ;;  %v9004_v61 = vld [vmem:[%s8761_s25 + $0x1e8] sm:$0xff]  ;;  %v9007_v62 = vld [vmem:[%s8761_s25 + $0x1e0] sm:$0xff] }
  0x31   : > { %18516 = vst [vmem:[#allocation13_spill] sm:$0xff] %v9004_v61  ;;  %18517 = vst [vmem:[#allocation14_spill] sm:$0xff] %v9007_v62  ;;  %v9012_v63 = vld [vmem:[%s8761_s25 + $0x1f8] sm:$0xff]  ;;  %v9015_v0 = vld [vmem:[%s8761_s25 + $0x1f0] sm:$0xff] }
  0x32   : > { %18518 = vst [vmem:[#allocation15_spill] sm:$0xff] %v9012_v63  ;;  %18519 = vst [vmem:[#allocation16_spill] sm:$0xff] %v9015_v0 }
  0x34   : > { %317 = vperm.xlu1 %8210, %v8812_v13   ;;  %314 = vperm.xlu0 %8209, %v8815_v14  }
  0x38   : > { %323 = vperm.xlu1 %8210, %v8820_v15   ;;  %320 = vperm.xlu0 %8209, %v8823_v16  }
  0x3c   : > { %329 = vperm.xlu1 %8210, %v8826_v17   ;;  %326 = vperm.xlu0 %8209, %v8829_v18  }
  0x40   : > { %335 = vperm.xlu1 %8210, %v8834_v19   ;;  %332 = vperm.xlu0 %8209, %v8837_v20  }
  0x44   : > { %341 = vperm.xlu1 %8210, %v8842_v21   ;;  %338 = vperm.xlu0 %8209, %v8845_v22  }
  0x48   : > { %347 = vperm.xlu1 %8210, %v8850_v23   ;;  %344 = vperm.xlu0 %8209, %v8853_v24  }
  0x4c   : > { %353 = vperm.xlu1 %8210, %v8858_v25   ;;  %350 = vperm.xlu0 %8209, %v8861_v26  }
  0x50   : > { %359 = vperm.xlu1 %8210, %v8866_v27   ;;  %356 = vperm.xlu0 %8209, %v8869_v28  }
  0x54   : > { %365 = vperm.xlu1 %8210, %v8874_v29   ;;  %362 = vperm.xlu0 %8209, %v8877_v30  }
  0x58   : > { %371 = vperm.xlu1 %8210, %v8884_v31   ;;  %368 = vperm.xlu0 %8209, %v8887_v32  }
  0x5c   : > { %377 = vperm.xlu1 %8210, %v8892_v33   ;;  %374 = vperm.xlu0 %8209, %v8895_v34  }
  0x60   : > { %383 = vperm.xlu1 %8210, %v8900_v35   ;;  %380 = vperm.xlu0 %8209, %v8903_v36  }
  0x64   : > { %389 = vperm.xlu1 %8210, %v8908_v37   ;;  %386 = vperm.xlu0 %8209, %v8911_v38  }
  0x68   : > { %395 = vperm.xlu1 %8210, %v8916_v39   ;;  %392 = vperm.xlu0 %8209, %v8919_v40  }
  0x6c   : > { %401 = vperm.xlu1 %8210, %v8924_v41   ;;  %398 = vperm.xlu0 %8209, %v8927_v42  }
  0x70   : > { %407 = vperm.xlu1 %8210, %v8932_v43   ;;  %404 = vperm.xlu0 %8209, %v8935_v44  }
  0x74   : > { %413 = vperm.xlu1 %8210, %v8940_v45   ;;  %410 = vperm.xlu0 %8209, %v8943_v46  }
  0x78   : > { %419 = vperm.xlu1 %8210, %v8948_v47   ;;  %416 = vperm.xlu0 %8209, %v8951_v48  }
  0x7c   : > { %425 = vperm.xlu1 %8210, %v8956_v49   ;;  %422 = vperm.xlu0 %8209, %v8959_v50  }
  0x80   : > { %431 = vperm.xlu1 %8210, %v8964_v51   ;;  %428 = vperm.xlu0 %8209, %v8967_v52  }
  0x84   : > { %437 = vperm.xlu1 %8210, %v8972_v53   ;;  %434 = vperm.xlu0 %8209, %v8975_v54  }
  0x88   : > { %443 = vperm.xlu1 %8210, %v8980_v55   ;;  %440 = vperm.xlu0 %8209, %v8983_v56   ;;  %v271_v55 = vld [vmem:[%s8761_s25 + $0x3e8] sm:$0xff] }
  0x8c   : > { %449 = vperm.xlu1 %8210, %v8988_v57   ;;  %446 = vperm.xlu0 %8209, %v8991_v58   ;;  %v9035_v58 = vld [vmem:[%s8761_s25 + $0x210] sm:$0xff] }
  0x8d   : > { %18525 = vst [vmem:[#allocation22_spill] sm:$0xff] %v9035_v58 }
  0x90   : > { %455 = vperm.xlu1 %8210, %v8996_v59   ;;  %452 = vperm.xlu0 %8209, %v8999_v60   ;;  %v9020_v59 = vld [vmem:[%s8761_s25 + $0x208] sm:$0xff]  ;;  %v9023_v60 = vld [vmem:[%s8761_s25 + $0x200] sm:$0xff] }
  0x91   : > { %18520 = vst [vmem:[#allocation17_spill] sm:$0xff] %v9020_v59  ;;  %18521 = vst [vmem:[#allocation18_spill] sm:$0xff] %v9023_v60 }
  0x94   : > { %461 = vperm.xlu1 %8210, %v9004_v61   ;;  %458 = vperm.xlu0 %8209, %v9007_v62   ;;  %v9032_v62 = vld [vmem:[%s8761_s25 + $0x218] sm:$0xff] }
  0x95   : > { %18524 = vst [vmem:[#allocation21_spill] sm:$0xff] %v9032_v62 }
  0x98   : > { %467 = vperm.xlu1 %8210, %v9012_v63   ;;  %464 = vperm.xlu0 %8209, %v9015_v0  }
  0x9b   : > { %v9025_v57 = vpop.permute.xlu1 %284  ;;  %v9027_v61 = vpop.permute.xlu0 %278 }
  0x9c   : > { %18522 = vst [vmem:[#allocation19_spill] sm:$0xff] %v9025_v57  ;;  %18523 = vst [vmem:[#allocation20_spill] sm:$0xff] %v9027_v61  ;;  %473 = vperm.xlu1 %8210, %v9020_v59   ;;  %470 = vperm.xlu0 %8209, %v9023_v60   ;;  %v9044_v57 = vld [vmem:[%s8761_s25 + $0x228] sm:$0xff]  ;;  %v9047_v61 = vld [vmem:[%s8761_s25 + $0x220] sm:$0xff] }
  0x9d   : > { %18528 = vst [vmem:[#allocation25_spill] sm:$0xff] %v9044_v57  ;;  %18529 = vst [vmem:[#allocation26_spill] sm:$0xff] %v9047_v61 }
  0x9f   : > { %v9037_v63 = vpop.permute.xlu1 %287  ;;  %v9039_v0 = vpop.permute.xlu0 %281 }
  0xa0   : > { %18526 = vst [vmem:[#allocation23_spill] sm:$0xff] %v9037_v63  ;;  %18527 = vst [vmem:[#allocation24_spill] sm:$0xff] %v9039_v0  ;;  %479 = vperm.xlu1 %8210, %v9032_v62   ;;  %476 = vperm.xlu0 %8209, %v9035_v58   ;;  %v9056_v63 = vld [vmem:[%s8761_s25 + $0x238] sm:$0xff]  ;;  %v9059_v0 = vld [vmem:[%s8761_s25 + $0x230] sm:$0xff] }
  0xa1   : > { %18532 = vst [vmem:[#allocation29_spill] sm:$0xff] %v9056_v63  ;;  %18533 = vst [vmem:[#allocation30_spill] sm:$0xff] %v9059_v0 }
  0xa3   : > { %v9049_v59 = vpop.permute.xlu1 %293  ;;  %v9051_v60 = vpop.permute.xlu0 %290 }
  0xa4   : > { %18530 = vst [vmem:[#allocation27_spill] sm:$0xff] %v9049_v59  ;;  %18531 = vst [vmem:[#allocation28_spill] sm:$0xff] %v9051_v60  ;;  %485 = vperm.xlu1 %8210, %v9044_v57   ;;  %482 = vperm.xlu0 %8209, %v9047_v61   ;;  %v9068_v59 = vld [vmem:[%s8761_s25 + $0x248] sm:$0xff]  ;;  %v9071_v60 = vld [vmem:[%s8761_s25 + $0x240] sm:$0xff] }
  0xa5   : > { %18536 = vst [vmem:[#allocation33_spill] sm:$0xff] %v9068_v59  ;;  %18537 = vst [vmem:[#allocation34_spill] sm:$0xff] %v9071_v60 }
  0xa7   : > { %v9061_v62 = vpop.permute.xlu1 %299  ;;  %v9063_v58 = vpop.permute.xlu0 %296 }
  0xa8   : > { %18534 = vst [vmem:[#allocation31_spill] sm:$0xff] %v9061_v62  ;;  %18535 = vst [vmem:[#allocation32_spill] sm:$0xff] %v9063_v58  ;;  %491 = vperm.xlu1 %8210, %v9056_v63   ;;  %488 = vperm.xlu0 %8209, %v9059_v0   ;;  %v9080_v62 = vld [vmem:[%s8761_s25 + $0x258] sm:$0xff]  ;;  %v9083_v58 = vld [vmem:[%s8761_s25 + $0x250] sm:$0xff] }
  0xa9   : > { %18540 = vst [vmem:[#allocation37_spill] sm:$0xff] %v9080_v62  ;;  %18541 = vst [vmem:[#allocation38_spill] sm:$0xff] %v9083_v58 }
  0xab   : > { %v9073_v57 = vpop.permute.xlu1 %305  ;;  %v9075_v61 = vpop.permute.xlu0 %302 }
  0xac   : > { %18538 = vst [vmem:[#allocation35_spill] sm:$0xff] %v9073_v57  ;;  %18539 = vst [vmem:[#allocation36_spill] sm:$0xff] %v9075_v61  ;;  %497 = vperm.xlu1 %8210, %v9068_v59   ;;  %494 = vperm.xlu0 %8209, %v9071_v60   ;;  %v9092_v57 = vld [vmem:[%s8761_s25 + $0x268] sm:$0xff]  ;;  %v9095_v61 = vld [vmem:[%s8761_s25 + $0x260] sm:$0xff] }
  0xad   : > { %18544 = vst [vmem:[#allocation41_spill] sm:$0xff] %v9092_v57  ;;  %18545 = vst [vmem:[#allocation42_spill] sm:$0xff] %v9095_v61 }
  0xaf   : > { %v9085_v63 = vpop.permute.xlu1 %311  ;;  %v9087_v0 = vpop.permute.xlu0 %308 }
  0xb0   : > { %18542 = vst [vmem:[#allocation39_spill] sm:$0xff] %v9085_v63  ;;  %18543 = vst [vmem:[#allocation40_spill] sm:$0xff] %v9087_v0  ;;  %503 = vperm.xlu1 %8210, %v9080_v62   ;;  %500 = vperm.xlu0 %8209, %v9083_v58   ;;  %v9104_v63 = vld [vmem:[%s8761_s25 + $0x278] sm:$0xff]  ;;  %v9107_v0 = vld [vmem:[%s8761_s25 + $0x270] sm:$0xff] }
  0xb1   : > { %18548 = vst [vmem:[#allocation45_spill] sm:$0xff] %v9104_v63  ;;  %18549 = vst [vmem:[#allocation46_spill] sm:$0xff] %v9107_v0 }
  0xb3   : > { %v9097_v59 = vpop.permute.xlu1 %317  ;;  %v9099_v60 = vpop.permute.xlu0 %314 }
  0xb4   : > { %18546 = vst [vmem:[#allocation43_spill] sm:$0xff] %v9097_v59  ;;  %18547 = vst [vmem:[#allocation44_spill] sm:$0xff] %v9099_v60  ;;  %509 = vperm.xlu1 %8210, %v9092_v57   ;;  %506 = vperm.xlu0 %8209, %v9095_v61   ;;  %v9116_v59 = vld [vmem:[%s8761_s25 + $0x288] sm:$0xff]  ;;  %v9119_v60 = vld [vmem:[%s8761_s25 + $0x280] sm:$0xff] }
  0xb5   : > { %18552 = vst [vmem:[#allocation49_spill] sm:$0xff] %v9116_v59  ;;  %18553 = vst [vmem:[#allocation50_spill] sm:$0xff] %v9119_v60 }
  0xb7   : > { %v9109_v62 = vpop.permute.xlu1 %323  ;;  %v9111_v58 = vpop.permute.xlu0 %320 }
  0xb8   : > { %18550 = vst [vmem:[#allocation47_spill] sm:$0xff] %v9109_v62  ;;  %18551 = vst [vmem:[#allocation48_spill] sm:$0xff] %v9111_v58  ;;  %515 = vperm.xlu1 %8210, %v9104_v63   ;;  %512 = vperm.xlu0 %8209, %v9107_v0   ;;  %v9128_v62 = vld [vmem:[%s8761_s25 + $0x298] sm:$0xff]  ;;  %v9131_v58 = vld [vmem:[%s8761_s25 + $0x290] sm:$0xff] }
  0xb9   : > { %18556 = vst [vmem:[#allocation53_spill] sm:$0xff] %v9128_v62  ;;  %18557 = vst [vmem:[#allocation54_spill] sm:$0xff] %v9131_v58 }
  0xbb   : > { %v9121_v57 = vpop.permute.xlu1 %329  ;;  %v9123_v61 = vpop.permute.xlu0 %326 }
  0xbc   : > { %18554 = vst [vmem:[#allocation51_spill] sm:$0xff] %v9121_v57  ;;  %18555 = vst [vmem:[#allocation52_spill] sm:$0xff] %v9123_v61  ;;  %521 = vperm.xlu1 %8210, %v9116_v59   ;;  %518 = vperm.xlu0 %8209, %v9119_v60   ;;  %v9140_v57 = vld [vmem:[%s8761_s25 + $0x2a8] sm:$0xff]  ;;  %v9143_v61 = vld [vmem:[%s8761_s25 + $0x2a0] sm:$0xff] }
  0xbd   : > { %18560 = vst [vmem:[#allocation57_spill] sm:$0xff] %v9140_v57  ;;  %18561 = vst [vmem:[#allocation58_spill] sm:$0xff] %v9143_v61 }
  0xbf   : > { %v9133_v63 = vpop.permute.xlu1 %335  ;;  %v9135_v0 = vpop.permute.xlu0 %332 }
  0xc0   : > { %18558 = vst [vmem:[#allocation55_spill] sm:$0xff] %v9133_v63  ;;  %18559 = vst [vmem:[#allocation56_spill] sm:$0xff] %v9135_v0  ;;  %527 = vperm.xlu1 %8210, %v9128_v62   ;;  %524 = vperm.xlu0 %8209, %v9131_v58   ;;  %v9152_v63 = vld [vmem:[%s8761_s25 + $0x2b8] sm:$0xff]  ;;  %v9155_v0 = vld [vmem:[%s8761_s25 + $0x2b0] sm:$0xff] }
  0xc1   : > { %18564 = vst [vmem:[#allocation61_spill] sm:$0xff] %v9152_v63  ;;  %18565 = vst [vmem:[#allocation62_spill] sm:$0xff] %v9155_v0 }
  0xc3   : > { %v9145_v59 = vpop.permute.xlu1 %341  ;;  %v9147_v60 = vpop.permute.xlu0 %338 }
  0xc4   : > { %18562 = vst [vmem:[#allocation59_spill] sm:$0xff] %v9145_v59  ;;  %18563 = vst [vmem:[#allocation60_spill] sm:$0xff] %v9147_v60  ;;  %533 = vperm.xlu1 %8210, %v9140_v57   ;;  %530 = vperm.xlu0 %8209, %v9143_v61   ;;  %v9164_v59 = vld [vmem:[%s8761_s25 + $0x2c8] sm:$0xff]  ;;  %v9167_v60 = vld [vmem:[%s8761_s25 + $0x2c0] sm:$0xff] }
  0xc5   : > { %18568 = vst [vmem:[#allocation65_spill] sm:$0xff] %v9164_v59  ;;  %18569 = vst [vmem:[#allocation66_spill] sm:$0xff] %v9167_v60 }
  0xc7   : > { %v9157_v62 = vpop.permute.xlu1 %347  ;;  %v9159_v58 = vpop.permute.xlu0 %344 }
  0xc8   : > { %18566 = vst [vmem:[#allocation63_spill] sm:$0xff] %v9157_v62  ;;  %18567 = vst [vmem:[#allocation64_spill] sm:$0xff] %v9159_v58  ;;  %539 = vperm.xlu1 %8210, %v9152_v63   ;;  %536 = vperm.xlu0 %8209, %v9155_v0   ;;  %v9176_v62 = vld [vmem:[%s8761_s25 + $0x2d8] sm:$0xff]  ;;  %v9179_v58 = vld [vmem:[%s8761_s25 + $0x2d0] sm:$0xff] }
  0xc9   : > { %18572 = vst [vmem:[#allocation69_spill] sm:$0xff] %v9176_v62  ;;  %18573 = vst [vmem:[#allocation70_spill] sm:$0xff] %v9179_v58 }
  0xcb   : > { %v9169_v57 = vpop.permute.xlu1 %353  ;;  %v9171_v61 = vpop.permute.xlu0 %350 }
  0xcc   : > { %18570 = vst [vmem:[#allocation67_spill] sm:$0xff] %v9169_v57  ;;  %18571 = vst [vmem:[#allocation68_spill] sm:$0xff] %v9171_v61  ;;  %545 = vperm.xlu1 %8210, %v9164_v59   ;;  %542 = vperm.xlu0 %8209, %v9167_v60   ;;  %v9188_v57 = vld [vmem:[%s8761_s25 + $0x2e8] sm:$0xff]  ;;  %v9191_v61 = vld [vmem:[%s8761_s25 + $0x2e0] sm:$0xff] }
  0xcd   : > { %18576 = vst [vmem:[#allocation73_spill] sm:$0xff] %v9188_v57  ;;  %18577 = vst [vmem:[#allocation74_spill] sm:$0xff] %v9191_v61 }
  0xcf   : > { %v9181_v63 = vpop.permute.xlu1 %359  ;;  %v9183_v0 = vpop.permute.xlu0 %356 }
  0xd0   : > { %18574 = vst [vmem:[#allocation71_spill] sm:$0xff] %v9181_v63  ;;  %18575 = vst [vmem:[#allocation72_spill] sm:$0xff] %v9183_v0  ;;  %551 = vperm.xlu1 %8210, %v9176_v62   ;;  %548 = vperm.xlu0 %8209, %v9179_v58   ;;  %v9200_v63 = vld [vmem:[%s8761_s25 + $0x2f8] sm:$0xff]  ;;  %v9203_v0 = vld [vmem:[%s8761_s25 + $0x2f0] sm:$0xff] }
  0xd1   : > { %18580 = vst [vmem:[#allocation77_spill] sm:$0xff] %v9200_v63  ;;  %18581 = vst [vmem:[#allocation78_spill] sm:$0xff] %v9203_v0 }
  0xd3   : > { %v9193_v59 = vpop.permute.xlu1 %365  ;;  %v9195_v60 = vpop.permute.xlu0 %362 }
  0xd4   : > { %18578 = vst [vmem:[#allocation75_spill] sm:$0xff] %v9193_v59  ;;  %18579 = vst [vmem:[#allocation76_spill] sm:$0xff] %v9195_v60  ;;  %557 = vperm.xlu1 %8210, %v9188_v57   ;;  %554 = vperm.xlu0 %8209, %v9191_v61   ;;  %v9212_v59 = vld [vmem:[%s8761_s25 + $0x308] sm:$0xff]  ;;  %v9215_v60 = vld [vmem:[%s8761_s25 + $0x300] sm:$0xff] }
  0xd5   : > { %18584 = vst [vmem:[#allocation81_spill] sm:$0xff] %v9212_v59  ;;  %18585 = vst [vmem:[#allocation82_spill] sm:$0xff] %v9215_v60 }
  0xd7   : > { %v9205_v62 = vpop.permute.xlu1 %371  ;;  %v9207_v58 = vpop.permute.xlu0 %368 }
  0xd8   : > { %18582 = vst [vmem:[#allocation79_spill] sm:$0xff] %v9205_v62  ;;  %18583 = vst [vmem:[#allocation80_spill] sm:$0xff] %v9207_v58  ;;  %563 = vperm.xlu1 %8210, %v9200_v63   ;;  %560 = vperm.xlu0 %8209, %v9203_v0   ;;  %v9224_v62 = vld [vmem:[%s8761_s25 + $0x318] sm:$0xff]  ;;  %v9227_v58 = vld [vmem:[%s8761_s25 + $0x310] sm:$0xff] }
  0xd9   : > { %18588 = vst [vmem:[#allocation85_spill] sm:$0xff] %v9224_v62  ;;  %18589 = vst [vmem:[#allocation86_spill] sm:$0xff] %v9227_v58 }
  0xdb   : > { %v9217_v57 = vpop.permute.xlu1 %377  ;;  %v9219_v61 = vpop.permute.xlu0 %374 }
  0xdc   : > { %18586 = vst [vmem:[#allocation83_spill] sm:$0xff] %v9217_v57  ;;  %18587 = vst [vmem:[#allocation84_spill] sm:$0xff] %v9219_v61  ;;  %569 = vperm.xlu1 %8210, %v9212_v59   ;;  %566 = vperm.xlu0 %8209, %v9215_v60   ;;  %v9236_v57 = vld [vmem:[%s8761_s25 + $0x328] sm:$0xff]  ;;  %v9239_v61 = vld [vmem:[%s8761_s25 + $0x320] sm:$0xff] }
  0xdd   : > { %18592 = vst [vmem:[#allocation89_spill] sm:$0xff] %v9236_v57  ;;  %18593 = vst [vmem:[#allocation90_spill] sm:$0xff] %v9239_v61 }
  0xdf   : > { %v9229_v63 = vpop.permute.xlu1 %383  ;;  %v9231_v0 = vpop.permute.xlu0 %380 }
  0xe0   : > { %18590 = vst [vmem:[#allocation87_spill] sm:$0xff] %v9229_v63  ;;  %18591 = vst [vmem:[#allocation88_spill] sm:$0xff] %v9231_v0  ;;  %575 = vperm.xlu1 %8210, %v9224_v62   ;;  %572 = vperm.xlu0 %8209, %v9227_v58   ;;  %v9248_v63 = vld [vmem:[%s8761_s25 + $0x338] sm:$0xff]  ;;  %v9251_v0 = vld [vmem:[%s8761_s25 + $0x330] sm:$0xff] }
  0xe1   : > { %18596 = vst [vmem:[#allocation93_spill] sm:$0xff] %v9248_v63  ;;  %18597 = vst [vmem:[#allocation94_spill] sm:$0xff] %v9251_v0 }
  0xe3   : > { %v9241_v59 = vpop.permute.xlu1 %389  ;;  %v9243_v60 = vpop.permute.xlu0 %386 }
  0xe4   : > { %18594 = vst [vmem:[#allocation91_spill] sm:$0xff] %v9241_v59  ;;  %18595 = vst [vmem:[#allocation92_spill] sm:$0xff] %v9243_v60  ;;  %581 = vperm.xlu1 %8210, %v9236_v57   ;;  %578 = vperm.xlu0 %8209, %v9239_v61   ;;  %v9260_v59 = vld [vmem:[%s8761_s25 + $0x348] sm:$0xff]  ;;  %v9263_v60 = vld [vmem:[%s8761_s25 + $0x340] sm:$0xff] }
  0xe5   : > { %18600 = vst [vmem:[#allocation97_spill] sm:$0xff] %v9260_v59  ;;  %18601 = vst [vmem:[#allocation98_spill] sm:$0xff] %v9263_v60 }
  0xe7   : > { %v9253_v62 = vpop.permute.xlu1 %395  ;;  %v9255_v58 = vpop.permute.xlu0 %392 }
  0xe8   : > { %18598 = vst [vmem:[#allocation95_spill] sm:$0xff] %v9253_v62  ;;  %18599 = vst [vmem:[#allocation96_spill] sm:$0xff] %v9255_v58  ;;  %587 = vperm.xlu1 %8210, %v9248_v63   ;;  %584 = vperm.xlu0 %8209, %v9251_v0   ;;  %v9272_v62 = vld [vmem:[%s8761_s25 + $0x358] sm:$0xff]  ;;  %v9275_v58 = vld [vmem:[%s8761_s25 + $0x350] sm:$0xff] }
  0xe9   : > { %18604 = vst [vmem:[#allocation101_spill] sm:$0xff] %v9272_v62  ;;  %18605 = vst [vmem:[#allocation102_spill] sm:$0xff] %v9275_v58 }
  0xeb   : > { %v9265_v57 = vpop.permute.xlu1 %401  ;;  %v9267_v61 = vpop.permute.xlu0 %398 }
  0xec   : > { %18602 = vst [vmem:[#allocation99_spill] sm:$0xff] %v9265_v57  ;;  %18603 = vst [vmem:[#allocation100_spill] sm:$0xff] %v9267_v61  ;;  %593 = vperm.xlu1 %8210, %v9260_v59   ;;  %590 = vperm.xlu0 %8209, %v9263_v60   ;;  %v9284_v57 = vld [vmem:[%s8761_s25 + $0x368] sm:$0xff]  ;;  %v9287_v61 = vld [vmem:[%s8761_s25 + $0x360] sm:$0xff] }
  0xed   : > { %18608 = vst [vmem:[#allocation105_spill] sm:$0xff] %v9284_v57  ;;  %18609 = vst [vmem:[#allocation106_spill] sm:$0xff] %v9287_v61 }
  0xef   : > { %v9277_v63 = vpop.permute.xlu1 %407  ;;  %v9279_v0 = vpop.permute.xlu0 %404 }
  0xf0   : > { %18606 = vst [vmem:[#allocation103_spill] sm:$0xff] %v9277_v63  ;;  %18607 = vst [vmem:[#allocation104_spill] sm:$0xff] %v9279_v0  ;;  %599 = vperm.xlu1 %8210, %v9272_v62   ;;  %596 = vperm.xlu0 %8209, %v9275_v58   ;;  %v9296_v63 = vld [vmem:[%s8761_s25 + $0x378] sm:$0xff]  ;;  %v9299_v0 = vld [vmem:[%s8761_s25 + $0x370] sm:$0xff] }
  0xf1   : > { %18612 = vst [vmem:[#allocation109_spill] sm:$0xff] %v9296_v63  ;;  %18613 = vst [vmem:[#allocation110_spill] sm:$0xff] %v9299_v0 }
  0xf3   : > { %v9289_v59 = vpop.permute.xlu1 %413  ;;  %v9291_v60 = vpop.permute.xlu0 %410 }
  0xf4   : > { %18610 = vst [vmem:[#allocation107_spill] sm:$0xff] %v9289_v59  ;;  %18611 = vst [vmem:[#allocation108_spill] sm:$0xff] %v9291_v60  ;;  %605 = vperm.xlu1 %8210, %v9284_v57   ;;  %602 = vperm.xlu0 %8209, %v9287_v61   ;;  %v9308_v59 = vld [vmem:[%s8761_s25 + $0x388] sm:$0xff]  ;;  %v9311_v60 = vld [vmem:[%s8761_s25 + $0x380] sm:$0xff] }
  0xf5   : > { %18616 = vst [vmem:[#allocation113_spill] sm:$0xff] %v9308_v59  ;;  %18617 = vst [vmem:[#allocation114_spill] sm:$0xff] %v9311_v60 }
  0xf7   : > { %v9301_v62 = vpop.permute.xlu1 %419  ;;  %v9303_v58 = vpop.permute.xlu0 %416 }
  0xf8   : > { %18614 = vst [vmem:[#allocation111_spill] sm:$0xff] %v9301_v62  ;;  %18615 = vst [vmem:[#allocation112_spill] sm:$0xff] %v9303_v58  ;;  %611 = vperm.xlu1 %8210, %v9296_v63   ;;  %608 = vperm.xlu0 %8209, %v9299_v0   ;;  %v9320_v62 = vld [vmem:[%s8761_s25 + $0x398] sm:$0xff]  ;;  %v9323_v58 = vld [vmem:[%s8761_s25 + $0x390] sm:$0xff] }
  0xf9   : > { %18620 = vst [vmem:[#allocation117_spill] sm:$0xff] %v9320_v62  ;;  %18621 = vst [vmem:[#allocation118_spill] sm:$0xff] %v9323_v58 }
  0xfb   : > { %v9313_v57 = vpop.permute.xlu1 %425  ;;  %v9315_v61 = vpop.permute.xlu0 %422 }
  0xfc   : > { %18618 = vst [vmem:[#allocation115_spill] sm:$0xff] %v9313_v57  ;;  %18619 = vst [vmem:[#allocation116_spill] sm:$0xff] %v9315_v61  ;;  %617 = vperm.xlu1 %8210, %v9308_v59   ;;  %614 = vperm.xlu0 %8209, %v9311_v60   ;;  %v9332_v57 = vld [vmem:[%s8761_s25 + $0x3a8] sm:$0xff]  ;;  %v9335_v61 = vld [vmem:[%s8761_s25 + $0x3a0] sm:$0xff] }
  0xfd   : > { %18624 = vst [vmem:[#allocation121_spill] sm:$0xff] %v9332_v57  ;;  %18625 = vst [vmem:[#allocation122_spill] sm:$0xff] %v9335_v61 }
  0xff   : > { %v9325_v63 = vpop.permute.xlu1 %431  ;;  %v9327_v0 = vpop.permute.xlu0 %428 }
 0x100   : > { %18622 = vst [vmem:[#allocation119_spill] sm:$0xff] %v9325_v63  ;;  %18623 = vst [vmem:[#allocation120_spill] sm:$0xff] %v9327_v0  ;;  %623 = vperm.xlu1 %8210, %v9320_v62   ;;  %620 = vperm.xlu0 %8209, %v9323_v58   ;;  %v9344_v63 = vld [vmem:[%s8761_s25 + $0x3b8] sm:$0xff]  ;;  %v9347_v0 = vld [vmem:[%s8761_s25 + $0x3b0] sm:$0xff] }
 0x101   : > { %18628 = vst [vmem:[#allocation125_spill] sm:$0xff] %v9344_v63  ;;  %18629 = vst [vmem:[#allocation126_spill] sm:$0xff] %v9347_v0 }
 0x103   : > { %v9337_v59 = vpop.permute.xlu1 %437  ;;  %v9339_v60 = vpop.permute.xlu0 %434 }
 0x104   : > { %18626 = vst [vmem:[#allocation123_spill] sm:$0xff] %v9337_v59  ;;  %18627 = vst [vmem:[#allocation124_spill] sm:$0xff] %v9339_v60  ;;  %629 = vperm.xlu1 %8210, %v9332_v57   ;;  %626 = vperm.xlu0 %8209, %v9335_v61   ;;  %v9356_v59 = vld [vmem:[%s8761_s25 + $0x3c8] sm:$0xff]  ;;  %v9359_v60 = vld [vmem:[%s8761_s25 + $0x3c0] sm:$0xff] }
 0x105   : > { %18632 = vst [vmem:[#allocation129_spill] sm:$0xff] %v9356_v59  ;;  %18633 = vst [vmem:[#allocation130_spill] sm:$0xff] %v9359_v60 }
 0x107   : > { %v9349_v62 = vpop.permute.xlu1 %443  ;;  %v9351_v58 = vpop.permute.xlu0 %440 }
 0x108   : > { %18630 = vst [vmem:[#allocation127_spill] sm:$0xff] %v9349_v62  ;;  %18631 = vst [vmem:[#allocation128_spill] sm:$0xff] %v9351_v58  ;;  %635 = vperm.xlu1 %8210, %v9344_v63   ;;  %632 = vperm.xlu0 %8209, %v9347_v0   ;;  %v269_v62 = vld [vmem:[%s8761_s25 + $0x3d8] sm:$0xff]  ;;  %v9369_v58 = vld [vmem:[%s8761_s25 + $0x3d0] sm:$0xff] }
 0x10b   : > { %v9361_v57 = vpop.permute.xlu1 %449  ;;  %v9363_v61 = vpop.permute.xlu0 %446 }
 0x10c   : > { %18634 = vst [vmem:[#allocation131_spill] sm:$0xff] %v9361_v57  ;;  %18635 = vst [vmem:[#allocation132_spill] sm:$0xff] %v9363_v61  ;;  %641 = vperm.xlu1 %8210, %v9356_v59   ;;  %638 = vperm.xlu0 %8209, %v9359_v60   ;;  %v270_v57 = vld [vmem:[%s8761_s25 + $0x3e0] sm:$0xff]  ;;  %v273_v59 = vld [vmem:[%s8761_s25 + $0x3f8] sm:$0xff] }
 0x10d   : > { %v272_v60 = vld [vmem:[%s8761_s25 + $0x3f0] sm:$0xff] }
 0x10f   : > { %v9371_v63 = vpop.permute.xlu1 %455  ;;  %v9373_v0 = vpop.permute.xlu0 %452 }
 0x110   : > { %18636 = vst [vmem:[#allocation133_spill] sm:$0xff] %v9371_v63  ;;  %18637 = vst [vmem:[#allocation134_spill] sm:$0xff] %v9373_v0  ;;  %647 = vperm.xlu1 %8210, %v269_v62   ;;  %644 = vperm.xlu0 %8209, %v9369_v58   ;;  %v18093_v0 = vmov 1  }
 0x113   : > { %v9378_v56 = vpop.permute.xlu1 %461  ;;  %v9380_v61 = vpop.permute.xlu0 %458 }
 0x114   : > { %18638 = vst [vmem:[#allocation135_spill] sm:$0xff] %v9378_v56  ;;  %18639 = vst [vmem:[#allocation136_spill] sm:$0xff] %v9380_v61  ;;  %653 = vperm.xlu1 %8210, %v271_v55   ;;  %650 = vperm.xlu0 %8209, %v270_v57  }
 0x117   : > { %v9384_v53 = vpop.permute.xlu1 %467  ;;  %v9386_v54 = vpop.permute.xlu0 %464 }
 0x118   : > { %18640 = vst [vmem:[#allocation137_spill] sm:$0xff] %v9384_v53  ;;  %18641 = vst [vmem:[#allocation138_spill] sm:$0xff] %v9386_v54  ;;  %659 = vperm.xlu1 %8210, %v273_v59   ;;  %656 = vperm.xlu0 %8209, %v272_v60   ;;  %v9808_v54 = vld [vmem:[%s17959_s1 + $0x38] sm:$0xff]  }
 0x11b   : > { %v9388_v63 = vpop.permute.xlu1 %473  ;;  %v9390_v62 = vpop.permute.xlu0 %470 }
 0x11c   : > { %18642 = vst [vmem:[#allocation139_spill] sm:$0xff] %v9388_v63  ;;  %18643 = vst [vmem:[#allocation140_spill] sm:$0xff] %v9390_v62  ;;  %8212 = vset.pattern.permute.xlu1 %v18093_v0  ;;  %8211 = vset.pattern.permute.xlu0 %v18093_v0  ;;  %v9791_v62 = vld [vmem:[%s17959_s1 + $0x30] sm:$0xff]  }
 0x11d   : > { %921 = vperm.xlu1 %8212, %v8775_v4   ;;  %918 = vperm.xlu0 %8211, %v8767_v2  }
 0x11f   : > { %v9396_v55 = vpop.permute.xlu1 %479  ;;  %v9398_v57 = vpop.permute.xlu0 %476 }
 0x120   : > { %18644 = vst [vmem:[#allocation141_spill] sm:$0xff] %v9396_v55  ;;  %18645 = vst [vmem:[#allocation142_spill] sm:$0xff] %v9398_v57 }
 0x121   : > { %924 = vperm.xlu1 %8212, %v8764_v1   ;;  %927 = vperm.xlu0 %8211, %v8772_v3  }
 0x123   : > { %v9402_v59 = vpop.permute.xlu1 %485  ;;  %v9404_v60 = vpop.permute.xlu0 %482 }
 0x124   : > { %18646 = vst [vmem:[#allocation143_spill] sm:$0xff] %v9402_v59  ;;  %18647 = vst [vmem:[#allocation144_spill] sm:$0xff] %v9404_v60  ;;  %v9774_v60 = vld [vmem:[%s17959_s1 + $0x28] sm:$0xff]  }
 0x125   : > { %930 = vperm.xlu1 %8212, %v8783_v6   ;;  %933 = vperm.xlu0 %8211, %v8780_v5  }
 0x127   : > { %v9408_v0 = vpop.permute.xlu1 %491  ;;  %v9410_v4 = vpop.permute.xlu0 %488 }
 0x128   : > { %18648 = vst [vmem:[#allocation145_spill] sm:$0xff] %v9408_v0  ;;  %18649 = vst [vmem:[#allocation146_spill] sm:$0xff] %v9410_v4  ;;  %v9757_v0 = vld [vmem:[%s17959_s1 + $0x20] sm:$0xff]  }
 0x129   : > { %936 = vperm.xlu1 %8212, %v8791_v8   ;;  %939 = vperm.xlu0 %8211, %v8788_v7  }
 0x12b   : > { %v9414_v2 = vpop.permute.xlu1 %497  ;;  %v9416_v1 = vpop.permute.xlu0 %494 }
 0x12c   : > { %18650 = vst [vmem:[#allocation147_spill] sm:$0xff] %v9414_v2  ;;  %18651 = vst [vmem:[#allocation148_spill] sm:$0xff] %v9416_v1 }
 0x12d   : > { %942 = vperm.xlu1 %8212, %v8799_v10   ;;  %945 = vperm.xlu0 %8211, %v8796_v9  }
 0x12f   : > { %v9420_v3 = vpop.permute.xlu1 %503  ;;  %v9422_v6 = vpop.permute.xlu0 %500 }
 0x130   : > { %18652 = vst [vmem:[#allocation149_spill] sm:$0xff] %v9420_v3  ;;  %18653 = vst [vmem:[#allocation150_spill] sm:$0xff] %v9422_v6  ;;  %v9740_v6 = vld [vmem:[%s17959_s1 + $0x18] sm:$0xff]  }
 0x131   : > { %948 = vperm.xlu1 %8212, %v8807_v12   ;;  %951 = vperm.xlu0 %8211, %v8804_v11  }
 0x133   : > { %v9426_v5 = vpop.permute.xlu1 %509  ;;  %v9428_v8 = vpop.permute.xlu0 %506 }
 0x134   : > { %18654 = vst [vmem:[#allocation151_spill] sm:$0xff] %v9426_v5  ;;  %18655 = vst [vmem:[#allocation152_spill] sm:$0xff] %v9428_v8  ;;  %v9723_v5 = vld [vmem:[%s17959_s1 + $0x10] sm:$0xff]  }
 0x135   : > { %954 = vperm.xlu1 %8212, %v8815_v14   ;;  %957 = vperm.xlu0 %8211, %v8812_v13  }
 0x137   : > { %v9432_v7 = vpop.permute.xlu1 %515  ;;  %v9434_v10 = vpop.permute.xlu0 %512 }
 0x138   : > { %18656 = vst [vmem:[#allocation153_spill] sm:$0xff] %v9432_v7  ;;  %18657 = vst [vmem:[#allocation154_spill] sm:$0xff] %v9434_v10  ;;  %v8383_v10 = vld [vmem:[%s17959_s1 + $0x90] sm:$0xff]  }
 0x139   : > { %960 = vperm.xlu1 %8212, %v8823_v16   ;;  %963 = vperm.xlu0 %8211, %v8820_v15  }
 0x13b   : > { %v9438_v9 = vpop.permute.xlu1 %521  ;;  %v9440_v12 = vpop.permute.xlu0 %518 }
 0x13c   : > { %18658 = vst [vmem:[#allocation155_spill] sm:$0xff] %v9438_v9  ;;  %18659 = vst [vmem:[#allocation156_spill] sm:$0xff] %v9440_v12  ;;  %v8381_v9 = vld [vmem:[%s17959_s1 + $0x88] sm:$0xff]  }
 0x13d   : > { %966 = vperm.xlu1 %8212, %v8829_v18   ;;  %969 = vperm.xlu0 %8211, %v8826_v17   ;;  %v9707_v12 = vld [vmem:[%s17959_s1 + $0x8] sm:$0xff]  }
 0x13f   : > { %v9444_v11 = vpop.permute.xlu1 %527  ;;  %v9446_v14 = vpop.permute.xlu0 %524 }
 0x140   : > { %18660 = vst [vmem:[#allocation157_spill] sm:$0xff] %v9444_v11  ;;  %18661 = vst [vmem:[#allocation158_spill] sm:$0xff] %v9446_v14  ;;  %v18765_v11 = vld [vmem:[#allocation81_spill] sm:$0xff]  ;;  %v18768_v14 = vld [vmem:[#allocation86_spill] sm:$0xff] }
 0x141   : > { %972 = vperm.xlu1 %8212, %v8837_v20   ;;  %975 = vperm.xlu0 %8211, %v8834_v19  }
 0x143   : > { %v9450_v13 = vpop.permute.xlu1 %533  ;;  %v9452_v16 = vpop.permute.xlu0 %530 }
 0x144   : > { %18662 = vst [vmem:[#allocation159_spill] sm:$0xff] %v9450_v13  ;;  %18663 = vst [vmem:[#allocation160_spill] sm:$0xff] %v9452_v16  ;;  %v18761_v13 = vld [vmem:[#allocation77_spill] sm:$0xff] }
 0x145   : > { %978 = vperm.xlu1 %8212, %v8845_v22   ;;  %981 = vperm.xlu0 %8211, %v8842_v21  }
 0x147   : > { %v9456_v15 = vpop.permute.xlu1 %539  ;;  %v9458_v18 = vpop.permute.xlu0 %536 }
 0x148   : > { %18664 = vst [vmem:[#allocation161_spill] sm:$0xff] %v9456_v15  ;;  %18665 = vst [vmem:[#allocation162_spill] sm:$0xff] %v9458_v18  ;;  %v18757_v15 = vld [vmem:[#allocation73_spill] sm:$0xff] }
 0x149   : > { %984 = vperm.xlu1 %8212, %v8853_v24   ;;  %987 = vperm.xlu0 %8211, %v8850_v23  }
 0x14b   : > { %v9462_v17 = vpop.permute.xlu1 %545  ;;  %v9464_v20 = vpop.permute.xlu0 %542 }
 0x14c   : > { %18666 = vst [vmem:[#allocation163_spill] sm:$0xff] %v9462_v17  ;;  %18667 = vst [vmem:[#allocation164_spill] sm:$0xff] %v9464_v20  ;;  %v18753_v17 = vld [vmem:[#allocation69_spill] sm:$0xff] }
 0x14d   : > { %990 = vperm.xlu1 %8212, %v8861_v26   ;;  %993 = vperm.xlu0 %8211, %v8858_v25  }
 0x14f   : > { %v9468_v19 = vpop.permute.xlu1 %551  ;;  %v9470_v22 = vpop.permute.xlu0 %548 }
 0x150   : > { %18668 = vst [vmem:[#allocation165_spill] sm:$0xff] %v9468_v19  ;;  %18669 = vst [vmem:[#allocation166_spill] sm:$0xff] %v9470_v22  ;;  %v18749_v19 = vld [vmem:[#allocation65_spill] sm:$0xff] }
 0x151   : > { %996 = vperm.xlu1 %8212, %v8869_v28   ;;  %999 = vperm.xlu0 %8211, %v8866_v27  }
 0x153   : > { %v9474_v21 = vpop.permute.xlu1 %557  ;;  %v9476_v24 = vpop.permute.xlu0 %554 }
 0x154   : > { %18670 = vst [vmem:[#allocation167_spill] sm:$0xff] %v9474_v21  ;;  %18671 = vst [vmem:[#allocation168_spill] sm:$0xff] %v9476_v24  ;;  %v18745_v21 = vld [vmem:[#allocation61_spill] sm:$0xff] }
 0x155   : > { %1002 = vperm.xlu1 %8212, %v8877_v30   ;;  %1005 = vperm.xlu0 %8211, %v8874_v29  }
 0x157   : > { %v9480_v23 = vpop.permute.xlu1 %563  ;;  %v9482_v26 = vpop.permute.xlu0 %560 }
 0x158   : > { %18672 = vst [vmem:[#allocation169_spill] sm:$0xff] %v9480_v23  ;;  %18673 = vst [vmem:[#allocation170_spill] sm:$0xff] %v9482_v26  ;;  %v18741_v23 = vld [vmem:[#allocation57_spill] sm:$0xff] }
 0x159   : > { %1008 = vperm.xlu1 %8212, %v8887_v32   ;;  %1011 = vperm.xlu0 %8211, %v8884_v31  }
 0x15b   : > { %v9486_v25 = vpop.permute.xlu1 %569  ;;  %v9488_v28 = vpop.permute.xlu0 %566 }
 0x15c   : > { %18674 = vst [vmem:[#allocation171_spill] sm:$0xff] %v9486_v25  ;;  %18675 = vst [vmem:[#allocation172_spill] sm:$0xff] %v9488_v28  ;;  %v18737_v25 = vld [vmem:[#allocation53_spill] sm:$0xff] }
 0x15d   : > { %1014 = vperm.xlu1 %8212, %v8895_v34   ;;  %1017 = vperm.xlu0 %8211, %v8892_v33  }
 0x15f   : > { %v9492_v27 = vpop.permute.xlu1 %575  ;;  %v9494_v30 = vpop.permute.xlu0 %572 }
 0x160   : > { %18676 = vst [vmem:[#allocation173_spill] sm:$0xff] %v9492_v27  ;;  %18677 = vst [vmem:[#allocation174_spill] sm:$0xff] %v9494_v30  ;;  %v18735_v27 = vld [vmem:[#allocation49_spill] sm:$0xff] }
 0x161   : > { %1020 = vperm.xlu1 %8212, %v8903_v36   ;;  %1023 = vperm.xlu0 %8211, %v8900_v35  }
 0x163   : > { %v9498_v29 = vpop.permute.xlu1 %581  ;;  %v9500_v32 = vpop.permute.xlu0 %578 }
 0x164   : > { %18678 = vst [vmem:[#allocation175_spill] sm:$0xff] %v9498_v29  ;;  %18679 = vst [vmem:[#allocation176_spill] sm:$0xff] %v9500_v32  ;;  %v18733_v29 = vld [vmem:[#allocation45_spill] sm:$0xff] }
 0x165   : > { %1026 = vperm.xlu1 %8212, %v8911_v38   ;;  %1029 = vperm.xlu0 %8211, %v8908_v37  }
 0x167   : > { %v9504_v31 = vpop.permute.xlu1 %587  ;;  %v9506_v34 = vpop.permute.xlu0 %584 }
 0x168   : > { %18680 = vst [vmem:[#allocation177_spill] sm:$0xff] %v9504_v31  ;;  %18681 = vst [vmem:[#allocation178_spill] sm:$0xff] %v9506_v34  ;;  %v18731_v31 = vld [vmem:[#allocation41_spill] sm:$0xff] }
 0x169   : > { %1032 = vperm.xlu1 %8212, %v8919_v40   ;;  %1035 = vperm.xlu0 %8211, %v8916_v39  }
 0x16b   : > { %v9510_v33 = vpop.permute.xlu1 %593  ;;  %v9512_v36 = vpop.permute.xlu0 %590 }
 0x16c   : > { %18682 = vst [vmem:[#allocation179_spill] sm:$0xff] %v9510_v33  ;;  %18683 = vst [vmem:[#allocation180_spill] sm:$0xff] %v9512_v36  ;;  %v18729_v33 = vld [vmem:[#allocation37_spill] sm:$0xff] }
 0x16d   : > { %1038 = vperm.xlu1 %8212, %v8927_v42   ;;  %1041 = vperm.xlu0 %8211, %v8924_v41  }
 0x16f   : > { %v9516_v35 = vpop.permute.xlu1 %599  ;;  %v9518_v38 = vpop.permute.xlu0 %596 }
 0x170   : > { %18684 = vst [vmem:[#allocation181_spill] sm:$0xff] %v9516_v35  ;;  %18685 = vst [vmem:[#allocation182_spill] sm:$0xff] %v9518_v38  ;;  %v18727_v35 = vld [vmem:[#allocation33_spill] sm:$0xff] }
 0x171   : > { %1044 = vperm.xlu1 %8212, %v8935_v44   ;;  %1047 = vperm.xlu0 %8211, %v8932_v43  }
 0x173   : > { %v9522_v37 = vpop.permute.xlu1 %605  ;;  %v9524_v40 = vpop.permute.xlu0 %602 }
 0x174   : > { %18686 = vst [vmem:[#allocation183_spill] sm:$0xff] %v9522_v37  ;;  %18687 = vst [vmem:[#allocation184_spill] sm:$0xff] %v9524_v40  ;;  %v18725_v37 = vld [vmem:[#allocation29_spill] sm:$0xff] }
 0x175   : > { %1050 = vperm.xlu1 %8212, %v8943_v46   ;;  %1053 = vperm.xlu0 %8211, %v8940_v45  }
 0x177   : > { %v9528_v39 = vpop.permute.xlu1 %611  ;;  %v9530_v42 = vpop.permute.xlu0 %608 }
 0x178   : > { %18688 = vst [vmem:[#allocation185_spill] sm:$0xff] %v9528_v39  ;;  %18689 = vst [vmem:[#allocation186_spill] sm:$0xff] %v9530_v42  ;;  %v18723_v39 = vld [vmem:[#allocation25_spill] sm:$0xff] }
 0x179   : > { %1056 = vperm.xlu1 %8212, %v8951_v48   ;;  %1059 = vperm.xlu0 %8211, %v8948_v47   ;;  %v18696_v47 = vld [vmem:[#allocation6_spill] sm:$0xff] }
 0x17b   : > { %v9534_v41 = vpop.permute.xlu1 %617  ;;  %v9536_v44 = vpop.permute.xlu0 %614 }
 0x17c   : > { %18690 = vst [vmem:[#allocation187_spill] sm:$0xff] %v9534_v41  ;;  %18691 = vst [vmem:[#allocation188_spill] sm:$0xff] %v9536_v44  ;;  %v18697_v41 = vld [vmem:[#allocation5_spill] sm:$0xff] }
 0x17d   : > { %1062 = vperm.xlu1 %8212, %v8959_v50   ;;  %1065 = vperm.xlu0 %8211, %v8956_v49   ;;  %v18700_v49 = vld [vmem:[#allocation8_spill] sm:$0xff] }
 0x17f   : > { %v9540_v43 = vpop.permute.xlu1 %623  ;;  %v9542_v46 = vpop.permute.xlu0 %620 }
 0x180   : > { %18692 = vst [vmem:[#allocation189_spill] sm:$0xff] %v9540_v43  ;;  %18693 = vst [vmem:[#allocation190_spill] sm:$0xff] %v9542_v46  ;;  %v18701_v43 = vld [vmem:[#allocation7_spill] sm:$0xff] }
 0x181   : > { %1068 = vperm.xlu1 %8212, %v8967_v52   ;;  %1071 = vperm.xlu0 %8211, %v8964_v51   ;;  %v18704_v51 = vld [vmem:[#allocation10_spill] sm:$0xff] }
 0x183   : > { %v9546_v45 = vpop.permute.xlu1 %629  ;;  %v9548_v48 = vpop.permute.xlu0 %626 }
 0x184   : > { %18694 = vst [vmem:[#allocation191_spill] sm:$0xff] %v9546_v45  ;;  %18695 = vst [vmem:[#allocation192_spill] sm:$0xff] %v9548_v48  ;;  %v18705_v45 = vld [vmem:[#allocation9_spill] sm:$0xff] }
 0x185   : > { %1074 = vperm.xlu1 %8212, %v18696_v47   ;;  %1077 = vperm.xlu0 %8211, %v18697_v41   ;;  %v18708_v41 = vld [vmem:[#allocation12_spill] sm:$0xff] }
 0x187   : > { %v9552_v44 = vpop.permute.xlu1 %635  ;;  %v9554_v50 = vpop.permute.xlu0 %632 }
 0x188   : > { %18698 = vst [vmem:[#allocation6_spill] sm:$0xff] %v9552_v44  ;;  %18699 = vst [vmem:[#allocation5_spill] sm:$0xff] %v9554_v50  ;;  %v18709_v44 = vld [vmem:[#allocation11_spill] sm:$0xff] }
 0x189   : > { %1080 = vperm.xlu1 %8212, %v18700_v49   ;;  %1083 = vperm.xlu0 %8211, %v18701_v43   ;;  %v18712_v43 = vld [vmem:[#allocation14_spill] sm:$0xff] }
 0x18b   : > { %v9558_v46 = vpop.permute.xlu1 %641  ;;  %v9560_v52 = vpop.permute.xlu0 %638 }
 0x18c   : > { %18702 = vst [vmem:[#allocation8_spill] sm:$0xff] %v9558_v46  ;;  %18703 = vst [vmem:[#allocation7_spill] sm:$0xff] %v9560_v52  ;;  %v18713_v46 = vld [vmem:[#allocation13_spill] sm:$0xff] }
 0x18d   : > { %1086 = vperm.xlu1 %8212, %v18704_v51   ;;  %1089 = vperm.xlu0 %8211, %v18705_v45   ;;  %v18716_v45 = vld [vmem:[#allocation16_spill] sm:$0xff] }
 0x18f   : > { %v9564_v48 = vpop.permute.xlu1 %647  ;;  %v9566_v47 = vpop.permute.xlu0 %644 }
 0x190   : > { %18706 = vst [vmem:[#allocation10_spill] sm:$0xff] %v9564_v48  ;;  %18707 = vst [vmem:[#allocation9_spill] sm:$0xff] %v9566_v47  ;;  %v18717_v48 = vld [vmem:[#allocation15_spill] sm:$0xff] }
 0x191   : > { %1092 = vperm.xlu1 %8212, %v18708_v41   ;;  %1095 = vperm.xlu0 %8211, %v18709_v44   ;;  %v18718_v44 = vld [vmem:[#allocation18_spill] sm:$0xff] }
 0x193   : > { %v9570_v50 = vpop.permute.xlu1 %653  ;;  %v9572_v49 = vpop.permute.xlu0 %650 }
 0x194   : > { %18710 = vst [vmem:[#allocation12_spill] sm:$0xff] %v9570_v50  ;;  %18711 = vst [vmem:[#allocation11_spill] sm:$0xff] %v9572_v49  ;;  %v18719_v50 = vld [vmem:[#allocation17_spill] sm:$0xff] }
 0x195   : > { %1098 = vperm.xlu1 %8212, %v18712_v43   ;;  %1101 = vperm.xlu0 %8211, %v18713_v46   ;;  %v18720_v46 = vld [vmem:[#allocation22_spill] sm:$0xff] }
 0x197   : > { %v9576_v52 = vpop.permute.xlu1 %659  ;;  %v9578_v51 = vpop.permute.xlu0 %656 }
 0x198   : > { %18714 = vst [vmem:[#allocation14_spill] sm:$0xff] %v9576_v52  ;;  %18715 = vst [vmem:[#allocation13_spill] sm:$0xff] %v9578_v51  ;;  %v18721_v52 = vld [vmem:[#allocation21_spill] sm:$0xff] }
 0x199   : > { %1104 = vperm.xlu1 %8212, %v18716_v45   ;;  %1107 = vperm.xlu0 %8211, %v18717_v48   ;;  %v18722_v48 = vld [vmem:[#allocation26_spill] sm:$0xff] }
 0x19c   : > { %v9582_v47 = vpop.permute.xlu1 %921  ;;  %v9584_v41 = vpop.permute.xlu0 %918 }
 0x19d   : > { %1110 = vperm.xlu1 %8212, %v18718_v44   ;;  %1113 = vperm.xlu0 %8211, %v18719_v50   ;;  %v18724_v50 = vld [vmem:[#allocation30_spill] sm:$0xff] }
 0x1a0   : > { %v9588_v49 = vpop.permute.xlu1 %924  ;;  %v9590_v43 = vpop.permute.xlu0 %927 }
 0x1a1   : > { %1116 = vperm.xlu1 %8212, %v18720_v46   ;;  %1119 = vperm.xlu0 %8211, %v18721_v52   ;;  %v18726_v52 = vld [vmem:[#allocation34_spill] sm:$0xff] }
 0x1a4   : > { %v9594_v51 = vpop.permute.xlu1 %930  ;;  %v9596_v45 = vpop.permute.xlu0 %933 }
 0x1a5   : > { %1122 = vperm.xlu1 %8212, %v18722_v48   ;;  %1125 = vperm.xlu0 %8211, %v18723_v39   ;;  %v18728_v39 = vld [vmem:[#allocation38_spill] sm:$0xff] }
 0x1a8   : > { %v9600_v42 = vpop.permute.xlu1 %936  ;;  %v9602_v44 = vpop.permute.xlu0 %939 }
 0x1a9   : > { %1128 = vperm.xlu1 %8212, %v18724_v50   ;;  %1131 = vperm.xlu0 %8211, %v18725_v37   ;;  %v18730_v37 = vld [vmem:[#allocation42_spill] sm:$0xff] }
 0x1ac   : > { %v9606_v40 = vpop.permute.xlu1 %942  ;;  %v9608_v46 = vpop.permute.xlu0 %945 }
 0x1ad   : > { %1134 = vperm.xlu1 %8212, %v18726_v52   ;;  %1137 = vperm.xlu0 %8211, %v18727_v35   ;;  %v18732_v35 = vld [vmem:[#allocation46_spill] sm:$0xff] }
 0x1b0   : > { %v9612_v38 = vpop.permute.xlu1 %948  ;;  %v9614_v48 = vpop.permute.xlu0 %951 }
 0x1b1   : > { %1140 = vperm.xlu1 %8212, %v18728_v39   ;;  %1143 = vperm.xlu0 %8211, %v18729_v33   ;;  %v18734_v33 = vld [vmem:[#allocation50_spill] sm:$0xff] }
 0x1b4   : > { %v9618_v36 = vpop.permute.xlu1 %954  ;;  %v9620_v50 = vpop.permute.xlu0 %957 }
 0x1b5   : > { %1146 = vperm.xlu1 %8212, %v18730_v37   ;;  %1149 = vperm.xlu0 %8211, %v18731_v31   ;;  %v18736_v31 = vld [vmem:[#allocation54_spill] sm:$0xff] }
 0x1b8   : > { %v9624_v34 = vpop.permute.xlu1 %960  ;;  %v9626_v52 = vpop.permute.xlu0 %963 }
 0x1b9   : > { %1152 = vperm.xlu1 %8212, %v18732_v35   ;;  %1155 = vperm.xlu0 %8211, %v18733_v29   ;;  %v18740_v29 = vld [vmem:[#allocation58_spill] sm:$0xff] }
 0x1bc   : > { %v9630_v32 = vpop.permute.xlu1 %966  ;;  %v9632_v39 = vpop.permute.xlu0 %969 }
 0x1bd   : > { %1158 = vperm.xlu1 %8212, %v18734_v33   ;;  %1161 = vperm.xlu0 %8211, %v18735_v27   ;;  %v18744_v27 = vld [vmem:[#allocation62_spill] sm:$0xff] }
 0x1c0   : > { %v9636_v30 = vpop.permute.xlu1 %972  ;;  %v9638_v37 = vpop.permute.xlu0 %975 }
 0x1c1   : > { %1164 = vperm.xlu1 %8212, %v18736_v31   ;;  %1167 = vperm.xlu0 %8211, %v18737_v25   ;;  %v18748_v25 = vld [vmem:[#allocation66_spill] sm:$0xff] }
 0x1c4   : > { %v9642_v28 = vpop.permute.xlu1 %978  ;;  %v9644_v35 = vpop.permute.xlu0 %981 }
 0x1c5   : > { %18738 = vst [vmem:[#allocation16_spill] sm:$0xff] %v9642_v28  ;;  %18739 = vst [vmem:[#allocation15_spill] sm:$0xff] %v9644_v35  ;;  %1170 = vperm.xlu1 %8212, %v18740_v29   ;;  %1173 = vperm.xlu0 %8211, %v18741_v23   ;;  %v18752_v23 = vld [vmem:[#allocation70_spill] sm:$0xff]  ;;  %v8475_v28 = vld [vmem:[%s8761_s25 + $0x1b0] sm:$0xff] }
 0x1c8   : > { %v9648_v26 = vpop.permute.xlu1 %984  ;;  %v9650_v33 = vpop.permute.xlu0 %987 }
 0x1c9   : > { %18742 = vst [vmem:[#allocation18_spill] sm:$0xff] %v9648_v26  ;;  %18743 = vst [vmem:[#allocation17_spill] sm:$0xff] %v9650_v33  ;;  %1176 = vperm.xlu1 %8212, %v18744_v27   ;;  %1179 = vperm.xlu0 %8211, %v18745_v21   ;;  %v18756_v21 = vld [vmem:[#allocation74_spill] sm:$0xff]  ;;  %v18921_v33 = vmov 0 }
 0x1ca   : > { %v8469_v26 = vld [vmem:[%s8761_s25 + $0x188] sm:$0xff] }
 0x1cc   : > { %v9654_v24 = vpop.permute.xlu1 %990  ;;  %v9656_v31 = vpop.permute.xlu0 %993 }
 0x1cd   : > { %18746 = vst [vmem:[#allocation22_spill] sm:$0xff] %v9654_v24  ;;  %18747 = vst [vmem:[#allocation21_spill] sm:$0xff] %v9656_v31  ;;  %1182 = vperm.xlu1 %8212, %v18748_v25   ;;  %1185 = vperm.xlu0 %8211, %v18749_v19   ;;  %v18760_v19 = vld [vmem:[#allocation78_spill] sm:$0xff] }
 0x1d0   : > { %v9660_v22 = vpop.permute.xlu1 %996  ;;  %v9662_v29 = vpop.permute.xlu0 %999 }
 0x1d1   : > { %18750 = vst [vmem:[#allocation26_spill] sm:$0xff] %v9660_v22  ;;  %18751 = vst [vmem:[#allocation25_spill] sm:$0xff] %v9662_v29  ;;  %1188 = vperm.xlu1 %8212, %v18752_v23   ;;  %1191 = vperm.xlu0 %8211, %v18753_v17   ;;  %v18764_v17 = vld [vmem:[#allocation82_spill] sm:$0xff] }
 0x1d4   : > { %v9666_v20 = vpop.permute.xlu1 %1002  ;;  %v9668_v27 = vpop.permute.xlu0 %1005 }
 0x1d5   : > { %18754 = vst [vmem:[#allocation30_spill] sm:$0xff] %v9666_v20  ;;  %18755 = vst [vmem:[#allocation29_spill] sm:$0xff] %v9668_v27  ;;  %1194 = vperm.xlu1 %8212, %v18756_v21   ;;  %1197 = vperm.xlu0 %8211, %v18757_v15   ;;  %v8379_v15 = vld [vmem:[%s17959_s1 + $0x80] sm:$0xff]   ;;  %v10110_v27 = vld [vmem:[%s8761_s25 + $0xd0] sm:$0xff] }
 0x1d6   : > { %v9690_v21 = vld [vmem:[%s17959_s1] sm:$0xff]   ;;  %4407 = vmatpush1.bf16.msra.mxu1 %v8379_v15  ;;  %v10129_v20 = vld [vmem:[%s8761_s25 + $0xf0] sm:$0xff] }
 0x1d7   : > { %5048 = vmatpush1.bf16.msra.mxu0 %v9690_v21 }
 0x1d8   : > { %v9672_v18 = vpop.permute.xlu1 %1008  ;;  %v9674_v25 = vpop.permute.xlu0 %1011 }
 0x1d9   : > { %18758 = vst [vmem:[#allocation34_spill] sm:$0xff] %v9672_v18  ;;  %18759 = vst [vmem:[#allocation33_spill] sm:$0xff] %v9674_v25  ;;  %1200 = vperm.xlu1 %8212, %v18760_v19   ;;  %1203 = vperm.xlu0 %8211, %v18761_v13  }
 0x1dc   : > { %v9678_v16 = vpop.permute.xlu1 %1014  ;;  %v9680_v23 = vpop.permute.xlu0 %1017 }
 0x1dd   : > { %18762 = vst [vmem:[#allocation38_spill] sm:$0xff] %v9678_v16  ;;  %18763 = vst [vmem:[#allocation37_spill] sm:$0xff] %v9680_v23  ;;  %1206 = vperm.xlu1 %8212, %v18764_v17   ;;  %1209 = vperm.xlu0 %8211, %v18765_v11   ;;  %v18769_v17 = vld [vmem:[#allocation85_spill] sm:$0xff]  ;;  %v18770_v11 = vmov 0  }
 0x1de   : > { %4408 = vmatprep.subr.bf16.mxu1 %v18770_v11  ;;  %5049 = vmatprep.subr.bf16.mxu0 %v18770_v11 }
 0x1df   : > { %4409 = vmatpush1.bf16.msra.mxu1 %v8381_v9  ;;  %5050 = vmatpush1.bf16.msra.mxu0 %v9707_v12  ;;  %v18777_v9 = vld [vmem:[#allocation94_spill] sm:$0xff] }
 0x1e0   : > { %v9692_v19 = vpop.permute.xlu1 %1020  ;;  %v9694_v13 = vpop.permute.xlu0 %1023  ;;  %4410 = vmatprep.subr.bf16.mxu1 %v18770_v11  ;;  %5051 = vmatprep.subr.bf16.mxu0 %v18770_v11 }
 0x1e1   : > { %18766 = vst [vmem:[#allocation42_spill] sm:$0xff] %v9692_v19  ;;  %18767 = vst [vmem:[#allocation41_spill] sm:$0xff] %v9694_v13  ;;  %1212 = vperm.xlu1 %8212, %v18768_v14   ;;  %1215 = vperm.xlu0 %8211, %v18769_v17   ;;  %v18773_v14 = vld [vmem:[#allocation90_spill] sm:$0xff]  ;;  %v18774_v17 = vld [vmem:[#allocation89_spill] sm:$0xff] }
 0x1e2   : > { %v8435_v19 = vld [vmem:[%s8761_s25 + $0x40] sm:$0xff] }
 0x1e3   : > { %4411 = vmatpush1.bf16.msra.mxu1 %v8383_v10  ;;  %5052 = vmatpush1.bf16.msra.mxu0 %v9723_v5  ;;  %v18781_v10 = vld [vmem:[#allocation98_spill] sm:$0xff] }
 0x1e4   : > { %v9709_v15 = vpop.permute.xlu1 %1026  ;;  %v9711_v7 = vpop.permute.xlu0 %1029  ;;  %4412 = vmatprep.subr.bf16.mxu1 %v18770_v11  ;;  %5053 = vmatprep.subr.bf16.mxu0 %v18770_v11 }
 0x1e5   : > { %18771 = vst [vmem:[#allocation46_spill] sm:$0xff] %v9709_v15  ;;  %18772 = vst [vmem:[#allocation45_spill] sm:$0xff] %v9711_v7  ;;  %1218 = vperm.xlu1 %8212, %v18773_v14   ;;  %1221 = vperm.xlu0 %8211, %v18774_v17   ;;  %v18778_v14 = vld [vmem:[#allocation93_spill] sm:$0xff]  ;;  %v8385_v17 = vld [vmem:[%s17959_s1 + $0x98] sm:$0xff]  }
 0x1e7   : > { %4413 = vmatpush1.bf16.msra.mxu1 %v8385_v17  ;;  %5054 = vmatpush1.bf16.msra.mxu0 %v9740_v6  ;;  %v18785_v17 = vld [vmem:[#allocation102_spill] sm:$0xff] }
 0x1e8   : > { %v9725_v8 = vpop.permute.xlu1 %1032  ;;  %v9727_v3 = vpop.permute.xlu0 %1035  ;;  %4414 = vmatprep.subr.bf16.mxu1 %v18770_v11  ;;  %5055 = vmatprep.subr.bf16.mxu0 %v18770_v11 }
 0x1e9   : > { %18775 = vst [vmem:[#allocation50_spill] sm:$0xff] %v9725_v8  ;;  %18776 = vst [vmem:[#allocation49_spill] sm:$0xff] %v9727_v3  ;;  %1224 = vperm.xlu1 %8212, %v18777_v9   ;;  %1227 = vperm.xlu0 %8211, %v18778_v14   ;;  %v18782_v9 = vld [vmem:[#allocation97_spill] sm:$0xff]  ;;  %v8432_v8 = vld [vmem:[%s8761_s25 + $0x28] sm:$0xff] }
 0x1ea   : > { %v8387_v14 = vld [vmem:[%s17959_s1 + $0xa0] sm:$0xff]  }
 0x1eb   : > { %4415 = vmatpush1.bf16.msra.mxu1 %v8387_v14  ;;  %5056 = vmatpush1.bf16.msra.mxu0 %v9757_v0  ;;  %v18789_v14 = vld [vmem:[#allocation106_spill] sm:$0xff] }
 0x1ec   : > { %v9742_v2 = vpop.permute.xlu1 %1038  ;;  %v9744_v1 = vpop.permute.xlu0 %1041  ;;  %4416 = vmatprep.subr.bf16.mxu1 %v18770_v11  ;;  %5057 = vmatprep.subr.bf16.mxu0 %v18770_v11 }
 0x1ed   : > { %18779 = vst [vmem:[#allocation54_spill] sm:$0xff] %v9742_v2  ;;  %18780 = vst [vmem:[#allocation53_spill] sm:$0xff] %v9744_v1  ;;  %1230 = vperm.xlu1 %8212, %v18781_v10   ;;  %1233 = vperm.xlu0 %8211, %v18782_v9   ;;  %v18786_v10 = vld [vmem:[#allocation101_spill] sm:$0xff]  ;;  %v8389_v9 = vld [vmem:[%s17959_s1 + $0xa8] sm:$0xff]  }
 0x1ee   : > { %v8409_v1 = vld [vmem:[%s17959_s1 + $0xf8] sm:$0xff]  }
 0x1ef   : > { %4417 = vmatpush1.bf16.msra.mxu1 %v8389_v9  ;;  %5058 = vmatpush1.bf16.msra.mxu0 %v9774_v60  ;;  %v18793_v9 = vld [vmem:[#allocation110_spill] sm:$0xff] }
 0x1f0   : > { %v9759_v4 = vpop.permute.xlu1 %1044  ;;  %v9761_v59 = vpop.permute.xlu0 %1047  ;;  %4418 = vmatprep.subr.bf16.mxu1 %v18770_v11  ;;  %5059 = vmatprep.subr.bf16.mxu0 %v18770_v11 }
 0x1f1   : > { %18783 = vst [vmem:[#allocation58_spill] sm:$0xff] %v9759_v4  ;;  %18784 = vst [vmem:[#allocation57_spill] sm:$0xff] %v9761_v59  ;;  %1236 = vperm.xlu1 %8212, %v18785_v17   ;;  %1239 = vperm.xlu0 %8211, %v18786_v10   ;;  %v18790_v17 = vld [vmem:[#allocation105_spill] sm:$0xff]  ;;  %v8391_v10 = vld [vmem:[%s17959_s1 + $0xb0] sm:$0xff]  }
 0x1f3   : > { %4419 = vmatpush1.bf16.msra.mxu1 %v8391_v10  ;;  %5060 = vmatpush1.bf16.msra.mxu0 %v9791_v62  ;;  %v18797_v10 = vld [vmem:[#allocation114_spill] sm:$0xff] }
 0x1f4   : > { %v9776_v55 = vpop.permute.xlu1 %1050  ;;  %v9778_v57 = vpop.permute.xlu0 %1053  ;;  %4420 = vmatprep.subr.bf16.mxu1 %v18770_v11  ;;  %5061 = vmatprep.subr.bf16.mxu0 %v18770_v11 }
 0x1f5   : > { %18787 = vst [vmem:[#allocation62_spill] sm:$0xff] %v9776_v55  ;;  %18788 = vst [vmem:[#allocation61_spill] sm:$0xff] %v9778_v57  ;;  %1242 = vperm.xlu1 %8212, %v18789_v14   ;;  %1245 = vperm.xlu0 %8211, %v18790_v17   ;;  %v18794_v14 = vld [vmem:[#allocation109_spill] sm:$0xff]  ;;  %v8393_v17 = vld [vmem:[%s17959_s1 + $0xb8] sm:$0xff]  }
 0x1f7   : > { %4421 = vmatpush1.bf16.msra.mxu1 %v8393_v17  ;;  %5062 = vmatpush1.bf16.msra.mxu0 %v9808_v54  ;;  %v18801_v17 = vld [vmem:[#allocation118_spill] sm:$0xff] }
 0x1f8   : > { %v9793_v63 = vpop.permute.xlu1 %1056  ;;  %v9795_v53 = vpop.permute.xlu0 %1059  ;;  %4422 = vmatprep.subr.bf16.mxu1 %v18770_v11  ;;  %5063 = vmatprep.subr.bf16.mxu0 %v18770_v11 }
 0x1f9   : > { %18791 = vst [vmem:[#allocation66_spill] sm:$0xff] %v9793_v63  ;;  %18792 = vst [vmem:[#allocation65_spill] sm:$0xff] %v9795_v53  ;;  %1248 = vperm.xlu1 %8212, %v18793_v9   ;;  %1251 = vperm.xlu0 %8211, %v18794_v14   ;;  %v18798_v9 = vld [vmem:[#allocation113_spill] sm:$0xff]  ;;  %v8399_v63 = vld [vmem:[%s17959_s1 + $0xd0] sm:$0xff]  }
 0x1fc   : > { %v9810_v56 = vpop.permute.xlu1 %1062  ;;  %v9812_v61 = vpop.permute.xlu0 %1065 }
 0x1fd   : > { %18795 = vst [vmem:[#allocation70_spill] sm:$0xff] %v9810_v56  ;;  %18796 = vst [vmem:[#allocation69_spill] sm:$0xff] %v9812_v61  ;;  %1254 = vperm.xlu1 %8212, %v18797_v10   ;;  %1257 = vperm.xlu0 %8211, %v18798_v9   ;;  %v8395_v61 = vld [vmem:[%s17959_s1 + $0xc0] sm:$0xff]   ;;  %v8397_v56 = vld [vmem:[%s17959_s1 + $0xc8] sm:$0xff]  }
 0x1fe   : > { %v9830_v10 = vld [vmem:[%s17959_s1 + $0x40] sm:$0xff]   ;;  %4423 = vmatpush1.bf16.msra.mxu1 %v8395_v61  ;;  %v18805_v61 = vld [vmem:[#allocation122_spill] sm:$0xff] }
 0x1ff   : > { %v18802_v9 = vld [vmem:[#allocation117_spill] sm:$0xff]  ;;  %5064 = vmatpush1.bf16.msra.mxu0 %v9830_v10  ;;  %4424 = vmatprep.subr.bf16.mxu1 %v18770_v11 }
 0x200   : > { %v9819_v14 = vpop.permute.xlu1 %1068  ;;  %v9821_v53 = vpop.permute.xlu0 %1071  ;;  %5065 = vmatprep.subr.bf16.mxu0 %v18770_v11 }
 0x201   : > { %18799 = vst [vmem:[#allocation74_spill] sm:$0xff] %v9819_v14  ;;  %18800 = vst [vmem:[#allocation73_spill] sm:$0xff] %v9821_v53  ;;  %1260 = vperm.xlu1 %8212, %v18801_v17   ;;  %1263 = vperm.xlu0 %8211, %v18802_v9   ;;  %v9847_v17 = vld [vmem:[%s17959_s1 + $0x48] sm:$0xff]   ;;  %v18806_v9 = vld [vmem:[#allocation121_spill] sm:$0xff] }
 0x202   : > { %4425 = vmatpush1.bf16.msra.mxu1 %v8397_v56  ;;  %v18809_v56 = vld [vmem:[#allocation126_spill] sm:$0xff] }
 0x203   : > { %5066 = vmatpush1.bf16.msra.mxu0 %v9847_v17  ;;  %4426 = vmatprep.subr.bf16.mxu1 %v18770_v11 }
 0x204   : > { %v9836_v53 = vpop.permute.xlu1 %1074  ;;  %v9838_v14 = vpop.permute.xlu0 %1077  ;;  %5067 = vmatprep.subr.bf16.mxu0 %v18770_v11 }
 0x205   : > { %18803 = vst [vmem:[#allocation78_spill] sm:$0xff] %v9836_v53  ;;  %18804 = vst [vmem:[#allocation77_spill] sm:$0xff] %v9838_v14  ;;  %1266 = vperm.xlu1 %8212, %v18805_v61   ;;  %1269 = vperm.xlu0 %8211, %v18806_v9   ;;  %v9864_v61 = vld [vmem:[%s17959_s1 + $0x50] sm:$0xff]   ;;  %v18810_v9 = vld [vmem:[#allocation125_spill] sm:$0xff] }
 0x206   : > { %4427 = vmatpush1.bf16.msra.mxu1 %v8399_v63  ;;  %v18813_v63 = vld [vmem:[#allocation130_spill] sm:$0xff] }
 0x207   : > { %5068 = vmatpush1.bf16.msra.mxu0 %v9864_v61  ;;  %4428 = vmatprep.subr.bf16.mxu1 %v18770_v11 }
 0x208   : > { %v9853_v14 = vpop.permute.xlu1 %1080  ;;  %v9855_v53 = vpop.permute.xlu0 %1083  ;;  %5069 = vmatprep.subr.bf16.mxu0 %v18770_v11 }
 0x209   : > { %18807 = vst [vmem:[#allocation82_spill] sm:$0xff] %v9853_v14  ;;  %18808 = vst [vmem:[#allocation81_spill] sm:$0xff] %v9855_v53  ;;  %1272 = vperm.xlu1 %8212, %v18809_v56   ;;  %1275 = vperm.xlu0 %8211, %v18810_v9   ;;  %v8401_v53 = vld [vmem:[%s17959_s1 + $0xd8] sm:$0xff]   ;;  %v18814_v56 = vld [vmem:[#allocation129_spill] sm:$0xff] }
 0x20a   : > { %v9876_v14 = vld [vmem:[%s17959_s1 + $0x58] sm:$0xff]   ;;  %4429 = vmatpush1.bf16.msra.mxu1 %v8401_v53  ;;  %v8403_v9 = vld [vmem:[%s17959_s1 + $0xe0] sm:$0xff]   ;;  %v18180_v53 = vmov 3  }
 0x20b   : > { %5070 = vmatpush1.bf16.msra.mxu0 %v9876_v14  ;;  %4430 = vmatprep.subr.bf16.mxu1 %v18770_v11 }
 0x20c   : > { %v9878_v57 = vpop.permute.xlu1 %1086  ;;  %v9880_v55 = vpop.permute.xlu0 %1089  ;;  %5071 = vmatprep.subr.bf16.mxu0 %v18770_v11 }
 0x20d   : > { %18811 = vst [vmem:[#allocation86_spill] sm:$0xff] %v9878_v57  ;;  %18812 = vst [vmem:[#allocation85_spill] sm:$0xff] %v9880_v55  ;;  %1278 = vperm.xlu1 %8212, %v18813_v63   ;;  %1281 = vperm.xlu0 %8211, %v18814_v56   ;;  %v9893_v55 = vld [vmem:[%s17959_s1 + $0x60] sm:$0xff]   ;;  %v8427_v63 = vld [vmem:[%s8761_s25 + $0x8] sm:$0xff] }
 0x20e   : > { %4431 = vmatpush1.bf16.msra.mxu1 %v8403_v9  ;;  %v8405_v56 = vld [vmem:[%s17959_s1 + $0xe8] sm:$0xff]   ;;  %v18185_v9 = vmov 2  }
 0x20f   : > { %5072 = vmatpush1.bf16.msra.mxu0 %v9893_v55  ;;  %4432 = vmatprep.subr.bf16.mxu1 %v18770_v11 }
 0x210   : > { %v9895_v57 = vpop.permute.xlu1 %1092  ;;  %v9897_v59 = vpop.permute.xlu0 %1095  ;;  %5073 = vmatprep.subr.bf16.mxu0 %v18770_v11 }
 0x211   : > { %18815 = vst [vmem:[#allocation90_spill] sm:$0xff] %v9895_v57  ;;  %18816 = vst [vmem:[#allocation89_spill] sm:$0xff] %v9897_v59  ;;  %1284 = vperm.xlu1 %8212, %v9369_v58   ;;  %8215 = vset.pattern.permute.xlu0 %v18180_v53  ;;  %v9910_v59 = vld [vmem:[%s17959_s1 + $0x68] sm:$0xff]   ;;  %v8428_v53 = vld [vmem:[%s8761_s25] sm:$0xff] }
 0x212   : > { %2713 = vperm.xlu0 %8215, %v8427_v63   ;;  %4433 = vmatpush1.bf16.msra.mxu1 %v8405_v56  ;;  %v18821_v56 = vmov 3  }
 0x213   : > { %5074 = vmatpush1.bf16.msra.mxu0 %v9910_v59  ;;  %4434 = vmatprep.subr.bf16.mxu1 %v18770_v11 }
 0x214   : > { %v9912_v57 = vpop.permute.xlu1 %1098  ;;  %v9914_v58 = vpop.permute.xlu0 %1101  ;;  %5075 = vmatprep.subr.bf16.mxu0 %v18770_v11 }
 0x215   : > { %18817 = vst [vmem:[#allocation94_spill] sm:$0xff] %v9912_v57  ;;  %18818 = vst [vmem:[#allocation93_spill] sm:$0xff] %v9914_v58  ;;  %8213 = vset.pattern.permute.xlu1 %v18185_v9  ;;  %v8407_v58 = vld [vmem:[%s17959_s1 + $0xf0] sm:$0xff]  }
 0x216   : > { %1817 = vperm.xlu1 %8213, %v8427_v63   ;;  %8216 = vset.pattern.permute.xlu0 %v18185_v9  ;;  %v9934_v63 = vld [vmem:[%s17959_s1 + $0x70] sm:$0xff]   ;;  %v8429_v9 = vld [vmem:[%s8761_s25 + $0x20] sm:$0xff] }
 0x217   : > { %1814 = vperm.xlu0 %8216, %v8428_v53   ;;  %4435 = vmatpush1.bf16.msra.mxu1 %v8407_v58  ;;  %v18824_v58 = vmov 2  }
 0x218   : > { %v9922_v4 = vpop.permute.xlu1 %1104  ;;  %v9924_v57 = vpop.permute.xlu0 %1107  ;;  %5076 = vmatpush1.bf16.msra.mxu0 %v9934_v63  ;;  %4436 = vmatprep.subr.bf16.mxu1 %v18770_v11 }
 0x219   : > { %18819 = vst [vmem:[#allocation98_spill] sm:$0xff] %v9922_v4  ;;  %18820 = vst [vmem:[#allocation97_spill] sm:$0xff] %v9924_v57  ;;  %5077 = vmatprep.subr.bf16.mxu0 %v18770_v11 }
 0x21a   : > { %8214 = vset.pattern.permute.xlu1 %v18821_v56 }
 0x21b   : > { %2710 = vperm.xlu1 %8214, %v8428_v53   ;;  %1826 = vperm.xlu0 %8216, %v8429_v9   ;;  %v9951_v53 = vld [vmem:[%s17959_s1 + $0x78] sm:$0xff]  }
 0x21c   : > { %v9938_v57 = vpop.permute.xlu1 %1110  ;;  %v9941_v4 = vpop.permute.xlu0 %1113  ;;  %4437 = vmatpush1.bf16.msra.mxu1 %v8409_v1  ;;  %5078 = vmatpush1.bf16.msra.mxu0 %v9951_v53  ;;  %v8431_v1 = vld [vmem:[%s8761_s25 + $0x18] sm:$0xff] }
 0x21d   : > { %18822 = vst [vmem:[#allocation102_spill] sm:$0xff] %v9938_v57  ;;  %18823 = vst [vmem:[#allocation101_spill] sm:$0xff] %v9941_v4  ;;  %v8430_v4 = vld [vmem:[%s8761_s25 + $0x10] sm:$0xff]  ;;  %7747 = vmatprep.subr.bf16.mxu1 %v18770_v11  ;;  %5721 = vmatprep.subr.bf16.mxu0 %v18770_v11 }
 0x21f   : > { %8217 = vset.pattern.permute.xlu1 %v18824_v58  ;;  %8219 = vset.pattern.permute.xlu0 %v18821_v56 }
 0x220   : > { %v9955_v57 = vpop.permute.xlu1 %1116  ;;  %1820 = vperm.xlu1 %8217, %v8430_v4   ;;  %2716 = vperm.xlu0 %8219, %v8430_v4   ;;  %v9958_v2 = vpop.permute.xlu0 %1119  ;;  %v8433_v4 = vld [vmem:[%s8761_s25 + $0x30] sm:$0xff] }
 0x221   : > { %18825 = vst [vmem:[#allocation106_spill] sm:$0xff] %v9955_v57  ;;  %18826 = vst [vmem:[#allocation105_spill] sm:$0xff] %v9958_v2 }
 0x224   : > { %v9963_v3 = vpop.permute.xlu1 %1122  ;;  %1823 = vperm.xlu1 %8217, %v8431_v1   ;;  %2725 = vperm.xlu0 %8219, %v8432_v8   ;;  %v9967_v57 = vpop.permute.xlu0 %1125 }
 0x225   : > { %18827 = vst [vmem:[#allocation110_spill] sm:$0xff] %v9963_v3  ;;  %18828 = vst [vmem:[#allocation109_spill] sm:$0xff] %v9967_v57  ;;  %v8434_v3 = vld [vmem:[%s8761_s25 + $0x48] sm:$0xff] }
 0x228   : > { %v9969_v7 = vpop.permute.xlu1 %1128  ;;  %8218 = vset.pattern.permute.xlu1 %v18821_v56  ;;  %2728 = vperm.xlu0 %8219, %v8433_v4   ;;  %v9973_v2 = vpop.permute.xlu0 %1131 }
 0x229   : > { %18829 = vst [vmem:[#allocation114_spill] sm:$0xff] %v9969_v7  ;;  %18830 = vst [vmem:[#allocation113_spill] sm:$0xff] %v9973_v2  ;;  %2719 = vperm.xlu1 %8218, %v8431_v1   ;;  %v8439_v2 = vld [vmem:[%s8761_s25 + $0x68] sm:$0xff] }
 0x22c   : > { %v9975_v15 = vpop.permute.xlu1 %1134  ;;  %2737 = vperm.xlu0 %8219, %v8434_v3   ;;  %v9978_v13 = vpop.permute.xlu0 %1137 }
 0x22d   : > { %18831 = vst [vmem:[#allocation118_spill] sm:$0xff] %v9975_v15  ;;  %18832 = vst [vmem:[#allocation117_spill] sm:$0xff] %v9978_v13  ;;  %8220 = vset.pattern.permute.xlu1 %v18824_v58  ;;  %v9993_v15 = vld [vmem:[%s8761_s25 + $0x60] sm:$0xff] }
 0x22e   : > { %1829 = vperm.xlu1 %8220, %v8432_v8  }
 0x230   : > { %v9981_v57 = vpop.permute.xlu1 %1140  ;;  %8226 = vset.pattern.permute.xlu0 %v18824_v58  ;;  %v9984_v7 = vpop.permute.xlu0 %1143 }
 0x231   : > { %18833 = vst [vmem:[#allocation122_spill] sm:$0xff] %v9981_v57  ;;  %18834 = vst [vmem:[#allocation121_spill] sm:$0xff] %v9984_v7  ;;  %1838 = vperm.xlu0 %8226, %v8435_v19  }
 0x232   : > { %8221 = vset.pattern.permute.xlu1 %v18821_v56 }
 0x233   : > { %2722 = vperm.xlu1 %8221, %v8429_v9   ;;  %v8437_v9 = vld [vmem:[%s8761_s25 + $0x50] sm:$0xff] }
 0x234   : > { %v9988_v1 = vpop.permute.xlu1 %1146  ;;  %v9990_v13 = vpop.permute.xlu0 %1149 }
 0x235   : > { %18835 = vst [vmem:[#allocation126_spill] sm:$0xff] %v9988_v1  ;;  %18836 = vst [vmem:[#allocation125_spill] sm:$0xff] %v9990_v13  ;;  %1850 = vperm.xlu0 %8226, %v9993_v15   ;;  %v8438_v13 = vld [vmem:[%s8761_s25 + $0x38] sm:$0xff] }
 0x237   : > { %8222 = vset.pattern.permute.xlu1 %v18824_v58 }
 0x238   : > { %v9997_v8 = vpop.permute.xlu1 %1152  ;;  %1832 = vperm.xlu1 %8222, %v8433_v4   ;;  %v9999_v7 = vpop.permute.xlu0 %1155 }
 0x239   : > { %18837 = vst [vmem:[#allocation130_spill] sm:$0xff] %v9997_v8  ;;  %18838 = vst [vmem:[#allocation129_spill] sm:$0xff] %v9999_v7  ;;  %8229 = vset.pattern.permute.xlu0 %v18821_v56  ;;  %v8440_v7 = vld [vmem:[%s8761_s25 + $0x70] sm:$0xff] }
 0x23a   : > { %2740 = vperm.xlu0 %8229, %v8437_v9  }
 0x23c   : > { %v10003_v57 = vpop.permute.xlu1 %1158  ;;  %1835 = vperm.xlu1 %8222, %v8438_v13   ;;  %v10006_v1 = vpop.permute.xlu0 %1161 }
 0x23d   : > { %18839 = vst [vmem:[#allocation193_spill] sm:$0xff] %v10003_v57  ;;  %18840 = vst [vmem:[#allocation194_spill] sm:$0xff] %v10006_v1  ;;  %v10021_v1 = vld [vmem:[%s8761_s25 + $0x88] sm:$0xff] }
 0x23e   : > { %2749 = vperm.xlu0 %8229, %v8439_v2  }
 0x240   : > { %v10009_v23 = vpop.permute.xlu1 %1164  ;;  %8223 = vset.pattern.permute.xlu1 %v18821_v56  ;;  %v10012_v4 = vpop.permute.xlu0 %1167 }
 0x241   : > { %18841 = vst [vmem:[#allocation195_spill] sm:$0xff] %v10009_v23  ;;  %18842 = vst [vmem:[#allocation196_spill] sm:$0xff] %v10012_v4  ;;  %2731 = vperm.xlu1 %8223, %v8438_v13   ;;  %v10031_v13 = vld [vmem:[%s8761_s25 + $0x80] sm:$0xff] }
 0x242   : > { %2752 = vperm.xlu0 %8229, %v8440_v7  }
 0x244   : > { %v10015_v8 = vpop.permute.xlu1 %1170  ;;  %v10017_v57 = vpop.permute.xlu0 %1173 }
 0x245   : > { %18843 = vst [vmem:[#allocation197_spill] sm:$0xff] %v10015_v8  ;;  %18844 = vst [vmem:[#allocation198_spill] sm:$0xff] %v10017_v57  ;;  %8224 = vset.pattern.permute.xlu1 %v18824_v58 }
 0x246   : > { %1841 = vperm.xlu1 %8224, %v8434_v3   ;;  %2761 = vperm.xlu0 %8229, %v10021_v1  }
 0x248   : > { %v10024_v23 = vpop.permute.xlu1 %1176  ;;  %v10026_v16 = vpop.permute.xlu0 %1179 }
 0x249   : > { %18845 = vst [vmem:[#allocation199_spill] sm:$0xff] %v10024_v23  ;;  %18846 = vst [vmem:[#allocation200_spill] sm:$0xff] %v10026_v16  ;;  %v10040_v23 = vld [vmem:[%s8761_s25 + $0xa0] sm:$0xff] }
 0x24a   : > { %8225 = vset.pattern.permute.xlu1 %v18821_v56  ;;  %8236 = vset.pattern.permute.xlu0 %v18824_v58 }
 0x24b   : > { %2734 = vperm.xlu1 %8225, %v8435_v19   ;;  %1862 = vperm.xlu0 %8236, %v10031_v13  }
 0x24c   : > { %v10034_v3 = vpop.permute.xlu1 %1182  ;;  %v10036_v57 = vpop.permute.xlu0 %1185 }
 0x24d   : > { %18847 = vst [vmem:[#allocation201_spill] sm:$0xff] %v10034_v3  ;;  %18848 = vst [vmem:[#allocation202_spill] sm:$0xff] %v10036_v57  ;;  %v8444_v3 = vld [vmem:[%s8761_s25 + $0x58] sm:$0xff]  ;;  %v10052_v57 = vld [vmem:[%s8761_s25 + $0x90] sm:$0xff] }
 0x24f   : > { %8227 = vset.pattern.permute.xlu1 %v18824_v58  ;;  %1874 = vperm.xlu0 %8236, %v10040_v23  }
 0x250   : > { %v10043_v16 = vpop.permute.xlu1 %1188  ;;  %1844 = vperm.xlu1 %8227, %v8437_v9   ;;  %v10045_v19 = vpop.permute.xlu0 %1191  ;;  %v10061_v9 = vld [vmem:[%s8761_s25 + $0xa8] sm:$0xff] }
 0x251   : > { %18849 = vst [vmem:[#allocation203_spill] sm:$0xff] %v10043_v16  ;;  %18850 = vst [vmem:[#allocation204_spill] sm:$0xff] %v10045_v19  ;;  %v10069_v16 = vld [vmem:[%s8761_s25 + $0xb0] sm:$0xff] }
 0x253   : > { %8239 = vset.pattern.permute.xlu0 %v18821_v56 }
 0x254   : > { %v10048_v8 = vpop.permute.xlu1 %1194  ;;  %1847 = vperm.xlu1 %8227, %v8444_v3   ;;  %2764 = vperm.xlu0 %8239, %v10052_v57   ;;  %v10055_v4 = vpop.permute.xlu0 %1197 }
 0x255   : > { %18851 = vst [vmem:[#allocation205_spill] sm:$0xff] %v10048_v8  ;;  %18852 = vst [vmem:[#allocation206_spill] sm:$0xff] %v10055_v4  ;;  %v10078_v4 = vld [vmem:[%s8761_s25 + $0xc8] sm:$0xff] }
 0x258   : > { %v10057_v25 = vpop.permute.xlu1 %1200  ;;  %8228 = vset.pattern.permute.xlu1 %v18821_v56  ;;  %2773 = vperm.xlu0 %8239, %v10061_v9   ;;  %v10064_v19 = vpop.permute.xlu0 %1203 }
 0x259   : > { %18853 = vst [vmem:[#allocation207_spill] sm:$0xff] %v10057_v25  ;;  %18854 = vst [vmem:[#allocation208_spill] sm:$0xff] %v10064_v19  ;;  %2743 = vperm.xlu1 %8228, %v8444_v3   ;;  %v8451_v19 = vld [vmem:[%s8761_s25 + $0x78] sm:$0xff] }
 0x25c   : > { %v10066_v8 = vpop.permute.xlu1 %1206  ;;  %2776 = vperm.xlu0 %8239, %v10069_v16   ;;  %v10072_v18 = vpop.permute.xlu0 %1209 }
 0x25d   : > { %18855 = vst [vmem:[#allocation209_spill] sm:$0xff] %v10066_v8  ;;  %18856 = vst [vmem:[#allocation210_spill] sm:$0xff] %v10072_v18  ;;  %8230 = vset.pattern.permute.xlu1 %v18824_v58  ;;  %v10091_v18 = vld [vmem:[%s8761_s25 + $0xc0] sm:$0xff] }
 0x25e   : > { %1853 = vperm.xlu1 %8230, %v8439_v2  }
 0x260   : > { %v10075_v25 = vpop.permute.xlu1 %1212  ;;  %2785 = vperm.xlu0 %8239, %v10078_v4   ;;  %v10081_v3 = vpop.permute.xlu0 %1215 }
 0x261   : > { %18857 = vst [vmem:[#allocation211_spill] sm:$0xff] %v10075_v25  ;;  %18858 = vst [vmem:[#allocation212_spill] sm:$0xff] %v10081_v3 }
 0x262   : > { %8231 = vset.pattern.permute.xlu1 %v18821_v56 }
 0x263   : > { %2746 = vperm.xlu1 %8231, %v9993_v15   ;;  %v10100_v15 = vld [vmem:[%s8761_s25 + $0xe0] sm:$0xff] }
 0x264   : > { %v10085_v8 = vpop.permute.xlu1 %1218  ;;  %8246 = vset.pattern.permute.xlu0 %v18824_v58  ;;  %v10088_v2 = vpop.permute.xlu0 %1221 }
 0x265   : > { %18859 = vst [vmem:[#allocation213_spill] sm:$0xff] %v10085_v8  ;;  %18860 = vst [vmem:[#allocation214_spill] sm:$0xff] %v10088_v2  ;;  %1886 = vperm.xlu0 %8246, %v10091_v18  }
 0x267   : > { %8232 = vset.pattern.permute.xlu1 %v18824_v58 }
 0x268   : > { %v10095_v25 = vpop.permute.xlu1 %1224  ;;  %1856 = vperm.xlu1 %8232, %v8440_v7   ;;  %v10097_v3 = vpop.permute.xlu0 %1227 }
 0x269   : > { %18861 = vst [vmem:[#allocation215_spill] sm:$0xff] %v10095_v25  ;;  %18862 = vst [vmem:[#allocation216_spill] sm:$0xff] %v10097_v3  ;;  %1898 = vperm.xlu0 %8246, %v10100_v15  }
 0x26c   : > { %v10103_v8 = vpop.permute.xlu1 %1230  ;;  %1859 = vperm.xlu1 %8232, %v8451_v19   ;;  %v10106_v2 = vpop.permute.xlu0 %1233 }
 0x26d   : > { %18863 = vst [vmem:[#allocation217_spill] sm:$0xff] %v10103_v8  ;;  %18864 = vst [vmem:[#allocation218_spill] sm:$0xff] %v10106_v2  ;;  %8249 = vset.pattern.permute.xlu0 %v18821_v56  ;;  %v10119_v8 = vld [vmem:[%s8761_s25 + $0xe8] sm:$0xff] }
 0x26e   : > { %2788 = vperm.xlu0 %8249, %v10110_v27  }
 0x270   : > { %v10113_v7 = vpop.permute.xlu1 %1236  ;;  %8233 = vset.pattern.permute.xlu1 %v18821_v56  ;;  %v10116_v3 = vpop.permute.xlu0 %1239 }
 0x271   : > { %18865 = vst [vmem:[#allocation219_spill] sm:$0xff] %v10113_v7  ;;  %18866 = vst [vmem:[#allocation220_spill] sm:$0xff] %v10116_v3  ;;  %2755 = vperm.xlu1 %8233, %v8451_v19  }
 0x272   : > { %2797 = vperm.xlu0 %8249, %v10119_v8  }
 0x274   : > { %v10122_v25 = vpop.permute.xlu1 %1242  ;;  %v10124_v2 = vpop.permute.xlu0 %1245 }
 0x275   : > { %18867 = vst [vmem:[#allocation221_spill] sm:$0xff] %v10122_v25  ;;  %18868 = vst [vmem:[#allocation222_spill] sm:$0xff] %v10124_v2  ;;  %8234 = vset.pattern.permute.xlu1 %v18824_v58  ;;  %v10138_v25 = vld [vmem:[%s8761_s25 + $0x108] sm:$0xff] }
 0x276   : > { %1865 = vperm.xlu1 %8234, %v10021_v1   ;;  %2800 = vperm.xlu0 %8249, %v10129_v20  }
 0x278   : > { %v10132_v3 = vpop.permute.xlu1 %1248  ;;  %v10134_v19 = vpop.permute.xlu0 %1251 }
 0x279   : > { %18869 = vst [vmem:[#allocation223_spill] sm:$0xff] %v10132_v3  ;;  %18870 = vst [vmem:[#allocation224_spill] sm:$0xff] %v10134_v19  ;;  %v10149_v3 = vld [vmem:[%s8761_s25 + $0x100] sm:$0xff] }
 0x27a   : > { %8235 = vset.pattern.permute.xlu1 %v18821_v56  ;;  %2809 = vperm.xlu0 %8249, %v10138_v25  }
 0x27b   : > { %2758 = vperm.xlu1 %8235, %v10031_v13   ;;  %v10158_v13 = vld [vmem:[%s8761_s25 + $0x120] sm:$0xff] }
 0x27c   : > { %v10142_v2 = vpop.permute.xlu1 %1254  ;;  %v10144_v1 = vpop.permute.xlu0 %1257 }
 0x27d   : > { %18871 = vst [vmem:[#allocation225_spill] sm:$0xff] %v10142_v2  ;;  %18872 = vst [vmem:[#allocation226_spill] sm:$0xff] %v10144_v1  ;;  %v8458_v2 = vld [vmem:[%s8761_s25 + $0x98] sm:$0xff] }
 0x27e   : > { %8256 = vset.pattern.permute.xlu0 %v18824_v58 }
 0x27f   : > { %8237 = vset.pattern.permute.xlu1 %v18824_v58  ;;  %1910 = vperm.xlu0 %8256, %v10149_v3  }
 0x280   : > { %v10152_v19 = vpop.permute.xlu1 %1260  ;;  %1868 = vperm.xlu1 %8237, %v10052_v57   ;;  %v10155_v7 = vpop.permute.xlu0 %1263  ;;  %v274_v57 = vlaneseq }
 0x281   : > { %18873 = vst [vmem:[#allocation227_spill] sm:$0xff] %v10152_v19  ;;  %18874 = vst [vmem:[#allocation228_spill] sm:$0xff] %v10155_v7  ;;  %v10171_v7 = vld [vmem:[%s8761_s25 + $0x110] sm:$0xff] }
 0x282   : > { %v10178_v31 = vand.u32 127, %v274_v57  ;;  %v18882_v57 = vld [vmem:[#allocation24_spill] sm:$0xff] }
 0x283   : > { %1922 = vperm.xlu0 %8256, %v10158_v13  }
 0x284   : > { %v10161_v1 = vpop.permute.xlu1 %1266  ;;  %1871 = vperm.xlu1 %8237, %v8458_v2   ;;  %v10164_v29 = vpop.permute.xlu0 %1269  ;;  %vm663_vm0 = vcmp.eq.s32.totalorder %v10178_v31, %v18882_v57  ;;  %vm1303_vm1 = vcmp.eq.s32.totalorder %v10178_v31, %v9582_v47  ;;  %vm1301_vm5 = vcmp.eq.s32.totalorder %v10178_v31, %v9584_v41  ;;  %vm1305_vm10 = vcmp.eq.s32.totalorder %v10178_v31, %v9588_v49 }
 0x285   : > { %18875 = vst [vmem:[#allocation229_spill] sm:$0xff] %v10161_v1  ;;  %18876 = vst [vmem:[#allocation230_spill] sm:$0xff] %v10164_v29  ;;  %v10181_v29 = vld [vmem:[%s8761_s25 + $0x128] sm:$0xff] }
 0x286   : > { %vm10215_vm7 = vmor %vm663_vm0, %vm1303_vm1 }
 0x287   : > { %8259 = vset.pattern.permute.xlu0 %v18821_v56 }
 0x288   : > { %v10167_v22 = vpop.permute.xlu1 %1272  ;;  %8238 = vset.pattern.permute.xlu1 %v18821_v56  ;;  %2812 = vperm.xlu0 %8259, %v10171_v7   ;;  %v10174_v19 = vpop.permute.xlu0 %1275 }
 0x289   : > { %18877 = vst [vmem:[#allocation231_spill] sm:$0xff] %v10167_v22  ;;  %18878 = vst [vmem:[#allocation232_spill] sm:$0xff] %v10174_v19  ;;  %2767 = vperm.xlu1 %8238, %v8458_v2   ;;  %v10191_v19 = vadd.s32 128, %v10178_v31  ;;  %v10194_v2 = vld [vmem:[%s8761_s25 + $0x130] sm:$0xff] }
 0x28b   : > { %vm664_vm2 = vcmp.eq.s32.totalorder %v10191_v19, %v18882_v57  ;;  %vm1304_vm3 = vcmp.eq.s32.totalorder %v10191_v19, %v9582_v47  ;;  %vm1302_vm8 = vcmp.eq.s32.totalorder %v10191_v19, %v9584_v41  ;;  %v10222_v57 = vld [vmem:[%s8761_s25 + $0x148] sm:$0xff]  ;;  %vm1306_vm0 = vcmp.eq.s32.totalorder %v10191_v19, %v9588_v49 }
 0x28c   : > { %v10176_v1 = vpop.permute.xlu1 %1278  ;;  %2821 = vperm.xlu0 %8259, %v10181_v29   ;;  %v10185_v22 = vpop.permute.xlu0 %1281  ;;  %18886 = vst [vmem:[#allocation24_spill] sm:$0xff] %v10222_v57  ;;  %vm10225_vm9 = vmor %vm664_vm2, %vm1304_vm3  ;;  %vm1307_vm2 = vcmp.eq.s32.totalorder %v10178_v31, %v9590_v43  ;;  %v18924_v49 = vmov 0 }
 0x28d   : > { %18879 = vst [vmem:[#allocation233_spill] sm:$0xff] %v10176_v1  ;;  %8240 = vset.pattern.permute.xlu1 %v18824_v58  ;;  %18880 = vst [vmem:[#allocation234_spill] sm:$0xff] %v10185_v22  ;;  %v18891_v1 = vld [vmem:[#allocation19_spill] sm:$0xff] }
 0x28e   : > { %1877 = vperm.xlu1 %8240, %v10061_v9   ;;  %v18883_v9 = vld [vmem:[#allocation20_spill] sm:$0xff]  ;;  %vm665_vm13 = vcmp.eq.s32.totalorder %v10178_v31, %v18891_v1 }
 0x28f   : > { %vm661_vm4 = vcmp.eq.s32.totalorder %v10178_v31, %v18883_v9  ;;  %vm662_vm6 = vcmp.eq.s32.totalorder %v10191_v19, %v18883_v9  ;;  %vm10247_vm1 = vmor %vm665_vm13, %vm1305_vm10  ;;  %v10346_v9 = vld [vmem:[%s8761_s25 + $0x150] sm:$0xff] }
 0x290   : > { %v10188_v24 = vpop.permute.xlu1 %1284  ;;  %2824 = vperm.xlu0 %8259, %v10194_v2   ;;  %vm10231_vm11 = vmor %vm661_vm4, %vm1301_vm5  ;;  %vm666_vm5 = vcmp.eq.s32.totalorder %v10191_v19, %v18891_v1 }
 0x291   : > { %18881 = vst [vmem:[#allocation235_spill] sm:$0xff] %v10188_v24  ;;  %v10202_v22 = vpop.permute.xlu0 %2713  ;;  %vm10239_vm14 = vmor %vm662_vm6, %vm1302_vm8  ;;  %vm1308_vm6 = vcmp.eq.s32.totalorder %v10191_v19, %v9590_v43  ;;  %v18910_v24 = vmov 0 }
 0x292   : > { %8241 = vset.pattern.permute.xlu1 %v18821_v56  ;;  %vm10283_vm13 = vmor %vm666_vm5, %vm1306_vm0 }
 0x293   : > { %2770 = vperm.xlu1 %8241, %v10040_v23   ;;  %v18899_v23 = vld [vmem:[#allocation23_spill] sm:$0xff] }
 0x294   : > { %2833 = vperm.xlu0 %8259, %v10222_v57   ;;  %v10256_v57 = vld [vmem:[%s8761_s25 + $0x140] sm:$0xff]  ;;  %vm668_vm3 = vcmp.eq.s32.totalorder %v10191_v19, %v18899_v23 }
 0x295   : > { %v1818_v47 = vpop.permute.xlu1 %1817  ;;  %18896 = vst [vmem:[#allocation20_spill] sm:$0xff] %v10256_v57 }
 0x296   : > { %vm2200_vm12 = vcmp.eq.s32.totalorder %v10191_v19, %v1818_v47  ;;  %v1815_v41 = vpop.permute.xlu0 %1814 }
 0x297   : > { %8242 = vset.pattern.permute.xlu1 %v18824_v58  ;;  %vm2198_vm15 = vcmp.eq.s32.totalorder %v10191_v19, %v1815_v41  ;;  %vm10263_vm4 = vmor %vm10225_vm9, %vm2200_vm12  ;;  %vm667_vm12 = vcmp.eq.s32.totalorder %v10178_v31, %v18899_v23  ;;  %vm2197_vm5 = vcmp.eq.s32.totalorder %v10178_v31, %v1815_v41  ;;  %v8465_v23 = vld [vmem:[%s8761_s25 + $0x160] sm:$0xff]  ;;  %v18306_v41 = vmov 1.0|1.0  }
 0x298   : > { %1880 = vperm.xlu1 %8242, %v10069_v16   ;;  %8266 = vset.pattern.permute.xlu0 %v18824_v58  ;;  %vm2454_vm9 = vmor %vm10239_vm14, %vm2198_vm15  ;;  %vm18904_vm15 = vcmp.eq.s32.totalorder %v10178_v31, %v1818_v47 }
 0x299   : > { %1934 = vperm.xlu0 %8266, %v10256_v57   ;;  %v8464_v57 = vld [vmem:[%s8761_s25 + $0xb8] sm:$0xff]  ;;  %vm10293_vm14 = vmor %vm667_vm12, %vm1307_vm2  ;;  %vm18909_vm2 = vcmp.eq.s32.totalorder %v10191_v19, %v10202_v22 }
 0x29a   : > { %v2711_v16 = vpop.permute.xlu1 %2710  ;;  %vm10301_vm0 = vmor %vm10215_vm7, %vm18904_vm15  ;;  %v10311_v43 = vpop.permute.xlu0 %1826 }
 0x29b   : > { %vm3094_vm10 = vcmp.eq.s32.totalorder %v10191_v19, %v2711_v16  ;;  %vm3352_vm7 = vmor %vm10263_vm4, %vm18909_vm2 }
 0x29c   : > { %1883 = vperm.xlu1 %8242, %v8464_v57   ;;  %vm3350_vm8 = vmor %vm2454_vm9, %vm3094_vm10  ;;  %vm3093_vm9 = vcmp.eq.s32.totalorder %v10178_v31, %v2711_v16 }
 0x29d   : > { %vm10306_vm10 = vmor %vm668_vm3, %vm1308_vm6  ;;  %1946 = vperm.xlu0 %8266, %v8465_v23   ;;  %vm3095_vm3 = vcmp.eq.s32.totalorder %v10178_v31, %v10202_v22  ;;  %v18914_v23 = vmov 0  ;;  %v8478_v22 = vld [vmem:[%s8761_s25 + $0x1c0] sm:$0xff] }
 0x29e   : > { %vm10319_vm12 = vmpackc.low %vm3352_vm7, %vm3350_vm8 }
 0x29f   : > { %v18911_v24 = vsel %vm10319_vm12, 4294967295, %v18910_v24  ;;  %v1821_v47 = vpop.permute.xlu1 %1820  ;;  %vm2453_vm6 = vmor %vm10231_vm11, %vm2197_vm5  ;;  %6910 = vmatprep.mubr.msk.bf16.mxu1 %vm10319_vm12, %v18306_v41  ;;  %7182 = vmatprep.mubr.msk.bf16.mxu0 %vm10319_vm12, %v18306_v41  ;;  %v2717_v35 = vpop.permute.xlu0 %2716 }
 0x2a0   : > { %vm2201_vm4 = vcmp.eq.s32.totalorder %v10178_v31, %v1821_v47  ;;  %vm3349_vm8 = vmor %vm2453_vm6, %vm3093_vm9  ;;  %8243 = vset.pattern.permute.xlu1 %v18821_v56  ;;  %vm2202_vm15 = vcmp.eq.s32.totalorder %v10191_v19, %v1821_v47  ;;  %v18926_v47 = vld [vmem:[#allocation32_spill] sm:$0xff] }
 0x2a1   : > { %vm10338_vm2 = vmor %vm10247_vm1, %vm2201_vm4  ;;  %2779 = vperm.xlu1 %8243, %v8464_v57   ;;  %8269 = vset.pattern.permute.xlu0 %v18821_v56  ;;  %v10377_v57 = vld [vmem:[%s8761_s25 + $0x168] sm:$0xff] }
 0x2a2   : > { %vm3351_vm11 = vmor %vm10301_vm0, %vm3095_vm3  ;;  %2836 = vperm.xlu0 %8269, %v10346_v9   ;;  %vm3098_vm0 = vcmp.eq.s32.totalorder %v10191_v19, %v2717_v35  ;;  %vm3097_vm3 = vcmp.eq.s32.totalorder %v10178_v31, %v2717_v35 }
 0x2a3   : > { %v1824_v16 = vpop.permute.xlu1 %1823  ;;  %vm10349_vm5 = vmpackc.low %vm3351_vm11, %vm3349_vm8 }
 0x2a4   : > { %v18915_v23 = vsel %vm10349_vm5, 4294967295, %v18914_v23  ;;  %vm2203_vm1 = vcmp.eq.s32.totalorder %v10178_v31, %v1824_v16  ;;  %vm2204_vm9 = vcmp.eq.s32.totalorder %v10191_v19, %v1824_v16  ;;  %vm2458_vm7 = vmor %vm10283_vm13, %vm2202_vm15  ;;  %6912 = vmatmul.mubr.msk.bf16.vlgmr.msra.gmra.mrb[0].mxu1 %vm10349_vm5, %v18306_v41  ;;  %7184 = vmatmul.mubr.msk.bf16.vlgmr.msra.gmra.mrb[0].mxu0 %vm10349_vm5, %v18306_v41  ;;  %vm18936_vm5 = vcmp.eq.s32.totalorder %v10191_v19, %v10311_v43 }
 0x2a5   : > { %vm10367_vm6 = vmor %vm10293_vm14, %vm2203_vm1  ;;  %8244 = vset.pattern.permute.xlu1 %v18824_v58  ;;  %7763 = vmatpush1.bf16.msra.mxu1 %v9690_v21  ;;  %v18920_v21 = vld [vmem:[#allocation28_spill] sm:$0xff]  ;;  %vm1310_vm1 = vcmp.eq.s32.totalorder %v10191_v19, %v9594_v51 }
 0x2a6   : > { %vm2460_vm13 = vmor %vm10306_vm10, %vm2204_vm9  ;;  %1889 = vperm.xlu1 %8244, %v10078_v4   ;;  %2845 = vperm.xlu0 %8269, %v10377_v57   ;;  %vm670_vm11 = vcmp.eq.s32.totalorder %v10191_v19, %v18920_v21  ;;  %v8468_v4 = vld [vmem:[%s8761_s25 + $0x170] sm:$0xff] }
 0x2a7   : > { %vm3354_vm4 = vmor %vm2458_vm7, %vm3098_vm0  ;;  %7748 = vmatprep.subr.bf16.mxu1 %v18770_v11  ;;  %vm1309_vm7 = vcmp.eq.s32.totalorder %v10178_v31, %v9594_v51  ;;  %vm1311_vm0 = vcmp.eq.s32.totalorder %v10178_v31, %v9596_v45  ;;  %v2726_v51 = vpop.permute.xlu0 %2725 }
 0x2a8   : > { %v2720_v1 = vpop.permute.xlu1 %2719  ;;  %vm10385_vm15 = vmor %vm10338_vm2, %vm3097_vm3  ;;  %vm669_vm2 = vcmp.eq.s32.totalorder %v10178_v31, %v18920_v21  ;;  %v8470_v21 = vld [vmem:[%s8761_s25 + $0x180] sm:$0xff] }
 0x2a9   : > { %vm3099_vm14 = vcmp.eq.s32.totalorder %v10178_v31, %v2720_v1  ;;  %vm3100_vm8 = vcmp.eq.s32.totalorder %v10191_v19, %v2720_v1  ;;  %7764 = vmatpush1.bf16.msra.mxu1 %v9707_v12  ;;  %v18923_v12 = vld [vmem:[#allocation27_spill] sm:$0xff] }
 0x2aa   : > { %vm3356_vm10 = vmor %vm2460_vm13, %vm3100_vm8  ;;  %8245 = vset.pattern.permute.xlu1 %v18821_v56  ;;  %2848 = vperm.xlu0 %8269, %v8468_v4   ;;  %vm671_vm13 = vcmp.eq.s32.totalorder %v10178_v31, %v18923_v12  ;;  %v19009_v4 = vmov 0 }
 0x2ab   : > { %vm10396_vm9 = vmpackc.low %vm3356_vm10, %vm3354_vm4  ;;  %2782 = vperm.xlu1 %8245, %v10091_v18   ;;  %vm1312_vm4 = vcmp.eq.s32.totalorder %v10191_v19, %v9596_v45  ;;  %7749 = vmatprep.subr.bf16.mxu1 %v18770_v11 }
 0x2ac   : > { %v18922_v33 = vsel %vm10396_vm9, 4294967295, %v18921_v33  ;;  %6914 = vmatprep.mubr.msk.bf16.mxu1 %vm10396_vm9, %v18306_v41  ;;  %vm3355_vm3 = vmor %vm10367_vm6, %vm3099_vm14  ;;  %7186 = vmatprep.mubr.msk.bf16.mxu0 %vm10396_vm9, %v18306_v41  ;;  %vm673_vm6 = vcmp.eq.s32.totalorder %v10178_v31, %v18926_v47  ;;  %vm1315_vm9 = vcmp.eq.s32.totalorder %v10178_v31, %v9602_v44 }
 0x2ad   : > { %v1830_v18 = vpop.permute.xlu1 %1829  ;;  %vm10423_vm8 = vmpackc.low %vm3355_vm3, %vm10385_vm15  ;;  %vm1313_vm15 = vcmp.eq.s32.totalorder %v10178_v31, %v9600_v42  ;;  %vm672_vm3 = vcmp.eq.s32.totalorder %v10191_v19, %v18923_v12  ;;  %7765 = vmatpush1.bf16.msra.mxu1 %v9723_v5 }
 0x2ae   : > { %v18925_v49 = vsel %vm10423_vm8, 4294967295, %v18924_v49  ;;  %vm10436_vm14 = vmor %vm670_vm11, %vm1310_vm1  ;;  %6916 = vmatmul.mubr.msk.bf16.gmra.mrb[4].mxu1 %vm10423_vm8, %v18306_v41  ;;  %7188 = vmatmul.mubr.msk.bf16.gmra.mrb[4].mxu0 %vm10423_vm8, %v18306_v41  ;;  %vm18935_vm10 = vcmp.eq.s32.totalorder %v10191_v19, %v1830_v18 }
 0x2af   : > { %vm10457_vm11 = vmor %vm669_vm2, %vm1309_vm7  ;;  %2857 = vperm.xlu0 %8269, %v8469_v26   ;;  %vm2207_vm7 = vcmp.eq.s32.totalorder %v10178_v31, %v1830_v18  ;;  %8247 = vset.pattern.permute.xlu1 %v18824_v58  ;;  %v2729_v18 = vpop.permute.xlu0 %2728  ;;  %v8473_v26 = vld [vmem:[%s8761_s25 + $0x190] sm:$0xff] }
 0x2b0   : > { %vm10464_vm1 = vmor %vm671_vm13, %vm1311_vm0  ;;  %7750 = vmatprep.subr.bf16.mxu1 %v18770_v11  ;;  %vm674_vm0 = vcmp.eq.s32.totalorder %v10191_v19, %v18926_v47  ;;  %vm1314_vm13 = vcmp.eq.s32.totalorder %v10191_v19, %v9600_v42  ;;  %1892 = vperm.xlu1 %8247, %v10110_v27   ;;  %v18941_v27 = vld [vmem:[#allocation31_spill] sm:$0xff]  ;;  %v8472_v47 = vld [vmem:[%s8761_s25 + $0x1a0] sm:$0xff] }
 0x2b1   : > { %vm1568_vm2 = vmor %vm672_vm3, %vm1312_vm4  ;;  %vm3104_vm3 = vcmp.eq.s32.totalorder %v10191_v19, %v2726_v51  ;;  %7766 = vmatpush1.bf16.msra.mxu1 %v9740_v6  ;;  %v8471_v6 = vld [vmem:[%s8761_s25 + $0xd8] sm:$0xff]  ;;  %vm676_vm12 = vcmp.eq.s32.totalorder %v10191_v19, %v18941_v27  ;;  %v8474_v42 = vld [vmem:[%s8761_s25 + $0x1a8] sm:$0xff] }
 0x2b2   : > { %vm10488_vm4 = vmor %vm673_vm6, %vm1313_vm15  ;;  %v2723_v45 = vpop.permute.xlu1 %2722  ;;  %7751 = vmatprep.subr.bf16.mxu1 %v18770_v11 }
 0x2b3   : > { %vm2464_vm8 = vmor %vm1568_vm2, %vm18935_vm10  ;;  %vm3102_vm10 = vcmp.eq.s32.totalorder %v10191_v19, %v2723_v45  ;;  %8276 = vset.pattern.permute.xlu0 %v18824_v58  ;;  %vm675_vm2 = vcmp.eq.s32.totalorder %v10178_v31, %v18941_v27  ;;  %v10589_v16 = vpop.permute.xlu0 %2737  ;;  %v18963_v27 = vld [vmem:[#allocation35_spill] sm:$0xff] }
 0x2b4   : > { %vm10503_vm6 = vmor %vm10436_vm14, %vm18936_vm5  ;;  %vm1316_vm14 = vcmp.eq.s32.totalorder %v10191_v19, %v9602_v44  ;;  %1958 = vperm.xlu0 %8276, %v8470_v21   ;;  %1895 = vperm.xlu1 %8247, %v8471_v6   ;;  %v18946_v44 = vmov 0  ;;  %v18964_v21 = vld [vmem:[#allocation40_spill] sm:$0xff] }
 0x2b5   : > { %vm10509_vm15 = vmor %vm10464_vm1, %vm2207_vm7  ;;  %7767 = vmatpush1.bf16.msra.mxu1 %v9757_v0  ;;  %v18952_v0 = vmov 0 }
 0x2b6   : > { %vm10518_vm5 = vmor %vm674_vm0, %vm1314_vm13  ;;  %vm2205_vm0 = vcmp.eq.s32.totalorder %v10178_v31, %v10311_v43  ;;  %7752 = vmatprep.subr.bf16.mxu1 %v18770_v11 }
 0x2b7   : > { %vm3360_vm1 = vmor %vm2464_vm8, %vm3104_vm3  ;;  %vm3103_vm8 = vcmp.eq.s32.totalorder %v10178_v31, %v2726_v51  ;;  %v1833_v43 = vpop.permute.xlu1 %1832 }
 0x2b8   : > { %vm10528_vm7 = vmor %vm675_vm2, %vm1315_vm9  ;;  %1970 = vperm.xlu0 %8276, %v8472_v47   ;;  %8248 = vset.pattern.permute.xlu1 %v18821_v56  ;;  %v8477_v47 = vld [vmem:[%s8761_s25 + $0xf8] sm:$0xff] }
 0x2b9   : > { %vm3358_vm13 = vmor %vm10503_vm6, %vm3102_vm10  ;;  %vm3101_vm10 = vcmp.eq.s32.totalorder %v10178_v31, %v2723_v45  ;;  %2791 = vperm.xlu1 %8248, %v8471_v6   ;;  %7768 = vmatpush1.bf16.msra.mxu1 %v9774_v60  ;;  %v1839_v45 = vpop.permute.xlu0 %1838 }
 0x2ba   : > { %vm10540_vm3 = vmpackc.low %vm3360_vm1, %vm3358_vm13  ;;  %7753 = vmatprep.subr.bf16.mxu1 %v18770_v11 }
 0x2bb   : > { %v18947_v44 = vsel %vm10540_vm3, 4294967295, %v18946_v44  ;;  %vm10544_vm9 = vmor %vm676_vm12, %vm1316_vm14  ;;  %6918 = vmatprep.mubr.msk.bf16.mxu1 %vm10540_vm3, %v18306_v41  ;;  %7190 = vmatprep.mubr.msk.bf16.mxu0 %vm10540_vm3, %v18306_v41  ;;  %vm2209_vm12 = vcmp.eq.s32.totalorder %v10178_v31, %v1833_v43  ;;  %vm2210_vm14 = vcmp.eq.s32.totalorder %v10191_v19, %v1833_v43  ;;  %v1836_v35 = vpop.permute.xlu1 %1835  ;;  %v8483_v43 = vld [vmem:[%s8761_s25 + $0x208] sm:$0xff]  ;;  %vm19052_vm3 = vcmp.eq.s32.totalorder %v10191_v19, %v9632_v39 }
 0x2bc   : > { %vm2461_vm6 = vmor %vm10457_vm11, %vm2205_vm0  ;;  %vm2212_vm13 = vcmp.eq.s32.totalorder %v10191_v19, %v1836_v35  ;;  %8279 = vset.pattern.permute.xlu0 %v18821_v56 }
 0x2bd   : > { %vm3359_vm2 = vmor %vm10509_vm15, %vm3103_vm8  ;;  %vm2211_vm15 = vcmp.eq.s32.totalorder %v10178_v31, %v1836_v35  ;;  %2860 = vperm.xlu0 %8279, %v8473_v26   ;;  %8250 = vset.pattern.permute.xlu1 %v18824_v58  ;;  %v10781_v60 = vpop.permute.xlu0 %1850 }
 0x2be   : > { %vm10567_vm11 = vmor %vm10488_vm4, %vm2209_vm12  ;;  %vm3106_vm4 = vcmp.eq.s32.totalorder %v10191_v19, %v2729_v18  ;;  %1901 = vperm.xlu1 %8250, %v10119_v8   ;;  %7769 = vmatpush1.bf16.msra.mxu1 %v9791_v62  ;;  %v18958_v8 = vld [vmem:[#allocation36_spill] sm:$0xff]  ;;  %v18959_v62 = vmov 0 }
 0x2bf   : > { %vm3357_vm1 = vmor %vm2461_vm6, %vm3101_vm10  ;;  %vm3105_vm6 = vcmp.eq.s32.totalorder %v10178_v31, %v2729_v18  ;;  %7754 = vmatprep.subr.bf16.mxu1 %v18770_v11  ;;  %v19032_v18 = vmov 0 }
 0x2c0   : > { %vm10571_vm0 = vmpackc.low %vm3359_vm2, %vm3357_vm1  ;;  %v2732_v51 = vpop.permute.xlu1 %2731  ;;  %vm677_vm1 = vcmp.eq.s32.totalorder %v10178_v31, %v18958_v8 }
 0x2c1   : > { %v18953_v0 = vsel %vm10571_vm0, 4294967295, %v18952_v0  ;;  %vm2466_vm8 = vmor %vm10518_vm5, %vm2210_vm14  ;;  %6920 = vmatmul.mubr.msk.bf16.gmra.mrb[8].mxu1 %vm10571_vm0, %v18306_v41  ;;  %7192 = vmatmul.mubr.msk.bf16.gmra.mrb[8].mxu0 %vm10571_vm0, %v18306_v41  ;;  %vm3108_vm2 = vcmp.eq.s32.totalorder %v10191_v19, %v2732_v51 }
 0x2c2   : > { %vm10593_vm10 = vmor %vm10528_vm7, %vm2211_vm15  ;;  %vm3107_vm7 = vcmp.eq.s32.totalorder %v10178_v31, %v2732_v51  ;;  %2869 = vperm.xlu0 %8279, %v8474_v42   ;;  %8251 = vset.pattern.permute.xlu1 %v18821_v56  ;;  %v2741_v42 = vpop.permute.xlu0 %2740  ;;  %v19177_v51 = vld [vmem:[#allocation30_spill] sm:$0xff] }
 0x2c3   : > { %vm2468_vm5 = vmor %vm10544_vm9, %vm2212_vm13  ;;  %vm1317_vm13 = vcmp.eq.s32.totalorder %v10178_v31, %v9606_v40  ;;  %2794 = vperm.xlu1 %8251, %v10100_v15   ;;  %v18961_v15 = vmov 0  ;;  %7770 = vmatpush1.bf16.msra.mxu1 %v9808_v54 }
 0x2c4   : > { %vm3362_vm12 = vmor %vm2466_vm8, %vm3106_vm4  ;;  %vm1318_vm4 = vcmp.eq.s32.totalorder %v10191_v19, %v9606_v40  ;;  %7755 = vmatprep.subr.bf16.mxu1 %v18770_v11  ;;  %v19011_v40 = vld [vmem:[#allocation43_spill] sm:$0xff] }
 0x2c5   : > { %vm10608_vm14 = vmor %vm10567_vm11, %vm3105_vm6  ;;  %vm678_vm11 = vcmp.eq.s32.totalorder %v10191_v19, %v18958_v8  ;;  %vm1319_vm6 = vcmp.eq.s32.totalorder %v10178_v31, %v9608_v46  ;;  %v1842_v1 = vpop.permute.xlu1 %1841  ;;  %v8486_v8 = vld [vmem:[%s8761_s25 + $0x220] sm:$0xff] }
 0x2c6   : > { %vm3364_vm9 = vmor %vm2468_vm5, %vm3108_vm2  ;;  %2872 = vperm.xlu0 %8279, %v8475_v28   ;;  %v19006_v28 = vld [vmem:[#allocation44_spill] sm:$0xff]  ;;  %v2750_v6 = vpop.permute.xlu0 %2749 }
 0x2c7   : > { %vm10617_vm15 = vmpackc.low %vm3364_vm9, %vm3362_vm12  ;;  %vm679_vm12 = vcmp.eq.s32.totalorder %v10178_v31, %v18963_v27  ;;  %vm1321_vm9 = vcmp.eq.s32.totalorder %v10178_v31, %v9612_v38  ;;  %8252 = vset.pattern.permute.xlu1 %v18824_v58  ;;  %7771 = vmatpush1.bf16.msra.mxu1 %v9830_v10  ;;  %v18978_v10 = vld [vmem:[#allocation39_spill] sm:$0xff] }
 0x2c8   : > { %v18960_v62 = vsel %vm10617_vm15, 4294967295, %v18959_v62  ;;  %6922 = vmatprep.mubr.msk.bf16.mxu1 %vm10617_vm15, %v18306_v41  ;;  %vm3363_vm8 = vmor %vm10593_vm10, %vm3107_vm7  ;;  %7194 = vmatprep.mubr.msk.bf16.mxu0 %vm10617_vm15, %v18306_v41  ;;  %vm1320_vm10 = vcmp.eq.s32.totalorder %v10191_v19, %v9608_v46  ;;  %vm683_vm7 = vcmp.eq.s32.totalorder %v10178_v31, %v18978_v10 }
 0x2c9   : > { %vm10642_vm5 = vmpackc.low %vm3363_vm8, %vm10608_vm14  ;;  %vm2214_vm8 = vcmp.eq.s32.totalorder %v10191_v19, %v1839_v45  ;;  %1904 = vperm.xlu1 %8252, %v10129_v20   ;;  %7756 = vmatprep.subr.bf16.mxu1 %v18770_v11 }
 0x2ca   : > { %v18962_v15 = vsel %vm10642_vm5, 4294967295, %v18961_v15  ;;  %6924 = vmatmul.mubr.msk.bf16.gmra.mrb[12].mxu1 %vm10642_vm5, %v18306_v41  ;;  %vm10663_vm2 = vmor %vm677_vm1, %vm1317_vm13  ;;  %7196 = vmatmul.mubr.msk.bf16.gmra.mrb[12].mxu0 %vm10642_vm5, %v18306_v41  ;;  %vm680_vm1 = vcmp.eq.s32.totalorder %v10191_v19, %v18963_v27  ;;  %v2735_v20 = vpop.permute.xlu1 %2734  ;;  %v10977_v12 = vpop.permute.xlu0 %2752 }
 0x2cb   : > { %vm10673_vm14 = vmor %vm678_vm11, %vm1318_vm4  ;;  %vm1322_vm4 = vcmp.eq.s32.totalorder %v10191_v19, %v9612_v38  ;;  %v8476_v38 = vld [vmem:[%s8761_s25 + $0x1c8] sm:$0xff]  ;;  %vm3110_vm15 = vcmp.eq.s32.totalorder %v10191_v19, %v2735_v20  ;;  %7772 = vmatpush1.bf16.msra.mxu1 %v9847_v17  ;;  %v18990_v17 = vmov 0 }
 0x2cc   : > { %vm10691_vm13 = vmor %vm679_vm12, %vm1319_vm6  ;;  %vm18971_vm6 = vcmp.eq.s32.totalorder %v10178_v31, %v18964_v21  ;;  %2881 = vperm.xlu0 %8279, %v8476_v38   ;;  %7757 = vmatprep.subr.bf16.mxu1 %v18770_v11  ;;  %v8482_v38 = vld [vmem:[%s8761_s25 + $0x1f0] sm:$0xff] }
 0x2cd   : > { %vm1576_vm5 = vmor %vm680_vm1, %vm1320_vm10  ;;  %vm18974_vm10 = vcmp.eq.s32.totalorder %v10191_v19, %v18964_v21  ;;  %vm1324_vm1 = vcmp.eq.s32.totalorder %v10191_v19, %v9614_v48  ;;  %1907 = vperm.xlu1 %8252, %v8477_v47   ;;  %v8481_v21 = vld [vmem:[%s8761_s25 + $0x1e8] sm:$0xff] }
 0x2ce   : > { %vm10707_vm12 = vmor %vm18971_vm6, %vm1321_vm9 }
 0x2cf   : > { %vm2470_vm11 = vmor %vm10673_vm14, %vm2214_vm8  ;;  %vm18977_vm8 = vcmp.eq.s32.totalorder %v10191_v19, %v1842_v1  ;;  %v1845_v35 = vpop.permute.xlu1 %1844  ;;  %7773 = vmatpush1.bf16.msra.mxu1 %v9864_v61  ;;  %v18998_v61 = vmov 0 }
 0x2d0   : > { %vm10721_vm9 = vmor %vm18974_vm10, %vm1322_vm4  ;;  %vm684_vm4 = vcmp.eq.s32.totalorder %v10191_v19, %v18978_v10  ;;  %vm18981_vm10 = vcmp.eq.s32.totalorder %v10178_v31, %v9614_v48  ;;  %8286 = vset.pattern.permute.xlu0 %v18824_v58  ;;  %7758 = vmatprep.subr.bf16.mxu1 %v18770_v11  ;;  %v19116_v10 = vld [vmem:[#allocation17_spill] sm:$0xff] }
 0x2d1   : > { %vm2472_vm6 = vmor %vm1576_vm5, %vm18977_vm8  ;;  %vm2213_vm5 = vcmp.eq.s32.totalorder %v10178_v31, %v1839_v45  ;;  %vm18984_vm8 = vcmp.eq.s32.totalorder %v10178_v31, %v1842_v1  ;;  %1982 = vperm.xlu0 %8286, %v8478_v22   ;;  %8253 = vset.pattern.permute.xlu1 %v18821_v56  ;;  %v8485_v22 = vld [vmem:[%s8761_s25 + $0x200] sm:$0xff] }
 0x2d2   : > { %vm10734_vm0 = vmor %vm2470_vm11, %vm3110_vm15  ;;  %2803 = vperm.xlu1 %8253, %v8477_v47   ;;  %v8484_v47 = vld [vmem:[%s8761_s25 + $0x118] sm:$0xff] }
 0x2d3   : > { %vm10743_vm14 = vmor %vm683_vm7, %vm18981_vm10  ;;  %vm3111_vm7 = vcmp.eq.s32.totalorder %v10178_v31, %v10589_v16  ;;  %vm18989_vm10 = vcmp.eq.s32.totalorder %v10191_v19, %v10589_v16  ;;  %v8479_v16 = vld [vmem:[%s8761_s25 + $0x1e0] sm:$0xff]  ;;  %v1848_v5 = vpop.permute.xlu1 %1847  ;;  %7774 = vmatpush1.bf16.msra.mxu1 %v9876_v14  ;;  %v8480_v14 = vld [vmem:[%s8761_s25 + $0x1d0] sm:$0xff] }
 0x2d4   : > { %vm10752_vm15 = vmor %vm10691_vm13, %vm18984_vm8  ;;  %vm3109_vm8 = vcmp.eq.s32.totalorder %v10178_v31, %v2735_v20  ;;  %7759 = vmatprep.subr.bf16.mxu1 %v18770_v11  ;;  %v19019_v20 = vld [vmem:[#allocation48_spill] sm:$0xff] }
 0x2d5   : > { %vm10758_vm11 = vmor %vm684_vm4, %vm1324_vm1  ;;  %1994 = vperm.xlu0 %8286, %v8479_v16   ;;  %v19042_v16 = vld [vmem:[#allocation51_spill] sm:$0xff] }
 0x2d6   : > { %vm3368_vm13 = vmor %vm2472_vm6, %vm18989_vm10  ;;  %vm2218_vm6 = vcmp.eq.s32.totalorder %v10191_v19, %v1845_v35  ;;  %8254 = vset.pattern.permute.xlu1 %v18824_v58 }
 0x2d7   : > { %vm10773_vm1 = vmpackc.low %vm3368_vm13, %vm10734_vm0  ;;  %vm2217_vm0 = vcmp.eq.s32.totalorder %v10178_v31, %v1845_v35  ;;  %vm2220_vm13 = vcmp.eq.s32.totalorder %v10191_v19, %v1848_v5  ;;  %1913 = vperm.xlu1 %8254, %v10138_v25   ;;  %7775 = vmatpush1.bf16.msra.mxu1 %v9893_v55  ;;  %v19004_v25 = vmov 0  ;;  %v11025_v35 = vpop.permute.xlu0 %2761  ;;  %v19060_v55 = vmov 0 }
 0x2d8   : > { %v18991_v17 = vsel %vm10773_vm1, 4294967295, %v18990_v17  ;;  %vm2469_vm4 = vmor %vm10663_vm2, %vm2213_vm5  ;;  %6926 = vmatprep.mubr.msk.bf16.mxu1 %vm10773_vm1, %v18306_v41  ;;  %7198 = vmatprep.mubr.msk.bf16.mxu0 %vm10773_vm1, %v18306_v41  ;;  %v2744_v1 = vpop.permute.xlu1 %2743  ;;  %vm1332_vm1 = vcmp.eq.s32.totalorder %v10191_v19, %v9626_v52 }
 0x2d9   : > { %vm10796_vm2 = vmor %vm10752_vm15, %vm3111_vm7  ;;  %vm2219_vm7 = vcmp.eq.s32.totalorder %v10178_v31, %v1848_v5  ;;  %8289 = vset.pattern.permute.xlu0 %v18821_v56  ;;  %7760 = vmatprep.subr.bf16.mxu1 %v18770_v11  ;;  %v8493_v5 = vld [vmem:[%s8761_s25 + $0x260] sm:$0xff] }
 0x2da   : > { %vm3365_vm5 = vmor %vm2469_vm4, %vm3109_vm8  ;;  %vm3113_vm4 = vcmp.eq.s32.totalorder %v10178_v31, %v2741_v42  ;;  %2884 = vperm.xlu0 %8289, %v8480_v14   ;;  %v19101_v14 = vmov 0 }
 0x2db   : > { %vm10805_vm10 = vmor %vm10707_vm12, %vm2217_vm0  ;;  %vm3114_vm12 = vcmp.eq.s32.totalorder %v10191_v19, %v2741_v42  ;;  %8255 = vset.pattern.permute.xlu1 %v18821_v56  ;;  %7776 = vmatpush1.bf16.msra.mxu1 %v9910_v59  ;;  %v1863_v27 = vpop.permute.xlu0 %1862  ;;  %v8491_v59 = vld [vmem:[%s8761_s25 + $0x248] sm:$0xff]  ;;  %v19097_v42 = vmov 0 }
 0x2dc   : > { %vm10812_vm15 = vmor %vm10721_vm9, %vm2218_vm6  ;;  %2806 = vperm.xlu1 %8255, %v10149_v3   ;;  %7761 = vmatprep.subr.bf16.mxu1 %v18770_v11 }
 0x2dd   : > { %vm10821_vm8 = vmpackc.low %vm10796_vm2, %vm3365_vm5  ;;  %vm3116_vm2 = vcmp.eq.s32.totalorder %v10191_v19, %v2744_v1  ;;  %vm1325_vm5 = vcmp.eq.s32.totalorder %v10178_v31, %v9618_v36  ;;  %v1854_v54 = vpop.permute.xlu1 %1853 }
 0x2de   : > { %v18999_v61 = vsel %vm10821_vm8, 4294967295, %v18998_v61  ;;  %6928 = vmatmul.mubr.msk.bf16.gmra.mrb[16].mxu1 %vm10821_vm8, %v18306_v41  ;;  %7200 = vmatmul.mubr.msk.bf16.gmra.mrb[16].mxu0 %vm10821_vm8, %v18306_v41  ;;  %vm10835_vm9 = vmor %vm10743_vm14, %vm2219_vm7  ;;  %vm3115_vm14 = vcmp.eq.s32.totalorder %v10178_v31, %v2744_v1  ;;  %v8494_v1 = vld [vmem:[%s8761_s25 + $0x250] sm:$0xff] }
 0x2df   : > { %vm2476_vm0 = vmor %vm10758_vm11, %vm2220_vm13  ;;  %2893 = vperm.xlu0 %8289, %v8481_v21   ;;  %7777 = vmatpush1.bf16.msra.mxu1 %v9934_v63  ;;  %v19081_v63 = vmov 0 }
 0x2e0   : > { %vm3370_vm6 = vmor %vm10812_vm15, %vm3114_vm12  ;;  %vm1326_vm15 = vcmp.eq.s32.totalorder %v10191_v19, %v9618_v36  ;;  %vm1328_vm12 = vcmp.eq.s32.totalorder %v10191_v19, %v9620_v50  ;;  %8257 = vset.pattern.permute.xlu1 %v18824_v58  ;;  %7762 = vmatprep.subr.bf16.mxu1 %v18770_v11  ;;  %v19067_v36 = vmov 0 }
 0x2e1   : > { %vm10851_vm11 = vmor %vm10805_vm10, %vm3113_vm4  ;;  %vm685_vm10 = vcmp.eq.s32.totalorder %v10178_v31, %v19006_v28  ;;  %1916 = vperm.xlu1 %8257, %v10171_v7   ;;  %v19026_v7 = vld [vmem:[#allocation47_spill] sm:$0xff] }
 0x2e2   : > { %vm3372_vm7 = vmor %vm2476_vm0, %vm3116_vm2  ;;  %vm686_vm0 = vcmp.eq.s32.totalorder %v10191_v19, %v19006_v28  ;;  %v2747_v46 = vpop.permute.xlu1 %2746  ;;  %vm691_vm8 = vcmp.eq.s32.totalorder %v10178_v31, %v19026_v7 }
 0x2e3   : > { %vm10861_vm13 = vmpackc.low %vm3372_vm7, %vm3370_vm6  ;;  %2896 = vperm.xlu0 %8289, %v8482_v38   ;;  %7778 = vmatpush1.bf16.msra.mxu1 %v9951_v53  ;;  %v19037_v53 = vld [vmem:[#allocation52_spill] sm:$0xff] }
 0x2e4   : > { %v19005_v25 = vsel %vm10861_vm13, 4294967295, %v19004_v25  ;;  %vm3371_vm4 = vmor %vm10835_vm9, %vm3115_vm14  ;;  %6930 = vmatprep.mubr.msk.bf16.mxu1 %vm10861_vm13, %v18306_v41  ;;  %vm688_vm9 = vcmp.eq.s32.totalorder %v10191_v19, %v19011_v40  ;;  %7202 = vmatprep.mubr.msk.bf16.mxu0 %vm10861_vm13, %v18306_v41  ;;  %v8490_v38 = vld [vmem:[%s8761_s25 + $0x138] sm:$0xff] }
 0x2e5   : > { %vm10878_vm6 = vmor %vm685_vm10, %vm1325_vm5  ;;  %vm687_vm10 = vcmp.eq.s32.totalorder %v10178_v31, %v19011_v40  ;;  %1919 = vperm.xlu1 %8257, %v8484_v47   ;;  %v8488_v40 = vld [vmem:[%s8761_s25 + $0x228] sm:$0xff] }
 0x2e6   : > { %vm10888_vm2 = vmpackc.low %vm3371_vm4, %vm10851_vm11  ;;  %vm2224_vm11 = vcmp.eq.s32.totalorder %v10191_v19, %v1854_v54  ;;  %vm1330_vm4 = vcmp.eq.s32.totalorder %v10191_v19, %v9624_v34 }
 0x2e7   : > { %v19010_v4 = vsel %vm10888_vm2, 4294967295, %v19009_v4  ;;  %vm10897_vm14 = vmor %vm686_vm0, %vm1326_vm15  ;;  %6932 = vmatmul.mubr.msk.bf16.gmra.mrb[20].mxu1 %vm10888_vm2, %v18306_v41  ;;  %vm2222_vm15 = vcmp.eq.s32.totalorder %v10191_v19, %v10781_v60  ;;  %7204 = vmatmul.mubr.msk.bf16.gmra.mrb[20].mxu0 %vm10888_vm2, %v18306_v41  ;;  %vm19022_vm0 = vcmp.eq.s32.totalorder %v10178_v31, %v9624_v34  ;;  %v8505_v34 = vld [vmem:[%s8761_s25 + $0x178] sm:$0xff] }
 0x2e8   : > { %vm1584_vm7 = vmor %vm688_vm9, %vm1328_vm12  ;;  %vm19016_vm12 = vcmp.eq.s32.totalorder %v10178_v31, %v9620_v50  ;;  %2905 = vperm.xlu0 %8289, %v8483_v43  }
 0x2e9   : > { %vm10924_vm5 = vmor %vm1584_vm7, %vm2224_vm11  ;;  %vm689_vm11 = vcmp.eq.s32.totalorder %v10178_v31, %v19019_v20  ;;  %8258 = vset.pattern.permute.xlu1 %v18821_v56 }
 0x2ea   : > { %vm10933_vm9 = vmor %vm687_vm10, %vm19016_vm12  ;;  %vm690_vm12 = vcmp.eq.s32.totalorder %v10191_v19, %v19019_v20  ;;  %2815 = vperm.xlu1 %8258, %v8484_v47   ;;  %v19069_v20 = vld [vmem:[#allocation56_spill] sm:$0xff]  ;;  %v19083_v47 = vld [vmem:[#allocation15_spill] sm:$0xff] }
 0x2eb   : > { %vm10949_vm10 = vmor %vm10897_vm14, %vm2222_vm15  ;;  %vm3118_vm14 = vcmp.eq.s32.totalorder %v10191_v19, %v2747_v46  ;;  %vm19025_vm15 = vcmp.eq.s32.totalorder %v10191_v19, %v2750_v6 }
 0x2ec   : > { %vm10959_vm2 = vmor %vm689_vm11, %vm19022_vm0  ;;  %vm2223_vm11 = vcmp.eq.s32.totalorder %v10178_v31, %v1854_v54  ;;  %8296 = vset.pattern.permute.xlu0 %v18824_v58  ;;  %v19107_v54 = vmov 0 }
 0x2ed   : > { %vm3376_vm13 = vmor %vm10924_vm5, %vm19025_vm15  ;;  %vm19029_vm5 = vcmp.eq.s32.totalorder %v10178_v31, %v9626_v52  ;;  %v1857_v52 = vpop.permute.xlu1 %1856  ;;  %2006 = vperm.xlu0 %8296, %v8485_v22   ;;  %v19084_v22 = vmov 0 }
 0x2ee   : > { %vm10973_vm0 = vmor %vm690_vm12, %vm1330_vm4  ;;  %vm3117_vm4 = vcmp.eq.s32.totalorder %v10178_v31, %v2747_v46  ;;  %8260 = vset.pattern.permute.xlu1 %v18824_v58  ;;  %v19070_v46 = vmov 0 }
 0x2ef   : > { %vm3374_vm7 = vmor %vm10949_vm10, %vm3118_vm14  ;;  %vm19034_vm10 = vcmp.eq.s32.totalorder %v10178_v31, %v10781_v60  ;;  %v19038_v60 = vmov 0  ;;  %1925 = vperm.xlu1 %8260, %v10181_v29   ;;  %v19058_v29 = vmov 0 }
 0x2f0   : > { %vm10987_vm15 = vmor %vm691_vm8, %vm19029_vm5  ;;  %vm3119_vm8 = vcmp.eq.s32.totalorder %v10178_v31, %v2750_v6  ;;  %v8496_v6 = vld [vmem:[%s8761_s25 + $0x270] sm:$0xff] }
 0x2f1   : > { %vm10992_vm12 = vmpackc.low %vm3376_vm13, %vm3374_vm7  ;;  %v1860_v26 = vpop.permute.xlu1 %1859  ;;  %2018 = vperm.xlu0 %8296, %v8486_v8  }
 0x2f2   : > { %v19033_v18 = vsel %vm10992_vm12, 4294967295, %v19032_v18  ;;  %vm2477_vm14 = vmor %vm10878_vm6, %vm19034_vm10  ;;  %6934 = vmatprep.mubr.msk.bf16.mxu1 %vm10992_vm12, %v18306_v41  ;;  %7206 = vmatprep.mubr.msk.bf16.mxu0 %vm10992_vm12, %v18306_v41  ;;  %vm692_vm6 = vcmp.eq.s32.totalorder %v10191_v19, %v19026_v7  ;;  %vm2225_vm10 = vcmp.eq.s32.totalorder %v10178_v31, %v1857_v52  ;;  %v19074_v7 = vld [vmem:[#allocation55_spill] sm:$0xff] }
 0x2f3   : > { %vm2479_vm13 = vmor %vm10933_vm9, %vm2223_vm11  ;;  %vm1333_vm9 = vcmp.eq.s32.totalorder %v10178_v31, %v9630_v32  ;;  %vm2226_vm11 = vcmp.eq.s32.totalorder %v10191_v19, %v1857_v52  ;;  %8261 = vset.pattern.permute.xlu1 %v18821_v56  ;;  %v8492_v52 = vld [vmem:[%s8761_s25 + $0x240] sm:$0xff] }
 0x2f4   : > { %vm3373_vm7 = vmor %vm2477_vm14, %vm3117_vm4  ;;  %2818 = vperm.xlu1 %8261, %v10158_v13   ;;  %v8489_v13 = vld [vmem:[%s8761_s25 + $0x230] sm:$0xff] }
 0x2f5   : > { %vm11017_vm5 = vmor %vm692_vm6, %vm1332_vm1  ;;  %vm693_vm1 = vcmp.eq.s32.totalorder %v10178_v31, %v19037_v53  ;;  %vm3121_vm6 = vcmp.eq.s32.totalorder %v10178_v31, %v10977_v12  ;;  %v2756_v28 = vpop.permute.xlu1 %2755  ;;  %8299 = vset.pattern.permute.xlu0 %v18821_v56 }
 0x2f6   : > { %vm3375_vm12 = vmor %vm2479_vm13, %vm3119_vm8  ;;  %vm2228_vm13 = vcmp.eq.s32.totalorder %v10191_v19, %v1860_v26 }
 0x2f7   : > { %vm11035_vm14 = vmpackc.low %vm3375_vm12, %vm3373_vm7  ;;  %vm2227_vm12 = vcmp.eq.s32.totalorder %v10178_v31, %v1860_v26  ;;  %vm695_vm7 = vcmp.eq.s32.totalorder %v10178_v31, %v19042_v16  ;;  %v19131_v26 = vld [vmem:[#allocation67_spill] sm:$0xff] }
 0x2f8   : > { %v19039_v60 = vsel %vm11035_vm14, 4294967295, %v19038_v60  ;;  %vm11043_vm8 = vmor %vm10959_vm2, %vm2225_vm10  ;;  %6936 = vmatmul.mubr.msk.bf16.gmra.mrb[24].mxu1 %vm11035_vm14, %v18306_v41  ;;  %7208 = vmatmul.mubr.msk.bf16.gmra.mrb[24].mxu0 %vm11035_vm14, %v18306_v41  ;;  %vm1334_vm2 = vcmp.eq.s32.totalorder %v10191_v19, %v9630_v32  ;;  %vm696_vm14 = vcmp.eq.s32.totalorder %v10191_v19, %v19042_v16  ;;  %v19048_v32 = vmov 0  ;;  %v8514_v16 = vld [vmem:[%s8761_s25 + $0x2e8] sm:$0xff] }
 0x2f9   : > { %vm11062_vm10 = vmor %vm693_vm1, %vm1333_vm9  ;;  %vm19047_vm9 = vcmp.eq.s32.totalorder %v10178_v31, %v9632_v39  ;;  %v8487_v39 = vld [vmem:[%s8761_s25 + $0x210] sm:$0xff]  ;;  %v1866_v21 = vpop.permute.xlu1 %1865  ;;  %8262 = vset.pattern.permute.xlu1 %v18824_v58 }
 0x2fa   : > { %vm11072_vm4 = vmor %vm10973_vm0, %vm2226_vm11  ;;  %vm694_vm11 = vcmp.eq.s32.totalorder %v10191_v19, %v19037_v53  ;;  %2908 = vperm.xlu0 %8299, %v8487_v39   ;;  %1928 = vperm.xlu1 %8262, %v10194_v2   ;;  %v11184_v2 = vpop.permute.xlu0 %1874  ;;  %v8499_v53 = vld [vmem:[%s8761_s25 + $0x280] sm:$0xff] }
 0x2fb   : > { %vm11082_vm1 = vmor %vm695_vm7, %vm19047_vm9 }
 0x2fc   : > { %v19049_v32 = vsel %vm11082_vm1, 4294967295, %v19048_v32  ;;  %vm11090_vm0 = vmor %vm10987_vm15, %vm2227_vm12  ;;  %vm19057_vm15 = vcmp.eq.s32.totalorder %v10191_v19, %v10977_v12  ;;  %v19077_v12 = vld [vmem:[#allocation16_spill] sm:$0xff] }
 0x2fd   : > { %vm11099_vm7 = vmor %vm696_vm14, %vm19052_vm3  ;;  %vm3124_vm14 = vcmp.eq.s32.totalorder %v10191_v19, %v2756_v28  ;;  %v2759_v3 = vpop.permute.xlu1 %2758 }
 0x2fe   : > { %vm2484_vm9 = vmor %vm11017_vm5, %vm2228_vm13  ;;  %vm3123_vm5 = vcmp.eq.s32.totalorder %v10178_v31, %v2756_v28  ;;  %2917 = vperm.xlu0 %8299, %v8488_v40   ;;  %1931 = vperm.xlu1 %8262, %v8490_v38   ;;  %v2765_v43 = vpop.permute.xlu0 %2764  ;;  %v19106_v28 = vld [vmem:[#allocation20_spill] sm:$0xff]  ;;  %v8495_v40 = vld [vmem:[%s8761_s25 + $0x268] sm:$0xff] }
 0x2ff   : > { %vm11106_vm1 = vmor %vm694_vm11, %vm1334_vm2  ;;  %vm2229_vm2 = vcmp.eq.s32.totalorder %v10178_v31, %v1863_v27 }
 0x300   : > { %vm3378_vm3 = vmor %vm11072_vm4, %vm19057_vm15  ;;  %vm2232_vm15 = vcmp.eq.s32.totalorder %v10191_v19, %v1866_v21 }
 0x301   : > { %vm3377_vm12 = vmor %vm11043_vm8, %vm3121_vm6  ;;  %vm2230_vm8 = vcmp.eq.s32.totalorder %v10191_v19, %v1863_v27  ;;  %v1869_v50 = vpop.permute.xlu1 %1868 }
 0x302   : > { %vm3380_vm13 = vmor %vm2484_vm9, %vm3124_vm14  ;;  %2920 = vperm.xlu0 %8299, %v8489_v13   ;;  %8263 = vset.pattern.permute.xlu1 %v18821_v56  ;;  %v2774_v8 = vpop.permute.xlu0 %2773 }
 0x303   : > { %vm11123_vm11 = vmpackc.low %vm3380_vm13, %vm3378_vm3  ;;  %vm3128_vm3 = vcmp.eq.s32.totalorder %v10191_v19, %v11025_v35  ;;  %2827 = vperm.xlu1 %8263, %v8490_v38   ;;  %v19112_v38 = vld [vmem:[#allocation18_spill] sm:$0xff] }
 0x304   : > { %v19059_v29 = vsel %vm11123_vm11, 4294967295, %v19058_v29  ;;  %6938 = vmatprep.mubr.msk.bf16.mxu1 %vm11123_vm11, %v18306_v41  ;;  %vm3379_vm4 = vmor %vm11090_vm0, %vm3123_vm5  ;;  %7210 = vmatprep.mubr.msk.bf16.mxu0 %vm11123_vm11, %v18306_v41  ;;  %vm2231_vm0 = vcmp.eq.s32.totalorder %v10178_v31, %v1866_v21  ;;  %vm19064_vm5 = vnez %v19049_v32  ;;  %vm3130_vm11 = vcmp.eq.s32.totalorder %v10191_v19, %v2765_v43  ;;  %v19100_v32 = vld [vmem:[#allocation24_spill] sm:$0xff] }
 0x305   : > { %vm11137_vm6 = vmpackc.low %vm3379_vm4, %vm3377_vm12  ;;  %vm3125_vm4 = vcmp.eq.s32.totalorder %v10178_v31, %v2759_v3  ;;  %v1872_v48 = vpop.permute.xlu1 %1871 }
 0x306   : > { %v19061_v55 = vsel %vm11137_vm6, 4294967295, %v19060_v55  ;;  %vm11144_vm9 = vmor %vm11062_vm10, %vm2229_vm2  ;;  %6940 = vmatmul.mubr.msk.bf16.gmra.mrb[28].mxu1 %vm11137_vm6, %v18306_v41  ;;  %7212 = vmatmul.mubr.msk.bf16.gmra.mrb[28].mxu0 %vm11137_vm6, %v18306_v41  ;;  %vm3127_vm10 = vcmp.eq.s32.totalorder %v10178_v31, %v11025_v35  ;;  %v19086_v35 = vld [vmem:[#allocation59_spill] sm:$0xff]  ;;  %v11338_v21 = vpop.permute.xlu0 %2776 }
 0x307   : > { %vm2487_vm14 = vmor %vm19064_vm5, %vm2231_vm0  ;;  %vm3126_vm0 = vcmp.eq.s32.totalorder %v10191_v19, %v2759_v3  ;;  %2929 = vperm.xlu0 %8299, %v8491_v59   ;;  %8264 = vset.pattern.permute.xlu1 %v18824_v58 }
 0x308   : > { %vm2488_vm12 = vmor %vm11099_vm7, %vm2232_vm15  ;;  %vm1338_vm15 = vcmp.eq.s32.totalorder %v10191_v19, %v9636_v30  ;;  %1937 = vperm.xlu1 %8264, %v19100_v32  }
 0x309   : > { %vm2486_vm13 = vmor %vm11106_vm1, %vm2230_vm8  ;;  %vm1337_vm1 = vcmp.eq.s32.totalorder %v10178_v31, %v9636_v30  ;;  %v19080_v30 = vld [vmem:[#allocation60_spill] sm:$0xff]  ;;  %v2768_v45 = vpop.permute.xlu1 %2767 }
 0x30a   : > { %vm3384_vm2 = vmor %vm2488_vm12, %vm3128_vm3  ;;  %v11368_v3 = vpop.permute.xlu0 %2785 }
 0x30b   : > { %vm11172_vm5 = vmor %vm2487_vm14, %vm3127_vm10  ;;  %vm697_vm14 = vcmp.eq.s32.totalorder %v10178_v31, %v19069_v20  ;;  %vm1339_vm10 = vcmp.eq.s32.totalorder %v10178_v31, %v9638_v37  ;;  %8306 = vset.pattern.permute.xlu0 %v18824_v58 }
 0x30c   : > { %vm3382_vm7 = vmor %vm2486_vm13, %vm3126_vm0  ;;  %2030 = vperm.xlu0 %8306, %v8492_v52   ;;  %8265 = vset.pattern.permute.xlu1 %v18821_v56  ;;  %v19168_v52 = vmov 0 }
 0x30d   : > { %vm11178_vm8 = vmpackc.low %vm3384_vm2, %vm3382_vm7  ;;  %vm1340_vm2 = vcmp.eq.s32.totalorder %v10191_v19, %v9638_v37  ;;  %vm700_vm7 = vcmp.eq.s32.totalorder %v10191_v19, %v19074_v7  ;;  %2830 = vperm.xlu1 %8265, %v19106_v28   ;;  %v1878_v39 = vpop.permute.xlu1 %1877  ;;  %v19152_v28 = vmov 0  ;;  %v19164_v37 = vmov 0 }
 0x30e   : > { %v19068_v36 = vsel %vm11178_vm8, 4294967295, %v19067_v36  ;;  %vm3381_vm3 = vmor %vm11144_vm9, %vm3125_vm4  ;;  %6942 = vmatprep.mubr.msk.bf16.mxu1 %vm11178_vm8, %v18306_v41  ;;  %7214 = vmatprep.mubr.msk.bf16.mxu0 %vm11178_vm8, %v18306_v41  ;;  %vm698_vm9 = vcmp.eq.s32.totalorder %v10191_v19, %v19069_v20  ;;  %vm699_vm4 = vcmp.eq.s32.totalorder %v10178_v31, %v19074_v7  ;;  %v19113_v20 = vmov 0  ;;  %v8498_v7 = vld [vmem:[%s8761_s25 + $0x288] sm:$0xff] }
 0x30f   : > { %vm11202_vm12 = vmpackc.low %vm11172_vm5, %vm3381_vm3  ;;  %vm1341_vm5 = vcmp.eq.s32.totalorder %v10178_v31, %v19077_v12  ;;  %vm701_vm3 = vcmp.eq.s32.totalorder %v10178_v31, %v19080_v30 }
 0x310   : > { %v19071_v46 = vsel %vm11202_vm12, 4294967295, %v19070_v46  ;;  %vm11211_vm13 = vmor %vm697_vm14, %vm1337_vm1  ;;  %6944 = vmatmul.mubr.msk.bf16.gmra.mrb[32].mxu1 %vm11202_vm12, %v18306_v41  ;;  %7216 = vmatmul.mubr.msk.bf16.gmra.mrb[32].mxu0 %vm11202_vm12, %v18306_v41  ;;  %vm19087_vm12 = vcmp.eq.s32.totalorder %v10178_v31, %v1869_v50 }
 0x311   : > { %vm11225_vm0 = vmor %vm698_vm9, %vm1338_vm15  ;;  %vm703_vm9 = vcmp.eq.s32.totalorder %v10178_v31, %v19086_v35  ;;  %vm1342_vm15 = vcmp.eq.s32.totalorder %v10191_v19, %v19077_v12  ;;  %2042 = vperm.xlu0 %8306, %v8493_v5   ;;  %8267 = vset.pattern.permute.xlu1 %v18824_v58  ;;  %v19119_v12 = vld [vmem:[#allocation63_spill] sm:$0xff]  ;;  %v19180_v5 = vld [vmem:[#allocation29_spill] sm:$0xff] }
 0x312   : > { %vm11236_vm1 = vmor %vm699_vm4, %vm1339_vm10  ;;  %vm1343_vm10 = vcmp.eq.s32.totalorder %v10178_v31, %v19083_v47  ;;  %1940 = vperm.xlu1 %8267, %v10346_v9   ;;  %v2771_v13 = vpop.permute.xlu1 %2770  ;;  %v8497_v9 = vld [vmem:[%s8761_s25 + $0x158] sm:$0xff] }
 0x313   : > { %vm11245_vm14 = vmor %vm700_vm7, %vm1340_vm2  ;;  %vm1344_vm2 = vcmp.eq.s32.totalorder %v10191_v19, %v19083_v47  ;;  %vm2235_vm7 = vcmp.eq.s32.totalorder %v10178_v31, %v1872_v48 }
 0x314   : > { %v19082_v63 = vsel %vm11245_vm14, 4294967295, %v19081_v63  ;;  %vm11256_vm4 = vmor %vm701_vm3, %vm1341_vm5  ;;  %vm2236_vm5 = vcmp.eq.s32.totalorder %v10191_v19, %v1872_v48  ;;  %vm704_vm3 = vcmp.eq.s32.totalorder %v10191_v19, %v19086_v35  ;;  %v19127_v48 = vld [vmem:[#allocation21_spill] sm:$0xff]  ;;  %v19233_v35 = vld [vmem:[#allocation84_spill] sm:$0xff] }
 0x315   : > { %v19085_v22 = vsel %vm11256_vm4, 4294967295, %v19084_v22  ;;  %vm11271_vm8 = vmor %vm11211_vm13, %vm19087_vm12  ;;  %vm19092_vm4 = vcmp.eq.s32.totalorder %v10191_v19, %v1869_v50  ;;  %vm702_vm12 = vcmp.eq.s32.totalorder %v10191_v19, %v19080_v30  ;;  %8309 = vset.pattern.permute.xlu0 %v18821_v56  ;;  %v19115_v50 = vld [vmem:[#allocation64_spill] sm:$0xff]  ;;  %v19167_v30 = vld [vmem:[#allocation25_spill] sm:$0xff] }
 0x316   : > { %vm11278_vm6 = vmor %vm703_vm9, %vm1343_vm10  ;;  %2932 = vperm.xlu0 %8309, %v8494_v1   ;;  %1943 = vperm.xlu1 %8267, %v8497_v9   ;;  %v8500_v1 = vld [vmem:[%s8761_s25 + $0x2a0] sm:$0xff] }
 0x317   : > { %vm2490_vm14 = vmor %vm11225_vm0, %vm19092_vm4  ;;  %vm19099_vm0 = vnez %v19082_v63  ;;  %v1881_v59 = vpop.permute.xlu1 %1880  ;;  %v19124_v63 = vld [vmem:[#allocation22_spill] sm:$0xff] }
 0x318   : > { %vm11289_vm13 = vmor %vm704_vm3, %vm1344_vm2  ;;  %vm3132_vm2 = vcmp.eq.s32.totalorder %v10191_v19, %v2768_v45  ;;  %vm3131_vm3 = vcmp.eq.s32.totalorder %v10178_v31, %v2768_v45  ;;  %v19148_v45 = vmov 0 }
 0x319   : > { %vm11295_vm10 = vmor %vm11236_vm1, %vm2235_vm7  ;;  %vm3129_vm1 = vcmp.eq.s32.totalorder %v10178_v31, %v2765_v43  ;;  %v11420_v43 = vpop.permute.xlu0 %1886 }
 0x31a   : > { %vm11301_vm9 = vmor %vm702_vm12, %vm1342_vm15  ;;  %vm2237_vm15 = vcmp.eq.s32.totalorder %v10178_v31, %v11184_v2  ;;  %2941 = vperm.xlu0 %8309, %v8495_v40   ;;  %8268 = vset.pattern.permute.xlu1 %v18821_v56 }
 0x31b   : > { %v19098_v42 = vsel %vm11301_vm9, 4294967295, %v19097_v42  ;;  %vm2492_vm4 = vmor %vm19099_vm0, %vm2236_vm5  ;;  %2839 = vperm.xlu1 %8268, %v8497_v9   ;;  %v1884_v47 = vpop.permute.xlu1 %1883 }
 0x31c   : > { %vm3386_vm7 = vmor %vm2490_vm14, %vm3130_vm11  ;;  %vm19103_vm11 = vnez %v19085_v22  ;;  %v19128_v22 = vld [vmem:[#allocation68_spill] sm:$0xff] }
 0x31d   : > { %vm3388_vm12 = vmor %vm2492_vm4, %vm3132_vm2  ;;  %vm2239_vm4 = vcmp.eq.s32.totalorder %v10178_v31, %v1878_v39  ;;  %v11503_v32 = vpop.permute.xlu0 %1898 }
 0x31e   : > { %vm11316_vm9 = vmpackc.low %vm3388_vm12, %vm3386_vm7  ;;  %vm3136_vm7 = vcmp.eq.s32.totalorder %v10191_v19, %v2774_v8  ;;  %vm19109_vm12 = vnez %v19098_v42  ;;  %2944 = vperm.xlu0 %8309, %v8496_v6   ;;  %v19221_v6 = vld [vmem:[#allocation33_spill] sm:$0xff] }
 0x31f   : > { %v19102_v14 = vsel %vm11316_vm9, 4294967295, %v19101_v14  ;;  %vm3385_vm5 = vmor %vm11271_vm8, %vm3129_vm1  ;;  %6946 = vmatprep.mubr.msk.bf16.mxu1 %vm11316_vm9, %v18306_v41  ;;  %vm2238_vm8 = vcmp.eq.s32.totalorder %v10191_v19, %v11184_v2  ;;  %7218 = vmatprep.mubr.msk.bf16.mxu0 %vm11316_vm9, %v18306_v41  ;;  %vm2240_vm1 = vcmp.eq.s32.totalorder %v10191_v19, %v1878_v39  ;;  %v19110_v2 = vmov 0  ;;  %v8501_v39 = vld [vmem:[%s8761_s25 + $0x160] sm:$0xff] }
 0x320   : > { %vm11326_vm14 = vmor %vm19103_vm11, %vm2237_vm15  ;;  %vm3135_vm15 = vcmp.eq.s32.totalorder %v10178_v31, %v2774_v8  ;;  %vm3133_vm11 = vcmp.eq.s32.totalorder %v10178_v31, %v2771_v13  ;;  %8270 = vset.pattern.permute.xlu1 %v18824_v58  ;;  %v2780_v27 = vpop.permute.xlu1 %2779  ;;  %vm2245_vm9 = vcmp.eq.s32.totalorder %v10178_v31, %v11420_v43  ;;  %v8411_v8 = vld [vmem:[%s17959_s1 + $0x100] sm:$0xff]  }
 0x321   : > { %vm3387_vm0 = vmor %vm11295_vm10, %vm3131_vm3  ;;  %1949 = vperm.xlu1 %8270, %v10377_v57   ;;  %v11529_v57 = vpop.permute.xlu0 %2788  ;;  %5722 = vmatpush1.bf16.msra.mxu0 %v8411_v8  ;;  %v19215_v8 = vmov 0 }
 0x322   : > { %vm11345_vm2 = vmpackc.low %vm3387_vm0, %vm3385_vm5  ;;  %vm3134_vm0 = vcmp.eq.s32.totalorder %v10191_v19, %v2771_v13  ;;  %2953 = vperm.xlu0 %8309, %v8498_v7   ;;  %v19154_v13 = vmov 0  ;;  %v19163_v7 = vld [vmem:[#allocation26_spill] sm:$0xff]  ;;  %5723 = vmatprep.subr.bf16.mxu0 %v18770_v11 }
 0x323   : > { %v19108_v54 = vsel %vm11345_vm2, 4294967295, %v19107_v54  ;;  %vm2495_vm10 = vmor %vm11278_vm6, %vm2239_vm4  ;;  %6948 = vmatmul.mubr.msk.bf16.gmra.mrb[36].mxu1 %vm11345_vm2, %v18306_v41  ;;  %7220 = vmatmul.mubr.msk.bf16.gmra.mrb[36].mxu0 %vm11345_vm2, %v18306_v41  ;;  %vm3139_vm2 = vcmp.eq.s32.totalorder %v10178_v31, %v2780_v27 }
 0x324   : > { %vm2496_vm3 = vmor %vm11289_vm13, %vm2240_vm1 }
 0x325   : > { %vm2494_vm6 = vmor %vm19109_vm12, %vm2238_vm8  ;;  %vm1345_vm8 = vcmp.eq.s32.totalorder %v10178_v31, %v19112_v38  ;;  %vm1347_vm12 = vcmp.eq.s32.totalorder %v10178_v31, %v19116_v10  ;;  %8271 = vset.pattern.permute.xlu1 %v18821_v56  ;;  %v1890_v40 = vpop.permute.xlu1 %1889  ;;  %v11582_v9 = vpop.permute.xlu0 %2797 }
 0x326   : > { %vm3392_vm5 = vmor %vm2496_vm3, %vm3136_vm7  ;;  %vm705_vm3 = vcmp.eq.s32.totalorder %v10178_v31, %v19115_v50  ;;  %8316 = vset.pattern.permute.xlu0 %v18824_v58  ;;  %2842 = vperm.xlu1 %8271, %v8501_v39   ;;  %v19218_v39 = vmov 0 }
 0x327   : > { %vm3391_vm4 = vmor %vm2495_vm10, %vm3135_vm15  ;;  %vm1346_vm10 = vcmp.eq.s32.totalorder %v10191_v19, %v19112_v38  ;;  %2054 = vperm.xlu0 %8316, %v8499_v53   ;;  %v8507_v53 = vld [vmem:[%s8761_s25 + $0x2c8] sm:$0xff]  ;;  %v8508_v38 = vld [vmem:[%s8761_s25 + $0x2c0] sm:$0xff] }
 0x328   : > { %vm3390_vm13 = vmor %vm2494_vm6, %vm3134_vm0 }
 0x329   : > { %vm11371_vm1 = vmpackc.low %vm3392_vm5, %vm3390_vm13  ;;  %vm1348_vm5 = vcmp.eq.s32.totalorder %v10191_v19, %v19116_v10  ;;  %vm708_vm13 = vcmp.eq.s32.totalorder %v10191_v19, %v19119_v12 }
 0x32a   : > { %v19111_v2 = vsel %vm11371_vm1, 4294967295, %v19110_v2  ;;  %6950 = vmatprep.mubr.msk.bf16.mxu1 %vm11371_vm1, %v18306_v41  ;;  %vm3389_vm7 = vmor %vm11326_vm14, %vm3133_vm11  ;;  %7222 = vmatprep.mubr.msk.bf16.mxu0 %vm11371_vm1, %v18306_v41  ;;  %vm706_vm14 = vcmp.eq.s32.totalorder %v10191_v19, %v19115_v50  ;;  %vm707_vm11 = vcmp.eq.s32.totalorder %v10178_v31, %v19119_v12  ;;  %vm19141_vm1 = vcmp.eq.s32.totalorder %v10178_v31, %v1884_v47  ;;  %v8504_v50 = vld [vmem:[%s8761_s25 + $0x2a8] sm:$0xff]  ;;  %v2783_v10 = vpop.permute.xlu1 %2782  ;;  %v8506_v12 = vld [vmem:[%s8761_s25 + $0x2b0] sm:$0xff] }
 0x32b   : > { %vm11388_vm15 = vmpackc.low %vm3391_vm4, %vm3389_vm7  ;;  %vm2241_vm4 = vcmp.eq.s32.totalorder %v10178_v31, %v1881_v59  ;;  %vm19132_vm7 = vcmp.eq.s32.totalorder %v10178_v31, %v19124_v63  ;;  %2066 = vperm.xlu0 %8316, %v8500_v1   ;;  %8272 = vset.pattern.permute.xlu1 %v18824_v58  ;;  %v8412_v1 = vld [vmem:[%s17959_s1 + $0x108] sm:$0xff]  }
 0x32c   : > { %v19114_v20 = vsel %vm11388_vm15, 4294967295, %v19113_v20  ;;  %6952 = vmatmul.mubr.msk.bf16.gmra.mrb[40].mxu1 %vm11388_vm15, %v18306_v41  ;;  %vm11405_vm6 = vmor %vm705_vm3, %vm1345_vm8  ;;  %7224 = vmatmul.mubr.msk.bf16.gmra.mrb[40].mxu0 %vm11388_vm15, %v18306_v41  ;;  %vm712_vm15 = vcmp.eq.s32.totalorder %v10191_v19, %v19131_v26 }
 0x32d   : > { %vm11416_vm0 = vmor %vm706_vm14, %vm1346_vm10  ;;  %5724 = vmatpush1.bf16.msra.mxu0 %v8412_v1 }
 0x32e   : > { %vm11426_vm8 = vmor %vm707_vm11, %vm1347_vm12  ;;  %vm709_vm11 = vcmp.eq.s32.totalorder %v10178_v31, %v19128_v22  ;;  %vm1350_vm12 = vcmp.eq.s32.totalorder %v10191_v19, %v19124_v63  ;;  %v11616_v63 = vpop.permute.xlu0 %2800  ;;  %5725 = vmatprep.subr.bf16.mxu0 %v18770_v11 }
 0x32f   : > { %vm11433_vm3 = vmor %vm708_vm13, %vm1348_vm5  ;;  %vm711_vm13 = vcmp.eq.s32.totalorder %v10178_v31, %v19131_v26  ;;  %8319 = vset.pattern.permute.xlu0 %v18821_v56  ;;  %v8513_v26 = vld [vmem:[%s8761_s25 + $0x190] sm:$0xff] }
 0x330   : > { %vm11447_vm10 = vmor %vm11405_vm6, %vm2241_vm4  ;;  %vm19135_vm4 = vcmp.eq.s32.totalorder %v10191_v19, %v1881_v59  ;;  %vm19147_vm6 = vcmp.eq.s32.totalorder %v10191_v19, %v1884_v47  ;;  %v8503_v59 = vld [vmem:[%s8761_s25 + $0x170] sm:$0xff]  ;;  %v1893_v47 = vpop.permute.xlu1 %1892 }
 0x331   : > { %vm11460_vm14 = vmor %vm709_vm11, %vm19132_vm7  ;;  %vm19138_vm7 = vcmp.eq.s32.totalorder %v10178_v31, %v19127_v48  ;;  %1952 = vperm.xlu1 %8272, %v8503_v59   ;;  %v19278_v59 = vld [vmem:[#allocation46_spill] sm:$0xff] }
 0x332   : > { %vm11470_vm5 = vmor %vm11416_vm0, %vm19135_vm4  ;;  %vm710_vm4 = vcmp.eq.s32.totalorder %v10191_v19, %v19128_v22  ;;  %v19172_v22 = vld [vmem:[#allocation71_spill] sm:$0xff] }
 0x333   : > { %vm11479_vm11 = vmor %vm711_vm13, %vm19138_vm7  ;;  %vm19144_vm13 = vcmp.eq.s32.totalorder %v10191_v19, %v19127_v48 }
 0x334   : > { %vm11489_vm0 = vmor %vm11426_vm8, %vm19141_vm1  ;;  %v1896_v42 = vpop.permute.xlu1 %1895 }
 0x335   : > { %vm11499_vm7 = vmor %vm712_vm15, %vm19144_vm13  ;;  %vm19150_vm15 = vcmp.eq.s32.totalorder %v10191_v19, %v11338_v21  ;;  %1955 = vperm.xlu1 %8272, %v8505_v34  }
 0x336   : > { %vm2500_vm1 = vmor %vm11433_vm3, %vm19147_vm6  ;;  %vm3140_vm3 = vcmp.eq.s32.totalorder %v10191_v19, %v2780_v27  ;;  %v19184_v27 = vld [vmem:[#allocation75_spill] sm:$0xff] }
 0x337   : > { %vm11510_vm8 = vmor %vm710_vm4, %vm1350_vm12  ;;  %vm19151_vm12 = vcmp.eq.s32.totalorder %v10178_v31, %v11338_v21  ;;  %v8502_v21 = vld [vmem:[%s8761_s25 + $0x290] sm:$0xff] }
 0x338   : > { %v19149_v45 = vsel %vm11510_vm8, 4294967295, %v19148_v45  ;;  %vm3394_vm13 = vmor %vm11470_vm5, %vm19150_vm15  ;;  %2956 = vperm.xlu0 %8319, %v8502_v21   ;;  %v11696_v21 = vpop.permute.xlu0 %2809 }
 0x339   : > { %vm3393_vm6 = vmor %vm11447_vm10, %vm19151_vm12  ;;  %vm19160_vm12 = vnez %v19149_v45  ;;  %8273 = vset.pattern.permute.xlu1 %v18821_v56  ;;  %v19181_v45 = vld [vmem:[#allocation76_spill] sm:$0xff] }
 0x33a   : > { %vm3396_vm4 = vmor %vm2500_vm1, %vm3140_vm3  ;;  %vm2246_vm1 = vcmp.eq.s32.totalorder %v10191_v19, %v11420_v43  ;;  %v19166_v43 = vld [vmem:[#allocation72_spill] sm:$0xff]  ;;  %2851 = vperm.xlu1 %8273, %v8505_v34   ;;  %v2792_v34 = vpop.permute.xlu1 %2791 }
 0x33b   : > { %vm11532_vm8 = vmpackc.low %vm3396_vm4, %vm3394_vm13  ;;  %vm3144_vm13 = vcmp.eq.s32.totalorder %v10191_v19, %v11368_v3  ;;  %vm3141_vm4 = vcmp.eq.s32.totalorder %v10178_v31, %v2783_v10 }
 0x33c   : > { %v19153_v28 = vsel %vm11532_vm8, 4294967295, %v19152_v28  ;;  %vm3395_vm5 = vmor %vm11489_vm0, %vm3139_vm2  ;;  %6954 = vmatprep.mubr.msk.bf16.mxu1 %vm11532_vm8, %v18306_v41  ;;  %7226 = vmatprep.mubr.msk.bf16.mxu0 %vm11532_vm8, %v18306_v41  ;;  %vm2247_vm2 = vcmp.eq.s32.totalorder %v10178_v31, %v1890_v40  ;;  %vm2248_vm0 = vcmp.eq.s32.totalorder %v10191_v19, %v1890_v40  ;;  %vm3147_vm8 = vcmp.eq.s32.totalorder %v10178_v31, %v2792_v34  ;;  %v19220_v40 = vld [vmem:[#allocation80_spill] sm:$0xff] }
 0x33d   : > { %vm11544_vm10 = vmpackc.low %vm3395_vm5, %vm3393_vm6  ;;  %2965 = vperm.xlu0 %8319, %v8504_v50   ;;  %vm3142_vm5 = vcmp.eq.s32.totalorder %v10191_v19, %v2783_v10  ;;  %v8509_v50 = vld [vmem:[%s8761_s25 + $0x188] sm:$0xff]  ;;  %v8521_v10 = vld [vmem:[%s8761_s25 + $0x320] sm:$0xff] }
 0x33e   : > { %v19155_v13 = vsel %vm11544_vm10, 4294967295, %v19154_v13  ;;  %vm11552_vm15 = vmor %vm11460_vm14, %vm2245_vm9  ;;  %6956 = vmatmul.mubr.msk.bf16.gmra.mrb[44].mxu1 %vm11544_vm10, %v18306_v41  ;;  %7228 = vmatmul.mubr.msk.bf16.gmra.mrb[44].mxu0 %vm11544_vm10, %v18306_v41  ;;  %vm3143_vm14 = vcmp.eq.s32.totalorder %v10178_v31, %v11368_v3  ;;  %v1902_v48 = vpop.permute.xlu1 %1901 }
 0x33f   : > { %vm11568_vm9 = vmor %vm11479_vm11, %vm2247_vm2  ;;  %8274 = vset.pattern.permute.xlu1 %v18824_v58 }
 0x340   : > { %vm2504_vm3 = vmor %vm11499_vm7, %vm2248_vm0  ;;  %1961 = vperm.xlu1 %8274, %v8509_v50   ;;  %v19224_v50 = vld [vmem:[#allocation79_spill] sm:$0xff] }
 0x341   : > { %vm2502_vm11 = vmor %vm19160_vm12, %vm2246_vm1  ;;  %vm1353_vm1 = vcmp.eq.s32.totalorder %v10178_v31, %v19163_v7  ;;  %2968 = vperm.xlu0 %8319, %v8506_v12   ;;  %v8510_v12 = vld [vmem:[%s8761_s25 + $0x2e0] sm:$0xff] }
 0x342   : > { %vm3400_vm6 = vmor %vm2504_vm3, %vm3144_vm13  ;;  %vm1354_vm13 = vcmp.eq.s32.totalorder %v10191_v19, %v19163_v7  ;;  %vm1355_vm3 = vcmp.eq.s32.totalorder %v10178_v31, %v19167_v30  ;;  %v19229_v7 = vld [vmem:[#allocation38_spill] sm:$0xff] }
 0x343   : > { %vm11590_vm7 = vmor %vm11568_vm9, %vm3143_vm14  ;;  %vm713_vm14 = vcmp.eq.s32.totalorder %v10178_v31, %v19166_v43 }
 0x344   : > { %vm3398_vm2 = vmor %vm2502_vm11, %vm3142_vm5  ;;  %vm714_vm11 = vcmp.eq.s32.totalorder %v10191_v19, %v19166_v43  ;;  %v11764_v43 = vpop.permute.xlu0 %1910  ;;  %8275 = vset.pattern.permute.xlu1 %v18821_v56 }
 0x345   : > { %vm11598_vm0 = vmpackc.low %vm3400_vm6, %vm3398_vm2  ;;  %vm1356_vm6 = vcmp.eq.s32.totalorder %v10191_v19, %v19167_v30  ;;  %2977 = vperm.xlu0 %8319, %v8507_v53   ;;  %vm716_vm2 = vcmp.eq.s32.totalorder %v10191_v19, %v19172_v22  ;;  %v8511_v30 = vld [vmem:[%s8761_s25 + $0x180] sm:$0xff] }
 0x346   : > { %v19165_v37 = vsel %vm11598_vm0, 4294967295, %v19164_v37  ;;  %6958 = vmatprep.mubr.msk.bf16.mxu1 %vm11598_vm0, %v18306_v41  ;;  %7230 = vmatprep.mubr.msk.bf16.mxu0 %vm11598_vm0, %v18306_v41  ;;  %vm3397_vm9 = vmor %vm11552_vm15, %vm3141_vm4  ;;  %vm715_vm4 = vcmp.eq.s32.totalorder %v10178_v31, %v19172_v22  ;;  %vm19202_vm0 = vcmp.eq.s32.totalorder %v10178_v31, %v1896_v42  ;;  %v19209_v22 = vmov 0 }
 0x347   : > { %vm11620_vm12 = vmpackc.low %vm11590_vm7, %vm3397_vm9  ;;  %vm2250_vm7 = vcmp.eq.s32.totalorder %v10191_v19, %v1893_v47  ;;  %2854 = vperm.xlu1 %8275, %v8511_v30   ;;  %v19259_v30 = vmov 0 }
 0x348   : > { %v19169_v52 = vsel %vm11620_vm12, 4294967295, %v19168_v52  ;;  %vm11629_vm15 = vmor %vm713_vm14, %vm1353_vm1  ;;  %6960 = vmatmul.mubr.msk.bf16.gmra.mrb[48].mxu1 %vm11620_vm12, %v18306_v41  ;;  %7232 = vmatmul.mubr.msk.bf16.gmra.mrb[48].mxu0 %vm11620_vm12, %v18306_v41  ;;  %v11821_v53 = vpop.permute.xlu0 %1922 }
 0x349   : > { %vm11646_vm5 = vmor %vm714_vm11, %vm1354_vm13  ;;  %vm1357_vm13 = vcmp.eq.s32.totalorder %v10178_v31, %v19177_v51  ;;  %vm719_vm11 = vcmp.eq.s32.totalorder %v10178_v31, %v19184_v27  ;;  %8326 = vset.pattern.permute.xlu0 %v18824_v58 }
 0x34a   : > { %vm11658_vm1 = vmor %vm715_vm4, %vm1355_vm3  ;;  %vm717_vm3 = vcmp.eq.s32.totalorder %v10178_v31, %v19181_v45  ;;  %vm2252_vm4 = vcmp.eq.s32.totalorder %v10191_v19, %v1896_v42  ;;  %2078 = vperm.xlu0 %8326, %v8508_v38   ;;  %v8515_v42 = vld [vmem:[%s8761_s25 + $0x198] sm:$0xff]  ;;  %v8516_v38 = vld [vmem:[%s8761_s25 + $0x2f0] sm:$0xff] }
 0x34b   : > { %vm11664_vm9 = vmor %vm716_vm2, %vm1356_vm6  ;;  %8277 = vset.pattern.permute.xlu1 %v18824_v58 }
 0x34c   : > { %vm11684_vm2 = vmor %vm11646_vm5, %vm2250_vm7  ;;  %vm720_vm5 = vcmp.eq.s32.totalorder %v10191_v19, %v19184_v27  ;;  %vm19187_vm7 = vcmp.eq.s32.totalorder %v10178_v31, %v19180_v5  ;;  %1964 = vperm.xlu1 %8277, %v8513_v26   ;;  %v19236_v26 = vld [vmem:[#allocation83_spill] sm:$0xff] }
 0x34d   : > { %vm11692_vm12 = vmor %vm717_vm3, %vm1357_vm13  ;;  %vm19190_vm13 = vcmp.eq.s32.totalorder %v10178_v31, %v1893_v47  ;;  %v19232_v47 = vld [vmem:[#allocation37_spill] sm:$0xff] }
 0x34e   : > { %vm11705_vm6 = vmor %vm719_vm11, %vm19187_vm7  ;;  %vm718_vm11 = vcmp.eq.s32.totalorder %v10191_v19, %v19181_v45  ;;  %vm19193_vm7 = vcmp.eq.s32.totalorder %v10191_v19, %v19180_v5  ;;  %2090 = vperm.xlu0 %8326, %v8510_v12   ;;  %v11833_v5 = vpop.permute.xlu0 %2812  ;;  %v19217_v45 = vld [vmem:[#allocation34_spill] sm:$0xff] }
 0x34f   : > { %vm11713_vm3 = vmor %vm11629_vm15, %vm19190_vm13  ;;  %vm19196_vm15 = vcmp.eq.s32.totalorder %v10191_v19, %v11529_v57 }
 0x350   : > { %vm11725_vm14 = vmor %vm720_vm5, %vm19193_vm7  ;;  %vm19199_vm5 = vcmp.eq.s32.totalorder %v10191_v19, %v19177_v51  ;;  %v2795_v51 = vpop.permute.xlu1 %2794  ;;  %1967 = vperm.xlu1 %8277, %v8515_v42  }
 0x351   : > { %vm11735_vm13 = vmor %vm11684_vm2, %vm19196_vm15  ;;  %vm3145_vm2 = vcmp.eq.s32.totalorder %v10178_v31, %v11529_v57  ;;  %v19205_v57 = vmov 0 }
 0x352   : > { %vm11743_vm7 = vmor %vm718_vm11, %vm19199_vm5  ;;  %vm3148_vm11 = vcmp.eq.s32.totalorder %v10191_v19, %v2792_v34  ;;  %vm2253_vm5 = vcmp.eq.s32.totalorder %v10178_v31, %v11503_v32  ;;  %8329 = vset.pattern.permute.xlu0 %v18821_v56  ;;  %v11899_v34 = vpop.permute.xlu0 %2821 }
 0x353   : > { %vm11751_vm10 = vmor %vm11658_vm1, %vm19202_vm0 }
 0x354   : > { %vm2508_vm15 = vmor %vm11664_vm9, %vm2252_vm4  ;;  %v1905_v27 = vpop.permute.xlu1 %1904  ;;  %8278 = vset.pattern.permute.xlu1 %v18821_v56 }
 0x355   : > { %vm3404_vm0 = vmor %vm2508_vm15, %vm3148_vm11  ;;  %vm2254_vm15 = vcmp.eq.s32.totalorder %v10191_v19, %v11503_v32  ;;  %vm3152_vm11 = vcmp.eq.s32.totalorder %v10191_v19, %v11582_v9  ;;  %v8512_v32 = vld [vmem:[%s8761_s25 + $0x2d0] sm:$0xff]  ;;  %2863 = vperm.xlu1 %8278, %v8515_v42   ;;  %v8518_v42 = vld [vmem:[%s8761_s25 + $0x1a8] sm:$0xff] }
 0x356   : > { %vm11769_vm1 = vmpackc.low %vm3404_vm0, %vm11735_vm13  ;;  %2980 = vperm.xlu0 %8329, %v8512_v32  }
 0x357   : > { %v19206_v57 = vsel %vm11769_vm1, 4294967295, %v19205_v57  ;;  %6962 = vmatprep.mubr.msk.bf16.mxu1 %vm11769_vm1, %v18306_v41  ;;  %vm3401_vm9 = vmor %vm11713_vm3, %vm3145_vm2  ;;  %7234 = vmatprep.mubr.msk.bf16.mxu0 %vm11769_vm1, %v18306_v41  ;;  %vm2255_vm3 = vcmp.eq.s32.totalorder %v10178_v31, %v1902_v48  ;;  %vm2256_vm2 = vcmp.eq.s32.totalorder %v10191_v19, %v1902_v48  ;;  %v8517_v48 = vld [vmem:[%s8761_s25 + $0x308] sm:$0xff]  ;;  %vm19252_vm1 = vcmp.eq.s32.totalorder %v10178_v31, %v11616_v63 }
 0x358   : > { %vm11781_vm4 = vmor %vm11692_vm12, %vm2253_vm5  ;;  %v1908_v12 = vpop.permute.xlu1 %1907 }
 0x359   : > { %vm3403_vm13 = vmor %vm11751_vm10, %vm3147_vm8  ;;  %vm3151_vm10 = vcmp.eq.s32.totalorder %v10178_v31, %v11582_v9  ;;  %8280 = vset.pattern.permute.xlu1 %v18824_v58  ;;  %v8525_v9 = vld [vmem:[%s8761_s25 + $0x328] sm:$0xff] }
 0x35a   : > { %vm11795_vm12 = vmpackc.low %vm3403_vm13, %vm3401_vm9  ;;  %vm3149_vm9 = vcmp.eq.s32.totalorder %v10178_v31, %v2795_v51  ;;  %vm3150_vm13 = vcmp.eq.s32.totalorder %v10191_v19, %v2795_v51  ;;  %2989 = vperm.xlu0 %8329, %v8514_v16   ;;  %1973 = vperm.xlu1 %8280, %v8518_v42   ;;  %v8524_v51 = vld [vmem:[%s8761_s25 + $0x1b8] sm:$0xff]  ;;  %v19267_v16 = vmov 0  ;;  %v19270_v42 = vld [vmem:[#allocation42_spill] sm:$0xff] }
 0x35b   : > { %v19210_v22 = vsel %vm11795_vm12, 4294967295, %v19209_v22  ;;  %vm11803_vm8 = vmor %vm11705_vm6, %vm2255_vm3  ;;  %6964 = vmatmul.mubr.msk.bf16.gmra.mrb[52].mxu1 %vm11795_vm12, %v18306_v41  ;;  %7236 = vmatmul.mubr.msk.bf16.gmra.mrb[52].mxu0 %vm11795_vm12, %v18306_v41  ;;  %vm1361_vm3 = vcmp.eq.s32.totalorder %v10178_v31, %v19217_v45 }
 0x35c   : > { %vm2512_vm5 = vmor %vm11725_vm14, %vm2256_vm2  ;;  %v2804_v1 = vpop.permute.xlu1 %2803 }
 0x35d   : > { %vm2510_vm6 = vmor %vm11743_vm7, %vm2254_vm15 }
 0x35e   : > { %vm3408_vm0 = vmor %vm2512_vm5, %vm3152_vm11  ;;  %vm1362_vm11 = vcmp.eq.s32.totalorder %v10191_v19, %v19217_v45  ;;  %2992 = vperm.xlu0 %8329, %v8516_v38   ;;  %vm722_vm5 = vcmp.eq.s32.totalorder %v10191_v19, %v19220_v40  ;;  %v8519_v38 = vld [vmem:[%s8761_s25 + $0x300] sm:$0xff]  ;;  %8281 = vset.pattern.permute.xlu1 %v18821_v56 }
 0x35f   : > { %vm11828_vm14 = vmor %vm11803_vm8, %vm3151_vm10  ;;  %vm721_vm10 = vcmp.eq.s32.totalorder %v10178_v31, %v19220_v40  ;;  %v19250_v40 = vmov 0 }
 0x360   : > { %vm3406_vm7 = vmor %vm2510_vm6, %vm3150_vm13  ;;  %v1914_v3 = vpop.permute.xlu1 %1913 }
 0x361   : > { %vm11836_vm15 = vmpackc.low %vm3408_vm0, %vm3406_vm7  ;;  %vm1364_vm0 = vcmp.eq.s32.totalorder %v10191_v19, %v19221_v6  ;;  %vm724_vm7 = vcmp.eq.s32.totalorder %v10191_v19, %v19224_v50 }
 0x362   : > { %v19216_v8 = vsel %vm11836_vm15, 4294967295, %v19215_v8  ;;  %6966 = vmatprep.mubr.msk.bf16.mxu1 %vm11836_vm15, %v18306_v41  ;;  %7238 = vmatprep.mubr.msk.bf16.mxu0 %vm11836_vm15, %v18306_v41  ;;  %vm3405_vm2 = vmor %vm11781_vm4, %vm3149_vm9  ;;  %vm1363_vm4 = vcmp.eq.s32.totalorder %v10178_v31, %v19221_v6  ;;  %vm723_vm9 = vcmp.eq.s32.totalorder %v10178_v31, %v19224_v50  ;;  %vm19237_vm15 = vcmp.eq.s32.totalorder %v10178_v31, %v19229_v7  ;;  %v11975_v6 = vpop.permute.xlu0 %2824  ;;  %v8520_v50 = vld [vmem:[%s8761_s25 + $0x1a0] sm:$0xff] }
 0x363   : > { %vm11857_vm8 = vmpackc.low %vm11828_vm14, %vm3405_vm2  ;;  %vm2258_vm14 = vcmp.eq.s32.totalorder %v10191_v19, %v1905_v27  ;;  %3001 = vperm.xlu0 %8329, %v8517_v48   ;;  %vm727_vm2 = vcmp.eq.s32.totalorder %v10178_v31, %v19236_v26  ;;  %2866 = vperm.xlu1 %8281, %v8520_v50   ;;  %v8522_v48 = vld [vmem:[%s8761_s25 + $0x1b0] sm:$0xff] }
 0x364   : > { %v19219_v39 = vsel %vm11857_vm8, 4294967295, %v19218_v39  ;;  %6968 = vmatmul.mubr.msk.bf16.gmra.mrb[56].mxu1 %vm11857_vm8, %v18306_v41  ;;  %vm11871_vm6 = vmor %vm721_vm10, %vm1361_vm3  ;;  %7240 = vmatmul.mubr.msk.bf16.gmra.mrb[56].mxu0 %vm11857_vm8, %v18306_v41  ;;  %vm1367_vm10 = vcmp.eq.s32.totalorder %v10178_v31, %v19232_v47  ;;  %v2807_v32 = vpop.permute.xlu1 %2806  ;;  %v8526_v50 = vld [vmem:[%s8761_s25 + $0x330] sm:$0xff] }
 0x365   : > { %vm11883_vm13 = vmor %vm722_vm5, %vm1362_vm11  ;;  %vm725_vm5 = vcmp.eq.s32.totalorder %v10178_v31, %v19233_v35 }
 0x366   : > { %vm11893_vm3 = vmor %vm723_vm9, %vm1363_vm4  ;;  %vm2257_vm4 = vcmp.eq.s32.totalorder %v10178_v31, %v1905_v27  ;;  %vm1368_vm9 = vcmp.eq.s32.totalorder %v10191_v19, %v19232_v47  ;;  %v8413_v47 = vld [vmem:[%s17959_s1 + $0x110] sm:$0xff]   ;;  %v19274_v27 = vld [vmem:[#allocation88_spill] sm:$0xff] }
 0x367   : > { %vm11902_vm11 = vmor %vm724_vm7, %vm1364_vm0  ;;  %vm2260_vm0 = vcmp.eq.s32.totalorder %v10191_v19, %v1908_v12  ;;  %8336 = vset.pattern.permute.xlu0 %v18824_v58  ;;  %8282 = vset.pattern.permute.xlu1 %v18824_v58 }
 0x368   : > { %vm11920_vm7 = vmor %vm11883_vm13, %vm2258_vm14  ;;  %vm728_vm13 = vcmp.eq.s32.totalorder %v10191_v19, %v19236_v26  ;;  %2102 = vperm.xlu0 %8336, %v8519_v38   ;;  %1976 = vperm.xlu1 %8282, %v8522_v48   ;;  %v1917_v45 = vpop.permute.xlu1 %1916  ;;  %v19285_v48 = vld [vmem:[#allocation45_spill] sm:$0xff] }
 0x369   : > { %vm11931_vm12 = vmor %vm725_vm5, %vm19237_vm15  ;;  %vm726_vm15 = vcmp.eq.s32.totalorder %v10191_v19, %v19233_v35  ;;  %v8523_v35 = vld [vmem:[%s8761_s25 + $0x310] sm:$0xff]  ;;  %5726 = vmatpush1.bf16.msra.mxu0 %v8413_v47  ;;  %v19282_v47 = vld [vmem:[#allocation92_spill] sm:$0xff] }
 0x36a   : > { %vm11939_vm14 = vmor %vm727_vm2, %vm1367_vm10  ;;  %5727 = vmatprep.subr.bf16.mxu0 %v18770_v11  ;;  %v8529_v38 = vld [vmem:[%s8761_s25 + $0x340] sm:$0xff] }
 0x36b   : > { %vm11945_vm8 = vmor %vm11871_vm6, %vm2257_vm4  ;;  %vm19246_vm6 = vcmp.eq.s32.totalorder %v10191_v19, %v11616_v63  ;;  %vm19249_vm4 = vcmp.eq.s32.totalorder %v10191_v19, %v19229_v7  ;;  %v19255_v7 = vmov 0  ;;  %v8528_v63 = vld [vmem:[%s8761_s25 + $0x1c8] sm:$0xff] }
 0x36c   : > { %vm11952_vm5 = vmor %vm728_vm13, %vm1368_vm9  ;;  %vm2259_vm13 = vcmp.eq.s32.totalorder %v10178_v31, %v1908_v12  ;;  %2114 = vperm.xlu0 %8336, %v8521_v10   ;;  %v12021_v12 = vpop.permute.xlu0 %2833  ;;  %1979 = vperm.xlu1 %8282, %v8524_v51   ;;  %v19279_v10 = vld [vmem:[#allocation87_spill] sm:$0xff] }
 0x36d   : > { %vm11964_vm10 = vmor %vm11920_vm7, %vm19246_vm6  ;;  %vm3156_vm6 = vcmp.eq.s32.totalorder %v10191_v19, %v2804_v1 }
 0x36e   : > { %vm11971_vm9 = vmor %vm726_vm15, %vm19249_vm4  ;;  %vm2261_vm15 = vcmp.eq.s32.totalorder %v10178_v31, %v11764_v43  ;;  %vm3155_vm4 = vcmp.eq.s32.totalorder %v10178_v31, %v2804_v1  ;;  %v19271_v1 = vmov 0 }
 0x36f   : > { %v19251_v40 = vsel %vm11971_vm9, 4294967295, %v19250_v40  ;;  %vm2516_vm7 = vmor %vm11902_vm11, %vm2260_vm0 }
 0x370   : > { %vm3412_vm2 = vmor %vm2516_vm7, %vm3156_vm6  ;;  %8339 = vset.pattern.permute.xlu0 %v18821_v56  ;;  %v12067_v26 = vpop.permute.xlu0 %1934  ;;  %8283 = vset.pattern.permute.xlu1 %v18821_v56 }
 0x371   : > { %vm11993_vm9 = vmor %vm11945_vm8, %vm19252_vm1  ;;  %vm2262_vm8 = vcmp.eq.s32.totalorder %v10191_v19, %v11764_v43  ;;  %3004 = vperm.xlu0 %8339, %v8523_v35   ;;  %2875 = vperm.xlu1 %8283, %v8524_v51   ;;  %v1920_v35 = vpop.permute.xlu1 %1919  ;;  %v19306_v43 = vmov 0  ;;  %v19326_v51 = vmov 0 }
 0x372   : > { %vm2515_vm11 = vmor %vm11893_vm3, %vm2259_vm13  ;;  %vm2264_vm3 = vcmp.eq.s32.totalorder %v10191_v19, %v1914_v3 }
 0x373   : > { %vm12003_vm0 = vmpackc.low %vm3412_vm2, %vm11964_vm10  ;;  %vm3160_vm10 = vcmp.eq.s32.totalorder %v10191_v19, %v11696_v21 }
 0x374   : > { %v19256_v7 = vsel %vm12003_vm0, 4294967295, %v19255_v7  ;;  %vm12009_vm7 = vmor %vm11931_vm12, %vm2261_vm15  ;;  %6970 = vmatprep.mubr.msk.bf16.mxu1 %vm12003_vm0, %v18306_v41  ;;  %7242 = vmatprep.mubr.msk.bf16.mxu0 %vm12003_vm0, %v18306_v41  ;;  %vm2263_vm12 = vcmp.eq.s32.totalorder %v10178_v31, %v1914_v3  ;;  %v12126_v3 = vpop.permute.xlu0 %1946  ;;  %vm2269_vm0 = vcmp.eq.s32.totalorder %v10178_v31, %v11821_v53 }
 0x375   : > { %vm3411_vm1 = vmor %vm2515_vm11, %vm3155_vm4  ;;  %vm3157_vm11 = vcmp.eq.s32.totalorder %v10178_v31, %v2807_v32  ;;  %3013 = vperm.xlu0 %8339, %v8525_v9   ;;  %v8414_v9 = vld [vmem:[%s17959_s1 + $0x118] sm:$0xff]   ;;  %8284 = vset.pattern.permute.xlu1 %v18824_v58 }
 0x376   : > { %vm12027_vm2 = vmpackc.low %vm3411_vm1, %vm11993_vm9  ;;  %vm3159_vm9 = vcmp.eq.s32.totalorder %v10178_v31, %v11696_v21  ;;  %5728 = vmatpush1.bf16.msra.mxu0 %v8414_v9  ;;  %1985 = vperm.xlu1 %8284, %v8528_v63   ;;  %v19317_v21 = vmov 0  ;;  %v8533_v63 = vld [vmem:[%s8761_s25 + $0x350] sm:$0xff]  ;;  %v8416_v9 = vld [vmem:[%s17959_s1 + $0x128] sm:$0xff]  }
 0x377   : > { %v19260_v30 = vsel %vm12027_vm2, 4294967295, %v19259_v30  ;;  %vm12038_vm13 = vmor %vm11939_vm14, %vm2263_vm12  ;;  %6972 = vmatmul.mubr.msk.bf16.gmra.mrb[60].mxu1 %vm12027_vm2, %v18306_v41  ;;  %7244 = vmatmul.mubr.msk.bf16.gmra.mrb[60].mxu0 %vm12027_vm2, %v18306_v41  ;;  %vm19264_vm14 = vnez %v19251_v40  ;;  %v19275_v40 = vld [vmem:[#allocation41_spill] sm:$0xff] }
 0x378   : > { %19261 = vst [vmem:[#allocation19_spill] sm:$0xff] %v19260_v30  ;;  %vm2520_vm6 = vmor %vm11952_vm5, %vm2264_vm3  ;;  %vm3158_vm5 = vcmp.eq.s32.totalorder %v10191_v19, %v2807_v32  ;;  %vm1369_vm3 = vcmp.eq.s32.totalorder %v10178_v31, %v19270_v42  ;;  %5729 = vmatprep.subr.bf16.mxu0 %v18770_v11  ;;  %v8549_v30 = vld [vmem:[%s8761_s25 + $0x200] sm:$0xff] }
 0x379   : > { %vm2518_vm15 = vmor %vm19264_vm14, %vm2262_vm8  ;;  %vm730_vm14 = vcmp.eq.s32.totalorder %v10191_v19, %v19274_v27  ;;  %3016 = vperm.xlu0 %8339, %v8526_v50   ;;  %v12190_v50 = vpop.permute.xlu0 %2836 }
 0x37a   : > { %vm3416_vm4 = vmor %vm2520_vm6, %vm3160_vm10  ;;  %vm729_vm6 = vcmp.eq.s32.totalorder %v10178_v31, %v19274_v27  ;;  %8285 = vset.pattern.permute.xlu1 %v18821_v56  ;;  %v8532_v27 = vld [vmem:[%s8761_s25 + $0x1d0] sm:$0xff] }
 0x37b   : > { %vm12062_vm1 = vmor %vm12038_vm13, %vm3159_vm9  ;;  %vm1370_vm13 = vcmp.eq.s32.totalorder %v10191_v19, %v19270_v42  ;;  %v19293_v42 = vld [vmem:[#allocation91_spill] sm:$0xff] }
 0x37c   : > { %vm3414_vm8 = vmor %vm2518_vm15, %vm3158_vm5  ;;  %vm1372_vm15 = vcmp.eq.s32.totalorder %v10191_v19, %v19275_v40  ;;  %vm734_vm5 = vcmp.eq.s32.totalorder %v10191_v19, %v19282_v47 }
 0x37d   : > { %vm12071_vm12 = vmpackc.low %vm3416_vm4, %vm3414_vm8  ;;  %vm1371_vm4 = vcmp.eq.s32.totalorder %v10178_v31, %v19275_v40  ;;  %v8527_v40 = vld [vmem:[%s8761_s25 + $0x348] sm:$0xff] }
 0x37e   : > { %v19268_v16 = vsel %vm12071_vm12, 4294967295, %v19267_v16  ;;  %6974 = vmatprep.mubr.msk.bf16.mxu1 %vm12071_vm12, %v18306_v41  ;;  %7246 = vmatprep.mubr.msk.bf16.mxu0 %vm12071_vm12, %v18306_v41  ;;  %vm3413_vm10 = vmor %vm12009_vm7, %vm3157_vm11  ;;  %vm1373_vm11 = vcmp.eq.s32.totalorder %v10178_v31, %v19278_v59  ;;  %vm736_vm12 = vcmp.eq.s32.totalorder %v10191_v19, %v19293_v42 }
 0x37f   : > { %19269 = vst [vmem:[#allocation23_spill] sm:$0xff] %v19268_v16  ;;  %vm12089_vm9 = vmpackc.low %vm12062_vm1, %vm3413_vm10  ;;  %vm732_vm1 = vcmp.eq.s32.totalorder %v10191_v19, %v19279_v10  ;;  %vm731_vm10 = vcmp.eq.s32.totalorder %v10178_v31, %v19279_v10  ;;  %3025 = vperm.xlu0 %8339, %v8527_v40   ;;  %v19332_v10 = vld [vmem:[#allocation49_spill] sm:$0xff] }
 0x380   : > { %v19272_v1 = vsel %vm12089_vm9, 4294967295, %v19271_v1  ;;  %6976 = vmatmul.mubr.msk.bf16.gmra.mrb[64].mxu1 %vm12089_vm9, %v18306_v41  ;;  %7248 = vmatmul.mubr.msk.bf16.gmra.mrb[64].mxu0 %vm12089_vm9, %v18306_v41  ;;  %vm12105_vm7 = vmor %vm729_vm6, %vm1369_vm3  ;;  %vm733_vm6 = vcmp.eq.s32.totalorder %v10178_v31, %v19282_v47  ;;  %v2816_v47 = vpop.permute.xlu1 %2815 }
 0x381   : > { %19273 = vst [vmem:[#allocation28_spill] sm:$0xff] %v19272_v1  ;;  %vm12122_vm8 = vmor %vm730_vm14, %vm1370_vm13  ;;  %vm1375_vm14 = vcmp.eq.s32.totalorder %v10178_v31, %v19285_v48  ;;  %v8541_v1 = vld [vmem:[%s8761_s25 + $0x3a0] sm:$0xff] }
 0x382   : > { %vm12138_vm13 = vmor %vm732_vm1, %vm1372_vm15  ;;  %vm19290_vm15 = vcmp.eq.s32.totalorder %v10191_v19, %v19278_v59  ;;  %v19297_v59 = vmov 0 }
 0x383   : > { %vm12147_vm3 = vmor %vm731_vm10, %vm1371_vm4  ;;  %vm1376_vm4 = vcmp.eq.s32.totalorder %v10191_v19, %v19285_v48  ;;  %vm2265_vm10 = vcmp.eq.s32.totalorder %v10178_v31, %v1917_v45  ;;  %8346 = vset.pattern.permute.xlu0 %v18824_v58 }
 0x384   : > { %vm12154_vm9 = vmor %vm733_vm6, %vm1373_vm11  ;;  %vm735_vm11 = vcmp.eq.s32.totalorder %v10178_v31, %v19293_v42  ;;  %vm2268_vm6 = vcmp.eq.s32.totalorder %v10191_v19, %v1920_v35  ;;  %2126 = vperm.xlu0 %8346, %v8529_v38   ;;  %v8531_v42 = vld [vmem:[%s8761_s25 + $0x360] sm:$0xff]  ;;  %v19322_v38 = vmov 0 }
 0x385   : > { %vm12161_vm1 = vmor %vm734_vm5, %vm19290_vm15  ;;  %vm19294_vm5 = vcmp.eq.s32.totalorder %v10191_v19, %v1917_v45  ;;  %v19299_v45 = vmov 0 }
 0x386   : > { %vm12179_vm15 = vmor %vm12122_vm8, %vm19294_vm5 }
 0x387   : > { %vm12186_vm2 = vmor %vm735_vm11, %vm1375_vm14  ;;  %vm2270_vm14 = vcmp.eq.s32.totalorder %v10191_v19, %v11821_v53  ;;  %vm3164_vm11 = vcmp.eq.s32.totalorder %v10191_v19, %v2816_v47  ;;  %v12235_v53 = vpop.permute.xlu0 %2845 }
 0x388   : > { %v19298_v59 = vsel %vm12186_vm2, 4294967295, %v19297_v59  ;;  %vm12194_vm8 = vmor %vm736_vm12, %vm1376_vm4  ;;  %vm19303_vm12 = vcmp.eq.s32.totalorder %v10191_v19, %v11833_v5  ;;  %2138 = vperm.xlu0 %8346, %v8531_v42  }
 0x389   : > { %v19300_v45 = vsel %vm12194_vm8, 4294967295, %v19299_v45  ;;  %vm12200_vm5 = vmor %vm12105_vm7, %vm2265_vm10  ;;  %vm3161_vm7 = vcmp.eq.s32.totalorder %v10178_v31, %v11833_v5  ;;  %vm2267_vm8 = vcmp.eq.s32.totalorder %v10178_v31, %v1920_v35  ;;  %v8530_v35 = vld [vmem:[%s8761_s25 + $0x1c0] sm:$0xff]  ;;  %v1926_v5 = vpop.permute.xlu1 %1925 }
 0x38a   : > { %vm3418_vm4 = vmor %vm12179_vm15, %vm19303_vm12  ;;  %2878 = vperm.xlu1 %8285, %v8530_v35   ;;  %vm2272_vm12 = vcmp.eq.s32.totalorder %v10191_v19, %v1926_v5 }
 0x38b   : > { %vm2524_vm10 = vmor %vm12138_vm13, %vm2268_vm6  ;;  %vm3163_vm13 = vcmp.eq.s32.totalorder %v10178_v31, %v2816_v47  ;;  %v12284_v40 = vpop.permute.xlu0 %2848  ;;  %v8534_v47 = vld [vmem:[%s8761_s25 + $0x1d8] sm:$0xff] }
 0x38c   : > { %vm3420_vm2 = vmor %vm2524_vm10, %vm3164_vm11  ;;  %8349 = vset.pattern.permute.xlu0 %v18821_v56 }
 0x38d   : > { %vm12225_vm15 = vmor %vm12161_vm1, %vm2270_vm14  ;;  %3028 = vperm.xlu0 %8349, %v8533_v63  }
 0x38e   : > { %vm12231_vm6 = vmpackc.low %vm3420_vm2, %vm3418_vm4  ;;  %8287 = vset.pattern.permute.xlu1 %v18824_v58 }
 0x38f   : > { %v19307_v43 = vsel %vm12231_vm6, 4294967295, %v19306_v43  ;;  %6978 = vmatprep.mubr.msk.bf16.mxu1 %vm12231_vm6, %v18306_v41  ;;  %vm12246_vm1 = vmor %vm12200_vm5, %vm3161_vm7  ;;  %7250 = vmatprep.mubr.msk.bf16.mxu0 %vm12231_vm6, %v18306_v41  ;;  %vm2271_vm5 = vcmp.eq.s32.totalorder %v10178_v31, %v1926_v5  ;;  %v19329_v5 = vld [vmem:[#allocation50_spill] sm:$0xff]  ;;  %v12334_v42 = vpop.permute.xlu0 %2857 }
 0x390   : > { %19308 = vst [vmem:[#allocation27_spill] sm:$0xff] %v19307_v43  ;;  %vm12252_vm2 = vmor %vm12154_vm9, %vm2269_vm0  ;;  %vm3168_vm0 = vcmp.eq.s32.totalorder %v10191_v19, %v11899_v34  ;;  %vm19313_vm9 = vnez %v19298_v59  ;;  %1988 = vperm.xlu1 %8287, %v8532_v27   ;;  %v2819_v59 = vpop.permute.xlu1 %2818  ;;  %v8535_v27 = vld [vmem:[%s8761_s25 + $0x368] sm:$0xff] }
 0x391   : > { %vm2523_vm14 = vmor %vm12147_vm3, %vm2267_vm8  ;;  %vm3167_vm3 = vcmp.eq.s32.totalorder %v10178_v31, %v11899_v34  ;;  %vm19316_vm8 = vnez %v19300_v45  ;;  %v8415_v45 = vld [vmem:[%s17959_s1 + $0x120] sm:$0xff]   ;;  %v12316_v34 = vpop.f32.mrb[0].mxu1  ;;  %3037 = vperm.xlu0 %8349, %v8535_v27   ;;  %v8538_v43 = vld [vmem:[%s8761_s25 + $0x388] sm:$0xff] }
 0x392   : > { %vm3419_vm4 = vmor %vm2523_vm14, %vm3163_vm13  ;;  %vm3166_vm14 = vcmp.eq.s32.totalorder %v10191_v19, %v2819_v59  ;;  %5730 = vmatpush1.bf16.msra.mxu0 %v8415_v45  ;;  %19325 = vst [vmem:[#allocation36_spill] sm:$0xff] %v12316_v34  ;;  %v4442_v48 = vpop.f32.mrb[1].mxu1  ;;  %v19331_v45 = vld [vmem:[#allocation96_spill] sm:$0xff] }
 0x393   : > { %vm12268_vm7 = vmor %vm19313_vm9, %vm2271_vm5  ;;  %5731 = vmatprep.subr.bf16.mxu0 %v18770_v11  ;;  %vm1377_vm9 = vcmp.eq.s32.totalorder %v10178_v31, %v19329_v5  ;;  %v12336_v32 = vpop.f32.mrb[2].mxu1  ;;  %v19335_v48 = vld [vmem:[#allocation54_spill] sm:$0xff]  ;;  %v12413_v34 = vpop.permute.xlu0 %1958 }
 0x394   : > { %vm2528_vm10 = vmor %vm19316_vm8, %vm2272_vm12  ;;  %1991 = vperm.xlu1 %8287, %v8534_v47   ;;  %v1929_v35 = vpop.permute.xlu1 %1928  ;;  %19330 = vst [vmem:[#allocation40_spill] sm:$0xff] %v12336_v32  ;;  %vm738_vm8 = vcmp.eq.s32.totalorder %v10191_v19, %v19331_v45  ;;  %v8422_v32 = vld [vmem:[%s17959_s1 + $0x158] sm:$0xff]  }
 0x395   : > { %vm12279_vm11 = vmpackc.low %vm3419_vm4, %vm12246_vm1  ;;  %vm3165_vm1 = vcmp.eq.s32.totalorder %v10178_v31, %v2819_v59  ;;  %v4445_v59 = vpop.f32.mrb[3].mxu1 }
 0x396   : > { %v19318_v21 = vsel %vm12279_vm11, 4294967295, %v19317_v21  ;;  %6980 = vmatmul.mubr.msk.bf16.gmra.mrb[68].mxu1 %vm12279_vm11, %v18306_v41  ;;  %7252 = vmatmul.mubr.msk.bf16.gmra.mrb[68].mxu0 %vm12279_vm11, %v18306_v41  ;;  %vm3424_vm13 = vmor %vm2528_vm10, %vm3168_vm0  ;;  %v19336_v59 = vld [vmem:[#allocation95_spill] sm:$0xff] }
 0x397   : > { %19319 = vst [vmem:[#allocation32_spill] sm:$0xff] %v19318_v21  ;;  %vm12303_vm5 = vmor %vm12268_vm7, %vm3167_vm3  ;;  %vm737_vm7 = vcmp.eq.s32.totalorder %v10178_v31, %v19331_v45  ;;  %vm1380_vm3 = vcmp.eq.s32.totalorder %v10191_v19, %v19332_v10  ;;  %5732 = vmatpush1.bf16.msra.mxu0 %v8416_v9  ;;  %v19342_v9 = vld [vmem:[#allocation53_spill] sm:$0xff]  ;;  %v8537_v21 = vld [vmem:[%s8761_s25 + $0x1e8] sm:$0xff]  ;;  %v12483_v63 = vpop.permute.xlu0 %1970 }
 0x398   : > { %vm3422_vm12 = vmor %vm12225_vm15, %vm3166_vm14  ;;  %8288 = vset.pattern.permute.xlu1 %v18821_v56  ;;  %v12365_v27 = vpop.permute.xlu1 %1931  ;;  %vm740_vm14 = vcmp.eq.s32.totalorder %v10191_v19, %v19336_v59  ;;  %5733 = vmatprep.subr.bf16.mxu0 %v18770_v11 }
 0x399   : > { %vm12311_vm4 = vmpackc.low %vm3424_vm13, %vm3422_vm12  ;;  %vm1381_vm13 = vcmp.eq.s32.totalorder %v10178_v31, %v19335_v48  ;;  %2887 = vperm.xlu1 %8288, %v8534_v47   ;;  %v19339_v47 = vld [vmem:[#allocation100_spill] sm:$0xff] }
 0x39a   : > { %v19323_v38 = vsel %vm12311_vm4, 4294967295, %v19322_v38  ;;  %6982 = vmatprep.mubr.msk.bf16.mxu1 %vm12311_vm4, %v18306_v41  ;;  %7254 = vmatprep.mubr.msk.bf16.mxu0 %vm12311_vm4, %v18306_v41  ;;  %vm3421_vm15 = vmor %vm12252_vm2, %vm3165_vm1  ;;  %vm1378_vm2 = vcmp.eq.s32.totalorder %v10191_v19, %v19329_v5  ;;  %vm1382_vm1 = vcmp.eq.s32.totalorder %v10191_v19, %v19335_v48  ;;  %v8419_v5 = vld [vmem:[%s17959_s1 + $0x140] sm:$0xff]  }
 0x39b   : > { %19324 = vst [vmem:[#allocation31_spill] sm:$0xff] %v19323_v38  ;;  %vm12328_vm0 = vmpackc.low %vm12303_vm5, %vm3421_vm15  ;;  %vm739_vm15 = vcmp.eq.s32.totalorder %v10178_v31, %v19336_v59  ;;  %v19347_v59 = vld [vmem:[#allocation99_spill] sm:$0xff]  ;;  %v12436_v38 = vpop.f32.mrb[4].mxu1  ;;  %v8539_v48 = vld [vmem:[%s8761_s25 + $0x1e0] sm:$0xff] }
 0x39c   : > { %v19327_v51 = vsel %vm12328_vm0, 4294967295, %v19326_v51  ;;  %vm12357_vm10 = vmor %vm737_vm7, %vm1377_vm9  ;;  %vm741_vm9 = vcmp.eq.s32.totalorder %v10178_v31, %v19339_v47  ;;  %vm742_vm7 = vcmp.eq.s32.totalorder %v10191_v19, %v19339_v47  ;;  %19354 = vst [vmem:[#allocation39_spill] sm:$0xff] %v12436_v38  ;;  %v2828_v45 = vpop.permute.xlu1 %2827  ;;  %v8420_v47 = vld [vmem:[%s17959_s1 + $0x148] sm:$0xff]  }
 0x39d   : > { %19328 = vst [vmem:[#allocation35_spill] sm:$0xff] %v19327_v51  ;;  %vm12372_vm5 = vmor %vm738_vm8, %vm1378_vm2  ;;  %vm1384_vm8 = vcmp.eq.s32.totalorder %v10191_v19, %v19342_v9  ;;  %8290 = vset.pattern.permute.xlu1 %v18824_v58  ;;  %v8542_v51 = vld [vmem:[%s8761_s25 + $0x1f0] sm:$0xff] }
 0x39e   : > { %6984 = vmatmul.mubr.msk.bf16.gmra.mrb[72].mxu1 %vm12328_vm0, %v18306_v41  ;;  %7256 = vmatmul.mubr.msk.bf16.gmra.mrb[72].mxu0 %vm12328_vm0, %v18306_v41  ;;  %v8536_v41 = vld [vmem:[%s8761_s25 + $0x370] sm:$0xff]  ;;  %vm12388_vm2 = vmor %vm740_vm14, %vm1380_vm3  ;;  %vm2273_vm14 = vcmp.eq.s32.totalorder %v10178_v31, %v1929_v35  ;;  %vm744_vm0 = vcmp.eq.s32.totalorder %v10191_v19, %v19347_v59 }
 0x39f   : > { %3040 = vperm.xlu0 %8349, %v8536_v41   ;;  %v8417_v41 = vld [vmem:[%s17959_s1 + $0x130] sm:$0xff]   ;;  %vm12402_vm12 = vmor %vm741_vm9, %vm1381_vm13  ;;  %vm19348_vm13 = vcmp.eq.s32.totalorder %v10178_v31, %v19332_v10  ;;  %1997 = vperm.xlu1 %8290, %v8537_v21   ;;  %v8418_v21 = vld [vmem:[%s17959_s1 + $0x138] sm:$0xff]   ;;  %v19379_v10 = vmov 0 }
 0x3a0   : > { %vm12409_vm3 = vmor %vm742_vm7, %vm1382_vm1  ;;  %vm3170_vm1 = vcmp.eq.s32.totalorder %v10191_v19, %v11975_v6  ;;  %vm19351_vm7 = vcmp.eq.s32.totalorder %v10191_v19, %v1929_v35  ;;  %5734 = vmatpush1.bf16.msra.mxu0 %v8417_v41  ;;  %v4450_v41 = vpop.f32.mrb[5].mxu1 }
 0x3a1   : > { %vm12421_vm9 = vmor %vm739_vm15, %vm19348_vm13  ;;  %vm2276_vm13 = vcmp.eq.s32.totalorder %v10191_v19, %v12365_v27  ;;  %5735 = vmatprep.subr.bf16.mxu0 %v18770_v11  ;;  %v12459_v38 = vpop.f32.mrb[6].mxu1  ;;  %v8540_v41 = vld [vmem:[%s8761_s25 + $0x380] sm:$0xff] }
 0x3a2   : > { %vm12431_vm4 = vmor %vm12372_vm5, %vm19351_vm7  ;;  %19359 = vst [vmem:[#allocation44_spill] sm:$0xff] %v12459_v38  ;;  %v4453_v35 = vpop.f32.mrb[7].mxu1  ;;  %v19395_v38 = vld [vmem:[#allocation57_spill] sm:$0xff] }
 0x3a3   : > { %vm12438_vm15 = vmor %vm744_vm0, %vm1384_vm8  ;;  %3049 = vperm.xlu0 %8349, %v8538_v43   ;;  %vm3172_vm0 = vcmp.eq.s32.totalorder %v10191_v19, %v2828_v45  ;;  %vm1383_vm8 = vcmp.eq.s32.totalorder %v10178_v31, %v19342_v9  ;;  %8291 = vset.pattern.permute.xlu1 %v18821_v56  ;;  %v1938_v35 = vpop.permute.xlu1 %1937  ;;  %v12596_v9 = vpop.f32.mrb[8].mxu1  ;;  %v8543_v43 = vld [vmem:[%s8761_s25 + $0x1f8] sm:$0xff] }
 0x3a4   : > { %vm12450_vm5 = vmor %vm12357_vm10, %vm2273_vm14  ;;  %5736 = vmatpush1.bf16.msra.mxu0 %v8418_v21  ;;  %2890 = vperm.xlu1 %8291, %v8539_v48   ;;  %v19362_v21 = vmov 0  ;;  %v19370_v48 = vmov 1.0|1.0   ;;  %19383 = vst [vmem:[#allocation47_spill] sm:$0xff] %v12596_v9  ;;  %v19389_v9 = vld [vmem:[#allocation104_spill] sm:$0xff] }
 0x3a5   : > { %vm12466_vm10 = vmor %vm12431_vm4, %vm3170_vm1  ;;  %vm2277_vm1 = vcmp.eq.s32.totalorder %v10178_v31, %v12067_v26  ;;  %5737 = vmatprep.subr.bf16.mxu0 %v18770_v11 }
 0x3a6   : > { %vm2532_vm7 = vmor %vm12388_vm2, %vm2276_vm13  ;;  %vm743_vm2 = vcmp.eq.s32.totalorder %v10178_v31, %v19347_v59 }
 0x3a7   : > { %8356 = vset.pattern.permute.xlu0 %v18824_v58  ;;  %vm3428_vm14 = vmor %vm2532_vm7, %vm3172_vm0  ;;  %vm19367_vm7 = vcmp.eq.s32.totalorder %v10191_v19, %v12067_v26  ;;  %v12547_v26 = vpop.permute.xlu0 %2860 }
 0x3a8   : > { %2150 = vperm.xlu0 %8356, %v8540_v41   ;;  %vm12500_vm4 = vmpackc.low %vm3428_vm14, %vm12466_vm10  ;;  %vm2280_vm10 = vcmp.eq.s32.totalorder %v10191_v19, %v1938_v35  ;;  %vm19373_vm14 = vcmp.eq.s32.totalorder %v10178_v31, %v11975_v6  ;;  %5738 = vmatpush1.bf16.msra.mxu0 %v8419_v5  ;;  %v19382_v5 = vld [vmem:[#allocation58_spill] sm:$0xff] }
 0x3a9   : > { %v19363_v21 = vsel %vm12500_vm4, 4294967295, %v19362_v21  ;;  %vm12507_vm0 = vmor %vm743_vm2, %vm1383_vm8  ;;  %6986 = vmatprep.mubr.msk.bf16.mxu1 %vm12500_vm4, %v19370_v48  ;;  %7258 = vmatprep.mubr.msk.bf16.mxu0 %vm12500_vm4, %v19370_v48  ;;  %vm3171_vm8 = vcmp.eq.s32.totalorder %v10178_v31, %v2828_v45  ;;  %v8421_v45 = vld [vmem:[%s17959_s1 + $0x150] sm:$0xff]  }
 0x3aa   : > { %19364 = vst [vmem:[#allocation43_spill] sm:$0xff] %v19363_v21  ;;  %vm12516_vm13 = vmor %vm12409_vm3, %vm19367_vm7  ;;  %8292 = vset.pattern.permute.xlu1 %v18824_v58  ;;  %5739 = vmatprep.subr.bf16.mxu0 %v18770_v11 }
 0x3ab   : > { %vm12532_vm3 = vmor %vm12402_vm12, %vm2277_vm1  ;;  %vm19376_vm12 = vcmp.eq.s32.totalorder %v10178_v31, %v12365_v27  ;;  %2000 = vperm.xlu1 %8292, %v8542_v51   ;;  %v2831_v27 = vpop.permute.xlu1 %2830  ;;  %v12594_v41 = vpop.permute.xlu0 %2869  ;;  %v19384_v51 = vmov 0 }
 0x3ac   : > { %vm12542_vm2 = vmor %vm12450_vm5, %vm19373_vm14  ;;  %2162 = vperm.xlu0 %8356, %v8541_v1   ;;  %vm3176_vm5 = vcmp.eq.s32.totalorder %v10191_v19, %v12021_v12  ;;  %5740 = vmatpush1.bf16.msra.mxu0 %v8420_v47  ;;  %v8544_v1 = vld [vmem:[%s8761_s25 + $0x390] sm:$0xff]  ;;  %v4458_v47 = vpop.f32.mrb[9].mxu1 }
 0x3ad   : > { %vm2531_vm1 = vmor %vm12421_vm9, %vm19376_vm12  ;;  %5741 = vmatprep.subr.bf16.mxu0 %v18770_v11  ;;  %v8546_v47 = vld [vmem:[%s8761_s25 + $0x3b0] sm:$0xff] }
 0x3ae   : > { %vm12556_vm7 = vmor %vm12438_vm15, %vm2280_vm10  ;;  %vm3174_vm15 = vcmp.eq.s32.totalorder %v10191_v19, %v2831_v27  ;;  %vm2279_vm10 = vcmp.eq.s32.totalorder %v10178_v31, %v1938_v35  ;;  %v12626_v35 = vpop.f32.mrb[10].mxu1 }
 0x3af   : > { %vm3427_vm14 = vmor %vm2531_vm1, %vm3171_vm8  ;;  %vm1386_vm1 = vcmp.eq.s32.totalorder %v10191_v19, %v19382_v5  ;;  %2003 = vperm.xlu1 %8292, %v8543_v43   ;;  %19390 = vst [vmem:[#allocation51_spill] sm:$0xff] %v12626_v35  ;;  %v4461_v35 = vpop.f32.mrb[11].mxu1  ;;  %v12687_v59 = vpop.permute.xlu0 %2872 }
 0x3b0   : > { %vm12571_vm9 = vmpackc.low %vm3427_vm14, %vm12542_vm2  ;;  %vm3173_vm2 = vcmp.eq.s32.totalorder %v10178_v31, %v2831_v27  ;;  %8359 = vset.pattern.permute.xlu0 %v18821_v56  ;;  %vm746_vm14 = vcmp.eq.s32.totalorder %v10191_v19, %v19389_v9  ;;  %5742 = vmatpush1.bf16.msra.mxu0 %v8421_v45  ;;  %v8545_v27 = vld [vmem:[%s8761_s25 + $0x3a8] sm:$0xff]  ;;  %v19396_v45 = vld [vmem:[#allocation103_spill] sm:$0xff] }
 0x3b1   : > { %v19380_v10 = vsel %vm12571_vm9, 4294967295, %v19379_v10  ;;  %6988 = vmatmul.mubr.msk.bf16.gmra.mrb[76].mxu1 %vm12571_vm9, %v19370_v48  ;;  %7260 = vmatmul.mubr.msk.bf16.gmra.mrb[76].mxu0 %vm12571_vm9, %v19370_v48  ;;  %vm3430_vm8 = vmor %vm12516_vm13, %vm3174_vm15  ;;  %v19404_v35 = vld [vmem:[#allocation62_spill] sm:$0xff] }
 0x3b2   : > { %19381 = vst [vmem:[#allocation48_spill] sm:$0xff] %v19380_v10  ;;  %vm3432_vm12 = vmor %vm12556_vm7, %vm3176_vm5  ;;  %3052 = vperm.xlu0 %8359, %v8544_v1   ;;  %vm3175_vm7 = vcmp.eq.s32.totalorder %v10178_v31, %v12021_v12  ;;  %v12620_v1 = vpop.permute.xlu1 %1940  ;;  %v19399_v12 = vmov 0  ;;  %5743 = vmatprep.subr.bf16.mxu0 %v18770_v11  ;;  %v8547_v10 = vld [vmem:[%s8761_s25 + $0x208] sm:$0xff] }
 0x3b3   : > { %vm12600_vm13 = vmpackc.low %vm3432_vm12, %vm3430_vm8  ;;  %vm1387_vm8 = vcmp.eq.s32.totalorder %v10178_v31, %v19395_v38  ;;  %8293 = vset.pattern.permute.xlu1 %v18821_v56 }
 0x3b4   : > { %v19385_v51 = vsel %vm12600_vm13, 4294967295, %v19384_v51  ;;  %vm12610_vm5 = vmor %vm12507_vm0, %vm2279_vm10  ;;  %6990 = vmatprep.mubr.msk.bf16.mxu1 %vm12600_vm13, %v19370_v48  ;;  %7262 = vmatprep.mubr.msk.bf16.mxu0 %vm12600_vm13, %v19370_v48  ;;  %vm1385_vm0 = vcmp.eq.s32.totalorder %v10178_v31, %v19382_v5  ;;  %vm2281_vm13 = vcmp.eq.s32.totalorder %v10178_v31, %v12620_v1  ;;  %v8550_v5 = vld [vmem:[%s8761_s25 + $0x3c0] sm:$0xff] }
 0x3b5   : > { %19386 = vst [vmem:[#allocation52_spill] sm:$0xff] %v19385_v51  ;;  %vm12632_vm15 = vmor %vm12532_vm3, %vm3173_vm2  ;;  %vm745_vm3 = vcmp.eq.s32.totalorder %v10178_v31, %v19389_v9  ;;  %vm1388_vm2 = vcmp.eq.s32.totalorder %v10191_v19, %v19395_v38  ;;  %2899 = vperm.xlu1 %8293, %v8543_v43   ;;  %5744 = vmatpush1.bf16.msra.mxu0 %v8422_v32  ;;  %v8423_v32 = vld [vmem:[%s17959_s1 + $0x160] sm:$0xff]   ;;  %v12735_v51 = vpop.f32.mrb[12].mxu1  ;;  %v12774_v43 = vpop.permute.xlu0 %2881  ;;  %v8425_v38 = vld [vmem:[%s17959_s1 + $0x170] sm:$0xff]  }
 0x3b6   : > { %vm12640_vm10 = vmor %vm746_vm14, %vm1386_vm1  ;;  %3061 = vperm.xlu0 %8359, %v8545_v27   ;;  %vm747_vm1 = vcmp.eq.s32.totalorder %v10178_v31, %v19396_v45  ;;  %v1944_v6 = vpop.permute.xlu1 %1943  ;;  %v19408_v27 = vld [vmem:[#allocation108_spill] sm:$0xff]  ;;  %5745 = vmatprep.subr.bf16.mxu0 %v18770_v11  ;;  %19415 = vst [vmem:[#allocation55_spill] sm:$0xff] %v12735_v51  ;;  %v4466_v16 = vpop.f32.mrb[13].mxu1  ;;  %v19463_v51 = vmov 1  }
 0x3b7   : > { %vm3431_vm12 = vmor %vm12610_vm5, %vm3175_vm7  ;;  %vm19422_vm9 = vcmp.eq.s32.totalorder %v10191_v19, %v1944_v6  ;;  %v12765_v16 = vpop.f32.mrb[14].mxu1 }
 0x3b8   : > { %vm12665_vm14 = vmor %vm745_vm3, %vm1385_vm0  ;;  %vm19405_vm3 = vcmp.eq.s32.totalorder %v10191_v19, %v12620_v1  ;;  %19423 = vst [vmem:[#allocation16_spill] sm:$0xff] %v12765_v16 }
 0x3b9   : > { %vm12673_vm7 = vmpackc.low %vm3431_vm12, %vm12632_vm15  ;;  %vm748_vm15 = vcmp.eq.s32.totalorder %v10191_v19, %v19396_v45  ;;  %8294 = vset.pattern.permute.xlu1 %v18824_v58  ;;  %5746 = vmatpush1.bf16.msra.mxu0 %v8423_v32  ;;  %v4469_v45 = vpop.f32.mrb[15].mxu1  ;;  %v8424_v32 = vld [vmem:[%s17959_s1 + $0x168] sm:$0xff]  }
 0x3ba   : > { %v19400_v12 = vsel %vm12673_vm7, 4294967295, %v19399_v12  ;;  %vm12681_vm5 = vmor %vm747_vm1, %vm1387_vm8  ;;  %6992 = vmatmul.mubr.msk.bf16.gmra.mrb[80].mxu1 %vm12673_vm7, %v19370_v48  ;;  %7264 = vmatmul.mubr.msk.bf16.gmra.mrb[80].mxu0 %vm12673_vm7, %v19370_v48  ;;  %vm750_vm1 = vcmp.eq.s32.totalorder %v10191_v19, %v19408_v27  ;;  %v2840_v21 = vpop.permute.xlu1 %2839 }
 0x3bb   : > { %19401 = vst [vmem:[#allocation56_spill] sm:$0xff] %v19400_v12  ;;  %vm12704_vm12 = vmor %vm12640_vm10, %vm19405_vm3  ;;  %v19411_v12 = vld [vmem:[#allocation61_spill] sm:$0xff]  ;;  %3064 = vperm.xlu0 %8359, %v8546_v47   ;;  %vm19412_vm10 = vcmp.eq.s32.totalorder %v10191_v19, %v19404_v35  ;;  %v19416_v47 = vld [vmem:[#allocation107_spill] sm:$0xff]  ;;  %2009 = vperm.xlu1 %8294, %v8547_v10  }
 0x3bc   : > { %vm12713_vm0 = vmor %vm748_vm15, %vm1388_vm2  ;;  %vm1392_vm8 = vcmp.eq.s32.totalorder %v10191_v19, %v19411_v12  ;;  %vm752_vm3 = vcmp.eq.s32.totalorder %v10191_v19, %v19416_v47  ;;  %vm751_vm15 = vcmp.eq.s32.totalorder %v10178_v31, %v19416_v47  ;;  %vm19424_vm4 = vcmp.eq.s32.totalorder %v10178_v31, %v19411_v12  ;;  %v8548_v47 = vld [vmem:[%s8761_s25 + $0x3c8] sm:$0xff]  ;;  %5747 = vmatprep.subr.bf16.mxu0 %v18770_v11  ;;  %v19450_v10 = vld [vmem:[#allocation111_spill] sm:$0xff] }
 0x3bd   : > { %vm12728_vm2 = vmor %vm750_vm1, %vm19412_vm10  ;;  %vm19417_vm1 = vcmp.eq.s32.totalorder %v10191_v19, %v12190_v50  ;;  %v19427_v12 = vmov 0  ;;  %5748 = vmatpush1.bf16.msra.mxu0 %v8424_v32  ;;  %v8553_v32 = vld [vmem:[%s8761_s25 + $0x218] sm:$0xff] }
 0x3be   : > { %vm12745_vm10 = vmor %vm12704_vm12, %vm19417_vm1  ;;  %vm3180_vm1 = vcmp.eq.s32.totalorder %v10191_v19, %v2840_v21  ;;  %v1950_v1 = vpop.permute.xlu1 %1949  ;;  %5749 = vmatprep.subr.bf16.mxu0 %v18770_v11 }
 0x3bf   : > { %vm12754_vm7 = vmor %vm752_vm3, %vm1392_vm8  ;;  %vm2283_vm3 = vcmp.eq.s32.totalorder %v10178_v31, %v1944_v6  ;;  %3073 = vperm.xlu0 %8359, %v8548_v47   ;;  %8295 = vset.pattern.permute.xlu1 %v18821_v56 }
 0x3c0   : > { %vm2540_vm12 = vmor %vm12713_vm0, %vm19422_vm9  ;;  %vm3179_vm0 = vcmp.eq.s32.totalorder %v10178_v31, %v2840_v21  ;;  %2902 = vperm.xlu1 %8295, %v8549_v30   ;;  %v12841_v21 = vpop.permute.xlu0 %1982  ;;  %v19445_v30 = vld [vmem:[#allocation65_spill] sm:$0xff] }
 0x3c1   : > { %vm12770_vm8 = vmor %vm751_vm15, %vm19424_vm4  ;;  %vm1389_vm4 = vcmp.eq.s32.totalorder %v10178_v31, %v19404_v35  ;;  %v19433_v35 = vld [vmem:[#allocation66_spill] sm:$0xff]  ;;  %5750 = vmatpush1.bf16.msra.mxu0 %v8425_v38  ;;  %v19454_v38 = vmov 0 }
 0x3c2   : > { %vm3436_vm9 = vmor %vm2540_vm12, %vm3180_vm1  ;;  %vm1394_vm12 = vcmp.eq.s32.totalorder %v10191_v19, %v19433_v35  ;;  %v2843_v47 = vpop.permute.xlu1 %2842  ;;  %5751 = vmatprep.subr.bf16.mxu0 %v18770_v11  ;;  %v12933_v11 = vpop.f32.mrb[16].mxu1 }
 0x3c3   : > { %vm12787_vm15 = vmpackc.low %vm3436_vm9, %vm12745_vm10  ;;  %vm749_vm10 = vcmp.eq.s32.totalorder %v10178_v31, %v19408_v27  ;;  %8366 = vset.pattern.permute.xlu0 %v18824_v58  ;;  %v19437_v27 = vld [vmem:[#allocation112_spill] sm:$0xff]  ;;  %19456 = vst [vmem:[#allocation60_spill] sm:$0xff] %v12933_v11  ;;  %v4474_v16 = vpop.f32.mrb[17].mxu1 }
 0x3c4   : > { %v19428_v12 = vsel %vm12787_vm15, 4294967295, %v19427_v12  ;;  %vm12798_vm1 = vmor %vm12665_vm14, %vm2281_vm13  ;;  %6994 = vmatprep.mubr.msk.bf16.mxu1 %vm12787_vm15, %v19370_v48  ;;  %7266 = vmatprep.mubr.msk.bf16.mxu0 %vm12787_vm15, %v19370_v48  ;;  %v12925_v6 = vpop.permute.xlu0 %1994  ;;  %v12948_v9 = vpop.f32.mrb[18].mxu1  ;;  %v8559_v11 = vld [vmem:[%s8761_s25 + $0x3f8] sm:$0xff] }
 0x3c5   : > { %vm2539_vm13 = vmor %vm12681_vm5, %vm2283_vm3  ;;  %vm19434_vm5 = vcmp.eq.s32.totalorder %v10191_v19, %v12126_v3  ;;  %2174 = vperm.xlu0 %8366, %v8550_v5   ;;  %8297 = vset.pattern.permute.xlu1 %v18824_v58  ;;  %v8552_v5 = vld [vmem:[%s8761_s25 + $0x3d8] sm:$0xff]  ;;  %19458 = vst [vmem:[#allocation15_spill] sm:$0xff] %v12948_v9  ;;  %v4477_v16 = vpop.f32.mrb[19].mxu1 }
 0x3c6   : > { %vm12818_vm14 = vmor %vm749_vm10, %vm1389_vm4  ;;  %vm2288_vm4 = vcmp.eq.s32.totalorder %v10191_v19, %v1950_v1  ;;  %vm754_vm10 = vcmp.eq.s32.totalorder %v10191_v19, %v19437_v27  ;;  %v19490_v9 = vld [vmem:[#allocation120_spill] sm:$0xff] }
 0x3c7   : > { %vm3435_vm9 = vmor %vm2539_vm13, %vm3179_vm0  ;;  %vm2287_vm0 = vcmp.eq.s32.totalorder %v10178_v31, %v1950_v1  ;;  %v8551_v1 = vld [vmem:[%s8761_s25 + $0x210] sm:$0xff] }
 0x3c8   : > { %vm12832_vm3 = vmor %vm12728_vm2, %vm19434_vm5  ;;  %vm19438_vm2 = vcmp.eq.s32.totalorder %v10178_v31, %v12190_v50  ;;  %vm1393_vm5 = vcmp.eq.s32.totalorder %v10178_v31, %v19433_v35  ;;  %v19441_v50 = vmov 0  ;;  %2012 = vperm.xlu1 %8297, %v8551_v1   ;;  %v8554_v1 = vld [vmem:[%s8761_s25 + $0x3e8] sm:$0xff] }
 0x3c9   : > { %vm3433_vm13 = vmor %vm12798_vm1, %vm19438_vm2  ;;  %vm3184_vm1 = vcmp.eq.s32.totalorder %v10191_v19, %v12235_v53  ;;  %2183 = vperm.xlu0 %8366, %v8552_v5   ;;  %v1953_v5 = vpop.permute.xlu1 %1952 }
 0x3ca   : > { %vm12857_vm15 = vmor %vm754_vm10, %vm1394_vm12  ;;  %vm753_vm12 = vcmp.eq.s32.totalorder %v10178_v31, %v19437_v27  ;;  %v19478_v27 = vld [vmem:[#allocation116_spill] sm:$0xff] }
 0x3cb   : > { %vm12861_vm11 = vmpackc.low %vm3435_vm9, %vm3433_vm13  ;;  %vm755_vm13 = vcmp.eq.s32.totalorder %v10178_v31, %v19450_v10 }
 0x3cc   : > { %v19442_v50 = vsel %vm12861_vm11, 4294967295, %v19441_v50  ;;  %vm12870_vm2 = vmor %vm12754_vm7, %vm2288_vm4  ;;  %6996 = vmatmul.mubr.msk.bf16.gmra.mrb[84].mxu1 %vm12861_vm11, %v19370_v48  ;;  %7268 = vmatmul.mubr.msk.bf16.gmra.mrb[84].mxu0 %vm12861_vm11, %v19370_v48  ;;  %vm3182_vm4 = vcmp.eq.s32.totalorder %v10191_v19, %v2843_v47 }
 0x3cd   : > { %vm12886_vm7 = vmor %vm12770_vm8, %vm2287_vm0  ;;  %vm2285_vm8 = vcmp.eq.s32.totalorder %v10178_v31, %v12126_v3  ;;  %v8426_v3 = vld [vmem:[%s17959_s1 + $0x178] sm:$0xff]   ;;  %2015 = vperm.xlu1 %8297, %v8553_v32   ;;  %2189 = vperm.xlu0 %8366, %v8554_v1   ;;  %v1956_v45 = vpop.permute.xlu1 %1955  ;;  %v13006_v1 = vpop.f32.mrb[20].mxu1 }
 0x3ce   : > { %vm12896_vm10 = vmor %vm753_vm12, %vm1393_vm5  ;;  %5752 = vmatpush1.bf16.msra.mxu0 %v8426_v3  ;;  %v8555_v3 = vld [vmem:[%s8761_s25 + $0x3e0] sm:$0xff]  ;;  %19470 = vst [vmem:[#allocation59_spill] sm:$0xff] %v13006_v1  ;;  %v19474_v1 = vld [vmem:[#allocation70_spill] sm:$0xff] }
 0x3cf   : > { %vm3438_vm0 = vmor %vm12832_vm3, %vm3182_vm4  ;;  %vm19451_vm3 = vcmp.eq.s32.totalorder %v10178_v31, %v19445_v30  ;;  %vm3183_vm4 = vcmp.eq.s32.totalorder %v10178_v31, %v12235_v53  ;;  %v12966_v53 = vpop.permute.xlu0 %2884 }
 0x3d0   : > { %vm3440_vm5 = vmor %vm12870_vm2, %vm3184_vm1  ;;  %vm2290_vm2 = vcmp.eq.s32.totalorder %v10191_v19, %v1953_v5 }
 0x3d1   : > { %vm12919_vm12 = vmor %vm755_vm13, %vm19451_vm3  ;;  %8298 = vset.pattern.permute.xlu1 %v18821_v56  ;;  %8372 = vset.pattern.permute.xlu0 %v19463_v51 }
 0x3d2   : > { %vm12927_vm9 = vmpackc.low %vm3440_vm5, %vm3438_vm0  ;;  %vm1396_vm0 = vcmp.eq.s32.totalorder %v10191_v19, %v19445_v30  ;;  %vm2289_vm5 = vcmp.eq.s32.totalorder %v10178_v31, %v1953_v5  ;;  %v19461_v30 = vmov 0  ;;  %2911 = vperm.xlu1 %8298, %v8553_v32   ;;  %1290 = vperm.xlu0 %8372, %v8555_v3   ;;  %v2852_v5 = vpop.permute.xlu1 %2851  ;;  %v19482_v32 = vld [vmem:[#allocation115_spill] sm:$0xff] }
 0x3d3   : > { %v19455_v38 = vsel %vm12927_vm9, 4294967295, %v19454_v38  ;;  %vm2541_vm1 = vmor %vm12818_vm14, %vm2285_vm8  ;;  %6998 = vmatprep.mubr.msk.bf16.mxu1 %vm12927_vm9, %v19370_v48  ;;  %7270 = vmatprep.mubr.msk.bf16.mxu0 %vm12927_vm9, %v19370_v48  ;;  %vm19457_vm14 = vcmp.eq.s32.totalorder %v10178_v31, %v2843_v47  ;;  %v13008_v16 = vpop.permute.xlu0 %2893  ;;  %v4482_v47 = vpop.f32.mrb[21].mxu1 }
 0x3d4   : > { %vm3437_vm8 = vmor %vm2541_vm1, %vm19457_vm14  ;;  %vm756_vm1 = vcmp.eq.s32.totalorder %v10191_v19, %v19450_v10  ;;  %vm3186_vm14 = vcmp.eq.s32.totalorder %v10191_v19, %v12284_v40  ;;  %v13021_v3 = vpop.f32.mrb[22].mxu1  ;;  %v19475_v10 = vmov 0  ;;  %v19477_v47 = vld [vmem:[#allocation69_spill] sm:$0xff] }
 0x3d5   : > { %vm3439_vm13 = vmor %vm12886_vm7, %vm3183_vm4  ;;  %vm2291_vm4 = vcmp.eq.s32.totalorder %v10178_v31, %v1956_v45  ;;  %19473 = vst [vmem:[#allocation24_spill] sm:$0xff] %v13021_v3  ;;  %v8558_v3 = vld [vmem:[%s8761_s25 + $0x220] sm:$0xff] }
 0x3d6   : > { %vm12958_vm3 = vmor %vm12857_vm15, %vm2290_vm2  ;;  %8300 = vset.pattern.permute.xlu1 %v18824_v58 }
 0x3d7   : > { %vm12968_vm7 = vmpackc.low %vm3439_vm13, %vm3437_vm8  ;;  %vm2292_vm8 = vcmp.eq.s32.totalorder %v10191_v19, %v1956_v45  ;;  %v8557_v45 = vld [vmem:[%s8761_s25 + $0x228] sm:$0xff] }
 0x3d8   : > { %v19462_v30 = vsel %vm12968_vm7, 4294967295, %v19461_v30  ;;  %vm1652_vm15 = vmor %vm756_vm1, %vm1396_vm0  ;;  %7000 = vmatmul.mubr.msk.bf16.gmra.mrb[88].mxu1 %vm12968_vm7, %v19370_v48  ;;  %7272 = vmatmul.mubr.msk.bf16.gmra.mrb[88].mxu0 %vm12968_vm7, %v19370_v48  ;;  %vm3185_vm0 = vcmp.eq.s32.totalorder %v10178_v31, %v12284_v40  ;;  %v8556_v40 = vld [vmem:[%s8761_s25 + $0x3f0] sm:$0xff]  ;;  %vm3188_vm1 = vcmp.eq.s32.totalorder %v10191_v19, %v2852_v5  ;;  %vm3192_vm7 = vcmp.eq.s32.totalorder %v10191_v19, %v12334_v42 }
 0x3d9   : > { %vm12983_vm2 = vmor %vm12896_vm10, %vm2289_vm5  ;;  %1296 = vperm.xlu0 %8372, %v8556_v40   ;;  %2021 = vperm.xlu1 %8300, %v8557_v45   ;;  %v4485_v40 = vpop.f32.mrb[23].mxu1  ;;  %v1962_v45 = vpop.permute.xlu1 %1961 }
 0x3da   : > { %vm12996_vm13 = vmor %vm12958_vm3, %vm3186_vm14  ;;  %vm3187_vm3 = vcmp.eq.s32.totalorder %v10178_v31, %v2852_v5  ;;  %v19479_v40 = vmov 0  ;;  %v13148_v51 = vpop.f32.mrb[24].mxu1  ;;  %v19511_v5 = vmov 0 }
 0x3db   : > { %vm13002_vm10 = vmor %vm12919_vm12, %vm2291_vm4  ;;  %vm1398_vm4 = vcmp.eq.s32.totalorder %v10191_v19, %v19474_v1  ;;  %19504 = vst [vmem:[#allocation18_spill] sm:$0xff] %v13148_v51 }
 0x3dc   : > { %vm2548_vm5 = vmor %vm1652_vm15, %vm2292_vm8  ;;  %vm1397_vm15 = vcmp.eq.s32.totalorder %v10178_v31, %v19474_v1  ;;  %v19503_v1 = vld [vmem:[#allocation119_spill] sm:$0xff] }
 0x3dd   : > { %vm13016_vm12 = vmor %vm12983_vm2, %vm3185_vm0  ;;  %vm1399_vm2 = vcmp.eq.s32.totalorder %v10178_v31, %v19477_v47  ;;  %8376 = vset.pattern.permute.xlu0 %v18824_v58  ;;  %8301 = vset.pattern.permute.xlu1 %v18821_v56 }
 0x3de   : > { %vm3444_vm14 = vmor %vm2548_vm5, %vm3188_vm1  ;;  %vm758_vm5 = vcmp.eq.s32.totalorder %v10191_v19, %v19478_v27  ;;  %2914 = vperm.xlu1 %8301, %v8558_v3   ;;  %vm19491_vm1 = vcmp.eq.s32.totalorder %v10191_v19, %v19477_v47  ;;  %v2855_v47 = vpop.permute.xlu1 %2854 }
 0x3df   : > { %vm13029_vm8 = vmpackc.low %vm3444_vm14, %vm12996_vm13  ;;  %vm757_vm13 = vcmp.eq.s32.totalorder %v10178_v31, %v19478_v27  ;;  %v19487_v27 = vld [vmem:[#allocation74_spill] sm:$0xff] }
 0x3e0   : > { %v19476_v10 = vsel %vm13029_vm8, 4294967295, %v19475_v10  ;;  %7002 = vmatprep.mubr.msk.bf16.mxu1 %vm13029_vm8, %v19370_v48  ;;  %7274 = vmatprep.mubr.msk.bf16.mxu0 %vm13029_vm8, %v19370_v48  ;;  %vm3443_vm0 = vmor %vm13002_vm10, %vm3187_vm3  ;;  %vm759_vm10 = vcmp.eq.s32.totalorder %v10178_v31, %v19482_v32 }
 0x3e1   : > { %vm13053_vm14 = vmpackc.low %vm3443_vm0, %vm13016_vm12 }
 0x3e2   : > { %v19480_v40 = vsel %vm13053_vm14, 4294967295, %v19479_v40  ;;  %vm13063_vm3 = vmor %vm757_vm13, %vm1397_vm15  ;;  %7004 = vmatmul.mubr.msk.bf16.gmra.mrb[92].mxu1 %vm13053_vm14, %v19370_v48  ;;  %vm760_vm15 = vcmp.eq.s32.totalorder %v10191_v19, %v19482_v32  ;;  %vm2296_vm13 = vcmp.eq.s32.totalorder %v10191_v19, %v1962_v45  ;;  %7276 = vmatmul.mubr.msk.bf16.gmra.mrb[92].mxu0 %vm13053_vm14, %v19370_v48  ;;  %v13101_v32 = vpop.permute.xlu0 %2896  ;;  %vm19492_vm14 = vcmp.eq.s32.totalorder %v10191_v19, %v19487_v27 }
 0x3e3   : > { %19481 = vst [vmem:[#allocation20_spill] sm:$0xff] %v19480_v40  ;;  %vm13070_vm12 = vmor %vm758_vm5, %vm1398_vm4  ;;  %vm762_vm5 = vcmp.eq.s32.totalorder %v10191_v19, %v19490_v9  ;;  %2195 = vperm.xlu0 %8376, %v8559_v11   ;;  %8302 = vset.pattern.permute.xlu1 %v18824_v58  ;;  %v19507_v40 = vmov 0  ;;  %v1965_v11 = vpop.permute.xlu1 %1964 }
 0x3e4   : > { %vm13087_vm4 = vmor %vm759_vm10, %vm1399_vm2  ;;  %vm2295_vm2 = vcmp.eq.s32.totalorder %v10178_v31, %v1962_v45  ;;  %vm1401_vm10 = vcmp.eq.s32.totalorder %v10178_v31, %v19487_v27  ;;  %v19498_v45 = vld [vmem:[#allocation73_spill] sm:$0xff] }
 0x3e5   : > { %vm1656_vm0 = vmor %vm760_vm15, %vm19491_vm1  ;;  %vm19495_vm1 = vcmp.eq.s32.totalorder %v10191_v19, %v12413_v34 }
 0x3e6   : > { %vm13110_vm8 = vmor %vm762_vm5, %vm19492_vm14  ;;  %vm761_vm14 = vcmp.eq.s32.totalorder %v10178_v31, %v19490_v9  ;;  %vm1403_vm5 = vcmp.eq.s32.totalorder %v10178_v31, %v19498_v45  ;;  %v8560_v9 = vld [vmem:[%s8761_s25 + $0x230] sm:$0xff] }
 0x3e7   : > { %vm2550_vm15 = vmor %vm13070_vm12, %vm19495_vm1  ;;  %vm3190_vm12 = vcmp.eq.s32.totalorder %v10191_v19, %v2855_v47  ;;  %2024 = vperm.xlu1 %8302, %v8560_v9   ;;  %8378 = vset.pattern.permute.xlu0 %v18821_v56  ;;  %v4490_v9 = vpop.f32.mrb[25].mxu1 }
 0x3e8   : > { %vm13121_vm9 = vmor %vm1656_vm0, %vm2296_vm13  ;;  %vm2293_vm13 = vcmp.eq.s32.totalorder %v10178_v31, %v12413_v34  ;;  %v13167_v51 = vpop.f32.mrb[26].mxu1  ;;  %v8562_v34 = vld [vmem:[%s8761_s25 + $0x248] sm:$0xff] }
 0x3e9   : > { %vm13131_vm11 = vmor %vm13087_vm4, %vm2295_vm2  ;;  %vm763_vm4 = vcmp.eq.s32.totalorder %v10178_v31, %v19503_v1  ;;  %19509 = vst [vmem:[#allocation64_spill] sm:$0xff] %v13167_v51  ;;  %v4493_v9 = vpop.f32.mrb[27].mxu1 }
 0x3ea   : > { %vm13137_vm0 = vmor %vm761_vm14, %vm1401_vm10  ;;  %v13217_v27 = vpop.f32.mrb[28].mxu1  ;;  %v19521_v9 = vld [vmem:[#allocation78_spill] sm:$0xff] }
 0x3eb   : > { %vm3446_vm1 = vmor %vm2550_vm15, %vm3190_vm12  ;;  %vm3191_vm15 = vcmp.eq.s32.totalorder %v10178_v31, %v12334_v42  ;;  %v8561_v42 = vld [vmem:[%s8761_s25 + $0x238] sm:$0xff]  ;;  %19517 = vst [vmem:[#allocation17_spill] sm:$0xff] %v13217_v27 }
 0x3ec   : > { %vm3448_vm10 = vmor %vm13121_vm9, %vm3192_vm7  ;;  %2027 = vperm.xlu1 %8302, %v8561_v42   ;;  %vm2298_vm9 = vcmp.eq.s32.totalorder %v10191_v19, %v1965_v11  ;;  %vm19510_vm7 = vcmp.eq.s32.totalorder %v10178_v31, %v2855_v47  ;;  %v1968_v47 = vpop.permute.xlu1 %1967 }
 0x3ed   : > { %vm13155_vm14 = vmor %vm763_vm4, %vm1403_vm5 }
 0x3ee   : > { %vm13161_vm12 = vmpackc.low %vm3448_vm10, %vm3446_vm1  ;;  %vm2297_vm1 = vcmp.eq.s32.totalorder %v10178_v31, %v1965_v11  ;;  %vm764_vm10 = vcmp.eq.s32.totalorder %v10191_v19, %v19503_v1  ;;  %v4498_v1 = vpop.f32.mrb[29].mxu1 }
 0x3ef   : > { %v19508_v40 = vsel %vm13161_vm12, 4294967295, %v19507_v40  ;;  %vm2549_vm2 = vmor %vm13063_vm3, %vm2293_vm13  ;;  %7006 = vmatprep.mubr.msk.bf16.mxu1 %vm13161_vm12, %v19370_v48  ;;  %7278 = vmatprep.mubr.msk.bf16.mxu0 %vm13161_vm12, %v19370_v48  ;;  %vm1404_vm3 = vcmp.eq.s32.totalorder %v10191_v19, %v19498_v45  ;;  %vm3194_vm12 = vcmp.eq.s32.totalorder %v10191_v19, %v12547_v26  ;;  %v19526_v1 = vld [vmem:[#allocation124_spill] sm:$0xff]  ;;  %v19527_v45 = vld [vmem:[#allocation123_spill] sm:$0xff] }
 0x3f0   : > { %vm3445_vm5 = vmor %vm2549_vm2, %vm19510_vm7  ;;  %8303 = vset.pattern.permute.xlu1 %v18821_v56  ;;  %v2864_v35 = vpop.permute.xlu1 %2863 }
 0x3f1   : > { %vm3447_vm13 = vmor %vm13131_vm11, %vm3191_vm15  ;;  %vm2299_vm11 = vcmp.eq.s32.totalorder %v10178_v31, %v1968_v47  ;;  %vm2300_vm15 = vcmp.eq.s32.totalorder %v10191_v19, %v1968_v47  ;;  %2923 = vperm.xlu1 %8303, %v8561_v42   ;;  %v19519_v42 = vmov 0  ;;  %v19522_v47 = vld [vmem:[#allocation77_spill] sm:$0xff] }
 0x3f2   : > { %vm2554_vm4 = vmor %vm13110_vm8, %vm2298_vm9  ;;  %vm3193_vm9 = vcmp.eq.s32.totalorder %v10178_v31, %v12547_v26  ;;  %v13221_v26 = vpop.f32.mrb[30].mxu1 }
 0x3f3   : > { %vm13190_vm6 = vmpackc.low %vm3447_vm13, %vm3445_vm5  ;;  %vm3196_vm13 = vcmp.eq.s32.totalorder %v10191_v19, %v2864_v35  ;;  %19518 = vst [vmem:[#allocation63_spill] sm:$0xff] %v13221_v26  ;;  %v4501_v11 = vpop.f32.mrb[31].mxu1  ;;  %v19533_v26 = vld [vmem:[#allocation128_spill] sm:$0xff] }
 0x3f4   : > { %v19512_v5 = vsel %vm13190_vm6, 4294967295, %v19511_v5  ;;  %vm1660_vm2 = vmor %vm764_vm10, %vm1404_vm3  ;;  %7008 = vmatmul.mubr.msk.bf16.gmra.mrb[96].mxu1 %vm13190_vm6, %v19370_v48  ;;  %7280 = vmatmul.mubr.msk.bf16.gmra.mrb[96].mxu0 %vm13190_vm6, %v19370_v48  ;;  %vm3195_vm3 = vcmp.eq.s32.totalorder %v10178_v31, %v2864_v35  ;;  %vm1406_vm10 = vcmp.eq.s32.totalorder %v10191_v19, %v19521_v9  ;;  %v1974_v3 = vpop.permute.xlu1 %1973  ;;  %v19523_v35 = vmov 0  ;;  %v13288_v27 = vpop.f32.mrb[32].mxu1 }
 0x3f5   : > { %vm2553_vm8 = vmor %vm13137_vm0, %vm2297_vm1  ;;  %8304 = vset.pattern.permute.xlu1 %v18824_v58  ;;  %19534 = vst [vmem:[#allocation21_spill] sm:$0xff] %v13288_v27  ;;  %v4506_v51 = vpop.f32.mrb[33].mxu1 }
 0x3f6   : > { %vm13207_vm7 = vmor %vm2554_vm4, %vm3194_vm12  ;;  %2033 = vperm.xlu1 %8304, %v8562_v34   ;;  %vm1405_vm4 = vcmp.eq.s32.totalorder %v10178_v31, %v19521_v9  ;;  %v19530_v34 = vld [vmem:[#allocation82_spill] sm:$0xff]  ;;  %v13304_v27 = vpop.f32.mrb[34].mxu1  ;;  %v8565_v9 = vld [vmem:[%s8761_s25 + $0x258] sm:$0xff] }
 0x3f7   : > { %vm13213_vm5 = vmor %vm13155_vm14, %vm2299_vm11  ;;  %vm1407_vm11 = vcmp.eq.s32.totalorder %v10178_v31, %v19522_v47  ;;  %19539 = vst [vmem:[#allocation68_spill] sm:$0xff] %v13304_v27  ;;  %v4509_v51 = vpop.f32.mrb[35].mxu1  ;;  %v8564_v27 = vld [vmem:[%s8761_s25 + $0x250] sm:$0xff] }
 0x3f8   : > { %vm2556_vm0 = vmor %vm1660_vm2, %vm2300_vm15  ;;  %vm765_vm15 = vcmp.eq.s32.totalorder %v10178_v31, %v19526_v1  ;;  %v19545_v51 = vld [vmem:[#allocation127_spill] sm:$0xff] }
 0x3f9   : > { %vm3449_vm12 = vmor %vm2553_vm8, %vm3193_vm9  ;;  %vm766_vm9 = vcmp.eq.s32.totalorder %v10191_v19, %v19526_v1  ;;  %v8563_v1 = vld [vmem:[%s8761_s25 + $0x240] sm:$0xff] }
 0x3fa   : > { %vm3452_vm1 = vmor %vm2556_vm0, %vm3196_vm13  ;;  %vm1410_vm13 = vcmp.eq.s32.totalorder %v10191_v19, %v19530_v34  ;;  %8305 = vset.pattern.permute.xlu1 %v18821_v56 }
 0x3fb   : > { %vm13227_vm14 = vmpackc.low %vm3452_vm1, %vm13207_vm7  ;;  %vm1408_vm7 = vcmp.eq.s32.totalorder %v10191_v19, %v19522_v47  ;;  %vm768_vm1 = vcmp.eq.s32.totalorder %v10191_v19, %v19527_v45  ;;  %2926 = vperm.xlu1 %8305, %v8563_v1   ;;  %v2867_v1 = vpop.permute.xlu1 %2866 }
 0x3fc   : > { %v19520_v42 = vsel %vm13227_vm14, 4294967295, %v19519_v42  ;;  %7010 = vmatprep.mubr.msk.bf16.mxu1 %vm13227_vm14, %v19370_v48  ;;  %7282 = vmatprep.mubr.msk.bf16.mxu0 %vm13227_vm14, %v19370_v48  ;;  %vm3451_vm2 = vmor %vm13213_vm5, %vm3195_vm3  ;;  %vm767_vm5 = vcmp.eq.s32.totalorder %v10178_v31, %v19527_v45  ;;  %vm3200_vm14 = vcmp.eq.s32.totalorder %v10191_v19, %v12594_v41 }
 0x3fd   : > { %vm13245_vm8 = vmpackc.low %vm3451_vm2, %vm3449_vm12  ;;  %vm2302_vm12 = vcmp.eq.s32.totalorder %v10191_v19, %v12483_v63 }
 0x3fe   : > { %v19524_v35 = vsel %vm13245_vm8, 4294967295, %v19523_v35  ;;  %7012 = vmatmul.mubr.msk.bf16.gmra.mrb[100].mxu1 %vm13245_vm8, %v19370_v48  ;;  %7284 = vmatmul.mubr.msk.bf16.gmra.mrb[100].mxu0 %vm13245_vm8, %v19370_v48  ;;  %vm13263_vm0 = vmor %vm765_vm15, %vm1405_vm4  ;;  %vm2304_vm4 = vcmp.eq.s32.totalorder %v10191_v19, %v1974_v3  ;;  %vm2303_vm8 = vcmp.eq.s32.totalorder %v10178_v31, %v1974_v3 }
 0x3ff   : > { %19525 = vst [vmem:[#allocation22_spill] sm:$0xff] %v19524_v35  ;;  %vm1662_vm3 = vmor %vm766_vm9, %vm1406_vm10  ;;  %vm770_vm10 = vcmp.eq.s32.totalorder %v10191_v19, %v19533_v26  ;;  %vm1409_vm9 = vcmp.eq.s32.totalorder %v10178_v31, %v19530_v34  ;;  %v19540_v35 = vld [vmem:[#allocation81_spill] sm:$0xff]  ;;  %8307 = vset.pattern.permute.xlu1 %v18824_v58  ;;  %v1977_v34 = vpop.permute.xlu1 %1976 }
 0x400   : > { %vm13277_vm2 = vmor %vm767_vm5, %vm1407_vm11  ;;  %2036 = vperm.xlu1 %8307, %v8564_v27   ;;  %v19548_v27 = vmov 0 }
 0x401   : > { %vm1664_vm15 = vmor %vm768_vm1, %vm1408_vm7  ;;  %vm3198_vm7 = vcmp.eq.s32.totalorder %v10191_v19, %v2867_v1 }
 0x402   : > { %vm13292_vm11 = vmor %vm770_vm10, %vm1410_vm13  ;;  %vm769_vm13 = vcmp.eq.s32.totalorder %v10178_v31, %v19533_v26  ;;  %v8567_v26 = vld [vmem:[%s8761_s25 + $0x260] sm:$0xff] }
 0x403   : > { %vm2558_vm5 = vmor %vm1662_vm3, %vm2302_vm12  ;;  %vm1411_vm3 = vcmp.eq.s32.totalorder %v10178_v31, %v19540_v35  ;;  %v1980_v11 = vpop.permute.xlu1 %1979 }
 0x404   : > { %vm13299_vm6 = vmor %vm1664_vm15, %vm2304_vm4  ;;  %vm2301_vm4 = vcmp.eq.s32.totalorder %v10178_v31, %v12483_v63  ;;  %vm771_vm15 = vcmp.eq.s32.totalorder %v10178_v31, %v19545_v51  ;;  %2039 = vperm.xlu1 %8307, %v8565_v9   ;;  %v19560_v63 = vld [vmem:[#allocation86_spill] sm:$0xff] }
 0x405   : > { %vm3454_vm12 = vmor %vm2558_vm5, %vm3198_vm7  ;;  %vm3197_vm5 = vcmp.eq.s32.totalorder %v10178_v31, %v2867_v1  ;;  %v13393_v1 = vpop.f32.mrb[36].mxu1 }
 0x406   : > { %vm13314_vm1 = vmor %vm769_vm13, %vm1409_vm9  ;;  %19556 = vst [vmem:[#allocation67_spill] sm:$0xff] %v13393_v1  ;;  %v4514_v3 = vpop.f32.mrb[37].mxu1  ;;  %v19578_v1 = vld [vmem:[#allocation134_spill] sm:$0xff] }
 0x407   : > { %vm13322_vm10 = vmor %vm13277_vm2, %vm2303_vm8  ;;  %vm3199_vm8 = vcmp.eq.s32.totalorder %v10178_v31, %v12594_v41  ;;  %v19550_v41 = vmov 0  ;;  %v2876_v47 = vpop.permute.xlu1 %2875 }
 0x408   : > { %vm3456_vm9 = vmor %vm13299_vm6, %vm3200_vm14  ;;  %vm2306_vm6 = vcmp.eq.s32.totalorder %v10191_v19, %v1977_v34  ;;  %8308 = vset.pattern.permute.xlu1 %v18821_v56 }
 0x409   : > { %vm13335_vm7 = vmor %vm771_vm15, %vm1411_vm3  ;;  %vm1412_vm3 = vcmp.eq.s32.totalorder %v10191_v19, %v19540_v35  ;;  %vm772_vm15 = vcmp.eq.s32.totalorder %v10191_v19, %v19545_v51  ;;  %2935 = vperm.xlu1 %8308, %v8565_v9   ;;  %v19561_v9 = vmov 0  ;;  %v19564_v35 = vld [vmem:[#allocation132_spill] sm:$0xff] }
 0x40a   : > { %vm13341_vm2 = vmpackc.low %vm3456_vm9, %vm3454_vm12  ;;  %vm2305_vm12 = vcmp.eq.s32.totalorder %v10178_v31, %v1977_v34  ;;  %vm3202_vm9 = vcmp.eq.s32.totalorder %v10191_v19, %v12687_v59  ;;  %v8566_v34 = vld [vmem:[%s8761_s25 + $0x268] sm:$0xff] }
 0x40b   : > { %v19549_v27 = vsel %vm13341_vm2, 4294967295, %v19548_v27  ;;  %vm2557_vm13 = vmor %vm13263_vm0, %vm2301_vm4  ;;  %7014 = vmatprep.mubr.msk.bf16.mxu1 %vm13341_vm2, %v19370_v48  ;;  %7286 = vmatprep.mubr.msk.bf16.mxu0 %vm13341_vm2, %v19370_v48  ;;  %v1986_v3 = vpop.permute.xlu1 %1985 }
 0x40c   : > { %vm3453_vm14 = vmor %vm2557_vm13, %vm3197_vm5  ;;  %vm3201_vm13 = vcmp.eq.s32.totalorder %v10178_v31, %v12687_v59  ;;  %v13397_v59 = vpop.f32.mrb[38].mxu1 }
 0x40d   : > { %vm3455_vm0 = vmor %vm13322_vm10, %vm3199_vm8  ;;  %vm2308_vm8 = vcmp.eq.s32.totalorder %v10191_v19, %v1980_v11  ;;  %19557 = vst [vmem:[#allocation26_spill] sm:$0xff] %v13397_v59  ;;  %8310 = vset.pattern.permute.xlu1 %v18824_v58  ;;  %v4517_v51 = vpop.f32.mrb[39].mxu1 }
 0x40e   : > { %vm2562_vm4 = vmor %vm13292_vm11, %vm2306_vm6  ;;  %vm2307_vm11 = vcmp.eq.s32.totalorder %v10178_v31, %v1980_v11  ;;  %2045 = vperm.xlu1 %8310, %v8566_v34   ;;  %v19563_v11 = vld [vmem:[#allocation85_spill] sm:$0xff]  ;;  %v19565_v51 = vmov 0  ;;  %v13467_v34 = vpop.f32.mrb[40].mxu1 }
 0x40f   : > { %vm13366_vm2 = vmpackc.low %vm3455_vm0, %vm3453_vm14  ;;  %vm3204_vm0 = vcmp.eq.s32.totalorder %v10191_v19, %v2876_v47  ;;  %19573 = vst [vmem:[#allocation25_spill] sm:$0xff] %v13467_v34  ;;  %v4522_v59 = vpop.f32.mrb[41].mxu1  ;;  %v19579_v34 = vld [vmem:[#allocation89_spill] sm:$0xff] }
 0x410   : > { %v19551_v41 = vsel %vm13366_vm2, 4294967295, %v19550_v41  ;;  %vm1668_vm5 = vmor %vm772_vm15, %vm1412_vm3  ;;  %7016 = vmatmul.mubr.msk.bf16.gmra.mrb[104].mxu1 %vm13366_vm2, %v19370_v48  ;;  %7288 = vmatmul.mubr.msk.bf16.gmra.mrb[104].mxu0 %vm13366_vm2, %v19370_v48  ;;  %vm3203_vm3 = vcmp.eq.s32.totalorder %v10178_v31, %v2876_v47  ;;  %vm1414_vm15 = vcmp.eq.s32.totalorder %v10191_v19, %v19560_v63  ;;  %v19582_v47 = vld [vmem:[#allocation133_spill] sm:$0xff] }
 0x411   : > { %vm2561_vm10 = vmor %vm13314_vm1, %vm2305_vm12 }
 0x412   : > { %vm13383_vm6 = vmor %vm2562_vm4, %vm3202_vm9  ;;  %vm1413_vm4 = vcmp.eq.s32.totalorder %v10178_v31, %v19560_v63  ;;  %v19568_v63 = vld [vmem:[#allocation131_spill] sm:$0xff]  ;;  %8311 = vset.pattern.permute.xlu1 %v18821_v56 }
 0x413   : > { %vm13389_vm14 = vmor %vm13335_vm7, %vm2307_vm11  ;;  %2938 = vperm.xlu1 %8311, %v8567_v26   ;;  %v13479_v26 = vpop.f32.mrb[42].mxu1 }
 0x414   : > { %vm2564_vm1 = vmor %vm1668_vm5, %vm2308_vm8  ;;  %vm1416_vm5 = vcmp.eq.s32.totalorder %v10191_v19, %v19563_v11  ;;  %vm774_vm8 = vcmp.eq.s32.totalorder %v10191_v19, %v19564_v35  ;;  %19577 = vst [vmem:[#allocation71_spill] sm:$0xff] %v13479_v26  ;;  %v19589_v26 = vmov 0 }
 0x415   : > { %vm13399_vm12 = vmor %vm2561_vm10, %vm3201_vm13  ;;  %vm773_vm10 = vcmp.eq.s32.totalorder %v10178_v31, %v19564_v35 }
 0x416   : > { %vm3460_vm7 = vmor %vm2564_vm1, %vm3204_vm0  ;;  %vm2312_vm0 = vcmp.eq.s32.totalorder %v10191_v19, %v1986_v3 }
 0x417   : > { %vm13411_vm9 = vmpackc.low %vm3460_vm7, %vm13383_vm6  ;;  %vm776_vm6 = vcmp.eq.s32.totalorder %v10191_v19, %v19568_v63  ;;  %vm2310_vm7 = vcmp.eq.s32.totalorder %v10191_v19, %v12841_v21  ;;  %8312 = vset.pattern.permute.xlu1 %v18824_v58 }
 0x418   : > { %v19562_v9 = vsel %vm13411_vm9, 4294967295, %v19561_v9  ;;  %7018 = vmatprep.mubr.msk.bf16.mxu1 %vm13411_vm9, %v19370_v48  ;;  %7290 = vmatprep.mubr.msk.bf16.mxu0 %vm13411_vm9, %v19370_v48  ;;  %vm3459_vm11 = vmor %vm13389_vm14, %vm3203_vm3  ;;  %vm1415_vm3 = vcmp.eq.s32.totalorder %v10178_v31, %v19563_v11  ;;  %v19576_v11 = vld [vmem:[#allocation90_spill] sm:$0xff] }
 0x419   : > { %vm13433_vm13 = vmpackc.low %vm3459_vm11, %vm13399_vm12  ;;  %vm19583_vm9 = vcmp.eq.s32.totalorder %v10191_v19, %v19576_v11 }
 0x41a   : > { %v19566_v51 = vsel %vm13433_vm13, 4294967295, %v19565_v51  ;;  %vm13439_vm1 = vmor %vm773_vm10, %vm1413_vm4  ;;  %7020 = vmatmul.mubr.msk.bf16.gmra.mrb[108].mxu1 %vm13433_vm13, %v19370_v48  ;;  %7292 = vmatmul.mubr.msk.bf16.gmra.mrb[108].mxu0 %vm13433_vm13, %v19370_v48  ;;  %vm775_vm4 = vcmp.eq.s32.totalorder %v10178_v31, %v19568_v63  ;;  %v2879_v63 = vpop.permute.xlu1 %2878  ;;  %vm779_vm13 = vcmp.eq.s32.totalorder %v10178_v31, %v19582_v47 }
 0x41b   : > { %19567 = vst [vmem:[#allocation72_spill] sm:$0xff] %v19566_v51  ;;  %vm13443_vm14 = vmor %vm774_vm8, %vm1414_vm15  ;;  %vm3208_vm15 = vcmp.eq.s32.totalorder %v10191_v19, %v12774_v43  ;;  %v4525_v51 = vpop.f32.mrb[43].mxu1  ;;  %vm2309_vm8 = vcmp.eq.s32.totalorder %v10178_v31, %v12841_v21  ;;  %v19586_v21 = vmov 0 }
 0x41c   : > { %vm1672_vm12 = vmor %vm776_vm6, %vm1416_vm5  ;;  %vm1417_vm5 = vcmp.eq.s32.totalorder %v10178_v31, %v19576_v11  ;;  %v8569_v11 = vld [vmem:[%s8761_s25 + $0x278] sm:$0xff]  ;;  %v13575_v59 = vpop.f32.mrb[44].mxu1 }
 0x41d   : > { %vm2568_vm11 = vmor %vm1672_vm12, %vm2312_vm0  ;;  %vm3206_vm12 = vcmp.eq.s32.totalorder %v10191_v19, %v2879_v63  ;;  %19600 = vst [vmem:[#allocation30_spill] sm:$0xff] %v13575_v59  ;;  %v13766_v59 = vpop.permute.xlu0 %2905 }
 0x41e   : > { %vm13469_vm10 = vmor %vm775_vm4, %vm1415_vm3  ;;  %vm777_vm3 = vcmp.eq.s32.totalorder %v10178_v31, %v19578_v1 }
 0x41f   : > { %vm2566_vm6 = vmor %vm13443_vm14, %vm2310_vm7  ;;  %vm778_vm14 = vcmp.eq.s32.totalorder %v10191_v19, %v19578_v1  ;;  %v8568_v1 = vld [vmem:[%s8761_s25 + $0x270] sm:$0xff] }
 0x420   : > { %vm3464_vm4 = vmor %vm2568_vm11, %vm3208_vm15  ;;  %vm2311_vm11 = vcmp.eq.s32.totalorder %v10178_v31, %v1986_v3  ;;  %2048 = vperm.xlu1 %8312, %v8568_v1   ;;  %v1989_v3 = vpop.permute.xlu1 %1988 }
 0x421   : > { %vm13491_vm7 = vmor %vm777_vm3, %vm1417_vm5  ;;  %vm2313_vm2 = vcmp.eq.s32.totalorder %v10178_v31, %v1989_v3 }
 0x422   : > { %vm3462_vm0 = vmor %vm2566_vm6, %vm3206_vm12  ;;  %vm19588_vm6 = vcmp.eq.s32.totalorder %v10178_v31, %v19579_v34 }
 0x423   : > { %vm13503_vm15 = vmor %vm778_vm14, %vm19583_vm9  ;;  %vm3205_vm9 = vcmp.eq.s32.totalorder %v10178_v31, %v2879_v63  ;;  %vm780_vm14 = vcmp.eq.s32.totalorder %v10191_v19, %v19582_v47  ;;  %v4530_v47 = vpop.f32.mrb[45].mxu1  ;;  %v19605_v63 = vmov 0 }
 0x424   : > { %vm13509_vm5 = vmpackc.low %vm3464_vm4, %vm3462_vm0  ;;  %vm1420_vm0 = vcmp.eq.s32.totalorder %v10191_v19, %v19579_v34  ;;  %2051 = vperm.xlu1 %8312, %v8569_v11   ;;  %v1992_v45 = vpop.permute.xlu1 %1991  ;;  %v13579_v1 = vpop.f32.mrb[46].mxu1  ;;  %v19609_v34 = vld [vmem:[#allocation136_spill] sm:$0xff] }
 0x425   : > { %v19587_v21 = vsel %vm13509_vm5, 4294967295, %v19586_v21  ;;  %vm13516_vm3 = vmor %vm779_vm13, %vm19588_vm6  ;;  %7022 = vmatprep.mubr.msk.bf16.mxu1 %vm13509_vm5, %v19370_v48  ;;  %7294 = vmatprep.mubr.msk.bf16.mxu0 %vm13509_vm5, %v19370_v48  ;;  %vm3207_vm13 = vcmp.eq.s32.totalorder %v10178_v31, %v12774_v43  ;;  %v19593_v43 = vmov 0  ;;  %19601 = vst [vmem:[#allocation29_spill] sm:$0xff] %v13579_v1 }
 0x426   : > { %v19590_v26 = vsel %vm13516_vm3, 4294967295, %v19589_v26  ;;  %vm2565_vm12 = vmor %vm13439_vm1, %vm2309_vm8  ;;  %vm2314_vm1 = vcmp.eq.s32.totalorder %v10191_v19, %v1989_v3  ;;  %v19604_v3 = vld [vmem:[#allocation94_spill] sm:$0xff] }
 0x427   : > { %vm2567_vm4 = vmor %vm13469_vm10, %vm2311_vm11  ;;  %vm2315_vm10 = vcmp.eq.s32.totalorder %v10178_v31, %v1992_v45 }
 0x428   : > { %vm3461_vm6 = vmor %vm2565_vm12, %vm3205_vm9  ;;  %vm2316_vm9 = vcmp.eq.s32.totalorder %v10191_v19, %v1992_v45  ;;  %8313 = vset.pattern.permute.xlu1 %v18821_v56  ;;  %v2888_v51 = vpop.permute.xlu1 %2887  ;;  %v19608_v45 = vld [vmem:[#allocation93_spill] sm:$0xff] }
 0x429   : > { %vm13538_vm5 = vmor %vm780_vm14, %vm1420_vm0  ;;  %vm3210_vm0 = vcmp.eq.s32.totalorder %v10191_v19, %v12966_v53  ;;  %2947 = vperm.xlu1 %8313, %v8569_v11   ;;  %vm3211_vm14 = vcmp.eq.s32.totalorder %v10178_v31, %v2888_v51  ;;  %v8570_v11 = vld [vmem:[%s8761_s25 + $0x288] sm:$0xff] }
 0x42a   : > { %vm3463_vm8 = vmor %vm2567_vm4, %vm3207_vm13 }
 0x42b   : > { %vm13544_vm3 = vmpackc.low %vm3463_vm8, %vm3461_vm6  ;;  %vm3212_vm6 = vcmp.eq.s32.totalorder %v10191_v19, %v2888_v51  ;;  %v19610_v51 = vmov 0 }
 0x42c   : > { %v19594_v43 = vsel %vm13544_vm3, 4294967295, %v19593_v43  ;;  %vm13551_vm11 = vmor %vm13491_vm7, %vm2313_vm2  ;;  %7024 = vmatmul.mubr.msk.bf16.gmra.mrb[112].mxu1 %vm13544_vm3, %v19370_v48  ;;  %7296 = vmatmul.mubr.msk.bf16.gmra.mrb[112].mxu0 %vm13544_vm3, %v19370_v48  ;;  %vm3209_vm2 = vcmp.eq.s32.totalorder %v10178_v31, %v12966_v53  ;;  %vm19597_vm7 = vnez %v19590_v26  ;;  %v4533_v53 = vpop.f32.mrb[47].mxu1  ;;  %v1998_v47 = vpop.permute.xlu1 %1997  ;;  %v8574_v26 = vld [vmem:[%s8761_s25 + $0x2a8] sm:$0xff] }
 0x42d   : > { %vm2570_vm12 = vmor %vm13503_vm15, %vm2314_vm1  ;;  %8314 = vset.pattern.permute.xlu1 %v18824_v58  ;;  %v19613_v53 = vld [vmem:[#allocation135_spill] sm:$0xff]  ;;  %v13666_v1 = vpop.f32.mrb[48].mxu1 }
 0x42e   : > { %vm13571_vm13 = vmor %vm19597_vm7, %vm2315_vm10  ;;  %2057 = vperm.xlu1 %8314, %v8570_v11   ;;  %v19616_v11 = vld [vmem:[#allocation98_spill] sm:$0xff]  ;;  %19622 = vst [vmem:[#allocation34_spill] sm:$0xff] %v13666_v1  ;;  %v19633_v1 = vld [vmem:[#allocation137_spill] sm:$0xff] }
 0x42f   : > { %vm2572_vm4 = vmor %vm13538_vm5, %vm2316_vm9  ;;  %vm1422_vm5 = vcmp.eq.s32.totalorder %v10191_v19, %v19604_v3  ;;  %vm1421_vm9 = vcmp.eq.s32.totalorder %v10178_v31, %v19604_v3  ;;  %v8571_v3 = vld [vmem:[%s8761_s25 + $0x280] sm:$0xff] }
 0x430   : > { %vm3466_vm15 = vmor %vm2570_vm12, %vm3210_vm0  ;;  %vm782_vm12 = vcmp.eq.s32.totalorder %v10191_v19, %v19609_v34 }
 0x431   : > { %vm13585_vm1 = vmor %vm13551_vm11, %vm3209_vm2  ;;  %vm1423_vm11 = vcmp.eq.s32.totalorder %v10178_v31, %v19608_v45  ;;  %vm1424_vm2 = vcmp.eq.s32.totalorder %v10191_v19, %v19608_v45  ;;  %v4538_v45 = vpop.f32.mrb[49].mxu1 }
 0x432   : > { %vm3468_vm8 = vmor %vm2572_vm4, %vm3212_vm6  ;;  %vm783_vm4 = vcmp.eq.s32.totalorder %v10178_v31, %v19613_v53  ;;  %vm784_vm6 = vcmp.eq.s32.totalorder %v10191_v19, %v19613_v53  ;;  %8315 = vset.pattern.permute.xlu1 %v18821_v56  ;;  %v19621_v53 = vld [vmem:[#allocation138_spill] sm:$0xff]  ;;  %v13699_v45 = vpop.f32.mrb[50].mxu1 }
 0x433   : > { %vm13593_vm10 = vmpackc.low %vm3468_vm8, %vm3466_vm15  ;;  %2950 = vperm.xlu1 %8315, %v8571_v3   ;;  %v19627_v3 = vld [vmem:[#allocation97_spill] sm:$0xff]  ;;  %19632 = vst [vmem:[#allocation80_spill] sm:$0xff] %v13699_v45  ;;  %v4541_v35 = vpop.f32.mrb[51].mxu1  ;;  %v8572_v45 = vld [vmem:[%s8761_s25 + $0x290] sm:$0xff] }
 0x434   : > { %v19606_v63 = vsel %vm13593_vm10, 4294967295, %v19605_v63  ;;  %7026 = vmatprep.mubr.msk.bf16.mxu1 %vm13593_vm10, %v19370_v48  ;;  %7298 = vmatprep.mubr.msk.bf16.mxu0 %vm13593_vm10, %v19370_v48  ;;  %vm3467_vm0 = vmor %vm13571_vm13, %vm3211_vm14  ;;  %vm781_vm13 = vcmp.eq.s32.totalorder %v10178_v31, %v19609_v34  ;;  %vm1425_vm14 = vcmp.eq.s32.totalorder %v10178_v31, %v19616_v11  ;;  %vm3216_vm10 = vcmp.eq.s32.totalorder %v10191_v19, %v13008_v16  ;;  %v19654_v35 = vld [vmem:[#allocation139_spill] sm:$0xff] }
 0x435   : > { %19607 = vst [vmem:[#allocation76_spill] sm:$0xff] %v19606_v63  ;;  %vm13615_vm7 = vmpackc.low %vm3467_vm0, %vm13585_vm1  ;;  %vm2320_vm0 = vcmp.eq.s32.totalorder %v10191_v19, %v1998_v47  ;;  %v19647_v63 = vmov 0 }
 0x436   : > { %v19611_v51 = vsel %vm13615_vm7, 4294967295, %v19610_v51  ;;  %vm13626_vm15 = vmor %vm782_vm12, %vm1422_vm5  ;;  %7028 = vmatmul.mubr.msk.bf16.gmra.mrb[116].mxu1 %vm13615_vm7, %v19370_v48  ;;  %7300 = vmatmul.mubr.msk.bf16.gmra.mrb[116].mxu0 %vm13615_vm7, %v19370_v48  ;;  %vm1426_vm5 = vcmp.eq.s32.totalorder %v10191_v19, %v19616_v11  ;;  %vm2319_vm7 = vcmp.eq.s32.totalorder %v10178_v31, %v1998_v47  ;;  %v19660_v11 = vld [vmem:[#allocation102_spill] sm:$0xff] }
 0x437   : > { %19612 = vst [vmem:[#allocation75_spill] sm:$0xff] %v19611_v51  ;;  %vm13643_vm1 = vmor %vm781_vm13, %vm1421_vm9  ;;  %vm785_vm9 = vcmp.eq.s32.totalorder %v10178_v31, %v19621_v53  ;;  %v19625_v51 = vmov 0  ;;  %8317 = vset.pattern.permute.xlu1 %v18824_v58 }
 0x438   : > { %vm13650_vm8 = vmor %vm783_vm4, %vm1423_vm11  ;;  %vm2318_vm11 = vcmp.eq.s32.totalorder %v10191_v19, %v12925_v6  ;;  %vm786_vm4 = vcmp.eq.s32.totalorder %v10191_v19, %v19621_v53  ;;  %v2891_v53 = vpop.permute.xlu1 %2890  ;;  %2060 = vperm.xlu1 %8317, %v8572_v45   ;;  %v13791_v45 = vpop.f32.mrb[52].mxu1 }
 0x439   : > { %vm1680_vm12 = vmor %vm784_vm6, %vm1424_vm2  ;;  %vm1427_vm6 = vcmp.eq.s32.totalorder %v10178_v31, %v19627_v3  ;;  %19653 = vst [vmem:[#allocation33_spill] sm:$0xff] %v13791_v45  ;;  %v2007_v45 = vpop.permute.xlu0 %2006 }
 0x43a   : > { %vm13673_vm13 = vmor %vm785_vm9, %vm1425_vm14  ;;  %vm1428_vm14 = vcmp.eq.s32.totalorder %v10191_v19, %v19627_v3  ;;  %vm3214_vm9 = vcmp.eq.s32.totalorder %v10191_v19, %v2891_v53  ;;  %v19636_v3 = vmov 0 }
 0x43b   : > { %vm13678_vm2 = vmor %vm786_vm4, %vm1426_vm5  ;;  %vm2317_vm4 = vcmp.eq.s32.totalorder %v10178_v31, %v12925_v6  ;;  %v19640_v6 = vmov 0 }
 0x43c   : > { %v19626_v51 = vsel %vm13678_vm2, 4294967295, %v19625_v51  ;;  %vm13686_vm3 = vmor %vm1680_vm12, %vm2320_vm0  ;;  %vm787_vm0 = vcmp.eq.s32.totalorder %v10178_v31, %v19633_v1 }
 0x43d   : > { %vm13694_vm5 = vmor %vm13626_vm15, %vm2318_vm11  ;;  %vm788_vm15 = vcmp.eq.s32.totalorder %v10191_v19, %v19633_v1  ;;  %v2001_v1 = vpop.permute.xlu1 %2000 }
 0x43e   : > { %vm13705_vm12 = vmor %vm13650_vm8, %vm2319_vm7 }
 0x43f   : > { %vm13712_vm11 = vmor %vm787_vm0, %vm1427_vm6  ;;  %vm3215_vm6 = vcmp.eq.s32.totalorder %v10178_v31, %v13008_v16  ;;  %v8573_v16 = vld [vmem:[%s8761_s25 + $0x298] sm:$0xff] }
 0x440   : > { %v19637_v3 = vsel %vm13712_vm11, 4294967295, %v19636_v3  ;;  %vm3472_vm7 = vmor %vm13686_vm3, %vm3216_vm10  ;;  %vm2321_vm3 = vcmp.eq.s32.totalorder %v10178_v31, %v2001_v1  ;;  %vm2322_vm10 = vcmp.eq.s32.totalorder %v10191_v19, %v2001_v1  ;;  %2063 = vperm.xlu1 %8317, %v8573_v16  }
 0x441   : > { %vm13724_vm8 = vmor %vm788_vm15, %vm1428_vm14  ;;  %vm3213_vm14 = vcmp.eq.s32.totalorder %v10178_v31, %v2891_v53  ;;  %v2004_v47 = vpop.permute.xlu1 %2003  ;;  %v8575_v53 = vld [vmem:[%s8761_s25 + $0x2a0] sm:$0xff] }
 0x442   : > { %vm3470_vm0 = vmor %vm13694_vm5, %vm3214_vm9  ;;  %vm19644_vm9 = vnez %v19626_v51  ;;  %v19649_v51 = vld [vmem:[#allocation101_spill] sm:$0xff] }
 0x443   : > { %vm13732_vm11 = vmpackc.low %vm3472_vm7, %vm3470_vm0  ;;  %vm2323_vm7 = vcmp.eq.s32.totalorder %v10178_v31, %v2004_v47  ;;  %vm2324_vm0 = vcmp.eq.s32.totalorder %v10191_v19, %v2004_v47  ;;  %v4546_v47 = vpop.f32.mrb[53].mxu1 }
 0x444   : > { %v19641_v6 = vsel %vm13732_vm11, 4294967295, %v19640_v6  ;;  %vm2573_vm2 = vmor %vm13643_vm1, %vm2317_vm4  ;;  %7030 = vmatprep.mubr.msk.bf16.mxu1 %vm13732_vm11, %v19370_v48  ;;  %7302 = vmatprep.mubr.msk.bf16.mxu0 %vm13732_vm11, %v19370_v48  ;;  %v13806_v34 = vpop.f32.mrb[54].mxu1 }
 0x445   : > { %vm3471_vm5 = vmor %vm13705_vm12, %vm3215_vm6  ;;  %vm3218_vm12 = vcmp.eq.s32.totalorder %v10191_v19, %v13101_v32  ;;  %8318 = vset.pattern.permute.xlu1 %v18821_v56  ;;  %vm1431_vm6 = vcmp.eq.s32.totalorder %v10178_v31, %v19649_v51  ;;  %v2900_v1 = vpop.permute.xlu1 %2899  ;;  %19657 = vst [vmem:[#allocation79_spill] sm:$0xff] %v13806_v34  ;;  %v4549_v47 = vpop.f32.mrb[55].mxu1  ;;  %v19661_v34 = vmov 0 }
 0x446   : > { %vm13752_vm1 = vmor %vm13673_vm13, %vm2321_vm3  ;;  %vm19650_vm3 = vnez %v19637_v3  ;;  %2959 = vperm.xlu1 %8318, %v8573_v16   ;;  %v19673_v3 = vmov 0  ;;  %v19678_v47 = vld [vmem:[#allocation106_spill] sm:$0xff]  ;;  %v19709_v16 = vmov 0 }
 0x447   : > { %vm13758_vm15 = vmor %vm19644_vm9, %vm2322_vm10 }
 0x448   : > { %vm3469_vm4 = vmor %vm2573_vm2, %vm3213_vm14  ;;  %vm3217_vm2 = vcmp.eq.s32.totalorder %v10178_v31, %v13101_v32  ;;  %v19663_v32 = vld [vmem:[#allocation140_spill] sm:$0xff] }
 0x449   : > { %vm13768_vm13 = vmpackc.low %vm3471_vm5, %vm3469_vm4  ;;  %vm791_vm5 = vcmp.eq.s32.totalorder %v10178_v31, %v19654_v35 }
 0x44a   : > { %v19648_v63 = vsel %vm13768_vm13, 4294967295, %v19647_v63  ;;  %7032 = vmatmul.mubr.msk.bf16.gmra.mrb[120].mxu1 %vm13768_vm13, %v19370_v48  ;;  %7304 = vmatmul.mubr.msk.bf16.gmra.mrb[120].mxu0 %vm13768_vm13, %v19370_v48  ;;  %vm13785_vm10 = vmor %vm19650_vm3, %vm2323_vm7  ;;  %vm3220_vm7 = vcmp.eq.s32.totalorder %v10191_v19, %v2900_v1 }
 0x44b   : > { %vm2580_vm14 = vmor %vm13724_vm8, %vm2324_vm0  ;;  %vm3219_vm8 = vcmp.eq.s32.totalorder %v10178_v31, %v2900_v1  ;;  %8320 = vset.pattern.permute.xlu1 %v18824_v58  ;;  %v19666_v1 = vmov 0 }
 0x44c   : > { %vm3474_vm9 = vmor %vm13758_vm15, %vm3218_vm12  ;;  %vm1429_vm15 = vcmp.eq.s32.totalorder %v10178_v31, %v19660_v11  ;;  %2069 = vperm.xlu1 %8320, %v8574_v26   ;;  %v2010_v26 = vpop.permute.xlu1 %2009 }
 0x44d   : > { %vm13800_vm4 = vmor %vm791_vm5, %vm1431_vm6  ;;  %vm1432_vm6 = vcmp.eq.s32.totalorder %v10191_v19, %v19649_v51  ;;  %vm792_vm5 = vcmp.eq.s32.totalorder %v10191_v19, %v19654_v35  ;;  %v13876_v51 = vpop.f32.mrb[56].mxu1 }
 0x44e   : > { %vm13813_vm0 = vmor %vm13752_vm1, %vm3217_vm2  ;;  %vm789_vm1 = vcmp.eq.s32.totalorder %v10178_v31, %v19663_v32  ;;  %vm1430_vm2 = vcmp.eq.s32.totalorder %v10191_v19, %v19660_v11  ;;  %19669 = vst [vmem:[#allocation38_spill] sm:$0xff] %v13876_v51  ;;  %v4554_v35 = vpop.f32.mrb[57].mxu1  ;;  %v19697_v51 = vld [vmem:[#allocation109_spill] sm:$0xff] }
 0x44f   : > { %vm3476_vm12 = vmor %vm2580_vm14, %vm3220_vm7  ;;  %v13885_v11 = vpop.f32.mrb[58].mxu1  ;;  %v13927_v35 = vpop.permute.xlu0 %2018 }
 0x450   : > { %vm13822_vm3 = vmpackc.low %vm3476_vm12, %vm3474_vm9  ;;  %vm2328_vm12 = vcmp.eq.s32.totalorder %v10191_v19, %v2010_v26  ;;  %8321 = vset.pattern.permute.xlu1 %v18821_v56  ;;  %19672 = vst [vmem:[#allocation37_spill] sm:$0xff] %v13885_v11 }
 0x451   : > { %v19662_v34 = vsel %vm13822_vm3, 4294967295, %v19661_v34  ;;  %7034 = vmatprep.mubr.msk.bf16.mxu1 %vm13822_vm3, %v19370_v48  ;;  %vm3475_vm14 = vmor %vm13785_vm10, %vm3219_vm8  ;;  %7306 = vmatprep.mubr.msk.bf16.mxu0 %vm13822_vm3, %v19370_v48  ;;  %vm790_vm10 = vcmp.eq.s32.totalorder %v10191_v19, %v19663_v32  ;;  %v4557_v32 = vpop.f32.mrb[59].mxu1 }
 0x452   : > { %vm13840_vm9 = vmor %vm789_vm1, %vm1429_vm15  ;;  %vm2326_vm15 = vcmp.eq.s32.totalorder %v10191_v19, %v2007_v45  ;;  %vm2327_vm1 = vcmp.eq.s32.totalorder %v10178_v31, %v2010_v26  ;;  %2962 = vperm.xlu1 %8321, %v8575_v53   ;;  %v19679_v26 = vmov 0  ;;  %v19683_v53 = vld [vmem:[#allocation105_spill] sm:$0xff] }
 0x453   : > { %vm13849_vm7 = vmpackc.low %vm3475_vm14, %vm13813_vm0  ;;  %vm3224_vm14 = vcmp.eq.s32.totalorder %v10191_v19, %v13766_v59  ;;  %v19686_v32 = vld [vmem:[#allocation141_spill] sm:$0xff]  ;;  %v2909_v11 = vpop.permute.xlu0 %2908 }
 0x454   : > { %v19667_v1 = vsel %vm13849_vm7, 4294967295, %v19666_v1  ;;  %vm1688_vm8 = vmor %vm792_vm5, %vm1432_vm6  ;;  %7036 = vmatmul.mubr.msk.bf16.gmra.mrb[124].mxu1 %vm13849_vm7, %v19370_v48  ;;  %7308 = vmatmul.mubr.msk.bf16.gmra.mrb[124].mxu0 %vm13849_vm7, %v19370_v48  ;;  %vm19668_vm6 = vnez %v18911_v24  ;;  %v2903_v24 = vpop.permute.xlu1 %2902 }
 0x455   : > { %vm1686_vm0 = vmor %vm790_vm10, %vm1430_vm2  ;;  %7486 = vmatprep.mubr.msk.bf16.mxu0 %vm19668_vm6, %v19370_v48  ;;  %vm2325_vm10 = vcmp.eq.s32.totalorder %v10178_v31, %v2007_v45  ;;  %v8576_v45 = vld [vmem:[%s8761_s25 + $0x2b0] sm:$0xff] }
 0x456   : > { %vm2584_vm5 = vmor %vm1688_vm8, %vm2328_vm12  ;;  %vm3222_vm8 = vcmp.eq.s32.totalorder %v10191_v19, %v2903_v24  ;;  %8322 = vset.pattern.permute.xlu1 %v18824_v58 }
 0x457   : > { %vm2582_vm3 = vmor %vm1686_vm0, %vm2326_vm15  ;;  %vm3223_vm15 = vcmp.eq.s32.totalorder %v10178_v31, %v13766_v59  ;;  %2072 = vperm.xlu1 %8322, %v8576_v45  }
 0x458   : > { %vm13881_vm2 = vmor %vm13800_vm4, %vm2327_vm1  ;;  %vm3221_vm4 = vcmp.eq.s32.totalorder %v10178_v31, %v2903_v24  ;;  %v2013_v59 = vpop.permute.xlu1 %2012 }
 0x459   : > { %vm3480_vm12 = vmor %vm2584_vm5, %vm3224_vm14  ;;  %vm19676_vm14 = vnez %v18915_v23  ;;  %v8577_v23 = vld [vmem:[%s8761_s25 + $0x2b8] sm:$0xff] }
 0x45a   : > { %vm3478_vm0 = vmor %vm2582_vm3, %vm3222_vm8  ;;  %vm19677_vm3 = vnez %v18922_v33  ;;  %v19682_v33 = vld [vmem:[#allocation142_spill] sm:$0xff] }
 0x45b   : > { %vm13893_vm1 = vmpackc.low %vm3480_vm12, %vm3478_vm0  ;;  %vm1434_vm12 = vcmp.eq.s32.totalorder %v10191_v19, %v19678_v47  ;;  %2075 = vperm.xlu1 %8322, %v8577_v23   ;;  %vm794_vm0 = vcmp.eq.s32.totalorder %v10191_v19, %v19682_v33 }
 0x45c   : > { %v19674_v3 = vsel %vm13893_vm1, 4294967295, %v19673_v3  ;;  %vm2581_vm6 = vmor %vm13840_vm9, %vm2325_vm10  ;;  %7488 = vmatmul.mubr.msk.bf16.vlgmr.msra.gmra.mrb[0].mxu0 %vm19676_vm14, %v19370_v48  ;;  %7038 = vmatprep.mubr.msk.bf16.mxu1 %vm13893_vm1, %v19370_v48  ;;  %vm1433_vm9 = vcmp.eq.s32.totalorder %v10178_v31, %v19678_v47  ;;  %v2016_v24 = vpop.permute.xlu1 %2015  ;;  %vm795_vm14 = vcmp.eq.s32.totalorder %v10178_v31, %v19686_v32  ;;  %vm1440_vm1 = vcmp.eq.s32.totalorder %v10191_v19, %v19697_v51 }
 0x45d   : > { %19675 = vst [vmem:[#allocation84_spill] sm:$0xff] %v19674_v3  ;;  %7490 = vmatprep.mubr.msk.bf16.mxu0 %vm19677_vm3, %v19370_v48  ;;  %vm3479_vm5 = vmor %vm13881_vm2, %vm3223_vm15  ;;  %vm793_vm2 = vcmp.eq.s32.totalorder %v10178_v31, %v19682_v33  ;;  %vm1435_vm15 = vcmp.eq.s32.totalorder %v10178_v31, %v19683_v53  ;;  %v19691_v33 = vld [vmem:[#allocation110_spill] sm:$0xff]  ;;  %vm2331_vm7 = vcmp.eq.s32.totalorder %v10178_v31, %v2016_v24 }
 0x45e   : > { %vm3477_vm8 = vmor %vm2581_vm6, %vm3221_vm4  ;;  %vm1436_vm6 = vcmp.eq.s32.totalorder %v10191_v19, %v19683_v53 }
 0x45f   : > { %vm13913_vm10 = vmpackc.low %vm3479_vm5, %vm3477_vm8  ;;  %vm2330_vm5 = vcmp.eq.s32.totalorder %v10191_v19, %v2013_v59  ;;  %vm796_vm8 = vcmp.eq.s32.totalorder %v10191_v19, %v19686_v32  ;;  %8323 = vset.pattern.permute.xlu1 %v18821_v56  ;;  %v19696_v32 = vld [vmem:[#allocation144_spill] sm:$0xff] }
 0x460   : > { %v19680_v26 = vsel %vm13913_vm10, 4294967295, %v19679_v26  ;;  %7040 = vmatmul.mubr.msk.bf16.gmra.mrb[128].mxu1 %vm13913_vm10, %v19370_v48  ;;  %vm13931_vm4 = vmor %vm793_vm2, %vm1433_vm9  ;;  %vm1437_vm2 = vcmp.eq.s32.totalorder %v10178_v31, %v19691_v33  ;;  %vm2329_vm10 = vcmp.eq.s32.totalorder %v10178_v31, %v2013_v59  ;;  %2971 = vperm.xlu1 %8323, %v8577_v23   ;;  %v13975_v59 = vpop.f32.mrb[60].mxu1 }
 0x461   : > { %19681 = vst [vmem:[#allocation83_spill] sm:$0xff] %v19680_v26  ;;  %vm13939_vm3 = vmor %vm794_vm0, %vm1434_vm12  ;;  %vm19692_vm12 = vnez %v18925_v49  ;;  %v4562_v23 = vpop.f32.mrb[61].mxu1  ;;  %v19703_v26 = vld [vmem:[#allocation143_spill] sm:$0xff]  ;;  %v19721_v49 = vld [vmem:[#allocation114_spill] sm:$0xff] }
 0x462   : > { %vm13946_vm9 = vmor %vm795_vm14, %vm1435_vm15  ;;  %vm19695_vm15 = vnez %v18947_v44  ;;  %vm797_vm14 = vcmp.eq.s32.totalorder %v10178_v31, %v19696_v32  ;;  %19700 = vst [vmem:[#allocation42_spill] sm:$0xff] %v13975_v59  ;;  %v19706_v59 = vmov 0  ;;  %v14001_v23 = vpop.f32.mrb[62].mxu1 }
 0x463   : > { %vm13956_vm0 = vmor %vm796_vm8, %vm1436_vm6  ;;  %vm1438_vm8 = vcmp.eq.s32.totalorder %v10191_v19, %v19691_v33  ;;  %v2912_v33 = vpop.permute.xlu1 %2911  ;;  %v4565_v3 = vpop.f32.mrb[63].mxu1 }
 0x464   : > { %7492 = vmatmul.mubr.msk.bf16.gmra.mrb[4].mxu0 %vm19692_vm12, %v19370_v48  ;;  %vm13971_vm6 = vmor %vm13939_vm3, %vm2330_vm5  ;;  %vm800_vm12 = vcmp.eq.s32.totalorder %v10191_v19, %v19703_v26  ;;  %vm2332_vm5 = vcmp.eq.s32.totalorder %v10191_v19, %v2016_v24  ;;  %8324 = vset.pattern.permute.xlu1 %v18824_v58  ;;  %vm3228_vm13 = vcmp.eq.s32.totalorder %v10191_v19, %v2912_v33  ;;  %v14056_v53 = vpop.f32.mrb[64].mxu1 }
 0x465   : > { %7494 = vmatprep.mubr.msk.bf16.mxu0 %vm19695_vm15, %v19370_v48  ;;  %vm13979_vm15 = vmor %vm797_vm14, %vm1437_vm2  ;;  %vm798_vm2 = vcmp.eq.s32.totalorder %v10191_v19, %v19696_v32  ;;  %v8578_v32 = vld [vmem:[%s8761_s25 + $0x2c8] sm:$0xff]  ;;  %v4570_v44 = vpop.f32.mrb[65].mxu1 }
 0x466   : > { %vm13988_vm3 = vmor %vm13931_vm4, %vm2329_vm10  ;;  %vm19708_vm10 = vcmp.eq.s32.totalorder %v10191_v19, %v2909_v11  ;;  %2081 = vperm.xlu1 %8324, %v8578_v32   ;;  %v14070_v24 = vpop.f32.mrb[66].mxu1  ;;  %v19725_v32 = vld [vmem:[#allocation146_spill] sm:$0xff]  ;;  %v8580_v44 = vld [vmem:[%s8761_s25 + $0x2d0] sm:$0xff] }
 0x467   : > { %vm13995_vm14 = vmor %vm800_vm12, %vm1440_vm1  ;;  %vm1439_vm12 = vcmp.eq.s32.totalorder %v10178_v31, %v19697_v51  ;;  %v19714_v51 = vmov 0  ;;  %v2022_v3 = vpop.permute.xlu1 %2021  ;;  %19724 = vst [vmem:[#allocation88_spill] sm:$0xff] %v14070_v24  ;;  %v4573_v45 = vpop.f32.mrb[67].mxu1 }
 0x468   : > { %v19707_v59 = vsel %vm13995_vm14, 4294967295, %v19706_v59  ;;  %vm3482_vm4 = vmor %vm13971_vm6, %vm19708_vm10  ;;  %vm3227_vm6 = vcmp.eq.s32.totalorder %v10178_v31, %v2912_v33  ;;  %vm3225_vm10 = vcmp.eq.s32.totalorder %v10178_v31, %v2909_v11  ;;  %v19722_v33 = vmov 0  ;;  %v19745_v45 = vld [vmem:[#allocation117_spill] sm:$0xff] }
 0x469   : > { %vm14007_vm11 = vmor %vm798_vm2, %vm1438_vm8  ;;  %vm2333_vm8 = vcmp.eq.s32.totalorder %v10178_v31, %v13927_v35 }
 0x46a   : > { %v19710_v16 = vsel %vm14007_vm11, 4294967295, %v19709_v16  ;;  %vm14013_vm1 = vmor %vm13946_vm9, %vm2331_vm7  ;;  %vm19713_vm7 = vnez %v18953_v0  ;;  %vm799_vm9 = vcmp.eq.s32.totalorder %v10178_v31, %v19703_v26  ;;  %v2918_v0 = vpop.permute.xlu0 %2917  ;;  %8325 = vset.pattern.permute.xlu1 %v18821_v56  ;;  %v19743_v26 = vmov 0 }
 0x46b   : > { %vm2588_vm14 = vmor %vm13956_vm0, %vm2332_vm5  ;;  %vm19716_vm0 = vnez %v18960_v62  ;;  %v8579_v62 = vld [vmem:[%s8761_s25 + $0x2c0] sm:$0xff] }
 0x46c   : > { %vm3484_vm2 = vmor %vm2588_vm14, %vm3228_vm13  ;;  %7496 = vmatmul.mubr.msk.bf16.gmra.mrb[8].mxu0 %vm19713_vm7, %v19370_v48  ;;  %2974 = vperm.xlu1 %8325, %v8579_v62   ;;  %vm3232_vm7 = vcmp.eq.s32.totalorder %v10191_v19, %v2918_v0  ;;  %v19752_v62 = vld [vmem:[#allocation147_spill] sm:$0xff] }
 0x46d   : > { %vm14031_vm11 = vmpackc.low %vm3484_vm2, %vm3482_vm4  ;;  %7498 = vmatprep.mubr.msk.bf16.mxu0 %vm19716_vm0, %v19370_v48  ;;  %vm2336_vm4 = vcmp.eq.s32.totalorder %v10191_v19, %v2022_v3  ;;  %vm2334_vm2 = vcmp.eq.s32.totalorder %v10191_v19, %v13927_v35  ;;  %v2915_v35 = vpop.permute.xlu1 %2914 }
 0x46e   : > { %v19715_v51 = vsel %vm14031_vm11, 4294967295, %v19714_v51  ;;  %vm14038_vm5 = vmor %vm799_vm9, %vm1439_vm12  ;;  %7042 = vmatprep.mubr.msk.bf16.mxu1 %vm14031_vm11, %v19370_v48  ;;  %vm1442_vm12 = vcmp.eq.s32.totalorder %v10191_v19, %v19721_v49  ;;  %vm19726_vm9 = vnez %v19707_v59  ;;  %v14096_v59 = vpop.permute.xlu0 %2920  ;;  %vm19735_vm11 = vnez %v18991_v17  ;;  %v8581_v17 = vld [vmem:[%s8761_s25 + $0x2d8] sm:$0xff] }
 0x46f   : > { %vm3483_vm13 = vmor %vm14013_vm1, %vm3227_vm6  ;;  %vm802_vm6 = vcmp.eq.s32.totalorder %v10191_v19, %v19725_v32 }
 0x470   : > { %vm14050_vm14 = vmor %vm13979_vm15, %vm2333_vm8  ;;  %vm1441_vm8 = vcmp.eq.s32.totalorder %v10178_v31, %v19721_v49  ;;  %8327 = vset.pattern.permute.xlu1 %v18824_v58 }
 0x471   : > { %vm3481_vm15 = vmor %vm13988_vm3, %vm3225_vm10  ;;  %vm19731_vm10 = vnez %v19710_v16  ;;  %2084 = vperm.xlu1 %8327, %v8580_v44   ;;  %v2025_v49 = vpop.permute.xlu1 %2024  ;;  %v19787_v44 = vld [vmem:[#allocation122_spill] sm:$0xff] }
 0x472   : > { %vm14066_vm1 = vmpackc.low %vm3483_vm13, %vm3481_vm15  ;;  %vm801_vm15 = vcmp.eq.s32.totalorder %v10178_v31, %v19725_v32  ;;  %v19739_v32 = vld [vmem:[#allocation145_spill] sm:$0xff]  ;;  %v14142_v47 = vpop.permute.xlu0 %2929 }
 0x473   : > { %v19723_v33 = vsel %vm14066_vm1, 4294967295, %v19722_v33  ;;  %vm14079_vm0 = vmor %vm19726_vm9, %vm2336_vm4  ;;  %7044 = vmatmul.mubr.msk.bf16.gmra.mrb[132].mxu1 %vm14066_vm1, %v19370_v48  ;;  %vm3230_vm4 = vcmp.eq.s32.totalorder %v10191_v19, %v2915_v35  ;;  %vm2335_vm9 = vcmp.eq.s32.totalorder %v10178_v31, %v2022_v3  ;;  %v19737_v3 = vmov 0 }
 0x474   : > { %vm14086_vm3 = vmor %vm802_vm6, %vm1442_vm12  ;;  %vm19732_vm12 = vnez %v18962_v15  ;;  %v19736_v15 = vld [vmem:[#allocation113_spill] sm:$0xff] }
 0x475   : > { %vm2590_vm13 = vmor %vm19731_vm10, %vm2334_vm2  ;;  %7500 = vmatmul.mubr.msk.bf16.gmra.mrb[12].mxu0 %vm19732_vm12, %v19370_v48  ;;  %vm3229_vm10 = vcmp.eq.s32.totalorder %v10178_v31, %v2915_v35  ;;  %2087 = vperm.xlu1 %8327, %v8581_v17   ;;  %v2028_v35 = vpop.permute.xlu1 %2027 }
 0x476   : > { %vm3486_vm6 = vmor %vm2590_vm13, %vm3230_vm4  ;;  %7502 = vmatprep.mubr.msk.bf16.mxu0 %vm19735_vm11, %v19370_v48  ;;  %vm1443_vm13 = vcmp.eq.s32.totalorder %v10178_v31, %v19736_v15  ;;  %vm803_vm11 = vcmp.eq.s32.totalorder %v10178_v31, %v19739_v32 }
 0x477   : > { %vm14106_vm2 = vmor %vm801_vm15, %vm1441_vm8  ;;  %vm3231_vm8 = vcmp.eq.s32.totalorder %v10178_v31, %v2918_v0  ;;  %v19742_v0 = vld [vmem:[#allocation118_spill] sm:$0xff] }
 0x478   : > { %vm3488_vm1 = vmor %vm14079_vm0, %vm3232_vm7  ;;  %vm2338_vm0 = vcmp.eq.s32.totalorder %v10191_v19, %v2025_v49  ;;  %vm1445_vm12 = vcmp.eq.s32.totalorder %v10178_v31, %v19742_v0 }
 0x479   : > { %vm14120_vm4 = vmpackc.low %vm3488_vm1, %vm3486_vm6  ;;  %vm2337_vm6 = vcmp.eq.s32.totalorder %v10178_v31, %v2025_v49  ;;  %8328 = vset.pattern.permute.xlu1 %v18821_v56 }
 0x47a   : > { %v19738_v3 = vsel %vm14120_vm4, 4294967295, %v19737_v3  ;;  %vm2591_vm15 = vmor %vm14038_vm5, %vm2335_vm9  ;;  %7046 = vmatprep.mubr.msk.bf16.mxu1 %vm14120_vm4, %v19370_v48  ;;  %vm1444_vm5 = vcmp.eq.s32.totalorder %v10191_v19, %v19736_v15  ;;  %v19748_v15 = vld [vmem:[#allocation148_spill] sm:$0xff]  ;;  %2983 = vperm.xlu1 %8328, %v8581_v17   ;;  %v2031_v17 = vpop.permute.xlu0 %2030 }
 0x47b   : > { %vm3485_vm1 = vmor %vm14050_vm14, %vm3229_vm10  ;;  %vm804_vm14 = vcmp.eq.s32.totalorder %v10191_v19, %v19739_v32  ;;  %vm1447_vm10 = vcmp.eq.s32.totalorder %v10178_v31, %v19745_v45 }
 0x47c   : > { %vm14135_vm7 = vmor %vm803_vm11, %vm1443_vm13  ;;  %vm1446_vm13 = vcmp.eq.s32.totalorder %v10191_v19, %v19742_v0 }
 0x47d   : > { %vm3487_vm9 = vmor %vm2591_vm15, %vm3231_vm8  ;;  %vm805_vm15 = vcmp.eq.s32.totalorder %v10178_v31, %v19748_v15 }
 0x47e   : > { %vm14147_vm4 = vmpackc.low %vm3487_vm9, %vm3485_vm1  ;;  %vm807_vm9 = vcmp.eq.s32.totalorder %v10178_v31, %v19752_v62  ;;  %8330 = vset.pattern.permute.xlu1 %v18824_v58 }
 0x47f   : > { %v19744_v26 = vsel %vm14147_vm4, 4294967295, %v19743_v26  ;;  %vm14159_vm8 = vmor %vm14086_vm3, %vm2338_vm0  ;;  %7048 = vmatmul.mubr.msk.bf16.gmra.mrb[136].mxu1 %vm14147_vm4, %v19370_v48  ;;  %vm19751_vm0 = vnez %v18999_v61  ;;  %vm19757_vm3 = vnez %v19005_v25  ;;  %v19775_v61 = vmov 0 }
 0x480   : > { %vm14169_vm11 = vmor %vm804_vm14, %vm1444_vm5  ;;  %7504 = vmatmul.mubr.msk.bf16.gmra.mrb[16].mxu0 %vm19751_vm0, %v19370_v48  ;;  %vm2340_vm0 = vcmp.eq.s32.totalorder %v10191_v19, %v2028_v35 }
 0x481   : > { %vm14186_vm5 = vmor %vm805_vm15, %vm1445_vm12  ;;  %7506 = vmatprep.mubr.msk.bf16.mxu0 %vm19757_vm3, %v19370_v48  ;;  %vm808_vm12 = vcmp.eq.s32.totalorder %v10191_v19, %v19752_v62  ;;  %vm806_vm3 = vcmp.eq.s32.totalorder %v10191_v19, %v19748_v15  ;;  %v14246_v15 = vpop.f32.mrb[68].mxu1  ;;  %v8582_v62 = vld [vmem:[%s8761_s25 + $0x2e8] sm:$0xff] }
 0x482   : > { %vm14194_vm14 = vmor %vm14106_vm2, %vm2337_vm6  ;;  %vm19760_vm6 = vcmp.eq.s32.totalorder %v10191_v19, %v14096_v59  ;;  %vm19766_vm2 = vcmp.eq.s32.totalorder %v10178_v31, %v2028_v35  ;;  %2093 = vperm.xlu1 %8330, %v8582_v62   ;;  %v4578_v11 = vpop.f32.mrb[69].mxu1  ;;  %v19772_v62 = vmov 0 }
 0x483   : > { %vm14207_vm15 = vmor %vm807_vm9, %vm1447_vm10  ;;  %vm19763_vm10 = vcmp.eq.s32.totalorder %v10191_v19, %v19745_v45  ;;  %v2924_v45 = vpop.permute.xlu1 %2923  ;;  %v14256_v35 = vpop.f32.mrb[70].mxu1  ;;  %v19788_v11 = vmov 0 }
 0x484   : > { %vm14218_vm1 = vmor %vm14159_vm8, %vm19760_vm6  ;;  %v4581_v32 = vpop.f32.mrb[71].mxu1 }
 0x485   : > { %vm14227_vm9 = vmor %vm808_vm12, %vm19763_vm10  ;;  %vm3235_vm12 = vcmp.eq.s32.totalorder %v10178_v31, %v2924_v45  ;;  %v14306_v24 = vpop.f32.mrb[72].mxu1  ;;  %v19792_v32 = vld [vmem:[#allocation121_spill] sm:$0xff] }
 0x486   : > { %vm14235_vm4 = vmor %vm14135_vm7, %vm19766_vm2  ;;  %vm3236_vm7 = vcmp.eq.s32.totalorder %v10191_v19, %v2924_v45  ;;  %8331 = vset.pattern.permute.xlu1 %v18821_v56  ;;  %19782 = vst [vmem:[#allocation41_spill] sm:$0xff] %v14306_v24  ;;  %v8584_v45 = vld [vmem:[%s8761_s25 + $0x2f0] sm:$0xff] }
 0x487   : > { %vm14239_vm8 = vmor %vm806_vm3, %vm1446_vm13  ;;  %vm19771_vm13 = vcmp.eq.s32.totalorder %v10178_v31, %v14096_v59  ;;  %v2034_v59 = vpop.permute.xlu1 %2033 }
 0x488   : > { %vm2596_vm6 = vmor %vm14169_vm11, %vm2340_vm0  ;;  %vm2341_vm0 = vcmp.eq.s32.totalorder %v10178_v31, %v2031_v17 }
 0x489   : > { %vm3489_vm2 = vmor %vm14194_vm14, %vm19771_vm13  ;;  %vm19774_vm14 = vnez %v19010_v4  ;;  %v8583_v4 = vld [vmem:[%s8761_s25 + $0x2e0] sm:$0xff]  ;;  %vm2344_vm13 = vcmp.eq.s32.totalorder %v10191_v19, %v2034_v59 }
 0x48a   : > { %vm3492_vm11 = vmor %vm2596_vm6, %vm3236_vm7  ;;  %7508 = vmatmul.mubr.msk.bf16.gmra.mrb[20].mxu0 %vm19774_vm14, %v19370_v48  ;;  %vm2342_vm7 = vcmp.eq.s32.totalorder %v10191_v19, %v2031_v17  ;;  %2986 = vperm.xlu1 %8331, %v8583_v4   ;;  %v4586_v17 = vpop.f32.mrb[73].mxu1 }
 0x48b   : > { %vm14261_vm3 = vmpackc.low %vm3492_vm11, %vm14218_vm1  ;;  %vm19777_vm1 = vnez %v19033_v18  ;;  %vm3239_vm11 = vcmp.eq.s32.totalorder %v10178_v31, %v14142_v47  ;;  %v2927_v0 = vpop.permute.xlu1 %2926  ;;  %v14311_v49 = vpop.f32.mrb[74].mxu1  ;;  %v19793_v18 = vmov 0  ;;  %v19797_v17 = vld [vmem:[#allocation149_spill] sm:$0xff] }
 0x48c   : > { %v19773_v62 = vsel %vm14261_vm3, 4294967295, %v19772_v62  ;;  %7050 = vmatprep.mubr.msk.bf16.mxu1 %vm14261_vm3, %v19370_v48  ;;  %vm3491_vm10 = vmor %vm14235_vm4, %vm3235_vm12  ;;  %7510 = vmatprep.mubr.msk.bf16.mxu0 %vm19777_vm1, %v19370_v48  ;;  %vm2343_vm12 = vcmp.eq.s32.totalorder %v10178_v31, %v2034_v59  ;;  %19783 = vst [vmem:[#allocation46_spill] sm:$0xff] %v14311_v49  ;;  %vm3237_vm14 = vcmp.eq.s32.totalorder %v10178_v31, %v2927_v0  ;;  %v14345_v59 = vpop.permute.xlu0 %2042 }
 0x48d   : > { %vm14274_vm6 = vmpackc.low %vm3491_vm10, %vm3489_vm2  ;;  %vm3240_vm2 = vcmp.eq.s32.totalorder %v10191_v19, %v14142_v47  ;;  %vm3238_vm1 = vcmp.eq.s32.totalorder %v10191_v19, %v2927_v0  ;;  %v4589_v47 = vpop.f32.mrb[75].mxu1 }
 0x48e   : > { %v19776_v61 = vsel %vm14274_vm6, 4294967295, %v19775_v61  ;;  %vm14284_vm4 = vmor %vm14186_vm5, %vm2341_vm0  ;;  %7052 = vmatmul.mubr.msk.bf16.gmra.mrb[140].mxu1 %vm14274_vm6, %v19370_v48  ;;  %8332 = vset.pattern.permute.xlu1 %v18824_v58  ;;  %v19802_v47 = vld [vmem:[#allocation126_spill] sm:$0xff] }
 0x48f   : > { %vm14298_vm5 = vmor %vm14207_vm15, %vm2343_vm12  ;;  %2096 = vperm.xlu1 %8332, %v8584_v45   ;;  %vm1449_vm12 = vcmp.eq.s32.totalorder %v10178_v31, %v19787_v44  ;;  %v2037_v4 = vpop.permute.xlu1 %2036  ;;  %v19800_v45 = vmov 0 }
 0x490   : > { %vm2600_vm0 = vmor %vm14227_vm9, %vm2344_vm13  ;;  %v2933_v16 = vpop.permute.xlu0 %2932 }
 0x491   : > { %vm2598_vm10 = vmor %vm14239_vm8, %vm2342_vm7  ;;  %vm19786_vm8 = vnez %v19039_v60  ;;  %v19791_v60 = vld [vmem:[#allocation150_spill] sm:$0xff] }
 0x492   : > { %vm3496_vm15 = vmor %vm2600_vm0, %vm3240_vm2  ;;  %7512 = vmatmul.mubr.msk.bf16.gmra.mrb[24].mxu0 %vm19786_vm8, %v19370_v48  ;;  %vm19790_vm2 = vnez %v19059_v29  ;;  %vm809_vm0 = vcmp.eq.s32.totalorder %v10178_v31, %v19791_v60  ;;  %v8585_v29 = vld [vmem:[%s8761_s25 + $0x2f8] sm:$0xff] }
 0x493   : > { %vm14318_vm9 = vmor %vm14298_vm5, %vm3239_vm11  ;;  %7514 = vmatprep.mubr.msk.bf16.mxu0 %vm19790_vm2, %v19370_v48  ;;  %vm1450_vm5 = vcmp.eq.s32.totalorder %v10191_v19, %v19787_v44  ;;  %2099 = vperm.xlu1 %8332, %v8585_v29   ;;  %v2040_v44 = vpop.permute.xlu1 %2039 }
 0x494   : > { %vm3494_vm7 = vmor %vm2598_vm10, %vm3238_vm1  ;;  %vm1451_vm10 = vcmp.eq.s32.totalorder %v10178_v31, %v19792_v32  ;;  %vm1452_vm1 = vcmp.eq.s32.totalorder %v10191_v19, %v19792_v32  ;;  %vm2348_vm3 = vcmp.eq.s32.totalorder %v10191_v19, %v2040_v44 }
 0x495   : > { %vm14327_vm13 = vmpackc.low %vm3496_vm15, %vm3494_vm7  ;;  %vm2346_vm7 = vcmp.eq.s32.totalorder %v10191_v19, %v2037_v4 }
 0x496   : > { %v19789_v11 = vsel %vm14327_vm13, 4294967295, %v19788_v11  ;;  %7054 = vmatprep.mubr.msk.bf16.mxu1 %vm14327_vm13, %v19370_v48  ;;  %vm3493_vm11 = vmor %vm14284_vm4, %vm3237_vm14  ;;  %vm810_vm4 = vcmp.eq.s32.totalorder %v10191_v19, %v19791_v60  ;;  %v19803_v60 = vld [vmem:[#allocation125_spill] sm:$0xff] }
 0x497   : > { %vm14350_vm15 = vmpackc.low %vm14318_vm9, %vm3493_vm11  ;;  %vm811_vm9 = vcmp.eq.s32.totalorder %v10178_v31, %v19797_v17  ;;  %vm2345_vm11 = vcmp.eq.s32.totalorder %v10178_v31, %v2037_v4  ;;  %8333 = vset.pattern.permute.xlu1 %v18821_v56  ;;  %v19807_v4 = vld [vmem:[#allocation152_spill] sm:$0xff]  ;;  %v2936_v32 = vpop.permute.xlu1 %2935 }
 0x498   : > { %v19794_v18 = vsel %vm14350_vm15, 4294967295, %v19793_v18  ;;  %vm14356_vm14 = vmor %vm809_vm0, %vm1449_vm12  ;;  %7056 = vmatmul.mubr.msk.bf16.gmra.mrb[144].mxu1 %vm14350_vm15, %v19370_v48  ;;  %vm812_vm12 = vcmp.eq.s32.totalorder %v10191_v19, %v19797_v17  ;;  %2995 = vperm.xlu1 %8333, %v8585_v29   ;;  %vm3241_vm15 = vcmp.eq.s32.totalorder %v10178_v31, %v2933_v16  ;;  %v19809_v29 = vld [vmem:[#allocation151_spill] sm:$0xff] }
 0x499   : > { %vm1706_vm8 = vmor %vm810_vm4, %vm1450_vm5  ;;  %vm19810_vm5 = vcmp.eq.s32.totalorder %v10178_v31, %v19802_v47 }
 0x49a   : > { %vm14373_vm2 = vmor %vm811_vm9, %vm1451_vm10  ;;  %vm813_vm9 = vcmp.eq.s32.totalorder %v10178_v31, %v19807_v4 }
 0x49b   : > { %vm14378_vm0 = vmor %vm812_vm12, %vm1452_vm1  ;;  %vm19806_vm1 = vnez %v19061_v55  ;;  %vm1456_vm12 = vcmp.eq.s32.totalorder %v10191_v19, %v19803_v60  ;;  %v19811_v55 = vmov 0  ;;  %v2046_v25 = vpop.permute.xlu1 %2045 }
 0x49c   : > { %v19801_v45 = vsel %vm14378_vm0, 4294967295, %v19800_v45  ;;  %vm14388_vm4 = vmor %vm1706_vm8, %vm2346_vm7  ;;  %7516 = vmatmul.mubr.msk.bf16.gmra.mrb[28].mxu0 %vm19806_vm1, %v19370_v48  ;;  %vm19808_vm8 = vnez %v19068_v36  ;;  %vm815_vm7 = vcmp.eq.s32.totalorder %v10178_v31, %v19809_v29  ;;  %vm1454_vm1 = vcmp.eq.s32.totalorder %v10191_v19, %v19802_v47  ;;  %8334 = vset.pattern.permute.xlu1 %v18824_v58  ;;  %v8588_v36 = vld [vmem:[%s8761_s25 + $0x310] sm:$0xff] }
 0x49d   : > { %vm2601_vm10 = vmor %vm14356_vm14, %vm2345_vm11  ;;  %7518 = vmatprep.mubr.msk.bf16.mxu0 %vm19808_vm8, %v19370_v48  ;;  %vm2347_vm14 = vcmp.eq.s32.totalorder %v10178_v31, %v2040_v44  ;;  %vm816_vm11 = vcmp.eq.s32.totalorder %v10191_v19, %v19809_v29  ;;  %vm19813_vm8 = vcmp.eq.s32.totalorder %v10178_v31, %v19803_v60  ;;  %vm19816_vm0 = vcmp.eq.s32.totalorder %v10191_v19, %v2933_v16  ;;  %v8586_v60 = vld [vmem:[%s8761_s25 + $0x308] sm:$0xff]  ;;  %v2942_v44 = vpop.permute.xlu0 %2941 }
 0x49e   : > { %vm14412_vm13 = vmor %vm813_vm9, %vm19810_vm5  ;;  %vm814_vm9 = vcmp.eq.s32.totalorder %v10191_v19, %v19807_v4  ;;  %2105 = vperm.xlu1 %8334, %v8586_v60   ;;  %v14461_v4 = vpop.f32.mrb[76].mxu1  ;;  %v19830_v60 = vmov 0  ;;  %v19894_v16 = vmov 0 }
 0x49f   : > { %v19812_v55 = vsel %vm14412_vm13, 4294967295, %v19811_v55  ;;  %vm14422_vm6 = vmor %vm815_vm7, %vm19813_vm8  ;;  %19828 = vst [vmem:[#allocation87_spill] sm:$0xff] %v14461_v4  ;;  %v4594_v29 = vpop.f32.mrb[77].mxu1  ;;  %v2939_v47 = vpop.permute.xlu1 %2938  ;;  %v8590_v4 = vld [vmem:[%s8761_s25 + $0x328] sm:$0xff] }
 0x4a0   : > { %vm14431_vm5 = vmor %vm14388_vm4, %vm19816_vm0  ;;  %vm19827_vm4 = vnez %v19801_v45  ;;  %v14465_v0 = vpop.f32.mrb[78].mxu1  ;;  %v19833_v29 = vmov 0 }
 0x4a1   : > { %vm14437_vm13 = vmor %vm816_vm11, %vm1456_vm12  ;;  %vm3244_vm12 = vcmp.eq.s32.totalorder %v10191_v19, %v2936_v32  ;;  %19829 = vst [vmem:[#allocation92_spill] sm:$0xff] %v14465_v0  ;;  %v4597_v45 = vpop.f32.mrb[79].mxu1 }
 0x4a2   : > { %vm14442_vm7 = vmor %vm2601_vm10, %vm3241_vm15  ;;  %vm3243_vm10 = vcmp.eq.s32.totalorder %v10178_v31, %v2936_v32  ;;  %8335 = vset.pattern.permute.xlu1 %v18821_v56  ;;  %v8587_v32 = vld [vmem:[%s8761_s25 + $0x300] sm:$0xff] }
 0x4a3   : > { %vm14446_vm8 = vmor %vm814_vm9, %vm1454_vm1  ;;  %2998 = vperm.xlu1 %8335, %v8587_v32   ;;  %vm19836_vm9 = vnez %v19102_v14  ;;  %v2945_v32 = vpop.permute.xlu0 %2944  ;;  %v8589_v14 = vld [vmem:[%s8761_s25 + $0x318] sm:$0xff] }
 0x4a4   : > { %vm14452_vm0 = vmor %vm14373_vm2, %vm2347_vm14  ;;  %vm2349_vm2 = vcmp.eq.s32.totalorder %v10178_v31, %v14345_v59 }
 0x4a5   : > { %vm2604_vm15 = vmor %vm19827_vm4, %vm2348_vm3  ;;  %vm19832_vm3 = vnez %v19071_v46  ;;  %vm2350_vm4 = vcmp.eq.s32.totalorder %v10191_v19, %v14345_v59  ;;  %v19855_v59 = vld [vmem:[#allocation129_spill] sm:$0xff] }
 0x4a6   : > { %vm3500_vm1 = vmor %vm2604_vm15, %vm3244_vm12  ;;  %7520 = vmatmul.mubr.msk.bf16.gmra.mrb[32].mxu0 %vm19832_vm3, %v19370_v48  ;;  %vm19837_vm15 = vnez %v19812_v55  ;;  %vm3248_vm12 = vcmp.eq.s32.totalorder %v10191_v19, %v2942_v44  ;;  %v14522_v55 = vpop.f32.mrb[80].mxu1  ;;  %v19860_v46 = vld [vmem:[#allocation153_spill] sm:$0xff] }
 0x4a7   : > { %vm14469_vm14 = vmpackc.low %vm3500_vm1, %vm14431_vm5  ;;  %7522 = vmatprep.mubr.msk.bf16.mxu0 %vm19836_vm9, %v19370_v48  ;;  %8337 = vset.pattern.permute.xlu1 %v18824_v58  ;;  %19844 = vst [vmem:[#allocation91_spill] sm:$0xff] %v14522_v55  ;;  %v4602_v45 = vpop.f32.mrb[81].mxu1  ;;  %vm3245_vm9 = vcmp.eq.s32.totalorder %v10178_v31, %v2939_v47  ;;  %v19897_v55 = vmov 0 }
 0x4a8   : > { %v19831_v60 = vsel %vm14469_vm14, 4294967295, %v19830_v60  ;;  %7058 = vmatprep.mubr.msk.bf16.mxu1 %vm14469_vm14, %v19370_v48  ;;  %vm3499_vm11 = vmor %vm14452_vm0, %vm3243_vm10  ;;  %vm2351_vm10 = vcmp.eq.s32.totalorder %v10178_v31, %v2046_v25  ;;  %2108 = vperm.xlu1 %8337, %v8588_v36   ;;  %v14527_v17 = vpop.f32.mrb[82].mxu1  ;;  %v2049_v36 = vpop.permute.xlu1 %2048  ;;  %v19856_v45 = vmov 0 }
 0x4a9   : > { %vm14485_vm5 = vmpackc.low %vm3499_vm11, %vm14442_vm7  ;;  %vm2352_vm7 = vcmp.eq.s32.totalorder %v10191_v19, %v2046_v25  ;;  %19845 = vst [vmem:[#allocation50_spill] sm:$0xff] %v14527_v17  ;;  %v4605_v25 = vpop.f32.mrb[83].mxu1  ;;  %v19871_v17 = vld [vmem:[#allocation156_spill] sm:$0xff] }
 0x4aa   : > { %v19834_v29 = vsel %vm14485_vm5, 4294967295, %v19833_v29  ;;  %vm14496_vm0 = vmor %vm19837_vm15, %vm2349_vm2  ;;  %7060 = vmatmul.mubr.msk.bf16.gmra.mrb[148].mxu1 %vm14485_vm5, %v19370_v48  ;;  %vm3247_vm2 = vcmp.eq.s32.totalorder %v10178_v31, %v2942_v44  ;;  %v19850_v44 = vld [vmem:[#allocation130_spill] sm:$0xff]  ;;  %v14589_v25 = vpop.permute.xlu0 %2953 }
 0x4ab   : > { %19835 = vst [vmem:[#allocation45_spill] sm:$0xff] %v19834_v29  ;;  %vm14508_vm1 = vmor %vm14422_vm6, %vm2351_vm10  ;;  %vm19849_vm10 = vnez %v19111_v2  ;;  %v19854_v2 = vld [vmem:[#allocation154_spill] sm:$0xff] }
 0x4ac   : > { %vm2608_vm3 = vmor %vm14437_vm13, %vm2352_vm7  ;;  %vm3246_vm13 = vcmp.eq.s32.totalorder %v10191_v19, %v2939_v47  ;;  %vm1457_vm7 = vcmp.eq.s32.totalorder %v10178_v31, %v19850_v44  ;;  %2111 = vperm.xlu1 %8337, %v8589_v14  }
 0x4ad   : > { %vm14517_vm11 = vmor %vm14446_vm8, %vm2350_vm4  ;;  %vm19846_vm8 = vnez %v19108_v54  ;;  %v19851_v54 = vmov 0 }
 0x4ae   : > { %vm3504_vm6 = vmor %vm2608_vm3, %vm3248_vm12  ;;  %7524 = vmatmul.mubr.msk.bf16.gmra.mrb[36].mxu0 %vm19846_vm8, %v19370_v48  ;;  %vm817_vm3 = vcmp.eq.s32.totalorder %v10178_v31, %v19854_v2  ;;  %v2055_v0 = vpop.permute.xlu0 %2054 }
 0x4af   : > { %vm14534_vm4 = vmor %vm14508_vm1, %vm3247_vm2  ;;  %7526 = vmatprep.mubr.msk.bf16.mxu0 %vm19849_vm10, %v19370_v48  ;;  %vm1458_vm1 = vcmp.eq.s32.totalorder %v10191_v19, %v19850_v44  ;;  %vm820_vm10 = vcmp.eq.s32.totalorder %v10191_v19, %v19860_v46  ;;  %v8591_v44 = vld [vmem:[%s8761_s25 + $0x320] sm:$0xff] }
 0x4b0   : > { %vm3502_vm15 = vmor %vm14517_vm11, %vm3246_vm13  ;;  %vm1459_vm11 = vcmp.eq.s32.totalorder %v10178_v31, %v19855_v59  ;;  %vm818_vm13 = vcmp.eq.s32.totalorder %v10191_v19, %v19854_v2  ;;  %8338 = vset.pattern.permute.xlu1 %v18821_v56  ;;  %v19865_v2 = vld [vmem:[#allocation193_spill] sm:$0xff] }
 0x4b1   : > { %vm14545_vm12 = vmpackc.low %vm3504_vm6, %vm3502_vm15  ;;  %vm2354_vm15 = vcmp.eq.s32.totalorder %v10191_v19, %v2049_v36  ;;  %3007 = vperm.xlu1 %8338, %v8589_v14   ;;  %v19874_v14 = vld [vmem:[#allocation155_spill] sm:$0xff] }
 0x4b2   : > { %v19852_v54 = vsel %vm14545_vm12, 4294967295, %v19851_v54  ;;  %7062 = vmatprep.mubr.msk.bf16.mxu1 %vm14545_vm12, %v19370_v48  ;;  %vm3501_vm2 = vmor %vm14496_vm0, %vm3245_vm9  ;;  %vm1460_vm0 = vcmp.eq.s32.totalorder %v10191_v19, %v19855_v59  ;;  %vm819_vm9 = vcmp.eq.s32.totalorder %v10178_v31, %v19860_v46  ;;  %v2052_v59 = vpop.permute.xlu1 %2051  ;;  %v19867_v46 = vld [vmem:[#allocation194_spill] sm:$0xff] }
 0x4b3   : > { %19853 = vst [vmem:[#allocation96_spill] sm:$0xff] %v19852_v54  ;;  %vm14565_vm6 = vmpackc.low %vm14534_vm4, %vm3501_vm2  ;;  %vm2353_vm2 = vcmp.eq.s32.totalorder %v10178_v31, %v2049_v36  ;;  %vm1464_vm12 = vcmp.eq.s32.totalorder %v10191_v19, %v19867_v46  ;;  %vm2355_vm5 = vcmp.eq.s32.totalorder %v10178_v31, %v2052_v59 }
 0x4b4   : > { %v19857_v45 = vsel %vm14565_vm6, 4294967295, %v19856_v45  ;;  %vm14571_vm8 = vmor %vm817_vm3, %vm1457_vm7  ;;  %7064 = vmatmul.mubr.msk.bf16.gmra.mrb[152].mxu1 %vm14565_vm6, %v19370_v48 }
 0x4b5   : > { %vm1714_vm4 = vmor %vm818_vm13, %vm1458_vm1  ;;  %vm1461_vm1 = vcmp.eq.s32.totalorder %v10178_v31, %v19865_v2  ;;  %vm1463_vm13 = vcmp.eq.s32.totalorder %v10178_v31, %v19867_v46  ;;  %8340 = vset.pattern.permute.xlu1 %v18824_v58  ;;  %v14640_v46 = vpop.f32.mrb[84].mxu1 }
 0x4b6   : > { %vm14585_vm7 = vmor %vm819_vm9, %vm1459_vm11  ;;  %vm19866_vm11 = vnez %v19114_v20  ;;  %19879 = vst [vmem:[#allocation49_spill] sm:$0xff] %v14640_v46  ;;  %2117 = vperm.xlu1 %8340, %v8590_v4   ;;  %v4610_v49 = vpop.f32.mrb[85].mxu1  ;;  %v2948_v4 = vpop.permute.xlu1 %2947  ;;  %v8592_v20 = vld [vmem:[%s8761_s25 + $0x330] sm:$0xff]  ;;  %v20065_v46 = vld [vmem:[#allocation206_spill] sm:$0xff] }
 0x4b7   : > { %vm14593_vm3 = vmor %vm820_vm10, %vm1460_vm0  ;;  %7528 = vmatmul.mubr.msk.bf16.gmra.mrb[40].mxu0 %vm19866_vm11, %v19370_v48  ;;  %vm19870_vm0 = vnez %v19153_v28  ;;  %vm821_vm10 = vcmp.eq.s32.totalorder %v10178_v31, %v19871_v17  ;;  %vm824_vm11 = vcmp.eq.s32.totalorder %v10191_v19, %v19874_v14  ;;  %v19908_v49 = vmov 0 }
 0x4b8   : > { %vm14605_vm6 = vmor %vm1714_vm4, %vm2354_vm15  ;;  %7530 = vmatprep.mubr.msk.bf16.mxu0 %vm19870_vm0, %v19370_v48  ;;  %vm823_vm4 = vcmp.eq.s32.totalorder %v10178_v31, %v19874_v14  ;;  %vm1462_vm15 = vcmp.eq.s32.totalorder %v10191_v19, %v19865_v2 }
 0x4b9   : > { %vm14619_vm9 = vmor %vm14571_vm8, %vm2353_vm2  ;;  %vm2356_vm8 = vcmp.eq.s32.totalorder %v10191_v19, %v2052_v59  ;;  %vm19880_vm2 = vcmp.eq.s32.totalorder %v10191_v19, %v2945_v32 }
 0x4ba   : > { %vm14627_vm0 = vmor %vm821_vm10, %vm1461_vm1  ;;  %8341 = vset.pattern.permute.xlu1 %v18821_v56 }
 0x4bb   : > { %vm14634_vm14 = vmor %vm823_vm4, %vm1463_vm13  ;;  %vm822_vm13 = vcmp.eq.s32.totalorder %v10191_v19, %v19871_v17  ;;  %vm19885_vm4 = vcmp.eq.s32.totalorder %v10178_v31, %v2945_v32  ;;  %v14680_v32 = vpop.f32.mrb[86].mxu1  ;;  %3010 = vperm.xlu1 %8341, %v8591_v44   ;;  %v19907_v17 = vld [vmem:[#allocation195_spill] sm:$0xff]  ;;  %v19913_v44 = vmov 0 }
 0x4bc   : > { %vm14646_vm1 = vmor %vm14605_vm6, %vm19880_vm2  ;;  %19892 = vst [vmem:[#allocation54_spill] sm:$0xff] %v14680_v32  ;;  %vm3252_vm2 = vcmp.eq.s32.totalorder %v10191_v19, %v2948_v4  ;;  %v4613_v2 = vpop.f32.mrb[87].mxu1 }
 0x4bd   : > { %vm14652_vm10 = vmor %vm824_vm11, %vm1464_vm12  ;;  %v14739_v59 = vpop.f32.mrb[88].mxu1 }
 0x4be   : > { %vm14661_vm6 = vmor %vm14619_vm9, %vm19885_vm4  ;;  %19903 = vst [vmem:[#allocation95_spill] sm:$0xff] %v14739_v59  ;;  %v4618_v28 = vpop.f32.mrb[89].mxu1  ;;  %v20003_v59 = vld [vmem:[#allocation163_spill] sm:$0xff] }
 0x4bf   : > { %vm14668_vm12 = vmor %vm822_vm13, %vm1462_vm15  ;;  %vm3251_vm15 = vcmp.eq.s32.totalorder %v10178_v31, %v2948_v4  ;;  %8342 = vset.pattern.permute.xlu1 %v18824_v58  ;;  %v14744_v36 = vpop.f32.mrb[90].mxu1  ;;  %v19912_v4 = vld [vmem:[#allocation196_spill] sm:$0xff] }
 0x4c0   : > { %vm14676_vm11 = vmor %vm14585_vm7, %vm2355_vm5  ;;  %vm19893_vm5 = vnez %v19155_v13  ;;  %vm2357_vm7 = vcmp.eq.s32.totalorder %v10178_v31, %v2055_v0  ;;  %v2058_v13 = vpop.permute.xlu1 %2057  ;;  %2120 = vperm.xlu1 %8342, %v8592_v20   ;;  %19904 = vst [vmem:[#allocation100_spill] sm:$0xff] %v14744_v36  ;;  %v4621_v14 = vpop.f32.mrb[91].mxu1  ;;  %v8595_v20 = vld [vmem:[%s8761_s25 + $0x340] sm:$0xff] }
 0x4c1   : > { %vm2612_vm9 = vmor %vm14593_vm3, %vm2356_vm8  ;;  %7532 = vmatmul.mubr.msk.bf16.gmra.mrb[44].mxu0 %vm19893_vm5, %v19370_v48  ;;  %vm19896_vm3 = vnez %v19165_v37  ;;  %vm2360_vm5 = vcmp.eq.s32.totalorder %v10191_v19, %v2058_v13  ;;  %v19918_v37 = vld [vmem:[#allocation157_spill] sm:$0xff] }
 0x4c2   : > { %vm3508_vm13 = vmor %vm2612_vm9, %vm3252_vm2  ;;  %7534 = vmatprep.mubr.msk.bf16.mxu0 %vm19896_vm3, %v19370_v48  ;;  %vm2358_vm9 = vcmp.eq.s32.totalorder %v10191_v19, %v2055_v0  ;;  %v8599_v14 = vld [vmem:[%s8761_s25 + $0x360] sm:$0xff] }
 0x4c3   : > { %vm14695_vm4 = vmpackc.low %vm3508_vm13, %vm14646_vm1  ;;  %vm2359_vm13 = vcmp.eq.s32.totalorder %v10178_v31, %v2058_v13  ;;  %v8594_v13 = vld [vmem:[%s8761_s25 + $0x348] sm:$0xff] }
 0x4c4   : > { %v19895_v16 = vsel %vm14695_vm4, 4294967295, %v19894_v16  ;;  %7066 = vmatprep.mubr.msk.bf16.mxu1 %vm14695_vm4, %v19370_v48  ;;  %vm3507_vm8 = vmor %vm14676_vm11, %vm3251_vm15  ;;  %v2951_v47 = vpop.permute.xlu1 %2950 }
 0x4c5   : > { %vm14710_vm1 = vmpackc.low %vm3507_vm8, %vm14661_vm6  ;;  %vm3256_vm6 = vcmp.eq.s32.totalorder %v10191_v19, %v14589_v25  ;;  %vm3254_vm8 = vcmp.eq.s32.totalorder %v10191_v19, %v2951_v47 }
 0x4c6   : > { %v19898_v55 = vsel %vm14710_vm1, 4294967295, %v19897_v55  ;;  %vm14717_vm2 = vmor %vm14627_vm0, %vm2357_vm7  ;;  %7068 = vmatmul.mubr.msk.bf16.gmra.mrb[156].mxu1 %vm14710_vm1, %v19370_v48  ;;  %vm3255_vm0 = vcmp.eq.s32.totalorder %v10178_v31, %v14589_v25  ;;  %v19911_v25 = vld [vmem:[#allocation158_spill] sm:$0xff] }
 0x4c7   : > { %vm14730_vm11 = vmor %vm14634_vm14, %vm2359_vm13  ;;  %vm19905_vm14 = vnez %v19169_v52  ;;  %vm19906_vm13 = vnez %v19206_v57  ;;  %v8593_v52 = vld [vmem:[%s8761_s25 + $0x338] sm:$0xff]  ;;  %v14768_v57 = vpop.permute.xlu0 %2066 }
 0x4c8   : > { %vm2616_vm15 = vmor %vm14652_vm10, %vm2360_vm5  ;;  %vm3253_vm10 = vcmp.eq.s32.totalorder %v10178_v31, %v2951_v47  ;;  %vm1465_vm5 = vcmp.eq.s32.totalorder %v10178_v31, %v19907_v17  ;;  %2123 = vperm.xlu1 %8342, %v8593_v52   ;;  %v2061_v2 = vpop.permute.xlu1 %2060  ;;  %v14812_v47 = vpop.f32.mrb[92].mxu1 }
 0x4c9   : > { %vm2614_vm7 = vmor %vm14668_vm12, %vm2358_vm9  ;;  %7536 = vmatmul.mubr.msk.bf16.gmra.mrb[48].mxu0 %vm19905_vm14, %v19370_v48  ;;  %19924 = vst [vmem:[#allocation58_spill] sm:$0xff] %v14812_v47  ;;  %v19933_v47 = vld [vmem:[#allocation160_spill] sm:$0xff] }
 0x4ca   : > { %vm3512_vm3 = vmor %vm2616_vm15, %vm3256_vm6  ;;  %7538 = vmatprep.mubr.msk.bf16.mxu0 %vm19906_vm13, %v19370_v48  ;;  %vm1466_vm15 = vcmp.eq.s32.totalorder %v10191_v19, %v19907_v17  ;;  %v19927_v17 = vld [vmem:[#allocation197_spill] sm:$0xff]  ;;  %vm830_vm1 = vcmp.eq.s32.totalorder %v10191_v19, %v19933_v47 }
 0x4cb   : > { %vm3511_vm12 = vmor %vm14730_vm11, %vm3255_vm0  ;;  %vm825_vm0 = vcmp.eq.s32.totalorder %v10178_v31, %v19911_v25  ;;  %v2957_v28 = vpop.permute.xlu0 %2956 }
 0x4cc   : > { %vm3510_vm9 = vmor %vm2614_vm7, %vm3254_vm8  ;;  %vm1467_vm7 = vcmp.eq.s32.totalorder %v10178_v31, %v19912_v4  ;;  %8343 = vset.pattern.permute.xlu1 %v18821_v56  ;;  %vm19948_vm4 = vcmp.eq.s32.totalorder %v10178_v31, %v2957_v28 }
 0x4cd   : > { %vm14762_vm6 = vmpackc.low %vm3512_vm3, %vm3510_vm9  ;;  %vm826_vm3 = vcmp.eq.s32.totalorder %v10191_v19, %v19911_v25  ;;  %vm828_vm9 = vcmp.eq.s32.totalorder %v10191_v19, %v19918_v37  ;;  %3019 = vperm.xlu1 %8343, %v8593_v52   ;;  %v2064_v25 = vpop.permute.xlu1 %2063  ;;  %v19929_v52 = vld [vmem:[#allocation198_spill] sm:$0xff] }
 0x4ce   : > { %v19909_v49 = vsel %vm14762_vm6, 4294967295, %v19908_v49  ;;  %7070 = vmatprep.mubr.msk.bf16.mxu1 %vm14762_vm6, %v19370_v48  ;;  %vm3509_vm11 = vmor %vm14717_vm2, %vm3253_vm10  ;;  %vm1468_vm2 = vcmp.eq.s32.totalorder %v10191_v19, %v19912_v4  ;;  %vm827_vm10 = vcmp.eq.s32.totalorder %v10178_v31, %v19918_v37  ;;  %v4626_v4 = vpop.f32.mrb[93].mxu1  ;;  %vm2364_vm6 = vcmp.eq.s32.totalorder %v10191_v19, %v2064_v25 }
 0x4cf   : > { %19910 = vst [vmem:[#allocation53_spill] sm:$0xff] %v19909_v49  ;;  %vm14779_vm14 = vmpackc.low %vm3511_vm12, %vm3509_vm11  ;;  %vm2362_vm12 = vcmp.eq.s32.totalorder %v10191_v19, %v2061_v2  ;;  %vm2361_vm11 = vcmp.eq.s32.totalorder %v10178_v31, %v2061_v2  ;;  %v14834_v37 = vpop.f32.mrb[94].mxu1  ;;  %v19936_v4 = vld [vmem:[#allocation159_spill] sm:$0xff]  ;;  %v19940_v2 = vmov 0 }
 0x4d0   : > { %v19914_v44 = vsel %vm14779_vm14, 4294967295, %v19913_v44  ;;  %vm14785_vm8 = vmor %vm825_vm0, %vm1465_vm5  ;;  %7072 = vmatmul.mubr.msk.bf16.gmra.mrb[160].mxu1 %vm14779_vm14, %v19370_v48  ;;  %19932 = vst [vmem:[#allocation104_spill] sm:$0xff] %v14834_v37  ;;  %v4629_v0 = vpop.f32.mrb[95].mxu1 }
 0x4d1   : > { %19915 = vst [vmem:[#allocation99_spill] sm:$0xff] %v19914_v44  ;;  %vm14796_vm13 = vmor %vm826_vm3, %vm1466_vm15  ;;  %vm19923_vm15 = vnez %v19210_v22  ;;  %vm19928_vm3 = vnez %v19216_v8  ;;  %8344 = vset.pattern.permute.xlu1 %v18824_v58  ;;  %v19946_v0 = vmov 0  ;;  %v14954_v37 = vpop.f32.mrb[96].mxu1  ;;  %v19981_v8 = vmov 0 }
 0x4d2   : > { %vm14804_vm5 = vmor %vm827_vm10, %vm1467_vm7  ;;  %7540 = vmatmul.mubr.msk.bf16.gmra.mrb[52].mxu0 %vm19923_vm15, %v19370_v48  ;;  %vm1469_vm7 = vcmp.eq.s32.totalorder %v10178_v31, %v19927_v17  ;;  %vm2363_vm10 = vcmp.eq.s32.totalorder %v10178_v31, %v2064_v25  ;;  %2129 = vperm.xlu1 %8344, %v8594_v13   ;;  %19965 = vst [vmem:[#allocation103_spill] sm:$0xff] %v14954_v37  ;;  %v8596_v13 = vld [vmem:[%s8761_s25 + $0x350] sm:$0xff]  ;;  %v19996_v37 = vld [vmem:[#allocation202_spill] sm:$0xff]  ;;  %v20007_v22 = vmov 0 }
 0x4d3   : > { %vm14814_vm0 = vmor %vm828_vm9, %vm1468_vm2  ;;  %7542 = vmatprep.mubr.msk.bf16.mxu0 %vm19928_vm3, %v19370_v48  ;;  %vm829_vm9 = vcmp.eq.s32.totalorder %v10178_v31, %v19933_v47  ;;  %v2960_v47 = vpop.permute.xlu1 %2959 }
 0x4d4   : > { %vm14830_vm2 = vmor %vm14796_vm13, %vm2362_vm12  ;;  %vm831_vm13 = vcmp.eq.s32.totalorder %v10178_v31, %v19936_v4  ;;  %vm1470_vm12 = vcmp.eq.s32.totalorder %v10191_v19, %v19927_v17  ;;  %v20022_v17 = vld [vmem:[#allocation31_spill] sm:$0xff] }
 0x4d5   : > { %vm14845_vm15 = vmor %vm14785_vm8, %vm2361_vm11  ;;  %vm832_vm8 = vcmp.eq.s32.totalorder %v10191_v19, %v19936_v4  ;;  %vm19939_vm11 = vcmp.eq.s32.totalorder %v10178_v31, %v19929_v52  ;;  %v19966_v4 = vld [vmem:[#allocation199_spill] sm:$0xff] }
 0x4d6   : > { %vm14856_vm3 = vmor %vm829_vm9, %vm1469_vm7  ;;  %vm19942_vm7 = vcmp.eq.s32.totalorder %v10191_v19, %v2957_v28  ;;  %8345 = vset.pattern.permute.xlu1 %v18821_v56  ;;  %v19955_v28 = vmov 0 }
 0x4d7   : > { %vm14867_vm14 = vmor %vm831_vm13, %vm19939_vm11  ;;  %vm19945_vm13 = vcmp.eq.s32.totalorder %v10191_v19, %v19929_v52  ;;  %3022 = vperm.xlu1 %8345, %v8595_v20   ;;  %v2966_v52 = vpop.permute.xlu0 %2965 }
 0x4d8   : > { %v19941_v2 = vsel %vm14867_vm14, 4294967295, %v19940_v2  ;;  %vm14877_vm9 = vmor %vm14830_vm2, %vm19942_vm7 }
 0x4d9   : > { %vm14886_vm11 = vmor %vm832_vm8, %vm19945_vm13  ;;  %vm3259_vm13 = vcmp.eq.s32.totalorder %v10178_v31, %v2960_v47 }
 0x4da   : > { %v19947_v0 = vsel %vm14886_vm11, 4294967295, %v19946_v0  ;;  %vm14894_vm14 = vmor %vm14845_vm15, %vm19948_vm4  ;;  %vm3260_vm11 = vcmp.eq.s32.totalorder %v10191_v19, %v2960_v47  ;;  %vm19953_vm4 = vnez %v19219_v39  ;;  %vm19954_vm15 = vnez %v19256_v7  ;;  %v2070_v39 = vpop.permute.xlu1 %2069  ;;  %v19971_v47 = vld [vmem:[#allocation19_spill] sm:$0xff] }
 0x4db   : > { %vm14898_vm2 = vmor %vm830_vm1, %vm1470_vm12  ;;  %7544 = vmatmul.mubr.msk.bf16.gmra.mrb[56].mxu0 %vm19953_vm4, %v19370_v48  ;;  %v19958_v7 = vmov 0  ;;  %vm2366_vm12 = vcmp.eq.s32.totalorder %v10191_v19, %v14768_v57  ;;  %8347 = vset.pattern.permute.xlu1 %v18824_v58  ;;  %vm3263_vm4 = vcmp.eq.s32.totalorder %v10178_v31, %v2966_v52 }
 0x4dc   : > { %vm2619_vm7 = vmor %vm14804_vm5, %vm2363_vm10  ;;  %7546 = vmatprep.mubr.msk.bf16.mxu0 %vm19954_vm15, %v19370_v48  ;;  %vm2365_vm5 = vcmp.eq.s32.totalorder %v10178_v31, %v14768_v57  ;;  %2132 = vperm.xlu1 %8347, %v8596_v13   ;;  %v19974_v57 = vld [vmem:[#allocation23_spill] sm:$0xff]  ;;  %v2969_v13 = vpop.permute.xlu0 %2968 }
 0x4dd   : > { %vm2620_vm8 = vmor %vm14814_vm0, %vm2364_vm6 }
 0x4de   : > { %vm3516_vm1 = vmor %vm2620_vm8, %vm3260_vm11  ;;  %vm2367_vm11 = vcmp.eq.s32.totalorder %v10178_v31, %v2070_v39  ;;  %vm19962_vm8 = vnez %v19941_v2  ;;  %v4634_v2 = vpop.f32.mrb[97].mxu1  ;;  %v2963_v20 = vpop.permute.xlu1 %2962 }
 0x4df   : > { %vm14920_vm6 = vmpackc.low %vm3516_vm1, %vm14877_vm9  ;;  %vm19967_vm1 = vnez %v19947_v0  ;;  %v14971_v25 = vpop.f32.mrb[98].mxu1  ;;  %v19973_v0 = vld [vmem:[#allocation162_spill] sm:$0xff]  ;;  %v8597_v2 = vld [vmem:[%s8761_s25 + $0x358] sm:$0xff] }
 0x4e0   : > { %v19956_v28 = vsel %vm14920_vm6, 4294967295, %v19955_v28  ;;  %7074 = vmatprep.mubr.msk.bf16.mxu1 %vm14920_vm6, %v19370_v48  ;;  %vm3515_vm0 = vmor %vm2619_vm7, %vm3259_vm13  ;;  %vm2368_vm7 = vcmp.eq.s32.totalorder %v10191_v19, %v2070_v39  ;;  %19970 = vst [vmem:[#allocation62_spill] sm:$0xff] %v14971_v25  ;;  %v4637_v39 = vpop.f32.mrb[99].mxu1  ;;  %2135 = vperm.xlu1 %8347, %v8597_v2   ;;  %v19994_v25 = vld [vmem:[#allocation27_spill] sm:$0xff]  ;;  %vm20015_vm6 = vcmp.eq.s32.totalorder %v10178_v31, %v2969_v13 }
 0x4e1   : > { %19957 = vst [vmem:[#allocation57_spill] sm:$0xff] %v19956_v28  ;;  %vm14929_vm10 = vmpackc.low %vm3515_vm0, %vm14894_vm14  ;;  %vm3264_vm14 = vcmp.eq.s32.totalorder %v10191_v19, %v2966_v52  ;;  %vm19972_vm0 = vnez %v19971_v47  ;;  %v19978_v47 = vmov 0  ;;  %v19980_v39 = vld [vmem:[#allocation200_spill] sm:$0xff] }
 0x4e2   : > { %v19959_v7 = vsel %vm14929_vm10, 4294967295, %v19958_v7  ;;  %vm14937_vm9 = vmor %vm14856_vm3, %vm2365_vm5  ;;  %7076 = vmatmul.mubr.msk.bf16.gmra.mrb[164].mxu1 %vm14929_vm10, %v19370_v48  ;;  %vm1473_vm3 = vcmp.eq.s32.totalorder %v10178_v31, %v19966_v4  ;;  %v2073_v52 = vpop.permute.xlu1 %2072 }
 0x4e3   : > { %vm14949_vm13 = vmor %vm19962_vm8, %vm2367_vm11  ;;  %7548 = vmatmul.mubr.msk.bf16.gmra.mrb[60].mxu0 %vm19972_vm0, %v19370_v48  ;;  %vm833_vm11 = vcmp.eq.s32.totalorder %v10178_v31, %v19973_v0  ;;  %vm3261_vm8 = vcmp.eq.s32.totalorder %v10178_v31, %v2963_v20 }
 0x4e4   : > { %vm2624_vm15 = vmor %vm19967_vm1, %vm2368_vm7  ;;  %vm3262_vm1 = vcmp.eq.s32.totalorder %v10191_v19, %v2963_v20  ;;  %8348 = vset.pattern.permute.xlu1 %v18821_v56  ;;  %v15038_v20 = vpop.f32.mrb[100].mxu1 }
 0x4e5   : > { %vm14967_vm5 = vmor %vm14898_vm2, %vm2366_vm12  ;;  %vm19975_vm2 = vnez %v19974_v57  ;;  %3031 = vperm.xlu1 %8348, %v8597_v2   ;;  %19990 = vst [vmem:[#allocation108_spill] sm:$0xff] %v15038_v20  ;;  %v4642_v2 = vpop.f32.mrb[101].mxu1  ;;  %v20024_v57 = vmov 0 }
 0x4e6   : > { %vm3520_vm7 = vmor %vm2624_vm15, %vm3264_vm14  ;;  %7550 = vmatprep.mubr.msk.bf16.mxu0 %vm19975_vm2, %v19370_v48  ;;  %v2076_v20 = vpop.permute.xlu1 %2075  ;;  %v15062_v36 = vpop.f32.mrb[102].mxu1 }
 0x4e7   : > { %vm14983_vm12 = vmor %vm833_vm11, %vm1473_vm3  ;;  %vm1474_vm3 = vcmp.eq.s32.totalorder %v10191_v19, %v19966_v4  ;;  %vm1475_vm11 = vcmp.eq.s32.totalorder %v10178_v31, %v19980_v39  ;;  %v19983_v4 = vld [vmem:[#allocation161_spill] sm:$0xff]  ;;  %19999 = vst [vmem:[#allocation61_spill] sm:$0xff] %v15062_v36  ;;  %v4645_v2 = vpop.f32.mrb[103].mxu1  ;;  %v20033_v36 = vld [vmem:[#allocation203_spill] sm:$0xff] }
 0x4e8   : > { %vm3519_vm0 = vmor %vm14949_vm13, %vm3263_vm4  ;;  %vm834_vm4 = vcmp.eq.s32.totalorder %v10191_v19, %v19973_v0  ;;  %vm835_vm2 = vcmp.eq.s32.totalorder %v10178_v31, %v19983_v4  ;;  %v19988_v0 = vld [vmem:[#allocation28_spill] sm:$0xff] }
 0x4e9   : > { %vm3518_vm14 = vmor %vm14967_vm5, %vm3262_vm1  ;;  %vm1476_vm5 = vcmp.eq.s32.totalorder %v10191_v19, %v19980_v39  ;;  %v19993_v39 = vld [vmem:[#allocation201_spill] sm:$0xff]  ;;  %8350 = vset.pattern.permute.xlu1 %v18824_v58 }
 0x4ea   : > { %vm14998_vm15 = vmpackc.low %vm3520_vm7, %vm3518_vm14  ;;  %vm2369_vm14 = vcmp.eq.s32.totalorder %v10178_v31, %v2073_v52 }
 0x4eb   : > { %v19979_v47 = vsel %vm14998_vm15, 4294967295, %v19978_v47  ;;  %7078 = vmatprep.mubr.msk.bf16.mxu1 %vm14998_vm15, %v19370_v48  ;;  %vm3517_vm13 = vmor %vm14937_vm9, %vm3261_vm8  ;;  %vm2370_vm9 = vcmp.eq.s32.totalorder %v10191_v19, %v2073_v52  ;;  %vm836_vm8 = vcmp.eq.s32.totalorder %v10191_v19, %v19983_v4  ;;  %v15046_v4 = vpop.permute.xlu0 %2977  ;;  %vm2372_vm15 = vcmp.eq.s32.totalorder %v10191_v19, %v2076_v20  ;;  %v8598_v52 = vld [vmem:[%s8761_s25 + $0x368] sm:$0xff] }
 0x4ec   : > { %vm15013_vm7 = vmpackc.low %vm3519_vm0, %vm3517_vm13  ;;  %2141 = vperm.xlu1 %8350, %v8598_v52   ;;  %v20026_v52 = vmov 0 }
 0x4ed   : > { %v19982_v8 = vsel %vm15013_vm7, 4294967295, %v19981_v8  ;;  %vm15019_vm1 = vmor %vm834_vm4, %vm1474_vm3  ;;  %7080 = vmatmul.mubr.msk.bf16.gmra.mrb[168].mxu1 %vm15013_vm7, %v19370_v48  ;;  %vm19989_vm3 = vnez %v19988_v0  ;;  %vm1477_vm4 = vcmp.eq.s32.totalorder %v10178_v31, %v19993_v39  ;;  %v20042_v0 = vld [vmem:[#allocation43_spill] sm:$0xff] }
 0x4ee   : > { %vm15030_vm0 = vmor %vm835_vm2, %vm1475_vm11  ;;  %7552 = vmatmul.mubr.msk.bf16.gmra.mrb[64].mxu0 %vm19989_vm3, %v19370_v48  ;;  %vm19995_vm11 = vnez %v19994_v25  ;;  %v20000_v25 = vld [vmem:[#allocation164_spill] sm:$0xff]  ;;  %vm1478_vm2 = vcmp.eq.s32.totalorder %v10191_v19, %v19993_v39  ;;  %vm2371_vm3 = vcmp.eq.s32.totalorder %v10178_v31, %v2076_v20  ;;  %v20049_v20 = vmov 0  ;;  %v8603_v39 = vld [vmem:[%s8761_s25 + $0x380] sm:$0xff] }
 0x4ef   : > { %vm15040_vm13 = vmor %vm836_vm8, %vm1476_vm5  ;;  %7554 = vmatprep.mubr.msk.bf16.mxu0 %vm19995_vm11, %v19370_v48  ;;  %vm837_vm8 = vcmp.eq.s32.totalorder %v10178_v31, %v20000_v25  ;;  %vm838_vm10 = vcmp.eq.s32.totalorder %v10191_v19, %v20000_v25  ;;  %v2079_v25 = vpop.permute.xlu0 %2078 }
 0x4f0   : > { %vm15058_vm5 = vmor %vm15019_vm1, %vm2370_vm9  ;;  %vm839_vm9 = vcmp.eq.s32.totalorder %v10178_v31, %v20003_v59  ;;  %8351 = vset.pattern.permute.xlu1 %v18821_v56 }
 0x4f1   : > { %vm15073_vm1 = vmor %vm14983_vm12, %vm2369_vm14  ;;  %vm840_vm12 = vcmp.eq.s32.totalorder %v10191_v19, %v20003_v59  ;;  %vm20006_vm14 = vcmp.eq.s32.totalorder %v10178_v31, %v19996_v37  ;;  %v20013_v59 = vmov 0  ;;  %3034 = vperm.xlu1 %8351, %v8599_v14   ;;  %v20040_v14 = vld [vmem:[#allocation166_spill] sm:$0xff] }
 0x4f2   : > { %vm15084_vm11 = vmor %vm837_vm8, %vm1477_vm4  ;;  %vm20009_vm4 = vcmp.eq.s32.totalorder %v10191_v19, %v2969_v13  ;;  %v20020_v13 = vld [vmem:[#allocation32_spill] sm:$0xff] }
 0x4f3   : > { %vm15095_vm7 = vmor %vm839_vm9, %vm20006_vm14  ;;  %vm20012_vm9 = vcmp.eq.s32.totalorder %v10191_v19, %v19996_v37  ;;  %v2972_v37 = vpop.permute.xlu1 %2971 }
 0x4f4   : > { %v20008_v22 = vsel %vm15095_vm7, 4294967295, %v20007_v22  ;;  %vm15105_vm8 = vmor %vm15058_vm5, %vm20009_vm4 }
 0x4f5   : > { %vm15114_vm14 = vmor %vm840_vm12, %vm20012_vm9  ;;  %vm3267_vm9 = vcmp.eq.s32.totalorder %v10178_v31, %v2972_v37  ;;  %8352 = vset.pattern.permute.xlu1 %v18824_v58 }
 0x4f6   : > { %v20014_v59 = vsel %vm15114_vm14, 4294967295, %v20013_v59  ;;  %vm15122_vm7 = vmor %vm15073_vm1, %vm20015_vm6  ;;  %vm3268_vm14 = vcmp.eq.s32.totalorder %v10191_v19, %v2972_v37  ;;  %vm20021_vm6 = vnez %v20020_v13  ;;  %vm2374_vm1 = vcmp.eq.s32.totalorder %v10191_v19, %v2079_v25  ;;  %v15188_v37 = vpop.f32.mrb[104].mxu1 }
 0x4f7   : > { %vm15126_vm5 = vmor %vm838_vm10, %vm1478_vm2  ;;  %7556 = vmatmul.mubr.msk.bf16.gmra.mrb[68].mxu0 %vm20021_vm6, %v19370_v48  ;;  %vm20023_vm2 = vnez %v20022_v17  ;;  %v2082_v2 = vpop.permute.xlu1 %2081  ;;  %vm3271_vm6 = vcmp.eq.s32.totalorder %v10178_v31, %v15046_v4  ;;  %20035 = vst [vmem:[#allocation107_spill] sm:$0xff] %v15188_v37  ;;  %v4650_v13 = vpop.f32.mrb[105].mxu1  ;;  %v20038_v17 = vld [vmem:[#allocation35_spill] sm:$0xff] }
 0x4f8   : > { %vm2627_vm4 = vmor %vm15030_vm0, %vm2371_vm3  ;;  %7558 = vmatprep.mubr.msk.bf16.mxu0 %vm20023_vm2, %v19370_v48  ;;  %vm2373_vm0 = vcmp.eq.s32.totalorder %v10178_v31, %v2079_v25  ;;  %v8600_v25 = vld [vmem:[%s8761_s25 + $0x370] sm:$0xff] }
 0x4f9   : > { %vm2628_vm12 = vmor %vm15040_vm13, %vm2372_vm15  ;;  %2144 = vperm.xlu1 %8352, %v8600_v25  }
 0x4fa   : > { %vm3524_vm10 = vmor %vm2628_vm12, %vm3268_vm14  ;;  %vm2375_vm14 = vcmp.eq.s32.totalorder %v10178_v31, %v2082_v2  ;;  %vm2376_vm12 = vcmp.eq.s32.totalorder %v10191_v19, %v2082_v2  ;;  %v15201_v2 = vpop.f32.mrb[106].mxu1 }
 0x4fb   : > { %vm15147_vm15 = vmpackc.low %vm3524_vm10, %vm15105_vm8  ;;  %vm20034_vm10 = vnez %v20014_v59  ;;  %v2975_v59 = vpop.permute.xlu1 %2974  ;;  %20041 = vst [vmem:[#allocation66_spill] sm:$0xff] %v15201_v2  ;;  %v4653_v13 = vpop.f32.mrb[107].mxu1  ;;  %v20061_v2 = vld [vmem:[#allocation205_spill] sm:$0xff] }
 0x4fc   : > { %v20025_v57 = vsel %vm15147_vm15, 4294967295, %v20024_v57  ;;  %7082 = vmatprep.mubr.msk.bf16.mxu1 %vm15147_vm15, %v19370_v48  ;;  %vm3523_vm13 = vmor %vm2627_vm4, %vm3267_vm9  ;;  %vm20030_vm4 = vnez %v20008_v22  ;;  %v15231_v13 = vpop.permute.xlu0 %2090  ;;  %v15276_v32 = vpop.f32.mrb[108].mxu1  ;;  %vm20082_vm15 = vcmp.eq.s32.totalorder %v10191_v19, %v20065_v46 }
 0x4fd   : > { %vm15156_vm3 = vmpackc.low %vm3523_vm13, %vm15122_vm7  ;;  %vm3272_vm7 = vcmp.eq.s32.totalorder %v10191_v19, %v15046_v4  ;;  %vm20039_vm13 = vnez %v20038_v17  ;;  %v8601_v17 = vld [vmem:[%s8761_s25 + $0x378] sm:$0xff]  ;;  %20064 = vst [vmem:[#allocation65_spill] sm:$0xff] %v15276_v32  ;;  %v4658_v24 = vpop.f32.mrb[109].mxu1 }
 0x4fe   : > { %v20027_v52 = vsel %vm15156_vm3, 4294967295, %v20026_v52  ;;  %vm15163_vm8 = vmor %vm15084_vm11, %vm2373_vm0  ;;  %7084 = vmatmul.mubr.msk.bf16.gmra.mrb[172].mxu1 %vm15156_vm3, %v19370_v48  ;;  %vm1481_vm11 = vcmp.eq.s32.totalorder %v10178_v31, %v20033_v36  ;;  %2147 = vperm.xlu1 %8352, %v8601_v17   ;;  %v15302_v32 = vpop.f32.mrb[110].mxu1  ;;  %v20074_v24 = vmov 0 }
 0x4ff   : > { %vm15176_vm9 = vmor %vm20030_vm4, %vm2375_vm14  ;;  %7560 = vmatmul.mubr.msk.bf16.gmra.mrb[72].mxu0 %vm20039_vm13, %v19370_v48  ;;  %vm841_vm14 = vcmp.eq.s32.totalorder %v10178_v31, %v20040_v14  ;;  %vm3269_vm4 = vcmp.eq.s32.totalorder %v10178_v31, %v2975_v59  ;;  %v2085_v4 = vpop.permute.xlu1 %2084  ;;  %20072 = vst [vmem:[#allocation111_spill] sm:$0xff] %v15302_v32  ;;  %v4661_v25 = vpop.f32.mrb[111].mxu1 }
 0x500   : > { %vm2632_vm2 = vmor %vm20034_vm10, %vm2376_vm12  ;;  %vm3270_vm10 = vcmp.eq.s32.totalorder %v10191_v19, %v2975_v59  ;;  %v20048_v59 = vld [vmem:[#allocation204_spill] sm:$0xff]  ;;  %v2981_v37 = vpop.permute.xlu0 %2980  ;;  %v20118_v25 = vld [vmem:[#allocation169_spill] sm:$0xff] }
 0x501   : > { %vm15192_vm0 = vmor %vm15126_vm5, %vm2374_vm1  ;;  %vm20043_vm5 = vnez %v20042_v0  ;;  %v20046_v0 = vmov 0 }
 0x502   : > { %vm3528_vm12 = vmor %vm2632_vm2, %vm3272_vm7  ;;  %7562 = vmatprep.mubr.msk.bf16.mxu0 %vm20043_vm5, %v19370_v48  ;;  %8353 = vset.pattern.permute.xlu1 %v18821_v56 }
 0x503   : > { %vm15209_vm1 = vmor %vm841_vm14, %vm1481_vm11  ;;  %vm1482_vm11 = vcmp.eq.s32.totalorder %v10191_v19, %v20033_v36  ;;  %vm1483_vm14 = vcmp.eq.s32.totalorder %v10178_v31, %v20048_v59  ;;  %v20052_v36 = vld [vmem:[#allocation165_spill] sm:$0xff]  ;;  %3043 = vperm.xlu1 %8353, %v8601_v17   ;;  %v20102_v17 = vld [vmem:[#allocation170_spill] sm:$0xff] }
 0x504   : > { %vm3527_vm13 = vmor %vm15176_vm9, %vm3271_vm6  ;;  %vm842_vm6 = vcmp.eq.s32.totalorder %v10191_v19, %v20040_v14  ;;  %vm843_vm5 = vcmp.eq.s32.totalorder %v10178_v31, %v20052_v36  ;;  %v20057_v14 = vld [vmem:[#allocation48_spill] sm:$0xff] }
 0x505   : > { %vm3526_vm7 = vmor %vm15192_vm0, %vm3270_vm10  ;;  %vm1484_vm0 = vcmp.eq.s32.totalorder %v10191_v19, %v20048_v59  ;;  %v20093_v59 = vmov 0 }
 0x506   : > { %vm15225_vm2 = vmpackc.low %vm3528_vm12, %vm3526_vm7 }
 0x507   : > { %v20047_v0 = vsel %vm15225_vm2, 4294967295, %v20046_v0  ;;  %7086 = vmatprep.mubr.msk.bf16.mxu1 %vm15225_vm2, %v19370_v48  ;;  %vm3525_vm9 = vmor %vm15163_vm8, %vm3269_vm4  ;;  %vm2378_vm8 = vcmp.eq.s32.totalorder %v10191_v19, %v2085_v4  ;;  %vm844_vm4 = vcmp.eq.s32.totalorder %v10191_v19, %v20052_v36  ;;  %v20062_v36 = vld [vmem:[#allocation52_spill] sm:$0xff]  ;;  %8354 = vset.pattern.permute.xlu1 %v18824_v58 }
 0x508   : > { %vm15242_vm12 = vmpackc.low %vm3527_vm13, %vm3525_vm9 }
 0x509   : > { %v20050_v20 = vsel %vm15242_vm12, 4294967295, %v20049_v20  ;;  %vm15248_vm10 = vmor %vm842_vm6, %vm1482_vm11  ;;  %7088 = vmatmul.mubr.msk.bf16.gmra.mrb[176].mxu1 %vm15242_vm12, %v19370_v48  ;;  %vm20058_vm11 = vnez %v20057_v14  ;;  %vm1485_vm6 = vcmp.eq.s32.totalorder %v10178_v31, %v20061_v2  ;;  %v2088_v14 = vpop.permute.xlu1 %2087  ;;  %vm20076_vm12 = vcmp.eq.s32.totalorder %v10191_v19, %v2981_v37 }
 0x50a   : > { %20051 = vst [vmem:[#allocation112_spill] sm:$0xff] %v20050_v20  ;;  %vm15259_vm13 = vmor %vm843_vm5, %vm1483_vm14  ;;  %7564 = vmatmul.mubr.msk.bf16.gmra.mrb[76].mxu0 %vm20058_vm11, %v19370_v48  ;;  %vm20063_vm14 = vnez %v20062_v36  ;;  %v20068_v36 = vld [vmem:[#allocation168_spill] sm:$0xff]  ;;  %vm20069_vm5 = vcmp.eq.s32.totalorder %v10178_v31, %v2085_v4  ;;  %v20073_v20 = vld [vmem:[#allocation167_spill] sm:$0xff]  ;;  %vm2380_vm11 = vcmp.eq.s32.totalorder %v10191_v19, %v2088_v14 }
 0x50b   : > { %vm15267_vm9 = vmor %vm844_vm4, %vm1484_vm0  ;;  %7566 = vmatprep.mubr.msk.bf16.mxu0 %vm20063_vm14, %v19370_v48  ;;  %vm845_vm4 = vcmp.eq.s32.totalorder %v10178_v31, %v20068_v36  ;;  %v8602_v4 = vld [vmem:[%s8761_s25 + $0x388] sm:$0xff]  ;;  %vm846_vm3 = vcmp.eq.s32.totalorder %v10191_v19, %v20068_v36 }
 0x50c   : > { %vm15285_vm0 = vmor %vm15248_vm10, %vm2378_vm8  ;;  %vm847_vm10 = vcmp.eq.s32.totalorder %v10178_v31, %v20073_v20  ;;  %vm1486_vm8 = vcmp.eq.s32.totalorder %v10191_v19, %v20061_v2  ;;  %2153 = vperm.xlu1 %8354, %v8602_v4   ;;  %v2990_v4 = vpop.permute.xlu0 %2989  ;;  %v20100_v2 = vld [vmem:[#allocation207_spill] sm:$0xff] }
 0x50d   : > { %vm15298_vm7 = vmor %vm15209_vm1, %vm20069_vm5  ;;  %vm2379_vm1 = vcmp.eq.s32.totalorder %v10178_v31, %v2088_v14  ;;  %vm848_vm5 = vcmp.eq.s32.totalorder %v10191_v19, %v20073_v20  ;;  %v20083_v20 = vmov 0 }
 0x50e   : > { %vm15311_vm14 = vmor %vm845_vm4, %vm1485_vm6  ;;  %vm20079_vm4 = vcmp.eq.s32.totalorder %v10178_v31, %v20065_v46  ;;  %v2984_v46 = vpop.permute.xlu1 %2983 }
 0x50f   : > { %v20075_v24 = vsel %vm15311_vm14, 4294967295, %v20074_v24  ;;  %vm15325_vm6 = vmor %vm15285_vm0, %vm20076_vm12  ;;  %vm20085_vm12 = vcmp.eq.s32.totalorder %v10178_v31, %v2981_v37  ;;  %v20090_v37 = vld [vmem:[#allocation56_spill] sm:$0xff] }
 0x510   : > { %vm15332_vm2 = vmor %vm847_vm10, %vm20079_vm4  ;;  %8355 = vset.pattern.permute.xlu1 %v18821_v56  ;;  %v2993_v14 = vpop.permute.xlu0 %2992 }
 0x511   : > { %vm15341_vm14 = vmor %vm848_vm5, %vm20082_vm15  ;;  %vm3275_vm5 = vcmp.eq.s32.totalorder %v10178_v31, %v2984_v46  ;;  %3046 = vperm.xlu1 %8355, %v8603_v39  }
 0x512   : > { %v20084_v20 = vsel %vm15341_vm14, 4294967295, %v20083_v20  ;;  %vm15349_vm0 = vmor %vm15298_vm7, %vm20085_vm12  ;;  %vm3276_vm14 = vcmp.eq.s32.totalorder %v10191_v19, %v2984_v46  ;;  %vm20091_vm7 = vnez %v20090_v37  ;;  %v2094_v36 = vpop.permute.xlu1 %2093  ;;  %v15422_v46 = vpop.f32.mrb[112].mxu1 }
 0x513   : > { %vm15353_vm10 = vmor %vm846_vm3, %vm1486_vm8  ;;  %7568 = vmatmul.mubr.msk.bf16.gmra.mrb[80].mxu0 %vm20091_vm7, %v19370_v48  ;;  %vm20092_vm8 = vnez %v19428_v12  ;;  %v20095_v12 = vmov 0  ;;  %20105 = vst [vmem:[#allocation70_spill] sm:$0xff] %v15422_v46  ;;  %v4666_v39 = vpop.f32.mrb[113].mxu1  ;;  %v20135_v46 = vld [vmem:[#allocation171_spill] sm:$0xff] }
 0x514   : > { %vm2635_vm4 = vmor %vm15259_vm13, %vm2379_vm1  ;;  %7570 = vmatprep.mubr.msk.bf16.mxu0 %vm20092_vm8, %v19370_v48  ;;  %vm2381_vm13 = vcmp.eq.s32.totalorder %v10178_v31, %v15231_v13  ;;  %vm2382_vm1 = vcmp.eq.s32.totalorder %v10191_v19, %v15231_v13  ;;  %vm20101_vm8 = vnez %v20084_v20  ;;  %v20124_v20 = vld [vmem:[#allocation209_spill] sm:$0xff]  ;;  %v15497_v39 = vpop.permute.xlu0 %3001 }
 0x515   : > { %vm2636_vm15 = vmor %vm15267_vm9, %vm2380_vm11  ;;  %8357 = vset.pattern.permute.xlu1 %v18824_v58 }
 0x516   : > { %vm3532_vm3 = vmor %vm2636_vm15, %vm3276_vm14  ;;  %vm2383_vm15 = vcmp.eq.s32.totalorder %v10178_v31, %v2094_v36  ;;  %v2987_v37 = vpop.permute.xlu1 %2986 }
 0x517   : > { %vm15375_vm9 = vmpackc.low %vm3532_vm3, %vm15325_vm6  ;;  %vm20097_vm6 = vnez %v20075_v24  ;;  %vm3280_vm3 = vcmp.eq.s32.totalorder %v10191_v19, %v2990_v4  ;;  %v8604_v24 = vld [vmem:[%s8761_s25 + $0x390] sm:$0xff] }
 0x518   : > { %v20094_v59 = vsel %vm15375_vm9, 4294967295, %v20093_v59  ;;  %7090 = vmatprep.mubr.msk.bf16.mxu1 %vm15375_vm9, %v19370_v48  ;;  %vm3531_vm11 = vmor %vm2635_vm4, %vm3275_vm5  ;;  %vm2384_vm4 = vcmp.eq.s32.totalorder %v10191_v19, %v2094_v36  ;;  %vm3279_vm5 = vcmp.eq.s32.totalorder %v10178_v31, %v2990_v4  ;;  %2156 = vperm.xlu1 %8357, %v8604_v24   ;;  %v20113_v4 = vld [vmem:[#allocation208_spill] sm:$0xff]  ;;  %v20114_v24 = vmov 0 }
 0x519   : > { %vm15384_vm14 = vmpackc.low %vm3531_vm11, %vm15349_vm0  ;;  %vm1489_vm0 = vcmp.eq.s32.totalorder %v10178_v31, %v20100_v2  ;;  %vm849_vm11 = vcmp.eq.s32.totalorder %v10178_v31, %v20102_v17 }
 0x51a   : > { %v20096_v12 = vsel %vm15384_vm14, 4294967295, %v20095_v12  ;;  %vm15392_vm12 = vmor %vm20097_vm6, %vm2381_vm13  ;;  %7092 = vmatmul.mubr.msk.bf16.gmra.mrb[180].mxu1 %vm15384_vm14, %v19370_v48  ;;  %v2097_v22 = vpop.permute.xlu1 %2096 }
 0x51b   : > { %vm2639_vm7 = vmor %vm15332_vm2, %vm2383_vm15  ;;  %vm20106_vm2 = vnez %v19442_v50  ;;  %v15443_v50 = vpop.f32.mrb[114].mxu1 }
 0x51c   : > { %vm2640_vm13 = vmor %vm20101_vm8, %vm2384_vm4  ;;  %7572 = vmatmul.mubr.msk.bf16.gmra.mrb[84].mxu0 %vm20106_vm2, %v19370_v48  ;;  %vm20109_vm4 = vnez %v19455_v38  ;;  %vm3277_vm8 = vcmp.eq.s32.totalorder %v10178_v31, %v2987_v37  ;;  %20112 = vst [vmem:[#allocation69_spill] sm:$0xff] %v15443_v50  ;;  %v8605_v38 = vld [vmem:[%s8761_s25 + $0x398] sm:$0xff]  ;;  %v4669_v36 = vpop.f32.mrb[115].mxu1  ;;  %vm850_vm2 = vcmp.eq.s32.totalorder %v10191_v19, %v20102_v17  ;;  %v8607_v17 = vld [vmem:[%s8761_s25 + $0x3a0] sm:$0xff] }
 0x51d   : > { %vm15418_vm6 = vmor %vm15353_vm10, %vm2382_vm1  ;;  %7574 = vmatprep.mubr.msk.bf16.mxu0 %vm20109_vm4, %v19370_v48  ;;  %2159 = vperm.xlu1 %8357, %v8605_v38   ;;  %vm851_vm4 = vcmp.eq.s32.totalorder %v10178_v31, %v20118_v25  ;;  %v20128_v36 = vld [vmem:[#allocation210_spill] sm:$0xff]  ;;  %v20132_v50 = vld [vmem:[#allocation172_spill] sm:$0xff] }
 0x51e   : > { %vm15427_vm15 = vmor %vm2639_vm7, %vm3279_vm5  ;;  %vm3278_vm5 = vcmp.eq.s32.totalorder %v10191_v19, %v2987_v37  ;;  %v20166_v37 = vld [vmem:[#allocation174_spill] sm:$0xff] }
 0x51f   : > { %vm15437_vm10 = vmor %vm849_vm11, %vm1489_vm0  ;;  %vm1490_vm0 = vcmp.eq.s32.totalorder %v10191_v19, %v20100_v2  ;;  %v20116_v2 = vmov 0 }
 0x520   : > { %vm3536_vm1 = vmor %vm2640_vm13, %vm3280_vm3  ;;  %vm1491_vm3 = vcmp.eq.s32.totalorder %v10178_v31, %v20113_v4 }
 0x521   : > { %vm3533_vm7 = vmor %vm15392_vm12, %vm3277_vm8  ;;  %vm1492_vm12 = vcmp.eq.s32.totalorder %v10191_v19, %v20113_v4  ;;  %vm2385_vm8 = vcmp.eq.s32.totalorder %v10178_v31, %v2097_v22  ;;  %8358 = vset.pattern.permute.xlu1 %v18821_v56  ;;  %v2100_v4 = vpop.permute.xlu1 %2099 }
 0x522   : > { %vm3534_vm11 = vmor %vm15418_vm6, %vm3278_vm5  ;;  %vm2386_vm5 = vcmp.eq.s32.totalorder %v10191_v19, %v2097_v22  ;;  %3055 = vperm.xlu1 %8358, %v8605_v38   ;;  %v20159_v38 = vmov 0 }
 0x523   : > { %vm15454_vm13 = vmpackc.low %vm3536_vm1, %vm3534_vm11 }
 0x524   : > { %v20115_v24 = vsel %vm15454_vm13, 4294967295, %v20114_v24  ;;  %7094 = vmatprep.mubr.msk.bf16.mxu1 %vm15454_vm13, %v19370_v48  ;;  %vm15467_vm6 = vmpackc.low %vm15427_vm15, %vm3533_vm7  ;;  %vm852_vm15 = vcmp.eq.s32.totalorder %v10191_v19, %v20118_v25  ;;  %v15518_v25 = vpop.f32.mrb[116].mxu1  ;;  %vm20149_vm13 = vcmp.eq.s32.totalorder %v10191_v19, %v20128_v36 }
 0x525   : > { %v20117_v2 = vsel %vm15467_vm6, 4294967295, %v20116_v2  ;;  %vm15473_vm1 = vmor %vm850_vm2, %vm1490_vm0  ;;  %7096 = vmatmul.mubr.msk.bf16.gmra.mrb[184].mxu1 %vm15467_vm6, %v19370_v48  ;;  %vm20123_vm0 = vnez %v19462_v30  ;;  %20131 = vst [vmem:[#allocation116_spill] sm:$0xff] %v15518_v25  ;;  %v4674_v13 = vpop.f32.mrb[117].mxu1  ;;  %vm854_vm6 = vcmp.eq.s32.totalorder %v10191_v19, %v20132_v50  ;;  %v2996_v30 = vpop.permute.xlu1 %2995  ;;  %v8608_v25 = vld [vmem:[%s8761_s25 + $0x3b0] sm:$0xff] }
 0x526   : > { %vm15488_vm7 = vmor %vm851_vm4, %vm1491_vm3  ;;  %7576 = vmatmul.mubr.msk.bf16.gmra.mrb[88].mxu0 %vm20123_vm0, %v19370_v48  ;;  %vm20127_vm3 = vnez %v19476_v10  ;;  %8360 = vset.pattern.permute.xlu1 %v18824_v58  ;;  %v15546_v22 = vpop.f32.mrb[118].mxu1  ;;  %v8606_v13 = vld [vmem:[%s8761_s25 + $0x3a8] sm:$0xff]  ;;  %vm3284_vm9 = vcmp.eq.s32.totalorder %v10191_v19, %v2996_v30  ;;  %v20165_v10 = vld [vmem:[#allocation211_spill] sm:$0xff] }
 0x527   : > { %vm15502_vm2 = vmor %vm852_vm15, %vm1492_vm12  ;;  %7578 = vmatprep.mubr.msk.bf16.mxu0 %vm20127_vm3, %v19370_v48  ;;  %vm853_vm12 = vcmp.eq.s32.totalorder %v10178_v31, %v20132_v50  ;;  %vm20136_vm15 = vcmp.eq.s32.totalorder %v10178_v31, %v20124_v20  ;;  %20139 = vst [vmem:[#allocation115_spill] sm:$0xff] %v15546_v22  ;;  %2165 = vperm.xlu1 %8360, %v8606_v13   ;;  %v4677_v32 = vpop.f32.mrb[119].mxu1  ;;  %v20153_v50 = vmov 0  ;;  %v8611_v13 = vld [vmem:[%s8761_s25 + $0x3c0] sm:$0xff] }
 0x528   : > { %vm15514_vm11 = vmor %vm15437_vm10, %vm2385_vm8  ;;  %vm855_vm8 = vcmp.eq.s32.totalorder %v10178_v31, %v20135_v46 }
 0x529   : > { %vm15529_vm10 = vmor %vm15473_vm1, %vm2386_vm5  ;;  %vm856_vm1 = vcmp.eq.s32.totalorder %v10191_v19, %v20135_v46  ;;  %vm20140_vm5 = vcmp.eq.s32.totalorder %v10178_v31, %v2993_v14 }
 0x52a   : > { %vm15540_vm0 = vmor %vm853_vm12, %vm20136_vm15  ;;  %vm2388_vm12 = vcmp.eq.s32.totalorder %v10191_v19, %v2100_v4  ;;  %vm20143_vm15 = vcmp.eq.s32.totalorder %v10178_v31, %v20128_v36  ;;  %v2106_v36 = vpop.permute.xlu1 %2105 }
 0x52b   : > { %vm15554_vm4 = vmor %vm15514_vm11, %vm20140_vm5  ;;  %vm20146_vm11 = vcmp.eq.s32.totalorder %v10191_v19, %v2993_v14  ;;  %v2103_v14 = vpop.permute.xlu0 %2102  ;;  %8361 = vset.pattern.permute.xlu1 %v18821_v56 }
 0x52c   : > { %vm15563_vm3 = vmor %vm855_vm8, %vm20143_vm15  ;;  %vm20152_vm8 = vcmp.eq.s32.totalorder %v10191_v19, %v20124_v20  ;;  %v20156_v20 = vld [vmem:[#allocation20_spill] sm:$0xff]  ;;  %3058 = vperm.xlu1 %8361, %v8607_v17  }
 0x52d   : > { %vm15573_vm5 = vmor %vm15529_vm10, %vm20146_vm11  ;;  %vm20155_vm10 = vcmp.eq.s32.totalorder %v10178_v31, %v2100_v4 }
 0x52e   : > { %vm15580_vm14 = vmor %vm856_vm1, %vm20149_vm13  ;;  %vm3283_vm1 = vcmp.eq.s32.totalorder %v10178_v31, %v2996_v30  ;;  %v2999_v22 = vpop.permute.xlu1 %2998  ;;  %v20180_v30 = vld [vmem:[#allocation212_spill] sm:$0xff] }
 0x52f   : > { %vm15587_vm15 = vmor %vm854_vm6, %vm20152_vm8  ;;  %vm20157_vm6 = vnez %v20156_v20  ;;  %v15688_v20 = vpop.permute.xlu0 %2114 }
 0x530   : > { %v20154_v50 = vsel %vm15587_vm15, 4294967295, %v20153_v50  ;;  %vm2643_vm11 = vmor %vm15488_vm7, %vm20155_vm10  ;;  %7580 = vmatmul.mubr.msk.bf16.gmra.mrb[92].mxu0 %vm20157_vm6, %v19370_v48  ;;  %vm20158_vm15 = vnez %v19508_v40  ;;  %vm2389_vm7 = vcmp.eq.s32.totalorder %v10178_v31, %v2103_v14  ;;  %v20161_v40 = vmov 0  ;;  %8362 = vset.pattern.permute.xlu1 %v18824_v58 }
 0x531   : > { %vm2644_vm13 = vmor %vm15502_vm2, %vm2388_vm12  ;;  %7582 = vmatprep.mubr.msk.bf16.mxu0 %vm20158_vm15, %v19370_v48  ;;  %2168 = vperm.xlu1 %8362, %v8608_v25   ;;  %v20185_v25 = vld [vmem:[#allocation173_spill] sm:$0xff] }
 0x532   : > { %vm3539_vm8 = vmor %vm2643_vm11, %vm3283_vm1  ;;  %vm2392_vm11 = vcmp.eq.s32.totalorder %v10191_v19, %v2106_v36  ;;  %vm3288_vm1 = vcmp.eq.s32.totalorder %v10191_v19, %v15497_v39  ;;  %v2109_v4 = vpop.permute.xlu1 %2108 }
 0x533   : > { %vm3540_vm10 = vmor %vm2644_vm13, %vm3284_vm9  ;;  %vm2390_vm9 = vcmp.eq.s32.totalorder %v10191_v19, %v2103_v14  ;;  %vm3287_vm13 = vcmp.eq.s32.totalorder %v10178_v31, %v15497_v39  ;;  %v20190_v39 = vld [vmem:[#allocation22_spill] sm:$0xff]  ;;  %v3005_v32 = vpop.permute.xlu0 %3004 }
 0x534   : > { %vm15610_vm2 = vmpackc.low %vm3540_vm10, %vm15573_vm5  ;;  %vm2391_vm5 = vcmp.eq.s32.totalorder %v10178_v31, %v2106_v36  ;;  %v20181_v36 = vmov 0 }
 0x535   : > { %v20160_v38 = vsel %vm15610_vm2, 4294967295, %v20159_v38  ;;  %7098 = vmatprep.mubr.msk.bf16.mxu1 %vm15610_vm2, %v19370_v48  ;;  %vm15619_vm12 = vmpackc.low %vm3539_vm8, %vm15554_vm4  ;;  %vm1497_vm4 = vcmp.eq.s32.totalorder %v10178_v31, %v20165_v10  ;;  %vm857_vm8 = vcmp.eq.s32.totalorder %v10178_v31, %v20166_v37 }
 0x536   : > { %v20162_v40 = vsel %vm15619_vm12, 4294967295, %v20161_v40  ;;  %vm15626_vm15 = vmor %vm15540_vm0, %vm2389_vm7  ;;  %7100 = vmatmul.mubr.msk.bf16.gmra.mrb[188].mxu1 %vm15619_vm12, %v19370_v48  ;;  %vm20167_vm7 = vnez %v20154_v50  ;;  %vm3286_vm12 = vcmp.eq.s32.totalorder %v10191_v19, %v2999_v22 }
 0x537   : > { %vm2647_vm0 = vmor %vm15563_vm3, %vm2391_vm5  ;;  %vm20170_vm3 = vnez %v19512_v5  ;;  %v15671_v5 = vpop.f32.mrb[120].mxu1 }
 0x538   : > { %vm2648_vm6 = vmor %vm15580_vm14, %vm2392_vm11  ;;  %7584 = vmatmul.mubr.msk.bf16.gmra.mrb[96].mxu0 %vm20170_vm3, %v19370_v48  ;;  %vm20173_vm14 = vnez %v19520_v42  ;;  %20176 = vst [vmem:[#allocation74_spill] sm:$0xff] %v15671_v5  ;;  %v4682_v50 = vpop.f32.mrb[121].mxu1  ;;  %v8609_v42 = vld [vmem:[%s8761_s25 + $0x3b8] sm:$0xff] }
 0x539   : > { %vm15651_vm10 = vmor %vm20167_vm7, %vm2390_vm9  ;;  %7586 = vmatprep.mubr.msk.bf16.mxu0 %vm20173_vm14, %v19370_v48  ;;  %vm3285_vm7 = vcmp.eq.s32.totalorder %v10178_v31, %v2999_v22  ;;  %2171 = vperm.xlu1 %8362, %v8609_v42   ;;  %v15684_v14 = vpop.f32.mrb[122].mxu1  ;;  %vm2393_vm14 = vcmp.eq.s32.totalorder %v10178_v31, %v2109_v4  ;;  %v20192_v22 = vld [vmem:[#allocation213_spill] sm:$0xff]  ;;  %v20224_v50 = vmov 0 }
 0x53a   : > { %vm15658_vm5 = vmor %vm2647_vm0, %vm3287_vm13  ;;  %20179 = vst [vmem:[#allocation120_spill] sm:$0xff] %v15684_v14  ;;  %v4685_v17 = vpop.f32.mrb[123].mxu1  ;;  %v20203_v14 = vld [vmem:[#allocation175_spill] sm:$0xff] }
 0x53b   : > { %vm15665_vm11 = vmor %vm857_vm8, %vm1497_vm4  ;;  %vm1498_vm4 = vcmp.eq.s32.totalorder %v10191_v19, %v20165_v10  ;;  %vm1500_vm8 = vcmp.eq.s32.totalorder %v10191_v19, %v20180_v30  ;;  %v20183_v10 = vmov 0  ;;  %v20219_v17 = vmov 0 }
 0x53c   : > { %vm3544_vm9 = vmor %vm2648_vm6, %vm3288_vm1  ;;  %vm1499_vm1 = vcmp.eq.s32.totalorder %v10178_v31, %v20180_v30  ;;  %vm858_vm6 = vcmp.eq.s32.totalorder %v10191_v19, %v20166_v37  ;;  %v2112_v30 = vpop.permute.xlu1 %2111 }
 0x53d   : > { %vm15675_vm13 = vmor %vm15626_vm15, %vm3285_vm7  ;;  %8363 = vset.pattern.permute.xlu1 %v18821_v56  ;;  %vm20221_vm2 = vcmp.eq.s32.totalorder %v10178_v31, %v2112_v30 }
 0x53e   : > { %vm3542_vm0 = vmor %vm15651_vm10, %vm3286_vm12  ;;  %vm859_vm10 = vcmp.eq.s32.totalorder %v10178_v31, %v20185_v25  ;;  %3067 = vperm.xlu1 %8363, %v8609_v42   ;;  %v20196_v42 = vld [vmem:[#allocation214_spill] sm:$0xff] }
 0x53f   : > { %vm15690_vm15 = vmpackc.low %vm3544_vm9, %vm3542_vm0  ;;  %vm2394_vm9 = vcmp.eq.s32.totalorder %v10191_v19, %v2109_v4 }
 0x540   : > { %v20182_v36 = vsel %vm15690_vm15, 4294967295, %v20181_v36  ;;  %7102 = vmatprep.mubr.msk.bf16.mxu1 %vm15690_vm15, %v19370_v48  ;;  %vm15705_vm12 = vmpackc.low %vm15658_vm5, %vm15675_vm13  ;;  %vm860_vm5 = vcmp.eq.s32.totalorder %v10191_v19, %v20185_v25  ;;  %vm20191_vm13 = vnez %v20190_v39  ;;  %v15754_v25 = vpop.f32.mrb[124].mxu1  ;;  %v20200_v39 = vld [vmem:[#allocation176_spill] sm:$0xff] }
 0x541   : > { %v20184_v10 = vsel %vm15705_vm12, 4294967295, %v20183_v10  ;;  %vm15711_vm3 = vmor %vm858_vm6, %vm1498_vm4  ;;  %7104 = vmatmul.mubr.msk.bf16.gmra.mrb[192].mxu1 %vm15705_vm12, %v19370_v48  ;;  %7588 = vmatmul.mubr.msk.bf16.gmra.mrb[100].mxu0 %vm20191_vm13, %v19370_v48  ;;  %vm1501_vm4 = vcmp.eq.s32.totalorder %v10178_v31, %v20192_v22  ;;  %20199 = vst [vmem:[#allocation73_spill] sm:$0xff] %v15754_v25  ;;  %v4690_v46 = vpop.f32.mrb[125].mxu1  ;;  %vm862_vm6 = vcmp.eq.s32.totalorder %v10191_v19, %v20200_v39  ;;  %v20233_v25 = vld [vmem:[#allocation40_spill] sm:$0xff] }
 0x542   : > { %vm15726_vm7 = vmor %vm859_vm10, %vm1499_vm1  ;;  %vm20195_vm1 = vnez %v19549_v27  ;;  %vm3289_vm10 = vcmp.eq.s32.totalorder %v10178_v31, %v3005_v32  ;;  %8364 = vset.pattern.permute.xlu1 %v18824_v58  ;;  %v15782_v4 = vpop.f32.mrb[126].mxu1  ;;  %v8610_v46 = vld [vmem:[%s8761_s25 + $0x3c8] sm:$0xff]  ;;  %vm20215_vm12 = vcmp.eq.s32.totalorder %v10191_v19, %v20196_v42 }
 0x543   : > { %vm15738_vm0 = vmor %vm860_vm5, %vm1500_vm8  ;;  %7590 = vmatprep.mubr.msk.bf16.mxu0 %vm20195_vm1, %v19370_v48  ;;  %vm861_vm8 = vcmp.eq.s32.totalorder %v10178_v31, %v20200_v39  ;;  %20206 = vst [vmem:[#allocation119_spill] sm:$0xff] %v15782_v4  ;;  %2177 = vperm.xlu1 %8364, %v8610_v46   ;;  %v4693_v5 = vpop.f32.mrb[127].mxu1  ;;  %v20228_v39 = vmov 0  ;;  %v20252_v46 = vld [vmem:[#allocation216_spill] sm:$0xff] }
 0x544   : > { %vm15750_vm13 = vmor %vm15665_vm11, %vm2393_vm14  ;;  %vm863_vm14 = vcmp.eq.s32.totalorder %v10178_v31, %v20203_v14  ;;  %v20240_v5 = vld [vmem:[#allocation72_spill] sm:$0xff] }
 0x545   : > { %vm15765_vm11 = vmor %vm15711_vm3, %vm2394_vm9  ;;  %vm864_vm3 = vcmp.eq.s32.totalorder %v10191_v19, %v20203_v14  ;;  %v3014_v14 = vpop.permute.xlu0 %3013 }
 0x546   : > { %vm15776_vm5 = vmor %vm861_vm8, %vm1501_vm4  ;;  %vm2396_vm4 = vcmp.eq.s32.totalorder %v10191_v19, %v2112_v30  ;;  %vm20209_vm8 = vcmp.eq.s32.totalorder %v10178_v31, %v20196_v42 }
 0x547   : > { %vm15791_vm9 = vmor %vm15750_vm13, %vm3289_vm10  ;;  %vm20212_vm10 = vcmp.eq.s32.totalorder %v10191_v19, %v3005_v32  ;;  %v3008_v32 = vpop.permute.xlu1 %3007  ;;  %8365 = vset.pattern.permute.xlu1 %v18821_v56 }
 0x548   : > { %vm15800_vm1 = vmor %vm863_vm14, %vm20209_vm8  ;;  %vm20218_vm14 = vcmp.eq.s32.totalorder %v10191_v19, %v20192_v22  ;;  %3070 = vperm.xlu1 %8365, %v8611_v13   ;;  %v5755_v22 = vpop.f32.mrb[0].mxu0  ;;  %v20234_v13 = vld [vmem:[#allocation215_spill] sm:$0xff] }
 0x549   : > { %vm15810_vm13 = vmor %vm15765_vm11, %vm20212_vm10  ;;  %vm3292_vm10 = vcmp.eq.s32.totalorder %v10191_v19, %v3008_v32  ;;  %v5757_v30 = vpop.f32.mrb[1].mxu0 }
 0x54a   : > { %vm15817_vm15 = vmor %vm864_vm3, %vm20215_vm12  ;;  %vm3291_vm3 = vcmp.eq.s32.totalorder %v10178_v31, %v3008_v32  ;;  %v5758_v27 = vpop.f32.mrb[2].mxu0  ;;  %v20266_v30 = vld [vmem:[#allocation217_spill] sm:$0xff] }
 0x54b   : > { %vm15824_vm8 = vmor %vm862_vm6, %vm20218_vm14  ;;  %vm20222_vm6 = vnez %v19551_v41  ;;  %v20227_v41 = vld [vmem:[#allocation36_spill] sm:$0xff]  ;;  %v7780_v37 = vadd.f32 %v5758_v27, %v20233_v25  ;;  %v5760_v32 = vpop.f32.mrb[3].mxu0  ;;  %v20251_v25 = vld [vmem:[#allocation39_spill] sm:$0xff] }
 0x54c   : > { %v20220_v17 = vsel %vm15824_vm8, 4294967295, %v20219_v17  ;;  %vm2651_vm11 = vmor %vm15726_vm7, %vm20221_vm2  ;;  %7592 = vmatmul.mubr.msk.bf16.gmra.mrb[104].mxu0 %vm20222_vm6, %v19370_v48  ;;  %vm20223_vm2 = vnez %v19562_v9  ;;  %vm2397_vm7 = vcmp.eq.s32.totalorder %v10178_v31, %v15688_v20  ;;  %v7779_v42 = vadd.f32 %v5755_v22, %v20227_v41  ;;  %v2118_v9 = vpop.permute.xlu1 %2117  ;;  %v15891_v41 = vld [vmem:[%s8761_s25 + $0x3d8] sm:$0xff]  ;;  %v5763_v27 = vpop.f32.mrb[4].mxu0 }
 0x54d   : > { %vm2652_vm12 = vmor %vm15738_vm0, %vm2396_vm4  ;;  %7594 = vmatprep.mubr.msk.bf16.mxu0 %vm20223_vm2, %v19370_v48  ;;  %v20235_v22 = vmov 1   ;;  %6395 = vst [vmem:[%s15877_s6 + $0x8] sm:$0xff] %v7780_v37  ;;  %v7781_v37 = vadd.f32 %v5763_v27, %v20251_v25  ;;  %v5765_v32 = vpop.f32.mrb[5].mxu0  ;;  %v20256_v27 = vld [vmem:[#allocation44_spill] sm:$0xff] }
 0x54e   : > { %vm3547_vm14 = vmor %vm2651_vm11, %vm3291_vm3  ;;  %vm2399_vm11 = vcmp.eq.s32.totalorder %v10178_v31, %v2118_v9  ;;  %6394 = vst [vmem:[%s15877_s6] sm:$0xff] %v7779_v42  ;;  %8367 = vset.pattern.permute.xlu1 %v20235_v22  ;;  %v20236_v42 = vld [vmem:[#allocation178_spill] sm:$0xff] }
 0x54f   : > { %vm3548_vm8 = vmor %vm2652_vm12, %vm3292_vm10  ;;  %vm2400_vm12 = vcmp.eq.s32.totalorder %v10191_v19, %v2118_v9  ;;  %vm3296_vm10 = vcmp.eq.s32.totalorder %v10191_v19, %v3014_v14  ;;  %1287 = vperm.xlu1 %8367, %v15891_v41   ;;  %6396 = vst [vmem:[%s15877_s6 + $0x10] sm:$0xff] %v7781_v37  ;;  %v20260_v37 = vld [vmem:[#allocation177_spill] sm:$0xff] }
 0x550   : > { %vm15850_vm0 = vmpackc.low %vm3548_vm8, %vm15810_vm13  ;;  %vm2398_vm13 = vcmp.eq.s32.totalorder %v10191_v19, %v15688_v20  ;;  %v3011_v9 = vpop.permute.xlu1 %3010 }
 0x551   : > { %v20225_v50 = vsel %vm15850_vm0, 4294967295, %v20224_v50  ;;  %7106 = vmatprep.mubr.msk.bf16.mxu1 %vm15850_vm0, %v19370_v48  ;;  %vm15860_vm4 = vmpackc.low %vm3547_vm14, %vm15791_vm9  ;;  %vm3295_vm9 = vcmp.eq.s32.totalorder %v10178_v31, %v3014_v14  ;;  %vm865_vm14 = vcmp.eq.s32.totalorder %v10178_v31, %v20236_v42  ;;  %v3017_v14 = vpop.permute.xlu0 %3016 }
 0x552   : > { %20226 = vst [vmem:[#allocation78_spill] sm:$0xff] %v20225_v50  ;;  %v20229_v39 = vsel %vm15860_vm4, 4294967295, %v20228_v39  ;;  %vm15868_vm8 = vmor %vm15776_vm5, %vm2397_vm7  ;;  %7108 = vmatmul.mubr.msk.bf16.gmra.mrb[196].mxu1 %vm15860_vm4, %v19370_v48  ;;  %vm1505_vm5 = vcmp.eq.s32.totalorder %v10178_v31, %v20234_v13 }
 0x553   : > { %20230 = vst [vmem:[#allocation77_spill] sm:$0xff] %v20229_v39  ;;  %vm2655_vm3 = vmor %vm15800_vm1, %vm2399_vm11  ;;  %vm20237_vm1 = vnez %v20220_v17  ;;  %vm20244_vm11 = vnez %v19587_v21  ;;  %8368 = vset.pattern.permute.xlu1 %v18824_v58  ;;  %v20253_v39 = vmov 0  ;;  %v20257_v17 = vmov 0 }
 0x554   : > { %vm2656_vm6 = vmor %vm15817_vm15, %vm2400_vm12  ;;  %vm20241_vm15 = vnez %v20240_v5  ;;  %v8613_v5 = vld [vmem:[%s8761_s25 + $0x3d0] sm:$0xff]  ;;  %v2121_v4 = vpop.permute.xlu1 %2120 }
 0x555   : > { %vm15902_vm2 = vmor %vm20237_vm1, %vm2398_vm13  ;;  %7596 = vmatmul.mubr.msk.bf16.gmra.mrb[108].mxu0 %vm20241_vm15, %v19370_v48  ;;  %2180 = vperm.xlu1 %8368, %v8613_v5   ;;  %v15997_v21 = vpop.permute.xlu0 %3025 }
 0x556   : > { %vm15909_vm7 = vmor %vm2655_vm3, %vm3295_vm9  ;;  %7598 = vmatprep.mubr.msk.bf16.mxu0 %vm20244_vm11, %v19370_v48  ;;  %vm3293_vm9 = vcmp.eq.s32.totalorder %v10178_v31, %v3011_v9  ;;  %vm3294_vm3 = vcmp.eq.s32.totalorder %v10191_v19, %v3011_v9  ;;  %v5766_v9 = vpop.f32.mrb[6].mxu0  ;;  %vm867_vm11 = vcmp.eq.s32.totalorder %v10178_v31, %v20260_v37 }
 0x557   : > { %vm15919_vm13 = vmor %vm865_vm14, %vm1505_vm5  ;;  %vm1506_vm5 = vcmp.eq.s32.totalorder %v10191_v19, %v20234_v13  ;;  %v7782_v25 = vadd.f32 %v5766_v9, %v20256_v27  ;;  %v5768_v32 = vpop.f32.mrb[7].mxu0  ;;  %vm866_vm14 = vcmp.eq.s32.totalorder %v10191_v19, %v20236_v42  ;;  %v20269_v27 = vld [vmem:[#allocation76_spill] sm:$0xff]  ;;  %v16109_v13 = vld [vmem:[%s8761_s25 + $0x3e8] sm:$0xff] }
 0x558   : > { %vm15923_vm12 = vmor %vm2656_vm6, %vm3296_vm10  ;;  %v20274_v32 = vld [vmem:[#allocation180_spill] sm:$0xff] }
 0x559   : > { %vm15931_vm1 = vmor %vm15868_vm8, %vm3293_vm9  ;;  %vm1507_vm8 = vcmp.eq.s32.totalorder %v10178_v31, %v20252_v46  ;;  %vm2401_vm9 = vcmp.eq.s32.totalorder %v10178_v31, %v2121_v4  ;;  %6397 = vst [vmem:[%s15877_s6 + $0x18] sm:$0xff] %v7782_v25  ;;  %8369 = vset.pattern.permute.xlu1 %v18821_v56  ;;  %v20271_v25 = vld [vmem:[#allocation218_spill] sm:$0xff] }
 0x55a   : > { %vm3550_vm10 = vmor %vm15902_vm2, %vm3294_vm3  ;;  %vm1508_vm2 = vcmp.eq.s32.totalorder %v10191_v19, %v20252_v46  ;;  %vm2402_vm3 = vcmp.eq.s32.totalorder %v10191_v19, %v2121_v4  ;;  %3076 = vperm.xlu1 %8369, %v8613_v5   ;;  %v2124_v5 = vpop.permute.xlu1 %2123  ;;  %v5771_v46 = vpop.f32.mrb[8].mxu0  ;;  %v8615_v4 = vld [vmem:[%s8761_s25 + $0x3e0] sm:$0xff] }
 0x55b   : > { %vm15946_vm6 = vmpackc.low %vm15923_vm12, %vm3550_vm10 }
 0x55c   : > { %v20254_v39 = vsel %vm15946_vm6, 4294967295, %v20253_v39  ;;  %7110 = vmatprep.mubr.msk.bf16.mxu1 %vm15946_vm6, %v19370_v48  ;;  %vm15963_vm15 = vmpackc.low %vm15909_vm7, %vm15931_vm1  ;;  %vm868_vm7 = vcmp.eq.s32.totalorder %v10191_v19, %v20260_v37  ;;  %v20277_v37 = vld [vmem:[#allocation47_spill] sm:$0xff]  ;;  %vm20291_vm6 = vcmp.eq.s32.totalorder %v10191_v19, %v20271_v25 }
 0x55d   : > { %20255 = vst [vmem:[#allocation124_spill] sm:$0xff] %v20254_v39  ;;  %v20258_v17 = vsel %vm15963_vm15, 4294967295, %v20257_v17  ;;  %vm15972_vm12 = vmor %vm866_vm14, %vm1506_vm5  ;;  %7112 = vmatmul.mubr.msk.bf16.gmra.mrb[200].mxu1 %vm15963_vm15, %v19370_v48  ;;  %vm20265_vm5 = vnez %v19594_v43  ;;  %v20278_v39 = vld [vmem:[#allocation179_spill] sm:$0xff]  ;;  %v20295_v43 = vmov 0 }
 0x55e   : > { %20259 = vst [vmem:[#allocation123_spill] sm:$0xff] %v20258_v17  ;;  %vm15988_vm1 = vmor %vm867_vm11, %vm1507_vm8  ;;  %7600 = vmatmul.mubr.msk.bf16.gmra.mrb[112].mxu0 %vm20265_vm5, %v19370_v48  ;;  %vm20270_vm8 = vnez %v20269_v27  ;;  %vm3297_vm5 = vcmp.eq.s32.totalorder %v10178_v31, %v3017_v14  ;;  %v7783_v27 = vadd.f32 %v5771_v46, %v20277_v37  ;;  %v5773_v17 = vpop.f32.mrb[9].mxu0  ;;  %3079 = vperm.xlu1 %8369, %v15891_v41   ;;  %v20284_v46 = vld [vmem:[#allocation51_spill] sm:$0xff] }
 0x55f   : > { %vm16002_vm14 = vmor %vm868_vm7, %vm1508_vm2  ;;  %7602 = vmatprep.mubr.msk.bf16.mxu0 %vm20270_vm8, %v19370_v48  ;;  %vm869_vm2 = vcmp.eq.s32.totalorder %v10178_v31, %v20274_v32  ;;  %vm20279_vm7 = vcmp.eq.s32.totalorder %v10178_v31, %v20266_v30  ;;  %v5774_v42 = vpop.f32.mrb[10].mxu0  ;;  %v20308_v17 = vld [vmem:[#allocation16_spill] sm:$0xff] }
 0x560   : > { %vm16016_vm10 = vmor %vm15919_vm13, %vm2401_vm9  ;;  %vm871_vm13 = vcmp.eq.s32.totalorder %v10178_v31, %v20278_v39  ;;  %6398 = vst [vmem:[%s15877_s6 + $0x20] sm:$0xff] %v7783_v27  ;;  %v7784_v37 = vadd.f32 %v5774_v42, %v20284_v46  ;;  %v5776_v50 = vpop.f32.mrb[11].mxu0  ;;  %v20304_v42 = vmov 0 }
 0x561   : > { %vm16029_vm11 = vmor %vm15972_vm12, %vm2402_vm3  ;;  %vm872_vm3 = vcmp.eq.s32.totalorder %v10191_v19, %v20278_v39  ;;  %v5779_v9 = vpop.f32.mrb[12].mxu0  ;;  %v20375_v50 = vld [vmem:[#allocation18_spill] sm:$0xff] }
 0x562   : > { %vm16041_vm8 = vmor %vm869_vm2, %vm20279_vm7  ;;  %vm2404_vm2 = vcmp.eq.s32.totalorder %v10191_v19, %v2124_v5  ;;  %vm20285_vm7 = vcmp.eq.s32.totalorder %v10178_v31, %v20271_v25  ;;  %6399 = vst [vmem:[%s15877_s6 + $0x28] sm:$0xff] %v7784_v37  ;;  %8370 = vset.pattern.permute.xlu1 %v20235_v22  ;;  %v20301_v25 = vmov 0  ;;  %v5781_v27 = vpop.f32.mrb[13].mxu0 }
 0x563   : > { %vm16052_vm15 = vmor %vm16016_vm10, %vm3297_vm5  ;;  %vm870_vm10 = vcmp.eq.s32.totalorder %v10191_v19, %v20274_v32  ;;  %vm20288_vm5 = vcmp.eq.s32.totalorder %v10191_v19, %v3017_v14  ;;  %v2127_v14 = vpop.permute.xlu0 %2126  ;;  %v3020_v32 = vpop.permute.xlu1 %3019  ;;  %1293 = vperm.xlu1 %8370, %v16109_v13  }
 0x564   : > { %vm16063_vm12 = vmor %vm871_vm13, %vm20285_vm7  ;;  %vm20294_vm13 = vcmp.eq.s32.totalorder %v10191_v19, %v20266_v30  ;;  %vm3300_vm0 = vcmp.eq.s32.totalorder %v10191_v19, %v3020_v32  ;;  %v20298_v30 = vld [vmem:[#allocation75_spill] sm:$0xff]  ;;  %v5782_v46 = vpop.f32.mrb[14].mxu0 }
 0x565   : > { %vm16073_vm9 = vmor %vm16029_vm11, %vm20288_vm5  ;;  %vm20297_vm11 = vcmp.eq.s32.totalorder %v10178_v31, %v2124_v5  ;;  %v20303_v5 = vld [vmem:[#allocation55_spill] sm:$0xff]  ;;  %v7786_v41 = vadd.f32 %v5782_v46, %v20308_v17  ;;  %v20324_v17 = vmov 0 }
 0x566   : > { %vm16080_vm4 = vmor %vm872_vm3, %vm20291_vm6  ;;  %vm3299_vm3 = vcmp.eq.s32.totalorder %v10178_v31, %v3020_v32  ;;  %v7785_v20 = vadd.f32 %v5779_v9, %v20303_v5  ;;  %v5784_v32 = vpop.f32.mrb[15].mxu0  ;;  %v20310_v9 = vld [vmem:[#allocation182_spill] sm:$0xff] }
 0x567   : > { %vm16087_vm7 = vmor %vm870_vm10, %vm20294_vm13  ;;  %vm20299_vm10 = vnez %v20298_v30  ;;  %v20309_v30 = vld [vmem:[#allocation219_spill] sm:$0xff]  ;;  %8371 = vset.pattern.permute.xlu1 %v18824_v58  ;;  %6401 = vst [vmem:[%s15877_s6 + $0x38] sm:$0xff] %v7786_v41  ;;  %v16192_v27 = vpop.permute.xlu0 %2138 }
 0x568   : > { %v20296_v43 = vsel %vm16087_vm7, 4294967295, %v20295_v43  ;;  %vm2659_vm5 = vmor %vm15988_vm1, %vm20297_vm11  ;;  %7604 = vmatmul.mubr.msk.bf16.gmra.mrb[116].mxu0 %vm20299_vm10, %v19370_v48  ;;  %vm20300_vm7 = vnez %v19641_v6  ;;  %vm2405_vm1 = vcmp.eq.s32.totalorder %v10178_v31, %v2127_v14  ;;  %v2130_v6 = vpop.permute.xlu1 %2129  ;;  %6400 = vst [vmem:[%s15877_s6 + $0x30] sm:$0xff] %v7785_v20  ;;  %2186 = vperm.xlu1 %8371, %v8615_v4   ;;  %v20321_v20 = vld [vmem:[#allocation220_spill] sm:$0xff]  ;;  %v20327_v41 = vld [vmem:[#allocation15_spill] sm:$0xff] }
 0x569   : > { %vm2660_vm6 = vmor %vm16002_vm14, %vm2404_vm2  ;;  %7606 = vmatprep.mubr.msk.bf16.mxu0 %vm20300_vm7, %v19370_v48  ;;  %vm2407_vm7 = vcmp.eq.s32.totalorder %v10178_v31, %v2130_v6 }
 0x56a   : > { %vm3555_vm13 = vmor %vm2659_vm5, %vm3299_vm3  ;;  %vm2408_vm5 = vcmp.eq.s32.totalorder %v10191_v19, %v2130_v6  ;;  %vm3304_vm3 = vcmp.eq.s32.totalorder %v10191_v19, %v15997_v21  ;;  %v20322_v6 = vmov 0 }
 0x56b   : > { %vm3556_vm11 = vmor %vm2660_vm6, %vm3300_vm0 }
 0x56c   : > { %vm16114_vm14 = vmpackc.low %vm3556_vm11, %vm16073_vm9  ;;  %vm2406_vm9 = vcmp.eq.s32.totalorder %v10191_v19, %v2127_v14  ;;  %v3023_v39 = vpop.permute.xlu1 %3022  ;;  %8373 = vset.pattern.permute.xlu1 %v18821_v56 }
 0x56d   : > { %v20302_v25 = vsel %vm16114_vm14, 4294967295, %v20301_v25  ;;  %7114 = vmatprep.mubr.msk.bf16.mxu1 %vm16114_vm14, %v19370_v48  ;;  %vm16124_vm0 = vmpackc.low %vm3555_vm13, %vm16052_vm15  ;;  %vm1513_vm15 = vcmp.eq.s32.totalorder %v10178_v31, %v20309_v30  ;;  %vm873_vm13 = vcmp.eq.s32.totalorder %v10178_v31, %v20310_v9  ;;  %3082 = vperm.xlu1 %8373, %v8615_v4  }
 0x56e   : > { %v20305_v42 = vsel %vm16124_vm0, 4294967295, %v20304_v42  ;;  %vm16131_vm2 = vmor %vm16041_vm8, %vm2405_vm1  ;;  %7116 = vmatmul.mubr.msk.bf16.gmra.mrb[204].mxu1 %vm16124_vm0, %v19370_v48  ;;  %vm3303_vm8 = vcmp.eq.s32.totalorder %v10178_v31, %v15997_v21  ;;  %vm20311_vm1 = vnez %v20296_v43  ;;  %v20320_v43 = vld [vmem:[#allocation60_spill] sm:$0xff]  ;;  %v20334_v21 = vld [vmem:[#allocation221_spill] sm:$0xff] }
 0x56f   : > { %vm2663_vm6 = vmor %vm16063_vm12, %vm2407_vm7  ;;  %vm20312_vm12 = vnez %v19648_v63  ;;  %v3029_v63 = vpop.permute.xlu0 %3028  ;;  %vm20364_vm0 = vcmp.eq.s32.totalorder %v10191_v19, %v20334_v21 }
 0x570   : > { %vm2664_vm10 = vmor %vm16080_vm4, %vm2408_vm5  ;;  %7608 = vmatmul.mubr.msk.bf16.gmra.mrb[120].mxu0 %vm20312_vm12, %v19370_v48  ;;  %vm20315_vm4 = vnez %v19662_v34  ;;  %v5787_v34 = vpop.f32.mrb[16].mxu0  ;;  %v2133_v37 = vpop.permute.xlu1 %2132 }
 0x571   : > { %vm2662_vm11 = vmor %vm20311_vm1, %vm2406_vm9  ;;  %7610 = vmatprep.mubr.msk.bf16.mxu0 %vm20315_vm4, %v19370_v48  ;;  %vm3301_vm1 = vcmp.eq.s32.totalorder %v10178_v31, %v3023_v39  ;;  %v7787_v14 = vadd.f32 %v5787_v34, %v20320_v43  ;;  %v5789_v5 = vpop.f32.mrb[17].mxu0  ;;  %3085 = vperm.xlu1 %8373, %v16109_v13   ;;  %v20337_v34 = vld [vmem:[#allocation84_spill] sm:$0xff]  ;;  %v20339_v43 = vld [vmem:[#allocation222_spill] sm:$0xff]  ;;  %v20371_v13 = vmov 0 }
 0x572   : > { %vm16164_vm7 = vmor %vm2663_vm6, %vm3303_vm8  ;;  %vm3302_vm8 = vcmp.eq.s32.totalorder %v10191_v19, %v3023_v39  ;;  %v5790_v46 = vpop.f32.mrb[18].mxu0  ;;  %v20342_v5 = vld [vmem:[#allocation184_spill] sm:$0xff] }
 0x573   : > { %vm16174_vm5 = vmor %vm873_vm13, %vm1513_vm15  ;;  %vm1514_vm15 = vcmp.eq.s32.totalorder %v10191_v19, %v20309_v30  ;;  %6402 = vst [vmem:[%s15877_s6 + $0x40] sm:$0xff] %v7787_v14  ;;  %v7788_v32 = vadd.f32 %v5790_v46, %v20327_v41  ;;  %v5792_v4 = vpop.f32.mrb[19].mxu0  ;;  %v20346_v46 = vld [vmem:[#allocation183_spill] sm:$0xff]  ;;  %v8616_v39 = vld [vmem:[%s8761_s25 + $0x3f8] sm:$0xff] }
 0x574   : > { %vm3560_vm9 = vmor %vm2664_vm10, %vm3304_vm3  ;;  %vm1515_vm3 = vcmp.eq.s32.totalorder %v10178_v31, %v20321_v20  ;;  %vm874_vm10 = vcmp.eq.s32.totalorder %v10191_v19, %v20310_v9  ;;  %v20328_v9 = vld [vmem:[#allocation181_spill] sm:$0xff]  ;;  %v2136_v14 = vpop.permute.xlu1 %2135  ;;  %v8617_v30 = vld [vmem:[%s8761_s25 + $0x3f0] sm:$0xff]  ;;  %s7746_s25 = sshll.u32 %s8726_s13, 14  ;;  %s17917_s13 = scalar_lea.sflag [#allocation3], %s135_s4 }
 0x575   : > { %vm16182_vm6 = vmor %vm16131_vm2, %vm3301_vm1  ;;  %vm875_vm4 = vcmp.eq.s32.totalorder %v10178_v31, %v20328_v9  ;;  %vm2409_vm1 = vcmp.eq.s32.totalorder %v10178_v31, %v2133_v37  ;;  %6403 = vst [vmem:[%s15877_s6 + $0x48] sm:$0xff] %v7788_v32  ;;  %8374 = vset.pattern.permute.xlu1 %v20235_v22  ;;  %v20379_v41 = vld [vmem:[#allocation64_spill] sm:$0xff]  ;;  %s17908_s16 = scalar_lea.hbm %s17960_s2, %s7746_s25 }
 0x576   : > { %vm3558_vm13 = vmor %vm2662_vm11, %vm3302_vm8  ;;  %vm1516_vm11 = vcmp.eq.s32.totalorder %v10191_v19, %v20321_v20  ;;  %v5795_v20 = vpop.f32.mrb[20].mxu0  ;;  %1299 = vperm.xlu1 %8374, %v8616_v39  }
 0x577   : > { %vm16194_vm2 = vmpackc.low %vm3560_vm9, %vm3558_vm13  ;;  %v5797_v4 = vpop.f32.mrb[21].mxu0 }
 0x578   : > { %v20323_v6 = vsel %vm16194_vm2, 4294967295, %v20322_v6  ;;  %7118 = vmatprep.mubr.msk.bf16.mxu1 %vm16194_vm2, %v19370_v48  ;;  %vm16209_vm12 = vmpackc.low %vm16164_vm7, %vm16182_vm6  ;;  %vm876_vm7 = vcmp.eq.s32.totalorder %v10191_v19, %v20328_v9  ;;  %v5798_v22 = vpop.f32.mrb[22].mxu0  ;;  %vm878_vm2 = vcmp.eq.s32.totalorder %v10191_v19, %v20342_v5 }
 0x579   : > { %v20325_v17 = vsel %vm16209_vm12, 4294967295, %v20324_v17  ;;  %vm16220_vm9 = vmor %vm874_vm10, %vm1514_vm15  ;;  %7120 = vmatmul.mubr.msk.bf16.gmra.mrb[208].mxu1 %vm16209_vm12, %v19370_v48  ;;  %vm20333_vm15 = vnez %v19667_v1  ;;  %vm20351_vm12 = vcmp.eq.s32.totalorder %v10178_v31, %v3029_v63  ;;  %v5800_v4 = vpop.f32.mrb[23].mxu0 }
 0x57a   : > { %20326 = vst [vmem:[#allocation82_spill] sm:$0xff] %v20325_v17  ;;  %vm16236_vm6 = vmor %vm875_vm4, %vm1515_vm3  ;;  %7612 = vmatmul.mubr.msk.bf16.gmra.mrb[124].mxu0 %vm20333_vm15, %v19370_v48  ;;  %vm20338_vm3 = vnez %v20337_v34  ;;  %vm20343_vm4 = vcmp.eq.s32.totalorder %v10191_v19, %v2133_v37  ;;  %v20350_v37 = vld [vmem:[#allocation59_spill] sm:$0xff]  ;;  %8375 = vset.pattern.permute.xlu1 %v18824_v58  ;;  %v20405_v17 = vld [vmem:[#allocation225_spill] sm:$0xff] }
 0x57b   : > { %vm16248_vm10 = vmor %vm876_vm7, %vm1516_vm11  ;;  %7614 = vmatprep.mubr.msk.bf16.mxu0 %vm20338_vm3, %v19370_v48  ;;  %vm877_vm11 = vcmp.eq.s32.totalorder %v10178_v31, %v20342_v5  ;;  %vm20347_vm7 = vcmp.eq.s32.totalorder %v10178_v31, %v20334_v21  ;;  %v7789_v32 = vadd.f32 %v5795_v20, %v20350_v37  ;;  %v3032_v5 = vpop.permute.xlu1 %3031  ;;  %v20368_v21 = vld [vmem:[#allocation83_spill] sm:$0xff]  ;;  %2192 = vperm.xlu1 %8375, %v8617_v30  }
 0x57c   : > { %vm16260_vm13 = vmor %vm16174_vm5, %vm2409_vm1  ;;  %vm879_vm5 = vcmp.eq.s32.totalorder %v10178_v31, %v20346_v46 }
 0x57d   : > { %vm16273_vm15 = vmor %vm16220_vm9, %vm20343_vm4  ;;  %vm880_vm4 = vcmp.eq.s32.totalorder %v10191_v19, %v20346_v46  ;;  %6404 = vst [vmem:[%s15877_s6 + $0x50] sm:$0xff] %v7789_v32  ;;  %v20360_v46 = vld [vmem:[#allocation24_spill] sm:$0xff] }
 0x57e   : > { %vm16284_vm8 = vmor %vm877_vm11, %vm20347_vm7  ;;  %vm2412_vm11 = vcmp.eq.s32.totalorder %v10191_v19, %v2136_v14  ;;  %vm20354_vm7 = vcmp.eq.s32.totalorder %v10178_v31, %v20339_v43  ;;  %v7790_v37 = vadd.f32 %v5798_v22, %v20360_v46  ;;  %v3038_v46 = vpop.permute.xlu0 %3037 }
 0x57f   : > { %vm16297_vm1 = vmor %vm16260_vm13, %vm20351_vm12  ;;  %vm20357_vm12 = vcmp.eq.s32.totalorder %v10191_v19, %v3029_v63  ;;  %v20365_v63 = vmov 0  ;;  %v2142_v58 = vpop.permute.xlu1 %2141  ;;  %8377 = vset.pattern.permute.xlu1 %v18821_v56  ;;  %v20399_v56 = vld [vmem:[#allocation185_spill] sm:$0xff] }
 0x580   : > { %vm16306_vm9 = vmor %vm879_vm5, %vm20354_vm7  ;;  %vm20361_vm5 = vcmp.eq.s32.totalorder %v10191_v19, %v20339_v43  ;;  %6405 = vst [vmem:[%s15877_s6 + $0x58] sm:$0xff] %v7790_v37  ;;  %v5803_v43 = vpop.f32.mrb[24].mxu0  ;;  %v20378_v37 = vld [vmem:[#allocation223_spill] sm:$0xff]  ;;  %3088 = vperm.xlu1 %8377, %v8617_v30  }
 0x581   : > { %vm16316_vm13 = vmor %vm16273_vm15, %vm20357_vm12  ;;  %vm20367_vm15 = vcmp.eq.s32.totalorder %v10178_v31, %v2136_v14  ;;  %v20373_v14 = vmov 0  ;;  %v7791_v32 = vadd.f32 %v5803_v43, %v20375_v50  ;;  %v5805_v22 = vpop.f32.mrb[25].mxu0  ;;  %v20380_v43 = vld [vmem:[#allocation186_spill] sm:$0xff] }
 0x582   : > { %vm16325_vm7 = vmor %vm880_vm4, %vm20361_vm5  ;;  %vm3307_vm4 = vcmp.eq.s32.totalorder %v10178_v31, %v3032_v5  ;;  %vm3308_vm5 = vcmp.eq.s32.totalorder %v10191_v19, %v3032_v5  ;;  %v5806_v9 = vpop.f32.mrb[26].mxu0  ;;  %v20392_v22 = vld [vmem:[#allocation224_spill] sm:$0xff] }
 0x583   : > { %vm16332_vm14 = vmor %vm878_vm2, %vm20364_vm0  ;;  %vm20369_vm0 = vnez %v20368_v21  ;;  %6406 = vst [vmem:[%s15877_s6 + $0x60] sm:$0xff] %v7791_v32  ;;  %v7792_v4 = vadd.f32 %v5806_v9, %v20379_v41  ;;  %v5808_v5 = vpop.f32.mrb[27].mxu0  ;;  %v3035_v20 = vpop.permute.xlu1 %3034  ;;  %v20395_v9 = vmov 0  ;;  %v20398_v41 = vld [vmem:[#allocation63_spill] sm:$0xff] }
 0x584   : > { %v20366_v63 = vsel %vm16332_vm14, 4294967295, %v20365_v63  ;;  %vm2667_vm12 = vmor %vm16236_vm6, %vm20367_vm15  ;;  %7616 = vmatmul.mubr.msk.bf16.gmra.mrb[128].mxu0 %vm20369_vm0, %v19370_v48  ;;  %vm20370_vm14 = vnez %v19715_v51  ;;  %vm2413_vm6 = vcmp.eq.s32.totalorder %v10178_v31, %v16192_v27  ;;  %3091 = vperm.xlu1 %8377, %v8616_v39   ;;  %v5811_v30 = vpop.f32.mrb[28].mxu0 }
 0x585   : > { %vm2668_vm3 = vmor %vm16248_vm10, %vm2412_vm11  ;;  %7618 = vmatprep.mubr.msk.bf16.mxu0 %vm20370_vm14, %v19370_v48  ;;  %6407 = vst [vmem:[%s15877_s6 + $0x68] sm:$0xff] %v7792_v4  ;;  %v5813_v32 = vpop.f32.mrb[29].mxu0 }
 0x586   : > { %vm3563_vm2 = vmor %vm2667_vm12, %vm3307_vm4  ;;  %vm2415_vm12 = vcmp.eq.s32.totalorder %v10178_v31, %v2142_v58  ;;  %vm20384_vm4 = vnez %v19723_v33  ;;  %v5814_v1 = vpop.f32.mrb[30].mxu0  ;;  %v20410_v32 = vld [vmem:[#allocation188_spill] sm:$0xff] }
 0x587   : > { %vm3564_vm10 = vmor %vm2668_vm3, %vm3308_vm5  ;;  %vm2414_vm3 = vcmp.eq.s32.totalorder %v10191_v19, %v16192_v27  ;;  %vm3311_vm5 = vcmp.eq.s32.totalorder %v10178_v31, %v3038_v46  ;;  %v2145_v39 = vpop.permute.xlu1 %2144  ;;  %v7794_v4 = vadd.f32 %v5814_v1, %v20398_v41  ;;  %v5816_v5 = vpop.f32.mrb[31].mxu0  ;;  %v20412_v1 = vld [vmem:[#allocation187_spill] sm:$0xff]  ;;  %v20444_v27 = vld [vmem:[#allocation26_spill] sm:$0xff] }
 0x588   : > { %vm16357_vm11 = vmpackc.low %vm3564_vm10, %vm16316_vm13  ;;  %vm881_vm10 = vcmp.eq.s32.totalorder %v10178_v31, %v20380_v43 }
 0x589   : > { %v20372_v13 = vsel %vm16357_vm11, 4294967295, %v20371_v13  ;;  %7122 = vmatprep.mubr.msk.bf16.mxu1 %vm16357_vm11, %v19370_v48  ;;  %vm16366_vm15 = vmpackc.low %vm3563_vm2, %vm16297_vm1  ;;  %vm2416_vm1 = vcmp.eq.s32.totalorder %v10191_v19, %v2142_v58  ;;  %vm3312_vm2 = vcmp.eq.s32.totalorder %v10191_v19, %v3038_v46  ;;  %vm3309_vm11 = vcmp.eq.s32.totalorder %v10178_v31, %v3035_v20  ;;  %v20391_v58 = vld [vmem:[#allocation17_spill] sm:$0xff]  ;;  %6409 = vst [vmem:[%s15877_s6 + $0x78] sm:$0xff] %v7794_v4 }
 0x58a   : > { %v20374_v14 = vsel %vm16366_vm15, 4294967295, %v20373_v14  ;;  %vm16375_vm13 = vmor %vm16284_vm8, %vm2413_vm6  ;;  %7124 = vmatmul.mubr.msk.bf16.gmra.mrb[212].mxu1 %vm16366_vm15, %v19370_v48  ;;  %v7793_v50 = vadd.f32 %v5811_v30, %v20391_v58  ;;  %v20393_v46 = vmov 0  ;;  %v20409_v58 = vld [vmem:[#allocation226_spill] sm:$0xff] }
 0x58b   : > { %vm2671_vm8 = vmor %vm16306_vm9, %vm2415_vm12  ;;  %vm20381_vm9 = vnez %v20366_v63  ;;  %v3041_v63 = vpop.permute.xlu0 %3040 }
 0x58c   : > { %vm2672_vm6 = vmor %vm16325_vm7, %vm2416_vm1  ;;  %7620 = vmatmul.mubr.msk.bf16.gmra.mrb[132].mxu0 %vm20384_vm4, %v19370_v48  ;;  %vm20387_vm7 = vnez %v19738_v3  ;;  %6408 = vst [vmem:[%s15877_s6 + $0x70] sm:$0xff] %v7793_v50  ;;  %v2148_v50 = vpop.permute.xlu1 %2147  ;;  %vm20423_vm4 = vcmp.eq.s32.totalorder %v10191_v19, %v3041_v63 }
 0x58d   : > { %vm16402_vm12 = vmor %vm20381_vm9, %vm2414_vm3  ;;  %7622 = vmatprep.mubr.msk.bf16.mxu0 %vm20387_vm7, %v19370_v48  ;;  %vm20388_vm3 = vcmp.eq.s32.totalorder %v10178_v31, %v20378_v37  ;;  %vm1522_vm7 = vcmp.eq.s32.totalorder %v10191_v19, %v20378_v37  ;;  %v20436_v37 = vmov 0 }
 0x58e   : > { %vm16410_vm15 = vmor %vm2671_vm8, %vm3311_vm5  ;;  %vm3310_vm5 = vcmp.eq.s32.totalorder %v10191_v19, %v3035_v20 }
 0x58f   : > { %vm16420_vm1 = vmor %vm881_vm10, %vm20388_vm3  ;;  %vm883_vm3 = vcmp.eq.s32.totalorder %v10178_v31, %v20399_v56  ;;  %v16483_v20 = vpop.permute.xlu0 %3049 }
 0x590   : > { %vm3568_vm9 = vmor %vm2672_vm6, %vm3312_vm2  ;;  %vm1523_vm2 = vcmp.eq.s32.totalorder %v10178_v31, %v20392_v22 }
 0x591   : > { %vm3565_vm8 = vmor %vm16375_vm13, %vm3309_vm11  ;;  %vm882_vm11 = vcmp.eq.s32.totalorder %v10191_v19, %v20380_v43  ;;  %vm1524_vm13 = vcmp.eq.s32.totalorder %v10191_v19, %v20392_v22  ;;  %v5819_v22 = vpop.f32.mrb[32].mxu0  ;;  %v20469_v43 = vld [vmem:[#allocation229_spill] sm:$0xff] }
 0x592   : > { %vm3566_vm10 = vmor %vm16402_vm12, %vm3310_vm5  ;;  %vm2417_vm5 = vcmp.eq.s32.totalorder %v10178_v31, %v2145_v39  ;;  %v5821_v4 = vpop.f32.mrb[33].mxu0 }
 0x593   : > { %vm16435_vm6 = vmpackc.low %vm3568_vm9, %vm3566_vm10 }
 0x594   : > { %v20394_v46 = vsel %vm16435_vm6, 4294967295, %v20393_v46  ;;  %7126 = vmatprep.mubr.msk.bf16.mxu1 %vm16435_vm6, %v19370_v48  ;;  %vm16448_vm12 = vmpackc.low %vm16410_vm15, %vm3565_vm8  ;;  %vm884_vm15 = vcmp.eq.s32.totalorder %v10191_v19, %v20399_v56  ;;  %vm885_vm6 = vcmp.eq.s32.totalorder %v10178_v31, %v20410_v32  ;;  %v5822_v56 = vpop.f32.mrb[34].mxu0 }
 0x595   : > { %v20396_v9 = vsel %vm16448_vm12, 4294967295, %v20395_v9  ;;  %vm16459_vm9 = vmor %vm882_vm11, %vm1522_vm7  ;;  %7128 = vmatmul.mubr.msk.bf16.gmra.mrb[216].mxu1 %vm16448_vm12, %v19370_v48  ;;  %vm20404_vm7 = vnez %v19744_v26  ;;  %vm887_vm12 = vcmp.eq.s32.totalorder %v10178_v31, %v20412_v1  ;;  %v5824_v4 = vpop.f32.mrb[35].mxu0 }
 0x596   : > { %20397 = vst [vmem:[#allocation128_spill] sm:$0xff] %v20396_v9  ;;  %vm16474_vm10 = vmor %vm883_vm3, %vm1523_vm2  ;;  %7624 = vmatmul.mubr.msk.bf16.gmra.mrb[136].mxu0 %vm20404_vm7, %v19370_v48  ;;  %vm20408_vm2 = vnez %v19773_v62  ;;  %vm20411_vm7 = vcmp.eq.s32.totalorder %v10191_v19, %v2145_v39  ;;  %v20416_v39 = vld [vmem:[#allocation21_spill] sm:$0xff]  ;;  %v20508_v9 = vld [vmem:[#allocation80_spill] sm:$0xff] }
 0x597   : > { %vm16488_vm8 = vmor %vm884_vm15, %vm1524_vm13  ;;  %7626 = vmatprep.mubr.msk.bf16.mxu0 %vm20408_vm2, %v19370_v48  ;;  %v7795_v41 = vadd.f32 %v5819_v22, %v20416_v39  ;;  %vm886_vm13 = vcmp.eq.s32.totalorder %v10191_v19, %v20410_v32  ;;  %v2151_v32 = vpop.permute.xlu0 %2150 }
 0x598   : > { %vm2673_vm11 = vmor %vm16420_vm1, %vm2417_vm5  ;;  %vm20413_vm5 = vcmp.eq.s32.totalorder %v10178_v31, %v20405_v17  ;;  %vm2420_vm1 = vcmp.eq.s32.totalorder %v10191_v19, %v2148_v50 }
 0x599   : > { %vm2674_vm3 = vmor %vm16459_vm9, %vm20411_vm7  ;;  %vm888_vm9 = vcmp.eq.s32.totalorder %v10191_v19, %v20412_v1  ;;  %vm20417_vm7 = vcmp.eq.s32.totalorder %v10178_v31, %v3041_v63  ;;  %6410 = vst [vmem:[%s15877_s6 + $0x80] sm:$0xff] %v7795_v41  ;;  %v20426_v1 = vld [vmem:[#allocation68_spill] sm:$0xff]  ;;  %v20431_v63 = vmov 0  ;;  %v3044_v41 = vpop.permute.xlu1 %3043 }
 0x59a   : > { %vm16516_vm2 = vmor %vm885_vm6, %vm20413_vm5  ;;  %vm20420_vm6 = vcmp.eq.s32.totalorder %v10178_v31, %v20409_v58  ;;  %v7796_v39 = vadd.f32 %v5822_v56, %v20426_v1  ;;  %vm3316_vm0 = vcmp.eq.s32.totalorder %v10191_v19, %v3044_v41 }
 0x59b   : > { %vm16526_vm15 = vmor %vm2673_vm11, %vm20417_vm7  ;;  %vm20427_vm7 = vcmp.eq.s32.totalorder %v10191_v19, %v20409_v58  ;;  %v20438_v58 = vmov 0 }
 0x59c   : > { %vm16534_vm5 = vmor %vm887_vm12, %vm20420_vm6  ;;  %vm20430_vm6 = vcmp.eq.s32.totalorder %v10191_v19, %v20405_v17  ;;  %6411 = vst [vmem:[%s15877_s6 + $0x88] sm:$0xff] %v7796_v39  ;;  %v5827_v17 = vpop.f32.mrb[36].mxu0  ;;  %v20443_v39 = vld [vmem:[#allocation227_spill] sm:$0xff] }
 0x59d   : > { %vm16542_vm11 = vmor %vm2674_vm3, %vm20423_vm4  ;;  %vm20433_vm4 = vcmp.eq.s32.totalorder %v10178_v31, %v2148_v50  ;;  %v2154_v30 = vpop.permute.xlu1 %2153  ;;  %v20440_v50 = vld [vmem:[#allocation67_spill] sm:$0xff]  ;;  %v5829_v22 = vpop.f32.mrb[37].mxu0 }
 0x59e   : > { %vm16551_vm12 = vmor %vm888_vm9, %vm20427_vm7  ;;  %vm3315_vm7 = vcmp.eq.s32.totalorder %v10178_v31, %v3044_v41  ;;  %v7797_v56 = vadd.f32 %v5827_v17, %v20440_v50  ;;  %v5830_v5 = vpop.f32.mrb[38].mxu0  ;;  %v20445_v17 = vld [vmem:[#allocation190_spill] sm:$0xff]  ;;  %v16651_v22 = vpop.permute.xlu0 %2162 }
 0x59f   : > { %vm16558_vm14 = vmor %vm886_vm13, %vm20430_vm6  ;;  %vm20434_vm13 = vnez %v19776_v61  ;;  %v7798_v4 = vadd.f32 %v5830_v5, %v20444_v27  ;;  %v5832_v41 = vpop.f32.mrb[39].mxu0  ;;  %v20456_v5 = vmov 0 }
 0x5a0   : > { %v20432_v63 = vsel %vm16558_vm14, 4294967295, %v20431_v63  ;;  %vm2675_vm3 = vmor %vm16474_vm10, %vm20433_vm4  ;;  %7628 = vmatmul.mubr.msk.bf16.gmra.mrb[140].mxu0 %vm20434_vm13, %v19370_v48  ;;  %vm20435_vm14 = vnez %v19789_v11  ;;  %vm2421_vm10 = vcmp.eq.s32.totalorder %v10178_v31, %v2151_v32  ;;  %6412 = vst [vmem:[%s15877_s6 + $0x90] sm:$0xff] %v7797_v56  ;;  %v20455_v56 = vld [vmem:[#allocation228_spill] sm:$0xff]  ;;  %v20462_v41 = vld [vmem:[#allocation71_spill] sm:$0xff] }
 0x5a1   : > { %vm2676_vm9 = vmor %vm16488_vm8, %vm2420_vm1  ;;  %7630 = vmatprep.mubr.msk.bf16.mxu0 %vm20435_vm14, %v19370_v48  ;;  %6413 = vst [vmem:[%s15877_s6 + $0x98] sm:$0xff] %v7798_v4  ;;  %v20459_v4 = vmov 0 }
 0x5a2   : > { %vm3571_vm6 = vmor %vm2675_vm3, %vm3315_vm7  ;;  %vm2423_vm3 = vcmp.eq.s32.totalorder %v10178_v31, %v2154_v30  ;;  %vm3319_vm7 = vcmp.eq.s32.totalorder %v10178_v31, %v16483_v20 }
 0x5a3   : > { %vm3572_vm4 = vmor %vm2676_vm9, %vm3316_vm0  ;;  %vm2422_vm0 = vcmp.eq.s32.totalorder %v10191_v19, %v2151_v32  ;;  %vm2424_vm9 = vcmp.eq.s32.totalorder %v10191_v19, %v2154_v30  ;;  %v20454_v32 = vld [vmem:[#allocation25_spill] sm:$0xff] }
 0x5a4   : > { %vm16580_vm8 = vmpackc.low %vm3572_vm4, %vm16542_vm11  ;;  %vm889_vm4 = vcmp.eq.s32.totalorder %v10178_v31, %v20445_v17 }
 0x5a5   : > { %v20437_v37 = vsel %vm16580_vm8, 4294967295, %v20436_v37  ;;  %7130 = vmatprep.mubr.msk.bf16.mxu1 %vm16580_vm8, %v19370_v48  ;;  %vm16589_vm1 = vmpackc.low %vm3571_vm6, %vm16526_vm15  ;;  %vm3320_vm6 = vcmp.eq.s32.totalorder %v10191_v19, %v16483_v20  ;;  %vm20446_vm15 = vnez %v20432_v63  ;;  %v3047_v20 = vpop.permute.xlu1 %3046  ;;  %v5835_v63 = vpop.f32.mrb[40].mxu0 }
 0x5a6   : > { %v20439_v58 = vsel %vm16589_vm1, 4294967295, %v20438_v58  ;;  %vm16597_vm11 = vmor %vm16516_vm2, %vm2421_vm10  ;;  %7132 = vmatmul.mubr.msk.bf16.gmra.mrb[220].mxu1 %vm16589_vm1, %v19370_v48  ;;  %v7799_v30 = vadd.f32 %v5835_v63, %v20454_v32  ;;  %v5837_v50 = vpop.f32.mrb[41].mxu0  ;;  %v20463_v32 = vld [vmem:[#allocation189_spill] sm:$0xff] }
 0x5a7   : > { %vm2679_vm2 = vmor %vm16534_vm5, %vm2423_vm3  ;;  %vm20447_vm5 = vnez %v19794_v18  ;;  %v5838_v1 = vpop.f32.mrb[42].mxu0 }
 0x5a8   : > { %vm2680_vm10 = vmor %vm16551_vm12, %vm2424_vm9  ;;  %7632 = vmatmul.mubr.msk.bf16.gmra.mrb[144].mxu0 %vm20447_vm5, %v19370_v48  ;;  %vm20450_vm12 = vnez %v19831_v60  ;;  %vm20451_vm9 = vcmp.eq.s32.totalorder %v10178_v31, %v20443_v39  ;;  %6414 = vst [vmem:[%s15877_s6 + $0xa0] sm:$0xff] %v7799_v30  ;;  %v5840_v63 = vpop.f32.mrb[43].mxu0  ;;  %v3053_v30 = vpop.permute.xlu0 %3052 }
 0x5a9   : > { %vm2678_vm1 = vmor %vm20446_vm15, %vm2422_vm0  ;;  %7634 = vmatprep.mubr.msk.bf16.mxu0 %vm20450_vm12, %v19370_v48  ;;  %vm3317_vm15 = vcmp.eq.s32.totalorder %v10178_v31, %v3047_v20  ;;  %vm1530_vm12 = vcmp.eq.s32.totalorder %v10191_v19, %v20443_v39  ;;  %v2157_v27 = vpop.permute.xlu1 %2156  ;;  %v20476_v63 = vld [vmem:[#allocation191_spill] sm:$0xff]  ;;  %v20500_v39 = vmov 0 }
 0x5aa   : > { %vm16628_vm3 = vmor %vm2679_vm2, %vm3319_vm7  ;;  %vm3318_vm7 = vcmp.eq.s32.totalorder %v10191_v19, %v3047_v20  ;;  %v7800_v20 = vadd.f32 %v5838_v1, %v20462_v41  ;;  %v20473_v1 = vld [vmem:[#allocation230_spill] sm:$0xff] }
 0x5ab   : > { %vm16638_vm8 = vmor %vm889_vm4, %vm20451_vm9  ;;  %vm1531_vm4 = vcmp.eq.s32.totalorder %v10178_v31, %v20455_v56 }
 0x5ac   : > { %vm3576_vm0 = vmor %vm2680_vm10, %vm3320_vm6  ;;  %6415 = vst [vmem:[%s15877_s6 + $0xa8] sm:$0xff] %v7800_v20  ;;  %v20474_v20 = vld [vmem:[#allocation192_spill] sm:$0xff] }
 0x5ad   : > { %vm3573_vm2 = vmor %vm16597_vm11, %vm3317_vm15  ;;  %vm890_vm11 = vcmp.eq.s32.totalorder %v10191_v19, %v20445_v17  ;;  %v2160_v41 = vpop.permute.xlu1 %2159  ;;  %vm895_vm15 = vcmp.eq.s32.totalorder %v10178_v31, %v20476_v63 }
 0x5ae   : > { %vm3574_vm5 = vmor %vm2678_vm1, %vm3318_vm7  ;;  %vm1532_vm1 = vcmp.eq.s32.totalorder %v10191_v19, %v20455_v56  ;;  %v5843_v56 = vpop.f32.mrb[44].mxu0 }
 0x5af   : > { %vm16653_vm6 = vmpackc.low %vm3576_vm0, %vm3574_vm5  ;;  %vm891_vm5 = vcmp.eq.s32.totalorder %v10178_v31, %v20463_v32  ;;  %vm2425_vm0 = vcmp.eq.s32.totalorder %v10178_v31, %v2157_v27  ;;  %v5845_v17 = vpop.f32.mrb[45].mxu0 }
 0x5b0   : > { %v20457_v5 = vsel %vm16653_vm6, 4294967295, %v20456_v5  ;;  %7134 = vmatprep.mubr.msk.bf16.mxu1 %vm16653_vm6, %v19370_v48  ;;  %vm16666_vm10 = vmpackc.low %vm16628_vm3, %vm3573_vm2  ;;  %vm892_vm3 = vcmp.eq.s32.totalorder %v10191_v19, %v20463_v32  ;;  %vm20487_vm6 = vcmp.eq.s32.totalorder %v10191_v19, %v3053_v30 }
 0x5b1   : > { %20458 = vst [vmem:[#allocation81_spill] sm:$0xff] %v20457_v5  ;;  %v20460_v4 = vsel %vm16666_vm10, 4294967295, %v20459_v4  ;;  %vm16677_vm9 = vmor %vm890_vm11, %vm1530_vm12  ;;  %7136 = vmatmul.mubr.msk.bf16.gmra.mrb[224].mxu1 %vm16666_vm10, %v19370_v48  ;;  %vm20468_vm12 = vnez %v19834_v29  ;;  %vm893_vm10 = vcmp.eq.s32.totalorder %v10178_v31, %v20474_v20  ;;  %v20532_v29 = vld [vmem:[#allocation233_spill] sm:$0xff] }
 0x5b2   : > { %20461 = vst [vmem:[#allocation127_spill] sm:$0xff] %v20460_v4  ;;  %vm16692_vm7 = vmor %vm891_vm5, %vm1531_vm4  ;;  %7636 = vmatmul.mubr.msk.bf16.gmra.mrb[148].mxu0 %vm20468_vm12, %v19370_v48  ;;  %vm20472_vm4 = vnez %v19852_v54  ;;  %vm20475_vm12 = vcmp.eq.s32.totalorder %v10191_v19, %v2157_v27  ;;  %v20480_v27 = vld [vmem:[#allocation30_spill] sm:$0xff]  ;;  %v5846_v4 = vpop.f32.mrb[46].mxu0 }
 0x5b3   : > { %vm16704_vm11 = vmor %vm892_vm3, %vm1532_vm1  ;;  %7638 = vmatprep.mubr.msk.bf16.mxu0 %vm20472_vm4, %v19370_v48  ;;  %v7801_v32 = vadd.f32 %v5843_v56, %v20480_v27  ;;  %v5848_v17 = vpop.f32.mrb[47].mxu0 }
 0x5b4   : > { %vm2681_vm2 = vmor %vm16638_vm8, %vm2425_vm0  ;;  %vm20477_vm0 = vcmp.eq.s32.totalorder %v10178_v31, %v20469_v43  ;;  %vm894_vm8 = vcmp.eq.s32.totalorder %v10191_v19, %v20474_v20 }
 0x5b5   : > { %vm2682_vm5 = vmor %vm16677_vm9, %vm20475_vm12  ;;  %vm896_vm9 = vcmp.eq.s32.totalorder %v10191_v19, %v20476_v63  ;;  %vm20481_vm12 = vcmp.eq.s32.totalorder %v10178_v31, %v3053_v30  ;;  %6416 = vst [vmem:[%s15877_s6 + $0xb0] sm:$0xff] %v7801_v32  ;;  %v20490_v63 = vld [vmem:[#allocation29_spill] sm:$0xff]  ;;  %v20495_v30 = vmov 0 }
 0x5b6   : > { %vm16732_vm4 = vmor %vm893_vm10, %vm20477_vm0  ;;  %vm2428_vm10 = vcmp.eq.s32.totalorder %v10191_v19, %v2160_v41  ;;  %vm20484_vm0 = vcmp.eq.s32.totalorder %v10178_v31, %v20473_v1  ;;  %v7802_v27 = vadd.f32 %v5846_v4, %v20490_v63  ;;  %v3056_v4 = vpop.permute.xlu1 %3055  ;;  %v3062_v63 = vpop.permute.xlu0 %3061 }
 0x5b7   : > { %vm16742_vm3 = vmor %vm2681_vm2, %vm20481_vm12  ;;  %vm20491_vm12 = vcmp.eq.s32.totalorder %v10191_v19, %v20473_v1  ;;  %v20502_v1 = vmov 0 }
 0x5b8   : > { %vm16750_vm1 = vmor %vm895_vm15, %vm20484_vm0  ;;  %vm20494_vm0 = vcmp.eq.s32.totalorder %v10191_v19, %v20469_v43  ;;  %6417 = vst [vmem:[%s15877_s6 + $0xb8] sm:$0xff] %v7802_v27  ;;  %v5851_v43 = vpop.f32.mrb[48].mxu0  ;;  %v20507_v27 = vld [vmem:[#allocation231_spill] sm:$0xff] }
 0x5b9   : > { %vm16758_vm2 = vmor %vm2682_vm5, %vm20487_vm6  ;;  %vm20497_vm6 = vcmp.eq.s32.totalorder %v10178_v31, %v2160_v41  ;;  %v20504_v41 = vld [vmem:[#allocation34_spill] sm:$0xff]  ;;  %v5853_v32 = vpop.f32.mrb[49].mxu0 }
 0x5ba   : > { %vm16767_vm15 = vmor %vm896_vm9, %vm20491_vm12  ;;  %vm3323_vm9 = vcmp.eq.s32.totalorder %v10178_v31, %v3056_v4  ;;  %vm3324_vm12 = vcmp.eq.s32.totalorder %v10191_v19, %v3056_v4  ;;  %v2166_v50 = vpop.permute.xlu1 %2165  ;;  %v7803_v20 = vadd.f32 %v5851_v43, %v20504_v41  ;;  %v5854_v54 = vpop.f32.mrb[50].mxu0  ;;  %v20509_v43 = vld [vmem:[#allocation5_spill] sm:$0xff] }
 0x5bb   : > { %vm16774_vm14 = vmor %vm894_vm8, %vm20494_vm0  ;;  %vm20498_vm8 = vnez %v19857_v45  ;;  %v7804_v17 = vadd.f32 %v5854_v54, %v20508_v9  ;;  %v5856_v4 = vpop.f32.mrb[51].mxu0  ;;  %v20518_v41 = vld [vmem:[#allocation33_spill] sm:$0xff]  ;;  %v20520_v54 = vmov 0 }
 0x5bc   : > { %v20496_v30 = vsel %vm16774_vm14, 4294967295, %v20495_v30  ;;  %vm2683_vm5 = vmor %vm16692_vm7, %vm20497_vm6  ;;  %7640 = vmatmul.mubr.msk.bf16.gmra.mrb[152].mxu0 %vm20498_vm8, %v19370_v48  ;;  %vm20499_vm14 = vnez %v19895_v16  ;;  %vm2429_vm7 = vcmp.eq.s32.totalorder %v10178_v31, %v16651_v22  ;;  %6418 = vst [vmem:[%s15877_s6 + $0xc0] sm:$0xff] %v7803_v20  ;;  %v20525_v4 = vld [vmem:[#allocation79_spill] sm:$0xff] }
 0x5bd   : > { %vm2684_vm13 = vmor %vm16704_vm11, %vm2428_vm10  ;;  %7642 = vmatprep.mubr.msk.bf16.mxu0 %vm20499_vm14, %v19370_v48  ;;  %6419 = vst [vmem:[%s15877_s6 + $0xc8] sm:$0xff] %v7804_v17  ;;  %v20522_v17 = vmov 0 }
 0x5be   : > { %vm3579_vm0 = vmor %vm2683_vm5, %vm3323_vm9  ;;  %vm2431_vm5 = vcmp.eq.s32.totalorder %v10178_v31, %v2166_v50  ;;  %vm20510_vm9 = vnez %v20496_v30  ;;  %v3059_v5 = vpop.permute.xlu1 %3058  ;;  %v3065_v30 = vpop.permute.xlu0 %3064 }
 0x5bf   : > { %vm3580_vm6 = vmor %vm2684_vm13, %vm3324_vm12  ;;  %vm2430_vm13 = vcmp.eq.s32.totalorder %v10191_v19, %v16651_v22  ;;  %vm3327_vm12 = vcmp.eq.s32.totalorder %v10178_v31, %v3062_v63 }
 0x5c0   : > { %vm16797_vm11 = vmpackc.low %vm3580_vm6, %vm16758_vm2  ;;  %vm897_vm6 = vcmp.eq.s32.totalorder %v10178_v31, %v20509_v43 }
 0x5c1   : > { %v20501_v39 = vsel %vm16797_vm11, 4294967295, %v20500_v39  ;;  %7138 = vmatprep.mubr.msk.bf16.mxu1 %vm16797_vm11, %v19370_v48  ;;  %vm16806_vm10 = vmpackc.low %vm3579_vm0, %vm16742_vm3  ;;  %vm2432_vm3 = vcmp.eq.s32.totalorder %v10191_v19, %v2166_v50  ;;  %vm3328_vm0 = vcmp.eq.s32.totalorder %v10191_v19, %v3062_v63  ;;  %v5859_v50 = vpop.f32.mrb[52].mxu0  ;;  %v20519_v63 = vld [vmem:[#allocation232_spill] sm:$0xff] }
 0x5c2   : > { %v20503_v1 = vsel %vm16806_vm10, 4294967295, %v20502_v1  ;;  %vm16815_vm2 = vmor %vm16732_vm4, %vm2429_vm7  ;;  %7140 = vmatmul.mubr.msk.bf16.gmra.mrb[228].mxu1 %vm16806_vm10, %v19370_v48  ;;  %v7805_v20 = vadd.f32 %v5859_v50, %v20518_v41  ;;  %v5861_v32 = vpop.f32.mrb[53].mxu0  ;;  %v2169_v56 = vpop.permute.xlu1 %2168  ;;  %v20526_v41 = vld [vmem:[#allocation6_spill] sm:$0xff] }
 0x5c3   : > { %vm2687_vm4 = vmor %vm16750_vm1, %vm2431_vm5  ;;  %vm20511_vm1 = vnez %v19898_v55  ;;  %v5862_v9 = vpop.f32.mrb[54].mxu0 }
 0x5c4   : > { %vm2688_vm7 = vmor %vm16767_vm15, %vm2432_vm3  ;;  %7644 = vmatmul.mubr.msk.bf16.gmra.mrb[156].mxu0 %vm20511_vm1, %v19370_v48  ;;  %vm20514_vm15 = vnez %v19909_v49  ;;  %vm20515_vm3 = vcmp.eq.s32.totalorder %v10178_v31, %v20507_v27  ;;  %6420 = vst [vmem:[%s15877_s6 + $0xd0] sm:$0xff] %v7805_v20  ;;  %v5864_v50 = vpop.f32.mrb[55].mxu0  ;;  %v16916_v20 = vpop.permute.xlu0 %3073  ;;  %v20599_v49 = vld [vmem:[#allocation46_spill] sm:$0xff] }
 0x5c5   : > { %vm2686_vm14 = vmor %vm20510_vm9, %vm2430_vm13  ;;  %7646 = vmatprep.mubr.msk.bf16.mxu0 %vm20514_vm15, %v19370_v48  ;;  %vm3325_vm9 = vcmp.eq.s32.totalorder %v10178_v31, %v3059_v5  ;;  %vm1538_vm15 = vcmp.eq.s32.totalorder %v10191_v19, %v20507_v27  ;;  %v20539_v50 = vld [vmem:[#allocation8_spill] sm:$0xff]  ;;  %v20563_v27 = vmov 0 }
 0x5c6   : > { %vm16845_vm5 = vmor %vm2687_vm4, %vm3327_vm12  ;;  %vm3326_vm12 = vcmp.eq.s32.totalorder %v10191_v19, %v3059_v5  ;;  %v7806_v5 = vadd.f32 %v5862_v9, %v20525_v4  ;;  %v20536_v9 = vld [vmem:[#allocation234_spill] sm:$0xff]  ;;  %v2172_v4 = vpop.permute.xlu1 %2171 }
 0x5c7   : > { %vm16855_vm10 = vmor %vm897_vm6, %vm20515_vm3  ;;  %vm1540_vm6 = vcmp.eq.s32.totalorder %v10191_v19, %v20519_v63 }
 0x5c8   : > { %vm3584_vm13 = vmor %vm2688_vm7, %vm3328_vm0  ;;  %vm1539_vm0 = vcmp.eq.s32.totalorder %v10178_v31, %v20519_v63  ;;  %6421 = vst [vmem:[%s15877_s6 + $0xd8] sm:$0xff] %v7806_v5  ;;  %v20537_v5 = vld [vmem:[#allocation7_spill] sm:$0xff]  ;;  %v5867_v63 = vpop.f32.mrb[56].mxu0 }
 0x5c9   : > { %vm3581_vm4 = vmor %vm16815_vm2, %vm3325_vm9  ;;  %vm898_vm2 = vcmp.eq.s32.totalorder %v10191_v19, %v20509_v43  ;;  %vm903_vm9 = vcmp.eq.s32.totalorder %v10178_v31, %v20539_v50  ;;  %v5869_v43 = vpop.f32.mrb[57].mxu0 }
 0x5ca   : > { %vm3582_vm1 = vmor %vm2686_vm14, %vm3326_vm12 }
 0x5cb   : > { %vm16868_vm7 = vmpackc.low %vm3584_vm13, %vm3582_vm1  ;;  %vm899_vm1 = vcmp.eq.s32.totalorder %v10178_v31, %v20526_v41  ;;  %vm2433_vm13 = vcmp.eq.s32.totalorder %v10178_v31, %v2169_v56 }
 0x5cc   : > { %v20521_v54 = vsel %vm16868_vm7, 4294967295, %v20520_v54  ;;  %7142 = vmatprep.mubr.msk.bf16.mxu1 %vm16868_vm7, %v19370_v48  ;;  %vm16881_vm14 = vmpackc.low %vm16845_vm5, %vm3581_vm4  ;;  %vm900_vm5 = vcmp.eq.s32.totalorder %v10191_v19, %v20526_v41  ;;  %vm20550_vm7 = vcmp.eq.s32.totalorder %v10191_v19, %v3065_v30 }
 0x5cd   : > { %v20523_v17 = vsel %vm16881_vm14, 4294967295, %v20522_v17  ;;  %vm16892_vm3 = vmor %vm898_vm2, %vm1538_vm15  ;;  %7144 = vmatmul.mubr.msk.bf16.gmra.mrb[232].mxu1 %vm16881_vm14, %v19370_v48  ;;  %vm20531_vm15 = vnez %v19914_v44  ;;  %vm20538_vm14 = vcmp.eq.s32.totalorder %v10191_v19, %v2169_v56  ;;  %v20543_v56 = vld [vmem:[#allocation38_spill] sm:$0xff]  ;;  %v5870_v44 = vpop.f32.mrb[58].mxu0 }
 0x5ce   : > { %20524 = vst [vmem:[#allocation86_spill] sm:$0xff] %v20523_v17  ;;  %vm16907_vm12 = vmor %vm899_vm1, %vm1539_vm0  ;;  %7648 = vmatmul.mubr.msk.bf16.gmra.mrb[160].mxu0 %vm20531_vm15, %v19370_v48  ;;  %vm20535_vm0 = vnez %v19956_v28  ;;  %vm901_vm15 = vcmp.eq.s32.totalorder %v10178_v31, %v20537_v5  ;;  %v7807_v41 = vadd.f32 %v5867_v63, %v20543_v56  ;;  %v5872_v43 = vpop.f32.mrb[59].mxu0 }
 0x5cf   : > { %vm16921_vm2 = vmor %vm900_vm5, %vm1540_vm6  ;;  %7650 = vmatprep.mubr.msk.bf16.mxu0 %vm20535_vm0, %v19370_v48  ;;  %vm902_vm6 = vcmp.eq.s32.totalorder %v10191_v19, %v20537_v5  ;;  %v2175_v5 = vpop.permute.xlu0 %2174 }
 0x5d0   : > { %vm2689_vm4 = vmor %vm16855_vm10, %vm2433_vm13  ;;  %vm20540_vm13 = vcmp.eq.s32.totalorder %v10178_v31, %v20532_v29  ;;  %vm2436_vm10 = vcmp.eq.s32.totalorder %v10191_v19, %v2172_v4  ;;  %6422 = vst [vmem:[%s15877_s6 + $0xe0] sm:$0xff] %v7807_v41 }
 0x5d1   : > { %vm2690_vm1 = vmor %vm16892_vm3, %vm20538_vm14  ;;  %vm904_vm14 = vcmp.eq.s32.totalorder %v10191_v19, %v20539_v50  ;;  %vm20544_vm3 = vcmp.eq.s32.totalorder %v10178_v31, %v3065_v30  ;;  %v20553_v50 = vld [vmem:[#allocation37_spill] sm:$0xff]  ;;  %v20558_v30 = vmov 0 }
 0x5d2   : > { %vm16949_vm0 = vmor %vm901_vm15, %vm20540_vm13  ;;  %vm20547_vm15 = vcmp.eq.s32.totalorder %v10178_v31, %v20536_v9  ;;  %v7808_v56 = vadd.f32 %v5870_v44, %v20553_v50  ;;  %v3068_v44 = vpop.permute.xlu1 %3067 }
 0x5d3   : > { %vm16959_vm5 = vmor %vm2689_vm4, %vm20544_vm3  ;;  %vm20554_vm3 = vcmp.eq.s32.totalorder %v10191_v19, %v20536_v9  ;;  %vm3332_vm11 = vcmp.eq.s32.totalorder %v10191_v19, %v3068_v44  ;;  %v20565_v9 = vmov 0 }
 0x5d4   : > { %vm16967_vm13 = vmor %vm903_vm9, %vm20547_vm15  ;;  %vm20557_vm15 = vcmp.eq.s32.totalorder %v10191_v19, %v20532_v29  ;;  %6423 = vst [vmem:[%s15877_s6 + $0xe8] sm:$0xff] %v7808_v56  ;;  %v5875_v29 = vpop.f32.mrb[60].mxu0 }
 0x5d5   : > { %vm16975_vm4 = vmor %vm2690_vm1, %vm20550_vm7  ;;  %vm20560_vm7 = vcmp.eq.s32.totalorder %v10178_v31, %v2172_v4  ;;  %v20567_v4 = vld [vmem:[#allocation42_spill] sm:$0xff]  ;;  %v5877_v63 = vpop.f32.mrb[61].mxu0 }
 0x5d6   : > { %vm16984_vm9 = vmor %vm904_vm14, %vm20554_vm3  ;;  %vm3331_vm3 = vcmp.eq.s32.totalorder %v10178_v31, %v3068_v44  ;;  %v2178_v32 = vpop.permute.xlu1 %2177  ;;  %v7809_v41 = vadd.f32 %v5875_v29, %v20567_v4  ;;  %v5878_v28 = vpop.f32.mrb[62].mxu0  ;;  %v20577_v29 = vmov 0  ;;  %v20583_v63 = vld [vmem:[#allocation9_spill] sm:$0xff] }
 0x5d7   : > { %vm16991_vm8 = vmor %vm902_vm6, %vm20557_vm15  ;;  %vm20561_vm6 = vnez %v19959_v7  ;;  %v7810_v22 = vadd.f32 %v5878_v28, %v14001_v23  ;;  %v5880_v56 = vpop.f32.mrb[63].mxu0 }
 0x5d8   : > { %v20559_v30 = vsel %vm16991_vm8, 4294967295, %v20558_v30  ;;  %vm2691_vm1 = vmor %vm16907_vm12, %vm20560_vm7  ;;  %7652 = vmatmul.mubr.msk.bf16.gmra.mrb[164].mxu0 %vm20561_vm6, %v19370_v48  ;;  %vm20562_vm8 = vnez %v19979_v47  ;;  %vm2437_vm12 = vcmp.eq.s32.totalorder %v10178_v31, %v2175_v5  ;;  %6424 = vst [vmem:[%s15877_s6 + $0xf0] sm:$0xff] %v7809_v41  ;;  %v5883_v17 = vpop.f32.mrb[64].mxu0  ;;  %v20581_v41 = vld [vmem:[#allocation235_spill] sm:$0xff]  ;;  %v2184_v56 = vpop.permute.xlu0 %2183 }
 0x5d9   : > { %vm2692_vm14 = vmor %vm16921_vm2, %vm2436_vm10  ;;  %7654 = vmatprep.mubr.msk.bf16.mxu0 %vm20562_vm8, %v19370_v48  ;;  %6425 = vst [vmem:[%s15877_s6 + $0xf8] sm:$0xff] %v7810_v22  ;;  %vm20571_vm8 = vnez %v19982_v8  ;;  %v5885_v43 = vpop.f32.mrb[65].mxu0  ;;  %v20584_v22 = vld [vmem:[#allocation10_spill] sm:$0xff] }
 0x5da   : > { %vm3587_vm15 = vmor %vm2691_vm1, %vm3331_vm3  ;;  %vm2439_vm1 = vcmp.eq.s32.totalorder %v10178_v31, %v2178_v32  ;;  %v3071_v23 = vpop.permute.xlu1 %3070 }
 0x5db   : > { %vm3588_vm7 = vmor %vm2692_vm14, %vm3332_vm11  ;;  %vm2438_vm11 = vcmp.eq.s32.totalorder %v10191_v19, %v2175_v5  ;;  %vm2440_vm14 = vcmp.eq.s32.totalorder %v10191_v19, %v2178_v32  ;;  %v5886_v5 = vpop.f32.mrb[66].mxu0  ;;  %v20579_v32 = vld [vmem:[#allocation88_spill] sm:$0xff] }
 0x5dc   : > { %vm17013_vm2 = vmpackc.low %vm3588_vm7, %vm16975_vm4  ;;  %v5888_v4 = vpop.f32.mrb[67].mxu0 }
 0x5dd   : > { %v20564_v27 = vsel %vm17013_vm2, 4294967295, %v20563_v27  ;;  %7146 = vmatprep.mubr.msk.bf16.mxu1 %vm17013_vm2, %v19370_v48  ;;  %vm17022_vm10 = vmpackc.low %vm3587_vm15, %vm16959_vm5  ;;  %vm3335_vm5 = vcmp.eq.s32.totalorder %v10178_v31, %v16916_v20  ;;  %v5891_v28 = vpop.f32.mrb[68].mxu0 }
 0x5de   : > { %v20566_v9 = vsel %vm17022_vm10, 4294967295, %v20565_v9  ;;  %vm17030_vm4 = vmor %vm16949_vm0, %vm2437_vm12  ;;  %7148 = vmatmul.mubr.msk.bf16.gmra.mrb[236].mxu1 %vm17022_vm10, %v19370_v48  ;;  %vm3336_vm0 = vcmp.eq.s32.totalorder %v10191_v19, %v16916_v20  ;;  %vm20570_vm12 = vnez %v20559_v30  ;;  %v7811_v20 = vadd.f32 %v5883_v17, %v14056_v53  ;;  %v1288_v44 = vpop.permute.xlu1 %1287  ;;  %v5893_v17 = vpop.f32.mrb[69].mxu0 }
 0x5df   : > { %vm2695_vm3 = vmor %vm16967_vm13, %vm2439_vm1  ;;  %vm20574_vm13 = vnez %v20025_v57  ;;  %v20575_v30 = vmov 0  ;;  %v7812_v53 = vadd.f32 %v5886_v5, %v20579_v32 }
 0x5e0   : > { %vm2696_vm15 = vmor %vm16984_vm9, %vm2440_vm14  ;;  %7656 = vmatmul.mubr.msk.bf16.gmra.mrb[168].mxu0 %vm20571_vm8, %v19370_v48  ;;  %vm3333_vm9 = vcmp.eq.s32.totalorder %v10178_v31, %v3071_v23  ;;  %6426 = vst [vmem:[%s15877_s6 + $0x100] sm:$0xff] %v7811_v20  ;;  %v5894_v20 = vpop.f32.mrb[70].mxu0 }
 0x5e1   : > { %vm2694_vm7 = vmor %vm20570_vm12, %vm2438_vm11  ;;  %7658 = vmatprep.mubr.msk.bf16.mxu0 %vm20574_vm13, %v19370_v48  ;;  %vm3334_vm11 = vcmp.eq.s32.totalorder %v10191_v19, %v3071_v23  ;;  %6427 = vst [vmem:[%s15877_s6 + $0x108] sm:$0xff] %v7812_v53  ;;  %vm1547_vm12 = vcmp.eq.s32.totalorder %v10178_v31, %v1288_v44  ;;  %v7813_v23 = vadd.f32 %v5891_v28, %v14246_v15  ;;  %v5896_v43 = vpop.f32.mrb[71].mxu0  ;;  %v2190_v53 = vpop.permute.xlu0 %2189 }
 0x5e2   : > { %vm17055_vm6 = vmor %vm2695_vm3, %vm3335_vm5  ;;  %v2181_v50 = vpop.permute.xlu1 %2180  ;;  %v7814_v15 = vadd.f32 %v5894_v20, %v14256_v35  ;;  %vm20588_vm13 = vcmp.eq.s32.totalorder %v10191_v19, %v20581_v41  ;;  %v5899_v4 = vpop.f32.mrb[72].mxu0  ;;  %v20600_v20 = vmov 0  ;;  %v20606_v35 = vld [vmem:[#allocation87_spill] sm:$0xff] }
 0x5e3   : > { %vm3592_vm1 = vmor %vm2696_vm15, %vm3336_vm0  ;;  %vm1545_vm15 = vcmp.eq.s32.totalorder %v10178_v31, %v20581_v41  ;;  %6428 = vst [vmem:[%s15877_s6 + $0x110] sm:$0xff] %v7813_v23 }
 0x5e4   : > { %vm3589_vm14 = vmor %vm17030_vm4, %vm3333_vm9  ;;  %vm20580_vm4 = vnez %v20027_v52  ;;  %vm907_vm9 = vcmp.eq.s32.totalorder %v10178_v31, %v20584_v22  ;;  %6429 = vst [vmem:[%s15877_s6 + $0x118] sm:$0xff] %v7814_v15 }
 0x5e5   : > { %vm3590_vm5 = vmor %vm2694_vm7, %vm3334_vm11  ;;  %vm905_vm7 = vcmp.eq.s32.totalorder %v10178_v31, %v20583_v63  ;;  %vm2444_vm11 = vcmp.eq.s32.totalorder %v10191_v19, %v2184_v56  ;;  %v1291_v15 = vpop.permute.xlu0 %1290 }
 0x5e6   : > { %vm17067_vm3 = vmpackc.low %vm3592_vm1, %vm3590_vm5  ;;  %vm908_vm5 = vcmp.eq.s32.totalorder %v10191_v19, %v20584_v22  ;;  %vm2443_vm1 = vcmp.eq.s32.totalorder %v10178_v31, %v2184_v56  ;;  %v3077_v5 = vpop.permute.xlu1 %3076  ;;  %v5901_v22 = vpop.f32.mrb[73].mxu0 }
 0x5e7   : > { %v20576_v30 = vsel %vm17067_vm3, 4294967295, %v20575_v30  ;;  %7150 = vmatprep.mubr.msk.bf16.mxu1 %vm17067_vm3, %v19370_v48  ;;  %vm17076_vm0 = vmpackc.low %vm17055_vm6, %vm3589_vm14  ;;  %vm20582_vm6 = vnez %v20047_v0  ;;  %v5902_v56 = vpop.f32.mrb[74].mxu0  ;;  %v20608_v22 = vld [vmem:[#allocation92_spill] sm:$0xff] }
 0x5e8   : > { %v20578_v29 = vsel %vm17076_vm0, 4294967295, %v20577_v29  ;;  %7152 = vmatmul.mubr.msk.bf16.gmra.mrb[240].mxu1 %vm17076_vm0, %v19370_v48  ;;  %7660 = vmatmul.mubr.msk.bf16.gmra.mrb[172].mxu0 %vm20580_vm4, %v19370_v48  ;;  %vm17102_vm14 = vmor %vm905_vm7, %vm1545_vm15  ;;  %vm906_vm4 = vcmp.eq.s32.totalorder %v10191_v19, %v20583_v63  ;;  %vm20587_vm15 = vcmp.eq.s32.totalorder %v10191_v19, %v1288_v44  ;;  %vm2441_vm0 = vcmp.eq.s32.totalorder %v10178_v31, %v2181_v50  ;;  %v20591_v44 = vld [vmem:[#allocation112_spill] sm:$0xff]  ;;  %v5904_v17 = vpop.f32.mrb[75].mxu0 }
 0x5e9   : > { %7662 = vmatprep.mubr.msk.bf16.mxu0 %vm20582_vm6, %v19370_v48  ;;  %vm1803_vm6 = vmor %vm907_vm9, %vm1547_vm12  ;;  %vm2442_vm12 = vcmp.eq.s32.totalorder %v10191_v19, %v2181_v50  ;;  %v20598_v50 = vld [vmem:[#allocation41_spill] sm:$0xff]  ;;  %v7816_v23 = vadd.f32 %v5902_v56, %v20599_v49  ;;  %v5907_v32 = vpop.f32.mrb[76].mxu0 }
 0x5ea   : > { %vm1804_vm7 = vmor %vm908_vm5, %vm20587_vm15  ;;  %vm20592_vm5 = vnez %v20591_v44  ;;  %vm3337_vm15 = vcmp.eq.s32.totalorder %v10178_v31, %v3077_v5  ;;  %v3080_v63 = vpop.permute.xlu1 %3079  ;;  %v7815_v28 = vadd.f32 %v5899_v4, %v20598_v50  ;;  %v7817_v4 = vadd.f32 %v5907_v32, %v20606_v35  ;;  %v20607_v50 = vld [vmem:[#allocation11_spill] sm:$0xff] }
 0x5eb   : > { %vm1802_vm8 = vmor %vm906_vm4, %vm20588_vm13  ;;  %vm20595_vm13 = vnez %v20094_v59  ;;  %6431 = vst [vmem:[%s15877_s6 + $0x128] sm:$0xff] %v7816_v23  ;;  %v20609_v23 = vld [vmem:[#allocation12_spill] sm:$0xff] }
 0x5ec   : > { %vm17123_vm9 = vmor %vm1803_vm6, %vm2443_vm1  ;;  %vm3338_vm6 = vcmp.eq.s32.totalorder %v10191_v19, %v3077_v5  ;;  %6430 = vst [vmem:[%s15877_s6 + $0x120] sm:$0xff] %v7815_v28  ;;  %v20603_v5 = vmov 0 }
 0x5ed   : > { %vm17131_vm3 = vmor %vm1804_vm7, %vm2444_vm11  ;;  %vm3339_vm7 = vcmp.eq.s32.totalorder %v10178_v31, %v3080_v63  ;;  %6432 = vst [vmem:[%s15877_s6 + $0x130] sm:$0xff] %v7817_v4 }
 0x5ee   : > { %vm2697_vm4 = vmor %vm17102_vm14, %vm2441_vm0  ;;  %v1294_v43 = vpop.permute.xlu1 %1293 }
 0x5ef   : > { %vm2698_vm1 = vmor %vm1802_vm8, %vm2442_vm12  ;;  %vm20602_vm12 = vnez %v20096_v12 }
 0x5f0   : > { %7664 = vmatmul.mubr.msk.bf16.gmra.mrb[176].mxu0 %vm20592_vm5, %v19370_v48  ;;  %vm17141_vm5 = vmor %vm2697_vm4, %vm3337_vm15  ;;  %vm1549_vm15 = vcmp.eq.s32.totalorder %v10178_v31, %v1291_v15  ;;  %vm20612_vm4 = vnez %v20117_v2 }
 0x5f1   : > { %7666 = vmatprep.mubr.msk.bf16.mxu0 %vm20595_vm13, %v19370_v48  ;;  %vm3594_vm11 = vmor %vm2698_vm1, %vm3338_vm6  ;;  %vm3340_vm13 = vcmp.eq.s32.totalorder %v10191_v19, %v3080_v63  ;;  %v5909_v63 = vpop.f32.mrb[77].mxu0  ;;  %vm911_vm6 = vcmp.eq.s32.totalorder %v10178_v31, %v20609_v23  ;;  %vm1550_vm1 = vcmp.eq.s32.totalorder %v10191_v19, %v1291_v15 }
 0x5f2   : > { %vm3595_vm0 = vmor %vm17123_vm9, %vm3339_vm7  ;;  %v5910_v41 = vpop.f32.mrb[78].mxu0  ;;  %v2187_v28 = vpop.permute.xlu1 %2186  ;;  %vm912_vm7 = vcmp.eq.s32.totalorder %v10191_v19, %v20609_v23 }
 0x5f3   : > { %vm3596_vm8 = vmor %vm17131_vm3, %vm3340_vm13  ;;  %vm20605_vm3 = vnez %v20115_v24  ;;  %vm909_vm13 = vcmp.eq.s32.totalorder %v10178_v31, %v20607_v50  ;;  %v7818_v56 = vadd.f32 %v5910_v41, %v20608_v22  ;;  %v5912_v49 = vpop.f32.mrb[79].mxu0  ;;  %v1297_v23 = vpop.permute.xlu0 %1296 }
 0x5f4   : > { %vm17154_vm14 = vmpackc.low %vm3596_vm8, %vm3594_vm11  ;;  %v5915_v35 = vpop.f32.mrb[80].mxu0 }
 0x5f5   : > { %v20601_v20 = vsel %vm17154_vm14, 4294967295, %v20600_v20  ;;  %7154 = vmatprep.mubr.msk.bf16.mxu1 %vm17154_vm14, %v19370_v48  ;;  %vm17167_vm9 = vmpackc.low %vm3595_vm0, %vm17141_vm5  ;;  %vm1551_vm5 = vcmp.eq.s32.totalorder %v10178_v31, %v1294_v43  ;;  %vm2447_vm0 = vcmp.eq.s32.totalorder %v10178_v31, %v2190_v53  ;;  %6433 = vst [vmem:[%s15877_s6 + $0x138] sm:$0xff] %v7818_v56  ;;  %v5917_v63 = vpop.f32.mrb[81].mxu0  ;;  %v20632_v56 = vld [vmem:[#allocation13_spill] sm:$0xff] }
 0x5f6   : > { %v20604_v5 = vsel %vm17167_vm9, 4294967295, %v20603_v5  ;;  %7156 = vmatmul.mubr.msk.bf16.gmra.mrb[244].mxu1 %vm17167_vm9, %v19370_v48  ;;  %vm17188_vm11 = vmor %vm909_vm13, %vm1549_vm15  ;;  %vm20613_vm15 = vcmp.eq.s32.totalorder %v10191_v19, %v1294_v43  ;;  %vm20614_vm9 = vnez %v20160_v38  ;;  %v3083_v15 = vpop.permute.xlu1 %3082  ;;  %v20619_v43 = vld [vmem:[#allocation91_spill] sm:$0xff]  ;;  %v5918_v41 = vpop.f32.mrb[82].mxu0 }
 0x5f7   : > { %vm1807_vm8 = vmor %vm911_vm6, %vm1551_vm5  ;;  %vm2445_vm5 = vcmp.eq.s32.totalorder %v10178_v31, %v2187_v28  ;;  %vm2446_vm6 = vcmp.eq.s32.totalorder %v10191_v19, %v2187_v28  ;;  %vm3341_vm10 = vcmp.eq.s32.totalorder %v10178_v31, %v3083_v15  ;;  %v7819_v4 = vadd.f32 %v5915_v35, %v20619_v43  ;;  %v5920_v22 = vpop.f32.mrb[83].mxu0 }
 0x5f8   : > { %7668 = vmatmul.mubr.msk.bf16.gmra.mrb[180].mxu0 %vm20602_vm12, %v19370_v48  ;;  %vm2448_vm12 = vcmp.eq.s32.totalorder %v10191_v19, %v2190_v53  ;;  %vm1808_vm13 = vmor %vm912_vm7, %vm20613_vm15  ;;  %v20627_v35 = vmov 0  ;;  %v20629_v53 = vld [vmem:[#allocation49_spill] sm:$0xff]  ;;  %v2196_v22 = vpop.permute.xlu0 %2195 }
 0x5f9   : > { %7670 = vmatprep.mubr.msk.bf16.mxu0 %vm20605_vm3, %v19370_v48  ;;  %vm910_vm3 = vcmp.eq.s32.totalorder %v10191_v19, %v20607_v50  ;;  %vm17214_vm7 = vmor %vm1808_vm13, %vm2448_vm12  ;;  %6434 = vst [vmem:[%s15877_s6 + $0x140] sm:$0xff] %v7819_v4  ;;  %v20620_v50 = vld [vmem:[#allocation50_spill] sm:$0xff] }
 0x5fa   : > { %vm1806_vm14 = vmor %vm910_vm3, %vm1550_vm1  ;;  %vm3342_vm1 = vcmp.eq.s32.totalorder %v10191_v19, %v3083_v15  ;;  %v7820_v28 = vadd.f32 %v5918_v41, %v20620_v50  ;;  %v3086_v49 = vpop.permute.xlu1 %3085  ;;  %v5923_v15 = vpop.f32.mrb[84].mxu0  ;;  %v20630_v41 = vld [vmem:[#allocation54_spill] sm:$0xff] }
 0x5fb   : > { %vm2701_vm3 = vmor %vm17188_vm11, %vm2445_vm5  ;;  %vm3343_vm15 = vcmp.eq.s32.totalorder %v10178_v31, %v3086_v49  ;;  %vm3344_vm13 = vcmp.eq.s32.totalorder %v10191_v19, %v3086_v49  ;;  %vm20623_vm11 = vnez %v20162_v40  ;;  %v7821_v43 = vadd.f32 %v5923_v15, %v20629_v53  ;;  %v5925_v4 = vpop.f32.mrb[85].mxu0  ;;  %v20633_v15 = vld [vmem:[#allocation78_spill] sm:$0xff] }
 0x5fc   : > { %6435 = vst [vmem:[%s15877_s6 + $0x148] sm:$0xff] %v7820_v28  ;;  %vm3600_vm5 = vmor %vm17214_vm7, %vm3344_vm13  ;;  %v5926_v63 = vpop.f32.mrb[86].mxu0  ;;  %vm1553_vm7 = vcmp.eq.s32.totalorder %v10178_v31, %v1297_v23 }
 0x5fd   : > { %6436 = vst [vmem:[%s15877_s6 + $0x150] sm:$0xff] %v7821_v43  ;;  %v7822_v50 = vadd.f32 %v5926_v63, %v20630_v41  ;;  %v5928_v28 = vpop.f32.mrb[87].mxu0  ;;  %v20637_v43 = vld [vmem:[#allocation14_spill] sm:$0xff] }
 0x5fe   : > { %v1300_v32 = vpop.permute.xlu1 %1299  ;;  %v20656_v28 = vmov 0 }
 0x5ff   : > { %6437 = vst [vmem:[%s15877_s6 + $0x158] sm:$0xff] %v7822_v50 }
 0x600   : > { %7672 = vmatmul.mubr.msk.bf16.gmra.mrb[184].mxu0 %vm20612_vm4, %v19370_v48  ;;  %vm17209_vm4 = vmor %vm1807_vm8, %vm2447_vm0 }
 0x601   : > { %7674 = vmatprep.mubr.msk.bf16.mxu0 %vm20614_vm9, %v19370_v48  ;;  %vm2702_vm0 = vmor %vm1806_vm14, %vm2446_vm6 }
 0x602   : > { %vm17224_vm8 = vmor %vm2701_vm3, %vm3341_vm10  ;;  %vm20624_vm10 = vnez %v20182_v36  ;;  %vm1555_vm3 = vcmp.eq.s32.totalorder %v10178_v31, %v1300_v32  ;;  %v2193_v49 = vpop.permute.xlu1 %2192 }
 0x603   : > { %vm3598_vm12 = vmor %vm2702_vm0, %vm3342_vm1  ;;  %vm20631_vm1 = vnez %v20184_v10  ;;  %vm913_vm0 = vcmp.eq.s32.totalorder %v10178_v31, %v20632_v56  ;;  %vm2449_vm9 = vcmp.eq.s32.totalorder %v10178_v31, %v2193_v49 }
 0x604   : > { %vm3599_vm14 = vmor %vm17209_vm4, %vm3343_vm15  ;;  %vm1554_vm15 = vcmp.eq.s32.totalorder %v10191_v19, %v1297_v23  ;;  %v20638_v23 = vld [vmem:[#allocation95_spill] sm:$0xff] }
 0x605   : > { %vm17241_vm6 = vmpackc.low %vm3600_vm5, %vm3598_vm12  ;;  %vm20634_vm12 = vnez %v20633_v15  ;;  %vm916_vm5 = vcmp.eq.s32.totalorder %v10191_v19, %v20637_v43 }
 0x606   : > { %7158 = vmatprep.mubr.msk.bf16.mxu1 %vm17241_vm6, %v19370_v48  ;;  %vm17250_vm4 = vmpackc.low %vm3599_vm14, %vm17224_vm8  ;;  %vm1556_vm8 = vcmp.eq.s32.totalorder %v10191_v19, %v1300_v32  ;;  %vm915_vm14 = vcmp.eq.s32.totalorder %v10178_v31, %v20637_v43  ;;  %v5931_v32 = vpop.f32.mrb[88].mxu0 }
 0x607   : > { %v20628_v35 = vsel %vm17250_vm4, 4294967295, %v20627_v35  ;;  %7160 = vmatmul.mubr.msk.bf16.gmra.mrb[248].mxu1 %vm17250_vm4, %v19370_v48  ;;  %vm17273_vm13 = vmor %vm913_vm0, %vm1553_vm7  ;;  %vm2452_vm7 = vcmp.eq.s32.totalorder %v10191_v19, %v2196_v22  ;;  %v7823_v4 = vadd.f32 %v5931_v32, %v20638_v23  ;;  %v5933_v63 = vpop.f32.mrb[89].mxu0  ;;  %v20646_v23 = vld [vmem:[#allocation77_spill] sm:$0xff]  ;;  %v20658_v32 = vld [vmem:[#allocation123_spill] sm:$0xff] }
 0x608   : > { %7676 = vmatmul.mubr.msk.bf16.gmra.mrb[188].mxu0 %vm20623_vm11, %v19370_v48  ;;  %vm1812_vm11 = vmor %vm916_vm5, %vm1556_vm8  ;;  %v5934_v50 = vpop.f32.mrb[90].mxu0  ;;  %v20652_v63 = vld [vmem:[#allocation58_spill] sm:$0xff] }
 0x609   : > { %7678 = vmatprep.mubr.msk.bf16.mxu0 %vm20624_vm10, %v19370_v48  ;;  %vm2451_vm10 = vcmp.eq.s32.totalorder %v10178_v31, %v2196_v22  ;;  %6438 = vst [vmem:[%s15877_s6 + $0x160] sm:$0xff] %v7823_v4  ;;  %v20643_v22 = vld [vmem:[#allocation100_spill] sm:$0xff]  ;;  %v5936_v15 = vpop.f32.mrb[91].mxu0  ;;  %vm17298_vm8 = vmor %vm1812_vm11, %vm2452_vm7 }
 0x60a   : > { %v7824_v43 = vadd.f32 %v5934_v50, %v20643_v22  ;;  %v5939_v4 = vpop.f32.mrb[92].mxu0  ;;  %v20653_v22 = vmov 0 }
 0x60b   : > { %v7825_v41 = vadd.f32 %v5939_v4, %v20652_v63  ;;  %v5941_v50 = vpop.f32.mrb[93].mxu0 }
 0x60c   : > { %6439 = vst [vmem:[%s15877_s6 + $0x168] sm:$0xff] %v7824_v43  ;;  %v20663_v50 = vld [vmem:[#allocation62_spill] sm:$0xff] }
 0x60d   : > { %6440 = vst [vmem:[%s15877_s6 + $0x170] sm:$0xff] %v7825_v41 }
 0x610   : > { %7680 = vmatmul.mubr.msk.bf16.gmra.mrb[192].mxu0 %vm20631_vm1, %v19370_v48  ;;  %vm1811_vm1 = vmor %vm915_vm14, %vm1555_vm3  ;;  %vm2450_vm14 = vcmp.eq.s32.totalorder %v10191_v19, %v2193_v49  ;;  %v20648_v49 = vld [vmem:[#allocation124_spill] sm:$0xff] }
 0x611   : > { %7682 = vmatprep.mubr.msk.bf16.mxu0 %vm20634_vm12, %v19370_v48  ;;  %vm914_vm12 = vcmp.eq.s32.totalorder %v10191_v19, %v20632_v56  ;;  %vm17291_vm3 = vmor %vm1811_vm1, %vm2451_vm10  ;;  %v3089_v56 = vpop.permute.xlu1 %3088  ;;  %vm20647_vm1 = vnez %v20646_v23  ;;  %vm20649_vm11 = vnez %v20648_v49 }
 0x612   : > { %vm17286_vm0 = vmor %vm914_vm12, %vm1554_vm15  ;;  %vm3345_vm12 = vcmp.eq.s32.totalorder %v10178_v31, %v3089_v56  ;;  %vm3346_vm10 = vcmp.eq.s32.totalorder %v10191_v19, %v3089_v56  ;;  %v5942_v56 = vpop.f32.mrb[94].mxu0 }
 0x613   : > { %vm2705_vm15 = vmor %vm17273_vm13, %vm2449_vm9 }
 0x614   : > { %vm2706_vm5 = vmor %vm17286_vm0, %vm2450_vm14 }
 0x615   : > { %vm17315_vm7 = vmor %vm2705_vm15, %vm3345_vm12  ;;  %v3092_v53 = vpop.permute.xlu1 %3091  ;;  %vm20661_vm12 = vnez %v20302_v25  ;;  %vm20664_vm15 = vnez %v20368_v21 }
 0x616   : > { %vm3602_vm9 = vmor %vm2706_vm5, %vm3346_vm10  ;;  %vm3347_vm13 = vcmp.eq.s32.totalorder %v10178_v31, %v3092_v53  ;;  %vm3348_vm4 = vcmp.eq.s32.totalorder %v10191_v19, %v3092_v53  ;;  %v20655_v31 = vld [vmem:[#allocation104_spill] sm:$0xff]  ;;  %v5944_v19 = vpop.f32.mrb[95].mxu0  ;;  %v20662_v53 = vld [vmem:[#allocation103_spill] sm:$0xff]  ;;  %vm20665_vm10 = vnez %v20305_v42  ;;  %vm20667_vm5 = vnez %v20323_v6 }
 0x617   : > { %vm3604_vm0 = vmor %vm17298_vm8, %vm3348_vm4  ;;  %v7826_v43 = vadd.f32 %v5942_v56, %v20655_v31  ;;  %vm20659_vm4 = vnez %v20658_v32  ;;  %vm20660_vm8 = vnez %v20337_v34  ;;  %v5947_v15 = vpop.f32.mrb[96].mxu0 }
 0x618   : > { %7684 = vmatmul.mubr.msk.bf16.gmra.mrb[196].mxu0 %vm20647_vm1, %v19370_v48  ;;  %vm3603_vm1 = vmor %vm17291_vm3, %vm3347_vm13  ;;  %v7827_v4 = vadd.f32 %v5947_v15, %v20662_v53  ;;  %v5949_v63 = vpop.f32.mrb[97].mxu0  ;;  %v20669_v53 = vld [vmem:[#allocation61_spill] sm:$0xff]  ;;  %vm20673_vm13 = vnez %v19738_v3 }
 0x619   : > { %7686 = vmatprep.mubr.msk.bf16.mxu0 %vm20649_vm11, %v19370_v48  ;;  %vm17326_vm14 = vmpackc.low %vm3604_vm0, %vm3602_vm9  ;;  %6441 = vst [vmem:[%s15877_s6 + $0x178] sm:$0xff] %v7826_v43  ;;  %v5950_v41 = vpop.f32.mrb[98].mxu0  ;;  %v20668_v43 = vld [vmem:[#allocation108_spill] sm:$0xff]  ;;  %vm20674_vm0 = vnez %v20372_v13 }
 0x61a   : > { %v20654_v22 = vsel %vm17326_vm14, 4294967295, %v20653_v22  ;;  %vm17334_vm3 = vmpackc.low %vm3603_vm1, %vm17315_vm7  ;;  %7162 = vmatprep.mubr.msk.bf16.mxu1 %vm17326_vm14, %v19370_v48  ;;  %6442 = vst [vmem:[%s15877_s6 + $0x180] sm:$0xff] %v7827_v4  ;;  %v7828_v56 = vadd.f32 %v5950_v41, %v20663_v50  ;;  %v5952_v31 = vpop.f32.mrb[99].mxu0  ;;  %vm20666_vm1 = vnez %v19715_v51  ;;  %vm20670_vm7 = vnez %v19723_v33  ;;  %v20671_v51 = vld [vmem:[#allocation82_spill] sm:$0xff]  ;;  %v20675_v50 = vld [vmem:[#allocation107_spill] sm:$0xff] }
 0x61b   : > { %v20657_v28 = vsel %vm17334_vm3, 4294967295, %v20656_v28  ;;  %7164 = vmatmul.mubr.msk.bf16.gmra.mrb[252].mxu1 %vm17334_vm3, %v19370_v48  ;;  %v5955_v34 = vpop.f32.mrb[100].mxu0  ;;  %vm20672_vm9 = vnez %v20671_v51 }
 0x61c   : > { %7310 = vmatprep.mubr.msk.bf16.mxu1 %vm20660_vm8, %v19370_v48  ;;  %6443 = vst [vmem:[%s15877_s6 + $0x188] sm:$0xff] %v7828_v56  ;;  %v7829_v19 = vadd.f32 %v5955_v34, %v20668_v43  ;;  %v5957_v15 = vpop.f32.mrb[101].mxu0  ;;  %v20676_v34 = vld [vmem:[#allocation66_spill] sm:$0xff]  ;;  %vm20677_vm8 = vnez %v19744_v26 }
 0x61d   : > { %v5958_v21 = vpop.f32.mrb[102].mxu0  ;;  %v20681_v15 = vld [vmem:[#allocation65_spill] sm:$0xff] }
 0x61e   : > { %6444 = vst [vmem:[%s15877_s6 + $0x190] sm:$0xff] %v7829_v19  ;;  %v7830_v4 = vadd.f32 %v5958_v21, %v20669_v53  ;;  %v5960_v63 = vpop.f32.mrb[103].mxu0 }
 0x61f   : > { %v5963_v41 = vpop.f32.mrb[104].mxu0 }
 0x620   : > { %7688 = vmatmul.mubr.msk.bf16.gmra.mrb[200].mxu0 %vm20659_vm4, %v19370_v48  ;;  %6445 = vst [vmem:[%s15877_s6 + $0x198] sm:$0xff] %v7830_v4  ;;  %v7831_v56 = vadd.f32 %v5963_v41, %v20675_v50  ;;  %v5965_v31 = vpop.f32.mrb[105].mxu0  ;;  %v20682_v4 = vld [vmem:[#allocation111_spill] sm:$0xff] }
 0x621   : > { %7690 = vmatprep.mubr.msk.bf16.mxu0 %vm20661_vm12, %v19370_v48  ;;  %v5966_v33 = vpop.f32.mrb[106].mxu0 }
 0x622   : > { %6446 = vst [vmem:[%s15877_s6 + $0x1a0] sm:$0xff] %v7831_v56  ;;  %v7832_v43 = vadd.f32 %v5966_v33, %v20676_v34  ;;  %v5968_v19 = vpop.f32.mrb[107].mxu0  ;;  %v20688_v56 = vld [vmem:[#allocation70_spill] sm:$0xff]  ;;  %v20689_v34 = vld [vmem:[#allocation69_spill] sm:$0xff] }
 0x623   : > { %7312 = vmatmul.mubr.msk.bf16.vlgmr.msra.gmra.mrb[128].mxu1 %vm20664_vm15, %v19370_v48  ;;  %vm20678_vm15 = vnez %v20374_v14 }
 0x624   : > { %7314 = vmatprep.mubr.msk.bf16.mxu1 %vm20666_vm1, %v19370_v48  ;;  %6447 = vst [vmem:[%s15877_s6 + $0x1a8] sm:$0xff] %v7832_v43  ;;  %vm20679_vm1 = vnez %v19773_v62  ;;  %v20684_v62 = vld [vmem:[#allocation128_spill] sm:$0xff] }
 0x628   : > { %7692 = vmatmul.mubr.msk.bf16.gmra.mrb[204].mxu0 %vm20665_vm10, %v19370_v48  ;;  %v5971_v3 = vpop.f32.mrb[108].mxu0 }
 0x629   : > { %7694 = vmatprep.mubr.msk.bf16.mxu0 %vm20667_vm5, %v19370_v48  ;;  %v7833_v21 = vadd.f32 %v5971_v3, %v20681_v15  ;;  %v5973_v53 = vpop.f32.mrb[109].mxu0  ;;  %v20695_v15 = vld [vmem:[#allocation116_spill] sm:$0xff] }
 0x62a   : > { %v5974_v26 = vpop.f32.mrb[110].mxu0 }
 0x62b   : > { %7316 = vmatmul.mubr.msk.bf16.gmra.mrb[132].mxu1 %vm20670_vm7, %v19370_v48  ;;  %vm20680_vm7 = vnez %v20394_v46  ;;  %6448 = vst [vmem:[%s15877_s6 + $0x1b0] sm:$0xff] %v7833_v21  ;;  %v7834_v63 = vadd.f32 %v5974_v26, %v20682_v4  ;;  %v5976_v41 = vpop.f32.mrb[111].mxu0  ;;  %v20696_v26 = vld [vmem:[#allocation115_spill] sm:$0xff] }
 0x62c   : > { %7318 = vmatprep.mubr.msk.bf16.mxu1 %vm20673_vm13, %v19370_v48  ;;  %vm20683_vm13 = vnez %v19776_v61  ;;  %v20697_v41 = vld [vmem:[#allocation45_spill] sm:$0xff] }
 0x62d   : > { %6449 = vst [vmem:[%s15877_s6 + $0x1b8] sm:$0xff] %v7834_v63 }
 0x630   : > { %7696 = vmatmul.mubr.msk.bf16.gmra.mrb[208].mxu0 %vm20672_vm9, %v19370_v48 }
 0x631   : > { %7698 = vmatprep.mubr.msk.bf16.mxu0 %vm20674_vm0, %v19370_v48  ;;  %v5979_v50 = vpop.f32.mrb[112].mxu0 }
 0x632   : > { %v7835_v31 = vadd.f32 %v5979_v50, %v20688_v56  ;;  %v5981_v33 = vpop.f32.mrb[113].mxu0  ;;  %v20701_v50 = vld [vmem:[#allocation96_spill] sm:$0xff] }
 0x633   : > { %7320 = vmatmul.mubr.msk.bf16.gmra.mrb[136].mxu1 %vm20677_vm8, %v19370_v48  ;;  %vm20685_vm8 = vnez %v20684_v62  ;;  %v5982_v61 = vpop.f32.mrb[114].mxu0 }
 0x634   : > { %7322 = vmatprep.mubr.msk.bf16.mxu1 %vm20679_vm1, %v19370_v48  ;;  %vm20686_vm1 = vnez %v19789_v11  ;;  %6450 = vst [vmem:[%s15877_s6 + $0x1c0] sm:$0xff] %v7835_v31  ;;  %v7836_v43 = vadd.f32 %v5982_v61, %v20689_v34  ;;  %v5984_v19 = vpop.f32.mrb[115].mxu0  ;;  %v20693_v11 = vld [vmem:[#allocation81_spill] sm:$0xff]  ;;  %v20704_v31 = vld [vmem:[#allocation74_spill] sm:$0xff] }
 0x636   : > { %6451 = vst [vmem:[%s15877_s6 + $0x1c8] sm:$0xff] %v7836_v43  ;;  %v20705_v43 = vld [vmem:[#allocation120_spill] sm:$0xff] }
 0x638   : > { %7700 = vmatmul.mubr.msk.bf16.gmra.mrb[212].mxu0 %vm20678_vm15, %v19370_v48 }
 0x639   : > { %7702 = vmatprep.mubr.msk.bf16.mxu0 %vm20680_vm7, %v19370_v48  ;;  %vm20687_vm7 = vnez %v20437_v37 }
 0x63b   : > { %7324 = vmatmul.mubr.msk.bf16.gmra.mrb[140].mxu1 %vm20683_vm13, %v19370_v48  ;;  %vm20690_vm13 = vnez %v19794_v18  ;;  %v5987_v3 = vpop.f32.mrb[116].mxu0 }
 0x63c   : > { %7326 = vmatprep.mubr.msk.bf16.mxu1 %vm20686_vm1, %v19370_v48  ;;  %vm20691_vm1 = vnez %v20439_v58  ;;  %v7837_v21 = vadd.f32 %v5987_v3, %v20695_v15  ;;  %v5989_v53 = vpop.f32.mrb[117].mxu0 }
 0x63d   : > { %v5990_v18 = vpop.f32.mrb[118].mxu0 }
 0x63e   : > { %6452 = vst [vmem:[%s15877_s6 + $0x1d0] sm:$0xff] %v7837_v21  ;;  %v7838_v4 = vadd.f32 %v5990_v18, %v20696_v26  ;;  %v5992_v63 = vpop.f32.mrb[119].mxu0  ;;  %v20710_v21 = vld [vmem:[#allocation73_spill] sm:$0xff] }
 0x640   : > { %7704 = vmatmul.mubr.msk.bf16.gmra.mrb[216].mxu0 %vm20685_vm8, %v19370_v48  ;;  %vm20694_vm8 = vnez %v20693_v11  ;;  %6453 = vst [vmem:[%s15877_s6 + $0x1d8] sm:$0xff] %v7838_v4 }
 0x641   : > { %7706 = vmatprep.mubr.msk.bf16.mxu0 %vm20687_vm7, %v19370_v48  ;;  %vm20692_vm7 = vnez %v19831_v60  ;;  %v20699_v60 = vld [vmem:[#allocation127_spill] sm:$0xff] }
 0x643   : > { %7328 = vmatmul.mubr.msk.bf16.gmra.mrb[144].mxu1 %vm20690_vm13, %v19370_v48  ;;  %vm20698_vm13 = vnez %v20697_v41  ;;  %v5995_v56 = vpop.f32.mrb[120].mxu0  ;;  %v20715_v41 = vld [vmem:[#allocation53_spill] sm:$0xff] }
 0x644   : > { %7330 = vmatprep.mubr.msk.bf16.mxu1 %vm20692_vm7, %v19370_v48  ;;  %vm20700_vm7 = vnez %v20699_v60  ;;  %v7839_v33 = vadd.f32 %v5995_v56, %v20704_v31  ;;  %v5997_v61 = vpop.f32.mrb[121].mxu0 }
 0x645   : > { %v5998_v34 = vpop.f32.mrb[122].mxu0  ;;  %v20720_v61 = vld [vmem:[#allocation57_spill] sm:$0xff] }
 0x646   : > { %6454 = vst [vmem:[%s15877_s6 + $0x1e0] sm:$0xff] %v7839_v33  ;;  %v7840_v19 = vadd.f32 %v5998_v34, %v20705_v43  ;;  %v6000_v3 = vpop.f32.mrb[123].mxu0  ;;  %v20717_v33 = vld [vmem:[#allocation99_spill] sm:$0xff] }
 0x648   : > { %7708 = vmatmul.mubr.msk.bf16.gmra.mrb[220].mxu0 %vm20691_vm1, %v19370_v48  ;;  %vm20703_vm1 = vnez %v20501_v39  ;;  %6455 = vst [vmem:[%s15877_s6 + $0x1e8] sm:$0xff] %v7840_v19 }
 0x649   : > { %7710 = vmatprep.mubr.msk.bf16.mxu0 %vm20694_vm8, %v19370_v48  ;;  %vm20702_vm8 = vnez %v20701_v50 }
 0x64b   : > { %7332 = vmatmul.mubr.msk.bf16.gmra.mrb[148].mxu1 %vm20698_vm13, %v19370_v48  ;;  %vm20706_vm13 = vnez %v19857_v45  ;;  %v20711_v45 = vld [vmem:[#allocation119_spill] sm:$0xff] }
 0x64c   : > { %7334 = vmatprep.mubr.msk.bf16.mxu1 %vm20702_vm8, %v19370_v48  ;;  %vm20707_vm8 = vnez %v20503_v1 }
 0x64d   : > { %v6003_v15 = vpop.f32.mrb[124].mxu0 }
 0x64e   : > { %v7841_v53 = vadd.f32 %v6003_v15, %v20710_v21  ;;  %v6005_v18 = vpop.f32.mrb[125].mxu0 }
 0x64f   : > { %v6006_v26 = vpop.f32.mrb[126].mxu0 }
 0x650   : > { %7712 = vmatmul.mubr.msk.bf16.gmra.mrb[224].mxu0 %vm20700_vm7, %v19370_v48  ;;  %vm20709_vm7 = vnez %v20521_v54  ;;  %6456 = vst [vmem:[%s15877_s6 + $0x1f0] sm:$0xff] %v7841_v53  ;;  %v7842_v4 = vadd.f32 %v6006_v26, %v20711_v45  ;;  %v6008_v63 = vpop.f32.mrb[127].mxu0 }
 0x651   : > { %7714 = vmatprep.mubr.msk.bf16.mxu0 %vm20703_vm1, %v19370_v48  ;;  %vm20708_vm1 = vnez %v19895_v16  ;;  %v20713_v16 = vld [vmem:[#allocation86_spill] sm:$0xff] }
 0x652   : > { %6457 = vst [vmem:[%s15877_s6 + $0x1f8] sm:$0xff] %v7842_v4 }
 0x653   : > { %7336 = vmatmul.mubr.msk.bf16.gmra.mrb[152].mxu1 %vm20706_vm13, %v19370_v48  ;;  %vm20712_vm13 = vnez %v19898_v55 }
 0x654   : > { %7338 = vmatprep.mubr.msk.bf16.mxu1 %vm20708_vm1, %v19370_v48  ;;  %vm20714_vm1 = vnez %v20713_v16 }
 0x657   : > { %v17482_v50 = vpop.f32.mrb[128].mxu0 }
 0x658   : > { %7716 = vmatmul.mubr.msk.bf16.gmra.mrb[228].mxu0 %vm20707_vm8, %v19370_v48  ;;  %v6013_v56 = vpop.f32.mrb[129].mxu0 }
 0x659   : > { %7718 = vmatprep.mubr.msk.bf16.mxu0 %vm20709_vm7, %v19370_v48  ;;  %vm20716_vm7 = vnez %v20715_v41  ;;  %v17484_v31 = vpop.f32.mrb[130].mxu0 }
 0x65a   : > { %v6016_v55 = vpop.f32.mrb[131].mxu0 }
 0x65b   : > { %7340 = vmatmul.mubr.msk.bf16.gmra.mrb[156].mxu1 %vm20712_vm13, %v19370_v48  ;;  %vm20718_vm13 = vnez %v20717_v33 }
 0x65c   : > { %7342 = vmatprep.mubr.msk.bf16.mxu1 %vm20716_vm7, %v19370_v48  ;;  %vm20721_vm7 = vnez %v20720_v61 }
 0x65f   : > { %v17498_v34 = vpop.f32.mrb[132].mxu0 }
 0x660   : > { %7720 = vmatmul.mubr.msk.bf16.gmra.mrb[232].mxu0 %vm20714_vm1, %v19370_v48  ;;  %vm20719_vm1 = vnez %v20566_v9  ;;  %v6021_v43 = vpop.f32.mrb[133].mxu0 }
 0x661   : > { %7722 = vmatprep.mubr.msk.bf16.mxu0 %vm17013_vm2, %v19370_v48  ;;  %vm20722_vm2 = vnez %v20576_v30  ;;  %v17500_v19 = vpop.f32.mrb[134].mxu0 }
 0x662   : > { %v6024_v3 = vpop.f32.mrb[135].mxu0 }
 0x663   : > { %7344 = vmatmul.mubr.msk.bf16.gmra.mrb[160].mxu1 %vm20718_vm13, %v19370_v48  ;;  %vm20723_vm13 = vnez %v19959_v7 }
 0x664   : > { %7346 = vmatprep.mubr.msk.bf16.mxu1 %vm20721_vm7, %v19370_v48  ;;  %vm20725_vm7 = vnez %v19979_v47 }
 0x668   : > { %7724 = vmatmul.mubr.msk.bf16.gmra.mrb[236].mxu0 %vm20719_vm1, %v19370_v48  ;;  %vm20724_vm1 = vnez %v20578_v29 }
 0x669   : > { %7726 = vmatprep.mubr.msk.bf16.mxu0 %vm20722_vm2, %v19370_v48  ;;  %vm20726_vm2 = vnez %v20601_v20  ;;  %v17514_v15 = vpop.f32.mrb[136].mxu0 }
 0x66a   : > { %v6029_v21 = vpop.f32.mrb[137].mxu0 }
 0x66b   : > { %7348 = vmatmul.mubr.msk.bf16.gmra.mrb[164].mxu1 %vm20723_vm13, %v19370_v48  ;;  %v17516_v53 = vpop.f32.mrb[138].mxu0  ;;  %vm20727_vm13 = vnez %v19982_v8 }
 0x66c   : > { %7350 = vmatprep.mubr.msk.bf16.mxu1 %vm20725_vm7, %v19370_v48  ;;  %v6032_v18 = vpop.f32.mrb[139].mxu0  ;;  %vm20729_vm7 = vnez %v20025_v57 }
 0x66d   : > { %v20742_v18 = vld [vmem:[#allocation78_spill] sm:$0xff] }
 0x670   : > { %7728 = vmatmul.mubr.msk.bf16.gmra.mrb[240].mxu0 %vm20724_vm1, %v19370_v48  ;;  %vm20728_vm1 = vnez %v20604_v5 }
 0x671   : > { %7730 = vmatprep.mubr.msk.bf16.mxu0 %vm20726_vm2, %v19370_v48 }
 0x673   : > { %7352 = vmatmul.mubr.msk.bf16.gmra.mrb[168].mxu1 %vm20727_vm13, %v19370_v48  ;;  %v17530_v7 = vpop.f32.mrb[140].mxu0  ;;  %vm20730_vm13 = vnez %v20027_v52 }
 0x674   : > { %7354 = vmatprep.mubr.msk.bf16.mxu1 %vm20729_vm7, %v19370_v48  ;;  %v6037_v47 = vpop.f32.mrb[141].mxu0  ;;  %vm20732_vm7 = vnez %v20047_v0 }
 0x675   : > { %v17532_v26 = vpop.f32.mrb[142].mxu0 }
 0x676   : > { %v6040_v45 = vpop.f32.mrb[143].mxu0 }
 0x678   : > { %7732 = vmatmul.mubr.msk.bf16.gmra.mrb[244].mxu0 %vm20728_vm1, %v19370_v48  ;;  %vm20731_vm1 = vnez %v20628_v35 }
 0x679   : > { %7734 = vmatprep.mubr.msk.bf16.mxu0 %vm17241_vm6, %v19370_v48 }
 0x67b   : > { %7356 = vmatmul.mubr.msk.bf16.gmra.mrb[172].mxu1 %vm20730_vm13, %v19370_v48  ;;  %v17546_v8 = vpop.f32.mrb[144].mxu0  ;;  %vm20733_vm13 = vnez %v20591_v44 }
 0x67c   : > { %7358 = vmatprep.mubr.msk.bf16.mxu1 %vm20732_vm7, %v19370_v48  ;;  %v6045_v57 = vpop.f32.mrb[145].mxu0  ;;  %vm20734_vm7 = vnez %v20094_v59 }
 0x67d   : > { %v17548_v4 = vpop.f32.mrb[146].mxu0 }
 0x67e   : > { %v6048_v63 = vpop.f32.mrb[147].mxu0 }
 0x680   : > { %7736 = vmatmul.mubr.msk.bf16.gmra.mrb[248].mxu0 %vm20731_vm1, %v19370_v48 }
 0x681   : > { %7738 = vmatprep.mubr.msk.bf16.mxu0 %vm17326_vm14, %v19370_v48  ;;  %vm20735_vm14 = vnez %v20096_v12 }
 0x683   : > { %7360 = vmatmul.mubr.msk.bf16.gmra.mrb[176].mxu1 %vm20733_vm13, %v19370_v48  ;;  %vm20736_vm13 = vnez %v20115_v24 }
 0x684   : > { %7362 = vmatprep.mubr.msk.bf16.mxu1 %vm20734_vm7, %v19370_v48  ;;  %vm20737_vm7 = vnez %v20117_v2 }
 0x685   : > { %v17559_v52 = vpop.f32.mrb[148].mxu0 }
 0x686   : > { %v6053_v0 = vpop.f32.mrb[149].mxu0 }
 0x687   : > { %v17561_v41 = vpop.f32.mrb[150].mxu0 }
 0x688   : > { %7740 = vmatmul.mubr.msk.bf16.gmra.mrb[252].mxu0 %vm17334_vm3, %v19370_v48  ;;  %v6056_v56 = vpop.f32.mrb[151].mxu0  ;;  %vm20738_vm3 = vnez %v20160_v38 }
 0x68b   : > { %7364 = vmatmul.mubr.msk.bf16.gmra.mrb[180].mxu1 %vm20735_vm14, %v19370_v48  ;;  %vm20739_vm14 = vnez %v20162_v40 }
 0x68c   : > { %7366 = vmatprep.mubr.msk.bf16.mxu1 %vm20736_vm13, %v19370_v48  ;;  %vm20740_vm13 = vnez %v20182_v36 }
 0x68f   : > { %v17569_v44 = vpop.f32.mrb[152].mxu0 }
 0x690   : > { %v6061_v55 = vpop.f32.mrb[153].mxu0 }
 0x691   : > { %v17571_v33 = vpop.f32.mrb[154].mxu0 }
 0x692   : > { %v6064_v59 = vpop.f32.mrb[155].mxu0 }
 0x693   : > { %7368 = vmatmul.mubr.msk.bf16.gmra.mrb[184].mxu1 %vm20737_vm7, %v19370_v48  ;;  %vm20743_vm7 = vnez %v20742_v18 }
 0x694   : > { %7370 = vmatprep.mubr.msk.bf16.mxu1 %vm20738_vm3, %v19370_v48  ;;  %vm20741_vm3 = vnez %v20184_v10 }
 0x697   : > { %v17579_v12 = vpop.f32.mrb[156].mxu0 }
 0x698   : > { %v6069_v61 = vpop.f32.mrb[157].mxu0 }
 0x699   : > { %v17581_v43 = vpop.f32.mrb[158].mxu0 }
 0x69a   : > { %v6072_v24 = vpop.f32.mrb[159].mxu0 }
 0x69b   : > { %7372 = vmatmul.mubr.msk.bf16.gmra.mrb[188].mxu1 %vm20739_vm14, %v19370_v48  ;;  %vm20744_vm14 = vnez %v20646_v23 }
 0x69c   : > { %7374 = vmatprep.mubr.msk.bf16.mxu1 %vm20740_vm13, %v19370_v48  ;;  %vm20753_vm13 = vnez %v20713_v16 }
 0x6a1   : > { %v17589_v2 = vpop.f32.mrb[160].mxu0 }
 0x6a2   : > { %v6077_v3 = vpop.f32.mrb[161].mxu0 }
 0x6a3   : > { %v17591_v21 = vpop.f32.mrb[162].mxu0  ;;  %7376 = vmatmul.mubr.msk.bf16.gmra.mrb[192].mxu1 %vm20741_vm3, %v19370_v48  ;;  %vm20754_vm3 = vnez %v20564_v27 }
 0x6a4   : > { %v6080_v38 = vpop.f32.mrb[163].mxu0  ;;  %7378 = vmatprep.mubr.msk.bf16.mxu1 %vm20743_vm7, %v19370_v48  ;;  %vm20756_vm7 = vnez %v20576_v30 }
 0x6ab   : > { %v17599_v40 = vpop.f32.mrb[164].mxu0  ;;  %7380 = vmatmul.mubr.msk.bf16.gmra.mrb[196].mxu1 %vm20744_vm14, %v19370_v48  ;;  %vm20757_vm14 = vnez %v20578_v29 }
 0x6ac   : > { %v6085_v47 = vpop.f32.mrb[165].mxu0  ;;  %7382 = vmatprep.mubr.msk.bf16.mxu1 %vm20649_vm11, %v19370_v48  ;;  %vm20745_vm11 = vnez %v20394_v46 }
 0x6ad   : > { %v17601_v45 = vpop.f32.mrb[166].mxu0 }
 0x6ae   : > { %v6088_v36 = vpop.f32.mrb[167].mxu0 }
 0x6b3   : > { %v17609_v10 = vpop.f32.mrb[168].mxu0  ;;  %7384 = vmatmul.mubr.msk.bf16.gmra.mrb[200].mxu1 %vm20659_vm4, %v19370_v48  ;;  %vm20746_vm4 = vnez %v20684_v62 }
 0x6b4   : > { %v6093_v57 = vpop.f32.mrb[169].mxu0  ;;  %7386 = vmatprep.mubr.msk.bf16.mxu1 %vm20661_vm12, %v19370_v48  ;;  %vm20747_vm12 = vnez %v20437_v37 }
 0x6b5   : > { %v17611_v63 = vpop.f32.mrb[170].mxu0 }
 0x6b6   : > { %v6096_v0 = vpop.f32.mrb[171].mxu0 }
 0x6bb   : > { %v17619_v23 = vpop.f32.mrb[172].mxu0  ;;  %7388 = vmatmul.mubr.msk.bf16.gmra.mrb[204].mxu1 %vm20665_vm10, %v19370_v48  ;;  %vm20748_vm10 = vnez %v20439_v58 }
 0x6bc   : > { %v6101_v56 = vpop.f32.mrb[173].mxu0  ;;  %7390 = vmatprep.mubr.msk.bf16.mxu1 %vm20667_vm5, %v19370_v48  ;;  %vm20749_vm5 = vnez %v20693_v11 }
 0x6bd   : > { %v17621_v55 = vpop.f32.mrb[174].mxu0 }
 0x6be   : > { %v6104_v49 = vpop.f32.mrb[175].mxu0 }
 0x6c3   : > { %v17629_v32 = vpop.f32.mrb[176].mxu0  ;;  %7392 = vmatmul.mubr.msk.bf16.gmra.mrb[208].mxu1 %vm20672_vm9, %v19370_v48  ;;  %vm20750_vm9 = vnez %v20699_v60 }
 0x6c4   : > { %v6109_v59 = vpop.f32.mrb[177].mxu0  ;;  %7394 = vmatprep.mubr.msk.bf16.mxu1 %vm20674_vm0, %v19370_v48  ;;  %vm20751_vm0 = vnez %v20501_v39 }
 0x6c5   : > { %v17631_v61 = vpop.f32.mrb[178].mxu0 }
 0x6c6   : > { %v6112_v25 = vpop.f32.mrb[179].mxu0 }
 0x6cb   : > { %v17639_v42 = vpop.f32.mrb[180].mxu0  ;;  %7396 = vmatmul.mubr.msk.bf16.gmra.mrb[212].mxu1 %vm20678_vm15, %v19370_v48  ;;  %vm20752_vm15 = vnez %v20521_v54 }
 0x6cc   : > { %v6117_v24 = vpop.f32.mrb[181].mxu0  ;;  %7398 = vmatprep.mubr.msk.bf16.mxu1 %vm20745_vm11, %v19370_v48 }
 0x6cd   : > { %v17641_v3 = vpop.f32.mrb[182].mxu0 }
 0x6ce   : > { %v6120_v6 = vpop.f32.mrb[183].mxu0 }
 0x6d3   : > { %v17649_v51 = vpop.f32.mrb[184].mxu0  ;;  %7400 = vmatmul.mubr.msk.bf16.gmra.mrb[216].mxu1 %vm20746_vm4, %v19370_v48 }
 0x6d4   : > { %v6125_v38 = vpop.f32.mrb[185].mxu0  ;;  %7402 = vmatprep.mubr.msk.bf16.mxu1 %vm20747_vm12, %v19370_v48 }
 0x6d5   : > { %v17651_v18 = vpop.f32.mrb[186].mxu0 }
 0x6d6   : > { %v6128_v13 = vpop.f32.mrb[187].mxu0 }
 0x6db   : > { %v17659_v14 = vpop.f32.mrb[188].mxu0  ;;  %7404 = vmatmul.mubr.msk.bf16.gmra.mrb[220].mxu1 %vm20748_vm10, %v19370_v48 }
 0x6dc   : > { %v6133_v47 = vpop.f32.mrb[189].mxu0  ;;  %7406 = vmatprep.mubr.msk.bf16.mxu1 %vm20749_vm5, %v19370_v48 }
 0x6dd   : > { %v17661_v36 = vpop.f32.mrb[190].mxu0 }
 0x6de   : > { %v6136_v46 = vpop.f32.mrb[191].mxu0 }
 0x6e3   : > { %v17669_v62 = vpop.f32.mrb[192].mxu0  ;;  %7408 = vmatmul.mubr.msk.bf16.gmra.mrb[224].mxu1 %vm20750_vm9, %v19370_v48 }
 0x6e4   : > { %v6141_v57 = vpop.f32.mrb[193].mxu0  ;;  %7410 = vmatprep.mubr.msk.bf16.mxu1 %vm20751_vm0, %v19370_v48 }
 0x6e5   : > { %v17671_v0 = vpop.f32.mrb[194].mxu0 }
 0x6e6   : > { %v6144_v37 = vpop.f32.mrb[195].mxu0 }
 0x6eb   : > { %v17679_v58 = vpop.f32.mrb[196].mxu0  ;;  %7412 = vmatmul.mubr.msk.bf16.gmra.mrb[228].mxu1 %vm20707_vm8, %v19370_v48  ;;  %vm20755_vm8 = vnez %v20566_v9 }
 0x6ec   : > { %v6149_v56 = vpop.f32.mrb[197].mxu0  ;;  %7414 = vmatprep.mubr.msk.bf16.mxu1 %vm20752_vm15, %v19370_v48 }
 0x6ed   : > { %v17681_v49 = vpop.f32.mrb[198].mxu0 }
 0x6ee   : > { %v6152_v11 = vpop.f32.mrb[199].mxu0 }
 0x6f3   : > { %v17689_v60 = vpop.f32.mrb[200].mxu0  ;;  %7416 = vmatmul.mubr.msk.bf16.gmra.mrb[232].mxu1 %vm20753_vm13, %v19370_v48 }
 0x6f4   : > { %v6157_v59 = vpop.f32.mrb[201].mxu0  ;;  %7418 = vmatprep.mubr.msk.bf16.mxu1 %vm20754_vm3, %v19370_v48 }
 0x6f5   : > { %v17691_v39 = vpop.f32.mrb[202].mxu0 }
 0x6f6   : > { %v6160_v25 = vpop.f32.mrb[203].mxu0  ;;  %v5337_v1 = vpop.f32.mrb[128].mxu1 }
 0x6f7   : > { %v7843_v54 = vadd.f32 %v17482_v50, %v5337_v1  ;;  %v5339_v6 = vpop.f32.mrb[129].mxu1 }
 0x6f8   : > { %v5340_v13 = vpop.f32.mrb[130].mxu1 }
 0x6f9   : > { %6458 = vst [vmem:[%s15877_s6 + $0x200] sm:$0xff] %v7843_v54  ;;  %v7844_v46 = vadd.f32 %v17484_v31, %v5340_v13  ;;  %v5342_v16 = vpop.f32.mrb[131].mxu1 }
 0x6fb   : > { %v17699_v24 = vpop.f32.mrb[204].mxu0  ;;  %6459 = vst [vmem:[%s15877_s6 + $0x208] sm:$0xff] %v7844_v46  ;;  %7420 = vmatmul.mubr.msk.bf16.gmra.mrb[236].mxu1 %vm20755_vm8, %v19370_v48 }
 0x6fc   : > { %v6165_v38 = vpop.f32.mrb[205].mxu0  ;;  %7422 = vmatprep.mubr.msk.bf16.mxu1 %vm20756_vm7, %v19370_v48 }
 0x6fd   : > { %v17702_v47 = vpop.f32.mrb[206].mxu0 }
 0x6fe   : > { %v6168_v57 = vpop.f32.mrb[207].mxu0  ;;  %v5345_v27 = vpop.f32.mrb[132].mxu1 }
 0x6ff   : > { %v7845_v37 = vadd.f32 %v17498_v34, %v5345_v27  ;;  %v5347_v56 = vpop.f32.mrb[133].mxu1 }
 0x700   : > { %v5348_v31 = vpop.f32.mrb[134].mxu1 }
 0x701   : > { %6460 = vst [vmem:[%s15877_s6 + $0x210] sm:$0xff] %v7845_v37  ;;  %v7846_v25 = vadd.f32 %v17500_v19, %v5348_v31  ;;  %v5350_v9 = vpop.f32.mrb[135].mxu1 }
 0x703   : > { %v17713_v50 = vpop.f32.mrb[208].mxu0  ;;  %6461 = vst [vmem:[%s15877_s6 + $0x218] sm:$0xff] %v7846_v25  ;;  %7424 = vmatmul.mubr.msk.bf16.gmra.mrb[240].mxu1 %vm20757_vm14, %v19370_v48 }
 0x704   : > { %v6173_v11 = vpop.f32.mrb[209].mxu0  ;;  %7426 = vmatprep.mubr.msk.bf16.mxu1 %vm20726_vm2, %v19370_v48  ;;  %vm20758_vm2 = vnez %v20604_v5 }
 0x705   : > { %v17716_v59 = vpop.f32.mrb[210].mxu0 }
 0x706   : > { %v6176_v1 = vpop.f32.mrb[211].mxu0  ;;  %v5353_v30 = vpop.f32.mrb[136].mxu1 }
 0x707   : > { %v7847_v54 = vadd.f32 %v17514_v15, %v5353_v30  ;;  %v5355_v6 = vpop.f32.mrb[137].mxu1 }
 0x708   : > { %v5356_v19 = vpop.f32.mrb[138].mxu1 }
 0x709   : > { %6462 = vst [vmem:[%s15877_s6 + $0x220] sm:$0xff] %v7847_v54  ;;  %v7848_v46 = vadd.f32 %v17516_v53, %v5356_v19  ;;  %v5358_v29 = vpop.f32.mrb[139].mxu1 }
 0x70b   : > { %v17727_v34 = vpop.f32.mrb[212].mxu0  ;;  %6463 = vst [vmem:[%s15877_s6 + $0x228] sm:$0xff] %v7848_v46  ;;  %7428 = vmatmul.mubr.msk.bf16.gmra.mrb[244].mxu1 %vm20758_vm2, %v19370_v48 }
 0x70c   : > { %v6181_v38 = vpop.f32.mrb[213].mxu0  ;;  %7430 = vmatprep.mubr.msk.bf16.mxu1 %vm17241_vm6, %v19370_v48  ;;  %vm20759_vm6 = vnez %v20654_v22 }
 0x70d   : > { %v17730_v13 = vpop.f32.mrb[214].mxu0 }
 0x70e   : > { %v6184_v16 = vpop.f32.mrb[215].mxu0  ;;  %v5361_v20 = vpop.f32.mrb[140].mxu1 }
 0x70f   : > { %v7849_v57 = vadd.f32 %v17530_v7, %v5361_v20  ;;  %v5363_v27 = vpop.f32.mrb[141].mxu1 }
 0x710   : > { %v5364_v53 = vpop.f32.mrb[142].mxu1 }
 0x711   : > { %6464 = vst [vmem:[%s15877_s6 + $0x230] sm:$0xff] %v7849_v57  ;;  %v7850_v11 = vadd.f32 %v17532_v26, %v5364_v53  ;;  %v5366_v5 = vpop.f32.mrb[143].mxu1 }
 0x713   : > { %v17741_v15 = vpop.f32.mrb[216].mxu0  ;;  %6465 = vst [vmem:[%s15877_s6 + $0x238] sm:$0xff] %v7850_v11  ;;  %7432 = vmatmul.mubr.msk.bf16.gmra.mrb[248].mxu1 %vm20731_vm1, %v19370_v48  ;;  %vm20760_vm1 = vnez %v20657_v28 }
 0x714   : > { %v6189_v37 = vpop.f32.mrb[217].mxu0  ;;  %7434 = vmatprep.mubr.msk.bf16.mxu1 %vm20759_vm6, %v19370_v48 }
 0x715   : > { %v17744_v56 = vpop.f32.mrb[218].mxu0 }
 0x716   : > { %v6192_v31 = vpop.f32.mrb[219].mxu0  ;;  %v5369_v17 = vpop.f32.mrb[144].mxu1 }
 0x717   : > { %v7851_v25 = vadd.f32 %v17546_v8, %v5369_v17  ;;  %v5371_v9 = vpop.f32.mrb[145].mxu1 }
 0x718   : > { %v5372_v26 = vpop.f32.mrb[146].mxu1 }
 0x719   : > { %6466 = vst [vmem:[%s15877_s6 + $0x240] sm:$0xff] %v7851_v25  ;;  %v7852_v54 = vadd.f32 %v17548_v4, %v5372_v26  ;;  %v5374_v35 = vpop.f32.mrb[147].mxu1 }
 0x71b   : > { %v17755_v7 = vpop.f32.mrb[220].mxu0  ;;  %6467 = vst [vmem:[%s15877_s6 + $0x248] sm:$0xff] %v7852_v54  ;;  %7436 = vmatmul.mubr.msk.bf16.gmra.mrb[252].mxu1 %vm20760_vm1, %v19370_v48 }
 0x71c   : > { %v6197_v1 = vpop.f32.mrb[221].mxu0 }
 0x71d   : > { %v17758_v30 = vpop.f32.mrb[222].mxu0 }
 0x71e   : > { %v6200_v6 = vpop.f32.mrb[223].mxu0  ;;  %v5377_v22 = vpop.f32.mrb[148].mxu1 }
 0x71f   : > { %v7853_v8 = vadd.f32 %v17559_v52, %v5377_v22  ;;  %v5379_v19 = vpop.f32.mrb[149].mxu1 }
 0x720   : > { %v5380_v29 = vpop.f32.mrb[150].mxu1 }
 0x721   : > { %6468 = vst [vmem:[%s15877_s6 + $0x250] sm:$0xff] %v7853_v8  ;;  %v7854_v4 = vadd.f32 %v17561_v41, %v5380_v29  ;;  %v5382_v20 = vpop.f32.mrb[151].mxu1 }
 0x723   : > { %v17766_v38 = vpop.f32.mrb[224].mxu0  ;;  %6469 = vst [vmem:[%s15877_s6 + $0x258] sm:$0xff] %v7854_v4 }
 0x724   : > { %v6205_v46 = vpop.f32.mrb[225].mxu0 }
 0x725   : > { %v17769_v16 = vpop.f32.mrb[226].mxu0 }
 0x726   : > { %v6208_v57 = vpop.f32.mrb[227].mxu0  ;;  %v5385_v28 = vpop.f32.mrb[152].mxu1 }
 0x727   : > { %v7855_v27 = vadd.f32 %v17569_v44, %v5385_v28  ;;  %v5387_v37 = vpop.f32.mrb[153].mxu1 }
 0x728   : > { %v5388_v53 = vpop.f32.mrb[154].mxu1 }
 0x729   : > { %6470 = vst [vmem:[%s15877_s6 + $0x260] sm:$0xff] %v7855_v27  ;;  %v7856_v5 = vadd.f32 %v17571_v33, %v5388_v53  ;;  %v5390_v31 = vpop.f32.mrb[155].mxu1 }
 0x72b   : > { %v17774_v48 = vpop.f32.mrb[228].mxu0  ;;  %6471 = vst [vmem:[%s15877_s6 + $0x268] sm:$0xff] %v7856_v5 }
 0x72c   : > { %v6213_v52 = vpop.f32.mrb[229].mxu0 }
 0x72d   : > { %v17777_v11 = vpop.f32.mrb[230].mxu0 }
 0x72e   : > { %v6216_v41 = vpop.f32.mrb[231].mxu0  ;;  %v5393_v17 = vpop.f32.mrb[156].mxu1 }
 0x72f   : > { %v7857_v9 = vadd.f32 %v17579_v12, %v5393_v17  ;;  %v5395_v1 = vpop.f32.mrb[157].mxu1 }
 0x730   : > { %v5396_v26 = vpop.f32.mrb[158].mxu1 }
 0x731   : > { %6472 = vst [vmem:[%s15877_s6 + $0x270] sm:$0xff] %v7857_v9  ;;  %v7858_v35 = vadd.f32 %v17581_v43, %v5396_v26  ;;  %v5398_v6 = vpop.f32.mrb[159].mxu1 }
 0x733   : > { %v17782_v25 = vpop.f32.mrb[232].mxu0  ;;  %6473 = vst [vmem:[%s15877_s6 + $0x278] sm:$0xff] %v7858_v35 }
 0x734   : > { %v6221_v44 = vpop.f32.mrb[233].mxu0 }
 0x735   : > { %v17785_v54 = vpop.f32.mrb[234].mxu0 }
 0x736   : > { %v6224_v33 = vpop.f32.mrb[235].mxu0  ;;  %v5401_v22 = vpop.f32.mrb[160].mxu1 }
 0x737   : > { %v7859_v19 = vadd.f32 %v17589_v2, %v5401_v22  ;;  %v5403_v46 = vpop.f32.mrb[161].mxu1 }
 0x738   : > { %v5404_v29 = vpop.f32.mrb[162].mxu1 }
 0x739   : > { %6474 = vst [vmem:[%s15877_s6 + $0x280] sm:$0xff] %v7859_v19  ;;  %v7860_v20 = vadd.f32 %v17591_v21, %v5404_v29  ;;  %v5406_v57 = vpop.f32.mrb[163].mxu1 }
 0x73b   : > { %v17790_v8 = vpop.f32.mrb[236].mxu0  ;;  %6475 = vst [vmem:[%s15877_s6 + $0x288] sm:$0xff] %v7860_v20 }
 0x73c   : > { %v6229_v12 = vpop.f32.mrb[237].mxu0 }
 0x73d   : > { %v17793_v4 = vpop.f32.mrb[238].mxu0 }
 0x73e   : > { %v6232_v43 = vpop.f32.mrb[239].mxu0  ;;  %v5409_v28 = vpop.f32.mrb[164].mxu1 }
 0x73f   : > { %v7861_v37 = vadd.f32 %v17599_v40, %v5409_v28  ;;  %v5411_v52 = vpop.f32.mrb[165].mxu1 }
 0x740   : > { %v5412_v53 = vpop.f32.mrb[166].mxu1 }
 0x741   : > { %6476 = vst [vmem:[%s15877_s6 + $0x290] sm:$0xff] %v7861_v37  ;;  %v7862_v31 = vadd.f32 %v17601_v45, %v5412_v53  ;;  %v5414_v41 = vpop.f32.mrb[167].mxu1 }
 0x743   : > { %v17798_v27 = vpop.f32.mrb[240].mxu0  ;;  %6477 = vst [vmem:[%s15877_s6 + $0x298] sm:$0xff] %v7862_v31 }
 0x744   : > { %v6237_v2 = vpop.f32.mrb[241].mxu0 }
 0x745   : > { %v17801_v5 = vpop.f32.mrb[242].mxu0 }
 0x746   : > { %v6240_v21 = vpop.f32.mrb[243].mxu0  ;;  %v5417_v17 = vpop.f32.mrb[168].mxu1 }
 0x747   : > { %v7863_v1 = vadd.f32 %v17609_v10, %v5417_v17  ;;  %v5419_v44 = vpop.f32.mrb[169].mxu1 }
 0x748   : > { %v5420_v26 = vpop.f32.mrb[170].mxu1 }
 0x749   : > { %6478 = vst [vmem:[%s15877_s6 + $0x2a0] sm:$0xff] %v7863_v1  ;;  %v7864_v6 = vadd.f32 %v17611_v63, %v5420_v26  ;;  %v5422_v33 = vpop.f32.mrb[171].mxu1 }
 0x74b   : > { %v17806_v9 = vpop.f32.mrb[244].mxu0  ;;  %6479 = vst [vmem:[%s15877_s6 + $0x2a8] sm:$0xff] %v7864_v6 }
 0x74c   : > { %v6245_v40 = vpop.f32.mrb[245].mxu0 }
 0x74d   : > { %v17809_v35 = vpop.f32.mrb[246].mxu0 }
 0x74e   : > { %v6248_v45 = vpop.f32.mrb[247].mxu0  ;;  %v5425_v22 = vpop.f32.mrb[172].mxu1 }
 0x74f   : > { %v7865_v46 = vadd.f32 %v17619_v23, %v5425_v22  ;;  %v5427_v12 = vpop.f32.mrb[173].mxu1 }
 0x750   : > { %v5428_v29 = vpop.f32.mrb[174].mxu1 }
 0x751   : > { %6480 = vst [vmem:[%s15877_s6 + $0x2b0] sm:$0xff] %v7865_v46  ;;  %v7866_v57 = vadd.f32 %v17621_v55, %v5428_v29  ;;  %v5430_v43 = vpop.f32.mrb[175].mxu1 }
 0x753   : > { %v17814_v19 = vpop.f32.mrb[248].mxu0  ;;  %6481 = vst [vmem:[%s15877_s6 + $0x2b8] sm:$0xff] %v7866_v57 }
 0x754   : > { %v6253_v10 = vpop.f32.mrb[249].mxu0 }
 0x755   : > { %v17817_v20 = vpop.f32.mrb[250].mxu0 }
 0x756   : > { %v6256_v63 = vpop.f32.mrb[251].mxu0  ;;  %v5433_v28 = vpop.f32.mrb[176].mxu1 }
 0x757   : > { %v7867_v52 = vadd.f32 %v17629_v32, %v5433_v28  ;;  %v5435_v23 = vpop.f32.mrb[177].mxu1 }
 0x758   : > { %v5436_v53 = vpop.f32.mrb[178].mxu1 }
 0x759   : > { %6482 = vst [vmem:[%s15877_s6 + $0x2c0] sm:$0xff] %v7867_v52  ;;  %v7868_v41 = vadd.f32 %v17631_v61, %v5436_v53  ;;  %v5438_v55 = vpop.f32.mrb[179].mxu1 }
 0x75b   : > { %v17822_v37 = vpop.f32.mrb[252].mxu0  ;;  %6483 = vst [vmem:[%s15877_s6 + $0x2c8] sm:$0xff] %v7868_v41 }
 0x75c   : > { %v6261_v2 = vpop.f32.mrb[253].mxu0 }
 0x75d   : > { %v17825_v31 = vpop.f32.mrb[254].mxu0 }
 0x75e   : > { %v6264_v21 = vpop.f32.mrb[255].mxu0  ;;  %v5441_v17 = vpop.f32.mrb[180].mxu1 }
 0x75f   : > { %v7869_v1 = vadd.f32 %v17639_v42, %v5441_v17  ;;  %v5443_v44 = vpop.f32.mrb[181].mxu1 }
 0x760   : > { %v5444_v40 = vpop.f32.mrb[182].mxu1 }
 0x761   : > { %6484 = vst [vmem:[%s15877_s6 + $0x2d0] sm:$0xff] %v7869_v1  ;;  %v7870_v32 = vadd.f32 %v17641_v3, %v5444_v40  ;;  %v5446_v26 = vpop.f32.mrb[183].mxu1 }
 0x763   : > { %6485 = vst [vmem:[%s15877_s6 + $0x2d8] sm:$0xff] %v7870_v32 }
 0x766   : > { %v5449_v6 = vpop.f32.mrb[184].mxu1 }
 0x767   : > { %v7871_v61 = vadd.f32 %v17649_v51, %v5449_v6  ;;  %v5451_v33 = vpop.f32.mrb[185].mxu1 }
 0x768   : > { %v5452_v45 = vpop.f32.mrb[186].mxu1 }
 0x769   : > { %6486 = vst [vmem:[%s15877_s6 + $0x2e0] sm:$0xff] %v7871_v61  ;;  %v7872_v22 = vadd.f32 %v17651_v18, %v5452_v45  ;;  %v5454_v46 = vpop.f32.mrb[187].mxu1 }
 0x76b   : > { %6487 = vst [vmem:[%s15877_s6 + $0x2e8] sm:$0xff] %v7872_v22 }
 0x76e   : > { %v5457_v42 = vpop.f32.mrb[188].mxu1 }
 0x76f   : > { %v7873_v12 = vadd.f32 %v17659_v14, %v5457_v42  ;;  %v5459_v10 = vpop.f32.mrb[189].mxu1 }
 0x770   : > { %v5460_v3 = vpop.f32.mrb[190].mxu1 }
 0x771   : > { %6488 = vst [vmem:[%s15877_s6 + $0x2f0] sm:$0xff] %v7873_v12  ;;  %v7874_v29 = vadd.f32 %v17661_v36, %v5460_v3  ;;  %v5462_v57 = vpop.f32.mrb[191].mxu1 }
 0x773   : > { %6489 = vst [vmem:[%s15877_s6 + $0x2f8] sm:$0xff] %v7874_v29 }
 0x776   : > { %v5465_v51 = vpop.f32.mrb[192].mxu1 }
 0x777   : > { %v7875_v43 = vadd.f32 %v17669_v62, %v5465_v51  ;;  %v5467_v63 = vpop.f32.mrb[193].mxu1 }
 0x778   : > { %v5468_v18 = vpop.f32.mrb[194].mxu1 }
 0x779   : > { %6490 = vst [vmem:[%s15877_s6 + $0x300] sm:$0xff] %v7875_v43  ;;  %v7876_v28 = vadd.f32 %v17671_v0, %v5468_v18  ;;  %v5470_v52 = vpop.f32.mrb[195].mxu1 }
 0x77b   : > { %6491 = vst [vmem:[%s15877_s6 + $0x308] sm:$0xff] %v7876_v28 }
 0x77e   : > { %v5473_v14 = vpop.f32.mrb[196].mxu1 }
 0x77f   : > { %v7877_v23 = vadd.f32 %v17679_v58, %v5473_v14  ;;  %v5475_v2 = vpop.f32.mrb[197].mxu1 }
 0x780   : > { %v5476_v36 = vpop.f32.mrb[198].mxu1 }
 0x781   : > { %6492 = vst [vmem:[%s15877_s6 + $0x310] sm:$0xff] %v7877_v23  ;;  %v7878_v53 = vadd.f32 %v17681_v49, %v5476_v36  ;;  %v5478_v41 = vpop.f32.mrb[199].mxu1 }
 0x783   : > { %6493 = vst [vmem:[%s15877_s6 + $0x318] sm:$0xff] %v7878_v53 }
 0x786   : > { %v5481_v62 = vpop.f32.mrb[200].mxu1 }
 0x787   : > { %v7879_v55 = vadd.f32 %v17689_v60, %v5481_v62  ;;  %v5483_v21 = vpop.f32.mrb[201].mxu1 }
 0x788   : > { %v5484_v0 = vpop.f32.mrb[202].mxu1 }
 0x789   : > { %6494 = vst [vmem:[%s15877_s6 + $0x320] sm:$0xff] %v7879_v55  ;;  %v7880_v17 = vadd.f32 %v17691_v39, %v5484_v0  ;;  %v5486_v1 = vpop.f32.mrb[203].mxu1 }
 0x78b   : > { %6495 = vst [vmem:[%s15877_s6 + $0x328] sm:$0xff] %v7880_v17 }
 0x78e   : > { %v5489_v58 = vpop.f32.mrb[204].mxu1 }
 0x78f   : > { %v7881_v44 = vadd.f32 %v17699_v24, %v5489_v58  ;;  %v5491_v40 = vpop.f32.mrb[205].mxu1 }
 0x790   : > { %v5492_v49 = vpop.f32.mrb[206].mxu1 }
 0x791   : > { %6496 = vst [vmem:[%s15877_s6 + $0x330] sm:$0xff] %v7881_v44  ;;  %v7882_v32 = vadd.f32 %v17702_v47, %v5492_v49  ;;  %v5494_v26 = vpop.f32.mrb[207].mxu1 }
 0x793   : > { %6497 = vst [vmem:[%s15877_s6 + $0x338] sm:$0xff] %v7882_v32 }
 0x796   : > { %v5497_v60 = vpop.f32.mrb[208].mxu1 }
 0x797   : > { %v7883_v6 = vadd.f32 %v17713_v50, %v5497_v60  ;;  %v5499_v61 = vpop.f32.mrb[209].mxu1 }
 0x798   : > { %v5500_v39 = vpop.f32.mrb[210].mxu1 }
 0x799   : > { %6498 = vst [vmem:[%s15877_s6 + $0x340] sm:$0xff] %v7883_v6  ;;  %v7884_v33 = vadd.f32 %v17716_v59, %v5500_v39  ;;  %v5502_v45 = vpop.f32.mrb[211].mxu1 }
 0x79b   : > { %6499 = vst [vmem:[%s15877_s6 + $0x348] sm:$0xff] %v7884_v33 }
 0x79e   : > { %v5505_v24 = vpop.f32.mrb[212].mxu1 }
 0x79f   : > { %v7885_v22 = vadd.f32 %v17727_v34, %v5505_v24  ;;  %v5507_v46 = vpop.f32.mrb[213].mxu1 }
 0x7a0   : > { %v5508_v47 = vpop.f32.mrb[214].mxu1 }
 0x7a1   : > { %6500 = vst [vmem:[%s15877_s6 + $0x350] sm:$0xff] %v7885_v22  ;;  %v7886_v42 = vadd.f32 %v17730_v13, %v5508_v47  ;;  %v5510_v12 = vpop.f32.mrb[215].mxu1 }
 0x7a3   : > { %6501 = vst [vmem:[%s15877_s6 + $0x358] sm:$0xff] %v7886_v42 }
 0x7a6   : > { %v5513_v50 = vpop.f32.mrb[216].mxu1 }
 0x7a7   : > { %v7887_v10 = vadd.f32 %v17741_v15, %v5513_v50  ;;  %v5515_v3 = vpop.f32.mrb[217].mxu1 }
 0x7a8   : > { %v5516_v59 = vpop.f32.mrb[218].mxu1 }
 0x7a9   : > { %6502 = vst [vmem:[%s15877_s6 + $0x360] sm:$0xff] %v7887_v10  ;;  %v7888_v29 = vadd.f32 %v17744_v56, %v5516_v59  ;;  %v5518_v57 = vpop.f32.mrb[219].mxu1 }
 0x7ab   : > { %6503 = vst [vmem:[%s15877_s6 + $0x368] sm:$0xff] %v7888_v29 }
 0x7ae   : > { %v5521_v34 = vpop.f32.mrb[220].mxu1 }
 0x7af   : > { %v7889_v51 = vadd.f32 %v17755_v7, %v5521_v34  ;;  %v5523_v43 = vpop.f32.mrb[221].mxu1 }
 0x7b0   : > { %v5524_v13 = vpop.f32.mrb[222].mxu1 }
 0x7b1   : > { %6504 = vst [vmem:[%s15877_s6 + $0x370] sm:$0xff] %v7889_v51  ;;  %v7890_v63 = vadd.f32 %v17758_v30, %v5524_v13  ;;  %v5526_v18 = vpop.f32.mrb[223].mxu1 }
 0x7b3   : > { %6505 = vst [vmem:[%s15877_s6 + $0x378] sm:$0xff] %v7890_v63 }
 0x7b6   : > { %v5529_v15 = vpop.f32.mrb[224].mxu1 }
 0x7b7   : > { %v7891_v28 = vadd.f32 %v17766_v38, %v5529_v15  ;;  %v5531_v52 = vpop.f32.mrb[225].mxu1 }
 0x7b8   : > { %v5532_v56 = vpop.f32.mrb[226].mxu1 }
 0x7b9   : > { %6506 = vst [vmem:[%s15877_s6 + $0x380] sm:$0xff] %v7891_v28  ;;  %v7892_v14 = vadd.f32 %v17769_v16, %v5532_v56  ;;  %v5534_v23 = vpop.f32.mrb[227].mxu1 }
 0x7bb   : > { %6507 = vst [vmem:[%s15877_s6 + $0x388] sm:$0xff] %v7892_v14 }
 0x7be   : > { %v5537_v7 = vpop.f32.mrb[228].mxu1 }
 0x7bf   : > { %v7893_v2 = vadd.f32 %v17774_v48, %v5537_v7  ;;  %v5539_v36 = vpop.f32.mrb[229].mxu1 }
 0x7c0   : > { %v5540_v30 = vpop.f32.mrb[230].mxu1 }
 0x7c1   : > { %6508 = vst [vmem:[%s15877_s6 + $0x390] sm:$0xff] %v7893_v2  ;;  %v7894_v53 = vadd.f32 %v17777_v11, %v5540_v30  ;;  %v5542_v41 = vpop.f32.mrb[231].mxu1 }
 0x7c3   : > { %6509 = vst [vmem:[%s15877_s6 + $0x398] sm:$0xff] %v7894_v53 }
 0x7c6   : > { %v5545_v38 = vpop.f32.mrb[232].mxu1 }
 0x7c7   : > { %v7895_v62 = vadd.f32 %v17782_v25, %v5545_v38  ;;  %v5547_v55 = vpop.f32.mrb[233].mxu1 }
 0x7c8   : > { %v5548_v16 = vpop.f32.mrb[234].mxu1 }
 0x7c9   : > { %6510 = vst [vmem:[%s15877_s6 + $0x3a0] sm:$0xff] %v7895_v62  ;;  %v7896_v21 = vadd.f32 %v17785_v54, %v5548_v16  ;;  %v5550_v0 = vpop.f32.mrb[235].mxu1 }
 0x7cb   : > { %6511 = vst [vmem:[%s15877_s6 + $0x3a8] sm:$0xff] %v7896_v21 }
 0x7ce   : > { %v5553_v48 = vpop.f32.mrb[236].mxu1 }
 0x7cf   : > { %v7897_v17 = vadd.f32 %v17790_v8, %v5553_v48  ;;  %v5555_v1 = vpop.f32.mrb[237].mxu1 }
 0x7d0   : > { %v5556_v11 = vpop.f32.mrb[238].mxu1 }
 0x7d1   : > { %6512 = vst [vmem:[%s15877_s6 + $0x3b0] sm:$0xff] %v7897_v17  ;;  %v7898_v58 = vadd.f32 %v17793_v4, %v5556_v11  ;;  %v5558_v44 = vpop.f32.mrb[239].mxu1 }
 0x7d3   : > { %6513 = vst [vmem:[%s15877_s6 + $0x3b8] sm:$0xff] %v7898_v58 }
 0x7d6   : > { %v5561_v25 = vpop.f32.mrb[240].mxu1 }
 0x7d7   : > { %v7899_v40 = vadd.f32 %v17798_v27, %v5561_v25  ;;  %v5563_v49 = vpop.f32.mrb[241].mxu1 }
 0x7d8   : > { %v5564_v54 = vpop.f32.mrb[242].mxu1 }
 0x7d9   : > { %6514 = vst [vmem:[%s15877_s6 + $0x3c0] sm:$0xff] %v7899_v40  ;;  %v7900_v32 = vadd.f32 %v17801_v5, %v5564_v54  ;;  %v5566_v26 = vpop.f32.mrb[243].mxu1 }
 0x7db   : > { %6515 = vst [vmem:[%s15877_s6 + $0x3c8] sm:$0xff] %v7900_v32 }
 0x7de   : > { %v5569_v8 = vpop.f32.mrb[244].mxu1 }
 0x7df   : > { %v7901_v60 = vadd.f32 %v17806_v9, %v5569_v8  ;;  %v5571_v4 = vpop.f32.mrb[245].mxu1 }
 0x7e0   : > { %v5572_v6 = vpop.f32.mrb[246].mxu1 }
 0x7e1   : > { %6516 = vst [vmem:[%s15877_s6 + $0x3d0] sm:$0xff] %v7901_v60  ;;  %v7902_v61 = vadd.f32 %v17809_v35, %v5572_v6  ;;  %v5574_v27 = vpop.f32.mrb[247].mxu1 }
 0x7e3   : > { %6517 = vst [vmem:[%s15877_s6 + $0x3d8] sm:$0xff] %v7902_v61 }
 0x7e6   : > { %v5577_v39 = vpop.f32.mrb[248].mxu1 }
 0x7e7   : > { %v7903_v33 = vadd.f32 %v17814_v19, %v5577_v39  ;;  %v5579_v5 = vpop.f32.mrb[249].mxu1 }
 0x7e8   : > { %v5580_v45 = vpop.f32.mrb[250].mxu1 }
 0x7e9   : > { %6518 = vst [vmem:[%s15877_s6 + $0x3e0] sm:$0xff] %v7903_v33  ;;  %v7904_v24 = vadd.f32 %v17817_v20, %v5580_v45  ;;  %v5582_v9 = vpop.f32.mrb[251].mxu1 }
 0x7eb   : > { %6519 = vst [vmem:[%s15877_s6 + $0x3e8] sm:$0xff] %v7904_v24 }
 0x7ee   : > { %v5585_v22 = vpop.f32.mrb[252].mxu1 }
 0x7ef   : > { %v7905_v35 = vadd.f32 %v17822_v37, %v5585_v22  ;;  %v5587_v46 = vpop.f32.mrb[253].mxu1 }
 0x7f0   : > { %v5588_v47 = vpop.f32.mrb[254].mxu1 }
 0x7f1   : > { %6520 = vst [vmem:[%s15877_s6 + $0x3f0] sm:$0xff] %v7905_v35  ;;  %v7906_v19 = vadd.f32 %v17825_v31, %v5588_v47  ;;  %v5590_v20 = vpop.f32.mrb[255].mxu1 }
 0x7f3   : > { %6521 = vst [vmem:[%s15877_s6 + $0x3f8] sm:$0xff] %v7906_v19 }
 0x7f4   : > { %8631 = shalt.err (!%p8628_p3)
}
 0x7f5   : > { %s8632_s24 = scalar_lea.hbm %s17908_s16, 16384  ;;  %s8636_s28 = scalar_lea.hbm %s17960_s2, 32768 }
 0x7f6   : > { %p8633_p4 = scmp.ne.s32.totalorder %s17908_s16, %s8632_s24  ;;  %p8637_p9 = scmp.lt.u32.totalorder %s17908_s16, %s17960_s2 }
 0x7f7   : > { %p8638_p10 = scmp.lt.u32.totalorder %s8636_s28, %s8632_s24  ;;  %p8640_p12 = scmp.lt.u32.totalorder %s8632_s24, %s17908_s16 }
 0x7f8   : > { %p8634_p7 = pnand %p8633_p4, %p8743_p5 }
 0x7f9   : > { %p8639_p11 = por %p8638_p10, %p8637_p9 }
 0x7fa   : > { %p8635_p8 = pneg %p8634_p7 }
 0x7fb   : > { %p8641_p13 = por %p8640_p12, %p8639_p11 }
 0x7fd   : > { %p8642_p0 = pnand %p8641_p13, %p8635_p8 }
 0x7ff   : > { %8645 = shalt.err (!%p8642_p0)
}
 0x800   : > { %s8688_s3 = smov 128   ;;  %s8689_s4 = smov 8  }
 0x801   : > { %8163 = dma.vmem_to_hbm [thread:$0]  (%p8743_p5), %s17910_s7, 16384, %s17908_s16, %s17917_s13, %s8688_s3, %s8688_s3, %s8689_s4  }
 0x802 PF: > { %p8169_p1 = scmp.ge.s32.totalorder %s8680_s12, 2  ;;  %s6551_s5 = sand.u32 1, %s8668_s9  }
 0x803   : > { %s6552_s6 = scalar_lea.sflag [#allocation3], %s6551_s5 }
 0x804   : > { %p8166_p2 = pnand %p8169_p1, %p8747_p6 }
 0x806   : > { %8663 = dma.done.wait (!%p8166_p2), %s6552_s6, 16384  }
 0x807   : > { %8665 = vsyncadd (!%p8166_p2), %s6552_s6, 4294950912  ;;  %p12_p3 = scmp.ge.s32.totalorder %s8730_s15, 4   ;;  %s20761_s9 = smov %s8672_s10 }
 0x808   : > { %s20762_s10 = smov %s8676_s11  ;;  %s20763_s11 = smov %s8741_s18 }
 0x809   : > { %s20764_s12 = smov %s8730_s15  ;;  %14 = sbr.rel (!%p12_p3) target bundleno = 3 (0x3), region = 65 }
 0x810   :  { %6557 = vsyncpa [#allocation3], 1 }
 0x811   :  { %6559 = vsyncpa [#allocation3 + $0x1], 1 }

</bundles_post_ra>
